<compile_context>
chip_gen: v7x
topology: tpu7x:2x2x1
jax: 0.10.0
libtpu: 0.0.40
codegen_flags: <defaults>
</compile_context>

<pallas_src>
import functools

import jax
import jax.numpy as jnp
from jax.experimental import pallas as pl
from jax.experimental.pallas import tpu as pltpu


# ----------------------------------------------------------------------------
# Pallas kernels
# ----------------------------------------------------------------------------

def _matmul_kernel(a_ref, w_ref, o_ref):
    # Single-K-block matmul: A (tm, K) bf16 @ W (K, N) bf16 -> f32 acc -> out.
    o_ref[...] = jnp.dot(a_ref[...], w_ref[...],
                         preferred_element_type=jnp.float32).astype(o_ref.dtype)


def _bn_relu_matmul_kernel(a_ref, s_ref, b_ref, w_ref, o_ref):
    # Fused prologue: relu(a * scale + bias) @ W.
    # BN math stays in f32 on the VPU (v5e has no bf16 VPU); MXU inputs bf16.
    a = a_ref[...].astype(jnp.float32)
    a = jnp.maximum(a * s_ref[...] + b_ref[...], 0.0)
    o_ref[...] = jnp.dot(a.astype(jnp.bfloat16), w_ref[...],
                         preferred_element_type=jnp.float32).astype(o_ref.dtype)


def _conv3x3_kernel(x_ref, w_ref, o_ref, *, n_rows, cin, wp):
    # Implicit-im2col 3x3 stride-1 convolution.  x_ref holds the flattened,
    # spatially zero-padded activation (plus a +/-(wp+1)-row halo of zeros)
    # fully resident in VMEM.  Each tap is a statically row-shifted view of
    # the same buffer, matmul'd with its (cin, cout) weight slice and
    # accumulated in f32 -- no (M, 9*C) slab ever touches HBM.  Border output
    # rows wrap across image rows and are junk; the caller slices them off.
    acc = None
    for ki in range(3):
        for kj in range(3):
            off = ki * wp + kj                                  # static offset
            a = x_ref[pl.ds(off, n_rows), :]                    # (n_rows, cin)
            wt = w_ref[pl.ds((ki * 3 + kj) * cin, cin), :]      # (cin, cout)
            d = jnp.dot(a, wt, preferred_element_type=jnp.float32)
            acc = d if acc is None else acc + d
    o_ref[...] = acc.astype(o_ref.dtype)


# ----------------------------------------------------------------------------
# Pallas wrappers
# ----------------------------------------------------------------------------

def _row_tiling(M, cap=1024):
    """Prefer the biggest row tile: the whole M when it fits (no pad, no slice
    copies), else the largest multiple-of-16 divisor <= cap, else pad to 512s."""
    if M <= cap:
        return M, M
    for tm in range(cap, 255, -16):
        if M % tm == 0:
            return M, tm
    tm = 512
    return -(-M // tm) * tm, tm


def pallas_matmul(a2d, w, *, scale=None, bias=None, out_dtype=jnp.bfloat16):
    """a2d: (M, K) bf16, w: (K, N) bf16 -> (M, N).

    If scale/bias (length-K f32) are given, computes relu(a*scale+bias) @ w
    (BatchNorm+ReLU fused into the matmul prologue)."""
    M, K = a2d.shape
    Kw, N = w.shape
    assert K == Kw
    Mp, tm = _row_tiling(M)
    if Mp != M:
        a2d = jnp.pad(a2d, ((0, Mp - M), (0, 0)))

    a_spec = pl.BlockSpec((tm, K), lambda i: (i, 0))
    w_spec = pl.BlockSpec((K, N), lambda i: (0, 0))
    o_spec = pl.BlockSpec((tm, N), lambda i: (i, 0))

    if scale is None:
        kernel, in_specs, args = _matmul_kernel, [a_spec, w_spec], (a2d, w)
    else:
        kernel = _bn_relu_matmul_kernel
        v_spec = pl.BlockSpec((1, K), lambda i: (0, 0))
        in_specs = [a_spec, v_spec, v_spec, w_spec]
        args = (a2d,
                scale.reshape(1, K).astype(jnp.float32),
                bias.reshape(1, K).astype(jnp.float32),
                w)

    out = pl.pallas_call(
        kernel,
        out_shape=jax.ShapeDtypeStruct((Mp, N), out_dtype),
        grid_spec=pltpu.PrefetchScalarGridSpec(
            num_scalar_prefetch=0,
            grid=(Mp // tm,),
            in_specs=in_specs,
            out_specs=o_spec),
        compiler_params=pltpu.CompilerParams(
            dimension_semantics=("parallel",)),
    )(*args)
    return out if Mp == M else out[:M]


def conv3x3_bn_relu(mid, scale, bias, w_mat, n, h, w):
    """relu(mid*scale+bias) -> zero-pad(1) -> 3x3 stride-1 conv.

    mid: (n*h*w, C) bf16 (conv1 output); w_mat: (9*C, Cout) bf16.
    The affine+ReLU+pad is one XLA-fused pass over `mid`; the convolution is a
    single Pallas kernel over the VMEM-resident padded activation."""
    M, C = mid.shape
    Cout = w_mat.shape[1]
    hp, wp = h + 2, w + 2
    L = n * hp * wp
    Lext = L + 2 * (wp + 1)
    assert Lext * C * 2 < (8 << 20), "tile too large for single-block conv"
    # TODO(synk): tile output rows (with a +/-(wp+1) halo) for larger maps.

    # bn2 + relu2 applied *before* the spatial zero pad (PyTorch semantics).
    act = jnp.maximum(mid.astype(jnp.float32) * scale[None, :] + bias[None, :],
                      0.0).astype(jnp.bfloat16)
    xp = jnp.pad(act.reshape(n, h, w, C), ((0, 0), (1, 1), (1, 1), (0, 0)))
    x_ext = jnp.pad(xp.reshape(L, C), ((wp + 1, wp + 1), (0, 0)))

    y = pl.pallas_call(
        functools.partial(_conv3x3_kernel, n_rows=L, cin=C, wp=wp),
        out_shape=jax.ShapeDtypeStruct((L, Cout), jnp.bfloat16),
        grid_spec=pltpu.PrefetchScalarGridSpec(
            num_scalar_prefetch=0,
            grid=(1,),
            in_specs=[pl.BlockSpec((Lext, C), lambda i: (0, 0)),
                      pl.BlockSpec((9 * C, Cout), lambda i: (0, 0))],
            out_specs=pl.BlockSpec((L, Cout), lambda i: (0, 0))),
        compiler_params=pltpu.CompilerParams(
            dimension_semantics=("arbitrary",)),
    )(x_ext, w_mat)
    y = y.reshape(n, hp, wp, Cout)[:, 1:1 + h, 1:1 + w, :]
    return y.reshape(M, Cout)


# ----------------------------------------------------------------------------
# Conv / BN / pooling glue (channels-last, no transposes)
# ----------------------------------------------------------------------------

def _col_stats(x2d):
    """Per-channel batch mean / biased variance (PyTorch train-mode BN)."""
    x = x2d.astype(jnp.float32)
    mean = jnp.mean(x, axis=0)
    var = jnp.mean(jnp.square(x - mean[None, :]), axis=0)
    return mean, var


def _scale_bias(mean, var, gamma, beta, eps=1e-5):
    scale = gamma * jax.lax.rsqrt(var + eps)
    return scale, beta - mean * scale


def conv_kxk_nhwc(x, w_mat, kh, kw, stride, padding):
    """KxK conv via im2col + Pallas matmul (used only for the one-off 7x7 stem)."""
    n, h, w, c = x.shape
    cout = w_mat.shape[1]
    if padding:
        x = jnp.pad(x, ((0, 0), (padding, padding), (padding, padding), (0, 0)))
    ho = (h + 2 * padding - kh) // stride + 1
    wo = (w + 2 * padding - kw) // stride + 1
    taps = [x[:, ki:ki + stride * ho:stride, kj:kj + stride * wo:stride, :]
            for ki in range(kh) for kj in range(kw)]
    a = jnp.stack(taps, axis=3).reshape(n * ho * wo, kh * kw * c)
    y = pallas_matmul(a, w_mat)
    return y.reshape(n, ho, wo, cout)


def maxpool_3x3_s2_p1_nhwc(x):
    n, h, w, c = x.shape
    pad_val = float(jnp.finfo(x.dtype).min)
    xp = jnp.pad(x, ((0, 0), (1, 1), (1, 1), (0, 0)), constant_values=pad_val)
    ho = (h + 2 - 3) // 2 + 1
    wo = (w + 2 - 3) // 2 + 1
    out = None
    for ki in range(3):
        for kj in range(3):
            sl = xp[:, ki:ki + 2 * ho:2, kj:kj + 2 * wo:2, :]
            out = sl if out is None else jnp.maximum(out, sl)
    return out


def avgpool_2x2_nhwc(x):
    n, h, w, c = x.shape
    x = x.reshape(n, h // 2, 2, w // 2, 2, c).astype(jnp.float32)
    return x.mean(axis=(2, 4)).astype(jnp.bfloat16)


# ----------------------------------------------------------------------------
# Parameter initialization (PyTorch-equivalent) and one-time preparation
# ----------------------------------------------------------------------------

def _kaiming_normal(key, shape):
    fan_in = shape[1] * shape[2] * shape[3]
    return jax.random.normal(key, shape, jnp.float32) * jnp.sqrt(2.0 / fan_in)


def init_densenet_params(key, *, growth_rate, block_config, num_init_features,
                         bn_size, compression_rate, num_classes):
    keys = iter(jax.random.split(key, 512))
    p = {}
    p["conv0"] = _kaiming_normal(next(keys), (num_init_features, 3, 7, 7))
    p["bn0"] = (jnp.ones(num_init_features, jnp.float32),
                jnp.zeros(num_init_features, jnp.float32))
    nf = num_init_features
    p["blocks"] = []
    p["trans"] = []
    for bi, num_layers in enumerate(block_config):
        layers = []
        for li in range(num_layers):
            cin = nf + li * growth_rate
            mid = bn_size * growth_rate
            layers.append({
                "bn1": (jnp.ones(cin, jnp.float32), jnp.zeros(cin, jnp.float32)),
                "conv1": _kaiming_normal(next(keys), (mid, cin, 1, 1)),
                "bn2": (jnp.ones(mid, jnp.float32), jnp.zeros(mid, jnp.float32)),
                "conv2": _kaiming_normal(next(keys), (growth_rate, mid, 3, 3)),
            })
        p["blocks"].append(layers)
        nf += num_layers * growth_rate
        if bi != len(block_config) - 1:
            nout = int(nf * compression_rate)
            p["trans"].append({
                "bn": (jnp.ones(nf, jnp.float32), jnp.zeros(nf, jnp.float32)),
                "conv": _kaiming_normal(next(keys), (nout, nf, 1, 1)),
            })
            nf = nout
    p["tail_bn"] = (jnp.ones(nf, jnp.float32), jnp.zeros(nf, jnp.float32))
    bound = 1.0 / float(nf) ** 0.5
    p["fc_w"] = jax.random.uniform(next(keys), (num_classes, nf), jnp.float32,
                                   -bound, bound)
    p["fc_b"] = jnp.zeros((num_classes,), jnp.float32)
    return p


def _conv_w_to_mat(w, pad_k_to=None):
    """(Cout, Cin, KH, KW) -> (KH*KW*Cin, Cout) bf16, rows ordered (ki, kj, c)."""
    cout, cin, kh, kw = w.shape
    mat = jnp.transpose(w, (2, 3, 1, 0)).reshape(kh * kw * cin, cout)
    if pad_k_to is not None and pad_k_to > mat.shape[0]:
        mat = jnp.pad(mat, ((0, pad_k_to - mat.shape[0]), (0, 0)))
    return mat.astype(jnp.bfloat16)


def prepare_params(raw, *, growth_rate):
    """One-time weight reshape/transpose/K-pad/bf16 cast (kept out of forward)."""
    p = {
        "conv0_w": _conv_w_to_mat(raw["conv0"]),
        "bn0": raw["bn0"],
        "blocks": [],
        "trans": [],
        "tail_bn": raw["tail_bn"],
        "fc_w": raw["fc_w"],
        "fc_b": raw["fc_b"],
    }
    for layers in raw["blocks"]:
        cin0 = layers[0]["conv1"].shape[1]
        c_final = cin0 + len(layers) * growth_rate
        prepared = []
        for lp in layers:
            prepared.append({
                # conv1 weight K-padded to the block's final channel count so
                # every layer can read the full pre-allocated channel slab.
                "bn1": lp["bn1"],
                "conv1_w": _conv_w_to_mat(lp["conv1"], pad_k_to=c_final),
                "bn2": lp["bn2"],
                "conv2_w": _conv_w_to_mat(lp["conv2"]),
            })
        p["blocks"].append(prepared)
    for tp in raw["trans"]:
        p["trans"].append({"bn": tp["bn"], "conv_w": _conv_w_to_mat(tp["conv"])})
    return p


# ----------------------------------------------------------------------------
# DenseNet forward (channels-last bf16 slabs end-to-end)
# ----------------------------------------------------------------------------

def densenet_forward(params, x):
    n = x.shape[0]
    # Single layout change for the whole network: NCHW -> NHWC, bf16 activations.
    x = jnp.transpose(x, (0, 2, 3, 1)).astype(jnp.bfloat16)

    # ---- stem: conv7x7 s2 p3 (Pallas matmul) -> BN+ReLU (XLA, fused into the
    #      maxpool tap build) -> maxpool 3x3 s2 p1 ----
    x = conv_kxk_nhwc(x, params["conv0_w"], 7, 7, 2, 3)
    _, H, W, C = x.shape
    m0, v0 = _col_stats(x.reshape(-1, C))
    s0, t0 = _scale_bias(m0, v0, *params["bn0"])
    x = jnp.maximum(x.reshape(-1, C).astype(jnp.float32) * s0[None, :] + t0[None, :],
                    0.0).astype(jnp.bfloat16).reshape(n, H, W, C)
    x = maxpool_3x3_s2_p1_nhwc(x)

    # ---- dense blocks + transitions ----
    num_blocks = len(params["blocks"])
    mean_all = var_all = None
    for bi in range(num_blocks):
        layers = params["blocks"][bi]
        _, H, W, Cin = x.shape
        M = n * H * W
        growth = layers[0]["conv2_w"].shape[1]
        c_final = Cin + len(layers) * growth
        x2d = x.reshape(M, Cin)
        # Pre-allocated channel slab replaces per-layer concatenation.
        slab = jnp.pad(x2d, ((0, 0), (0, c_final - Cin)))
        # Cached per-segment BN statistics: slab columns are written exactly
        # once, so their batch mean/var never needs recomputation.
        seg_stats = [_col_stats(x2d)]
        for li, lp in enumerate(layers):
            c_cur = Cin + li * growth
            mean_c = jnp.concatenate([m for m, _ in seg_stats])
            var_c = jnp.concatenate([v for _, v in seg_stats])
            s1, t1 = _scale_bias(mean_c, var_c, *lp["bn1"])
            s1 = jnp.pad(s1, (0, c_final - c_cur))
            t1 = jnp.pad(t1, (0, c_final - c_cur))
            # bn1 + relu1 fused into conv1's matmul prologue.  Not-yet-written
            # slab channels hold zeros, have zero scale/bias and zero weight
            # rows, so they contribute nothing.
            mid = pallas_matmul(slab, lp["conv1_w"], scale=s1, bias=t1)  # (M, mid)
            m2, v2 = _col_stats(mid)
            s2, t2 = _scale_bias(m2, v2, *lp["bn2"])
            # bn2 + relu2 + zero-pad + 3x3 conv: implicit-im2col Pallas kernel.
            new = conv3x3_bn_relu(mid, s2, t2, lp["conv2_w"], n, H, W)
            seg_stats.append(_col_stats(new))
            # drop_rate == 0 -> dropout is identity.
            slab = jax.lax.dynamic_update_slice(slab, new, (0, c_cur))
            # TODO(synk): write `new` straight into the slab through
            # input_output_aliases to avoid this full-slab copy on big configs.
        mean_all = jnp.concatenate([m for m, _ in seg_stats])
        var_all = jnp.concatenate([v for _, v in seg_stats])
        if bi != num_blocks - 1:
            tp = params["trans"][bi]
            st, tt = _scale_bias(mean_all, var_all, *tp["bn"])
            t2d = pallas_matmul(slab, tp["conv_w"], scale=st, bias=tt)
            x = avgpool_2x2_nhwc(t2d.reshape(n, H, W, -1))
        else:
            x = slab.reshape(n, H, W, c_final)

    # ---- tail: BN -> ReLU (XLA, cached stats) -> avg_pool2d(7) -> linear ----
    _, H, W, C = x.shape
    assert H == 7 and W == 7, "final feature map must be 7x7 (as in DenseNet)"
    st, tt = _scale_bias(mean_all, var_all, *params["tail_bn"])
    y = jnp.maximum(x.reshape(-1, C).astype(jnp.float32) * st[None, :] + tt[None, :],
                    0.0)
    feat = y.reshape(n, H * W, C).mean(axis=1)                     # (n, C) f32
    return jnp.dot(feat, params["fc_w"].T) + params["fc_b"][None, :]


# ----------------------------------------------------------------------------
# Main
# ----------------------------------------------------------------------------

if __name__ == "__main__":
    # Small DenseNet config (same architecture family, reduced hyperparams).
    growth_rate = 8
    block_config = (2, 2)
    num_init_features = 16
    bn_size = 2
    compression_rate = 0.5
    num_classes = 10

    raw = init_densenet_params(
        jax.random.PRNGKey(0),
        growth_rate=growth_rate,
        block_config=block_config,
        num_init_features=num_init_features,
        bn_size=bn_size,
        compression_rate=compression_rate,
        num_classes=num_classes,
    )
    params = prepare_params(raw, growth_rate=growth_rate)

    # Input 56x56 so that the final feature map is 7x7: 56 ->conv s2-> 28
    # ->maxpool s2-> 14 ->transition avgpool-> 7.
    x = jax.random.normal(jax.random.PRNGKey(0), (2, 3, 56, 56), jnp.float32)

    fwd = jax.jit(densenet_forward)
    out = fwd(params, x)
    jax.block_until_ready(out)
    assert out.shape == (2, num_classes)
    assert out.dtype == jnp.float32
    print("KERNEL_OK")
</pallas_src>

<mosaic_0001>
module attributes {stable_mosaic.version = 11 : i64} {
  func.func @_matmul_kernel(%arg0: i32, %arg1: memref<784x147xbf16, #tpu.memory_space<vmem>>, %arg2: memref<147x16xbf16, #tpu.memory_space<vmem>>, %arg3: memref<784x16xbf16, #tpu.memory_space<vmem>>) attributes {dimension_semantics = [#tpu.dimension_semantics<parallel>], iteration_bounds = array<i64: 2>, scalar_prefetch = 0 : i64, scratch_operands = 0 : i64, tpu.core_type = #tpu.core_type<tc>, window_params = [{transform_indices = @transform_0, window_bounds = array<i64: 784, 147>}, {pipeline_mode = #tpu.pipeline_mode<synchronous>, transform_indices = @transform_1, window_bounds = array<i64: 147, 16>}, {transform_indices = @transform_2, window_bounds = array<i64: 784, 16>}]} {
    %c0 = arith.constant 0 : index
    %c0_0 = arith.constant 0 : index
    %0 = vector.load %arg1[%c0, %c0_0] : memref<784x147xbf16, #tpu.memory_space<vmem>>, vector<784x147xbf16>
    %c0_1 = arith.constant 0 : index
    %c0_2 = arith.constant 0 : index
    %1 = vector.load %arg2[%c0_1, %c0_2] : memref<147x16xbf16, #tpu.memory_space<vmem>>, vector<147x16xbf16>
    %cst = arith.constant dense<0.000000e+00> : vector<784x16xf32>
    %2 = tpu.matmul %0, %1, %cst {dimension_numbers = #tpu.dot_dimension_numbers<[1], [0], [0], [1], [0, 0, 1, 1], [], []>} : vector<784x147xbf16>, vector<147x16xbf16>, vector<784x16xf32> -> vector<784x16xf32>
    %3 = arith.truncf %2 : vector<784x16xf32> to vector<784x16xbf16>
    %c0_3 = arith.constant 0 : index
    %c0_4 = arith.constant 0 : index
    %4 = vector.load %arg3[%c0_3, %c0_4] : memref<784x16xbf16, #tpu.memory_space<vmem>>, vector<784x16xbf16>
    tpu.vector_store %arg3[%c0_3, %c0_4], %3 {strides = array<i32>} : memref<784x16xbf16, #tpu.memory_space<vmem>>, vector<784x16xbf16>,
    return
  }
  func.func @transform_0(%arg0: i32) -> (i32, i32) {
    %c0_i32 = arith.constant 0 : i32
    %c0_i32_0 = arith.constant 0 : i32
    return %arg0, %c0_i32 : i32, i32
  }
  func.func @transform_1(%arg0: i32) -> (i32, i32) {
    %c0_i32 = arith.constant 0 : i32
    %c0_i32_0 = arith.constant 0 : i32
    %c0_i32_1 = arith.constant 0 : i32
    return %c0_i32, %c0_i32_0 : i32, i32
  }
  func.func @transform_2(%arg0: i32) -> (i32, i32) {
    %c0_i32 = arith.constant 0 : i32
    %c0_i32_0 = arith.constant 0 : i32
    return %arg0, %c0_i32 : i32, i32
  }
}

module attributes {stable_mosaic.version = 11 : i64} {
  func.func @_bn_relu_matmul_kernel(%arg0: i32, %arg1: memref<392x32xbf16, #tpu.memory_space<vmem>>, %arg2: memref<1x32xf32, #tpu.memory_space<vmem>>, %arg3: memref<1x32xf32, #tpu.memory_space<vmem>>, %arg4: memref<32x16xbf16, #tpu.memory_space<vmem>>, %arg5: memref<392x16xbf16, #tpu.memory_space<vmem>>) attributes {dimension_semantics = [#tpu.dimension_semantics<parallel>], iteration_bounds = array<i64: 1>, scalar_prefetch = 0 : i64, scratch_operands = 0 : i64, tpu.core_type = #tpu.core_type<tc>, window_params = [{transform_indices = @transform_0, window_bounds = array<i64: 392, 32>}, {pipeline_mode = #tpu.pipeline_mode<synchronous>, transform_indices = @transform_1, window_bounds = array<i64: 1, 32>}, {pipeline_mode = #tpu.pipeline_mode<synchronous>, transform_indices = @transform_2, window_bounds = array<i64: 1, 32>}, {pipeline_mode = #tpu.pipeline_mode<synchronous>, transform_indices = @transform_3, window_bounds = array<i64: 32, 16>}, {transform_indices = @transform_4, window_bounds = array<i64: 392, 16>}]} {
    %c0 = arith.constant 0 : index
    %c0_0 = arith.constant 0 : index
    %0 = vector.load %arg1[%c0, %c0_0] : memref<392x32xbf16, #tpu.memory_space<vmem>>, vector<392x32xbf16>
    %1 = arith.extf %0 : vector<392x32xbf16> to vector<392x32xf32>
    %c0_1 = arith.constant 0 : index
    %c0_2 = arith.constant 0 : index
    %2 = vector.load %arg2[%c0_1, %c0_2] : memref<1x32xf32, #tpu.memory_space<vmem>>, vector<1x32xf32>
    %3 = vector.broadcast %2 : vector<1x32xf32> to vector<392x32xf32>
    %4 = arith.mulf %1, %3 : vector<392x32xf32>
    %c0_3 = arith.constant 0 : index
    %c0_4 = arith.constant 0 : index
    %5 = vector.load %arg3[%c0_3, %c0_4] : memref<1x32xf32, #tpu.memory_space<vmem>>, vector<1x32xf32>
    %6 = vector.broadcast %5 : vector<1x32xf32> to vector<392x32xf32>
    %7 = arith.addf %4, %6 : vector<392x32xf32>
    %cst = arith.constant 0.000000e+00 : f32
    %8 = vector.broadcast %cst : f32 to vector<392x32xf32>
    %9 = arith.maximumf %7, %8 : vector<392x32xf32>
    %10 = arith.truncf %9 : vector<392x32xf32> to vector<392x32xbf16>
    %c0_5 = arith.constant 0 : index
    %c0_6 = arith.constant 0 : index
    %11 = vector.load %arg4[%c0_5, %c0_6] : memref<32x16xbf16, #tpu.memory_space<vmem>>, vector<32x16xbf16>
    %cst_7 = arith.constant dense<0.000000e+00> : vector<392x16xf32>
    %12 = tpu.matmul %10, %11, %cst_7 {dimension_numbers = #tpu.dot_dimension_numbers<[1], [0], [0], [1], [0, 0, 1, 1], [], []>} : vector<392x32xbf16>, vector<32x16xbf16>, vector<392x16xf32> -> vector<392x16xf32>
    %13 = arith.truncf %12 : vector<392x16xf32> to vector<392x16xbf16>
    %c0_8 = arith.constant 0 : index
    %c0_9 = arith.constant 0 : index
    %14 = vector.load %arg5[%c0_8, %c0_9] : memref<392x16xbf16, #tpu.memory_space<vmem>>, vector<392x16xbf16>
    tpu.vector_store %arg5[%c0_8, %c0_9], %13 {strides = array<i32>} : memref<392x16xbf16, #tpu.memory_space<vmem>>, vector<392x16xbf16>,
    return
  }
  func.func @transform_0(%arg0: i32) -> (i32, i32) {
    %c0_i32 = arith.constant 0 : i32
    %c0_i32_0 = arith.constant 0 : i32
    return %arg0, %c0_i32 : i32, i32
  }
  func.func @transform_1(%arg0: i32) -> (i32, i32) {
    %c0_i32 = arith.constant 0 : i32
    %c0_i32_0 = arith.constant 0 : i32
    %c0_i32_1 = arith.constant 0 : i32
    return %c0_i32, %c0_i32_0 : i32, i32
  }
  func.func @transform_2(%arg0: i32) -> (i32, i32) {
    %c0_i32 = arith.constant 0 : i32
    %c0_i32_0 = arith.constant 0 : i32
    %c0_i32_1 = arith.constant 0 : i32
    return %c0_i32, %c0_i32_0 : i32, i32
  }
  func.func @transform_3(%arg0: i32) -> (i32, i32) {
    %c0_i32 = arith.constant 0 : i32
    %c0_i32_0 = arith.constant 0 : i32
    %c0_i32_1 = arith.constant 0 : i32
    return %c0_i32, %c0_i32_0 : i32, i32
  }
  func.func @transform_4(%arg0: i32) -> (i32, i32) {
    %c0_i32 = arith.constant 0 : i32
    %c0_i32_0 = arith.constant 0 : i32
    return %arg0, %c0_i32 : i32, i32
  }
}

module attributes {stable_mosaic.version = 11 : i64} {
  func.func @_conv3x3_kernel(%arg0: i32, %arg1: memref<546x16xbf16, #tpu.memory_space<vmem>>, %arg2: memref<144x8xbf16, #tpu.memory_space<vmem>>, %arg3: memref<512x8xbf16, #tpu.memory_space<vmem>>) attributes {dimension_semantics = [#tpu.dimension_semantics<arbitrary>], iteration_bounds = array<i64: 1>, scalar_prefetch = 0 : i64, scratch_operands = 0 : i64, tpu.core_type = #tpu.core_type<tc>, window_params = [{pipeline_mode = #tpu.pipeline_mode<synchronous>, transform_indices = @transform_0, window_bounds = array<i64: 546, 16>}, {pipeline_mode = #tpu.pipeline_mode<synchronous>, transform_indices = @transform_1, window_bounds = array<i64: 144, 8>}, {pipeline_mode = #tpu.pipeline_mode<synchronous>, transform_indices = @transform_2, window_bounds = array<i64: 512, 8>}]} {
    %c0 = arith.constant 0 : index
    %c0_0 = arith.constant 0 : index
    %0 = vector.load %arg1[%c0, %c0_0] : memref<546x16xbf16, #tpu.memory_space<vmem>>, vector<512x16xbf16>
    %c0_1 = arith.constant 0 : index
    %c0_2 = arith.constant 0 : index
    %1 = vector.load %arg2[%c0_1, %c0_2] : memref<144x8xbf16, #tpu.memory_space<vmem>>, vector<16x8xbf16>
    %cst = arith.constant dense<0.000000e+00> : vector<512x8xf32>
    %2 = tpu.matmul %0, %1, %cst {dimension_numbers = #tpu.dot_dimension_numbers<[1], [0], [0], [1], [0, 0, 1, 1], [], []>} : vector<512x16xbf16>, vector<16x8xbf16>, vector<512x8xf32> -> vector<512x8xf32>
    %c1 = arith.constant 1 : index
    %c0_3 = arith.constant 0 : index
    %3 = vector.load %arg1[%c1, %c0_3] : memref<546x16xbf16, #tpu.memory_space<vmem>>, vector<512x16xbf16>
    %c16 = arith.constant 16 : index
    %c0_4 = arith.constant 0 : index
    %4 = vector.load %arg2[%c16, %c0_4] : memref<144x8xbf16, #tpu.memory_space<vmem>>, vector<16x8xbf16>
    %cst_5 = arith.constant dense<0.000000e+00> : vector<512x8xf32>
    %5 = tpu.matmul %3, %4, %cst_5 {dimension_numbers = #tpu.dot_dimension_numbers<[1], [0], [0], [1], [0, 0, 1, 1], [], []>} : vector<512x16xbf16>, vector<16x8xbf16>, vector<512x8xf32> -> vector<512x8xf32>
    %6 = arith.addf %2, %5 : vector<512x8xf32>
    %c2 = arith.constant 2 : index
    %c0_6 = arith.constant 0 : index
    %7 = vector.load %arg1[%c2, %c0_6] : memref<546x16xbf16, #tpu.memory_space<vmem>>, vector<512x16xbf16>
    %c32 = arith.constant 32 : index
    %c0_7 = arith.constant 0 : index
    %8 = vector.load %arg2[%c32, %c0_7] : memref<144x8xbf16, #tpu.memory_space<vmem>>, vector<16x8xbf16>
    %cst_8 = arith.constant dense<0.000000e+00> : vector<512x8xf32>
    %9 = tpu.matmul %7, %8, %cst_8 {dimension_numbers = #tpu.dot_dimension_numbers<[1], [0], [0], [1], [0, 0, 1, 1], [], []>} : vector<512x16xbf16>, vector<16x8xbf16>, vector<512x8xf32> -> vector<512x8xf32>
    %10 = arith.addf %6, %9 : vector<512x8xf32>
    %c16_9 = arith.constant 16 : index
    %c0_10 = arith.constant 0 : index
    %11 = vector.load %arg1[%c16_9, %c0_10] : memref<546x16xbf16, #tpu.memory_space<vmem>>, vector<512x16xbf16>
    %c48 = arith.constant 48 : index
    %c0_11 = arith.constant 0 : index
    %12 = vector.load %arg2[%c48, %c0_11] : memref<144x8xbf16, #tpu.memory_space<vmem>>, vector<16x8xbf16>
    %cst_12 = arith.constant dense<0.000000e+00> : vector<512x8xf32>
    %13 = tpu.matmul %11, %12, %cst_12 {dimension_numbers = #tpu.dot_dimension_numbers<[1], [0], [0], [1], [0, 0, 1, 1], [], []>} : vector<512x16xbf16>, vector<16x8xbf16>, vector<512x8xf32> -> vector<512x8xf32>
    %14 = arith.addf %10, %13 : vector<512x8xf32>
    %c17 = arith.constant 17 : index
    %c0_13 = arith.constant 0 : index
    %15 = vector.load %arg1[%c17, %c0_13] : memref<546x16xbf16, #tpu.memory_space<vmem>>, vector<512x16xbf16>
    %c64 = arith.constant 64 : index
    %c0_14 = arith.constant 0 : index
    %16 = vector.load %arg2[%c64, %c0_14] : memref<144x8xbf16, #tpu.memory_space<vmem>>, vector<16x8xbf16>
    %cst_15 = arith.constant dense<0.000000e+00> : vector<512x8xf32>
    %17 = tpu.matmul %15, %16, %cst_15 {dimension_numbers = #tpu.dot_dimension_numbers<[1], [0], [0], [1], [0, 0, 1, 1], [], []>} : vector<512x16xbf16>, vector<16x8xbf16>, vector<512x8xf32> -> vector<512x8xf32>
    %18 = arith.addf %14, %17 : vector<512x8xf32>
    %c18 = arith.constant 18 : index
    %c0_16 = arith.constant 0 : index
    %19 = vector.load %arg1[%c18, %c0_16] : memref<546x16xbf16, #tpu.memory_space<vmem>>, vector<512x16xbf16>
    %c80 = arith.constant 80 : index
    %c0_17 = arith.constant 0 : index
    %20 = vector.load %arg2[%c80, %c0_17] : memref<144x8xbf16, #tpu.memory_space<vmem>>, vector<16x8xbf16>
    %cst_18 = arith.constant dense<0.000000e+00> : vector<512x8xf32>
    %21 = tpu.matmul %19, %20, %cst_18 {dimension_numbers = #tpu.dot_dimension_numbers<[1], [0], [0], [1], [0, 0, 1, 1], [], []>} : vector<512x16xbf16>, vector<16x8xbf16>, vector<512x8xf32> -> vector<512x8xf32>
    %22 = arith.addf %18, %21 : vector<512x8xf32>
    %c32_19 = arith.constant 32 : index
    %c0_20 = arith.constant 0 : index
    %23 = vector.load %arg1[%c32_19, %c0_20] : memref<546x16xbf16, #tpu.memory_space<vmem>>, vector<512x16xbf16>
    %c96 = arith.constant 96 : index
    %c0_21 = arith.constant 0 : index
    %24 = vector.load %arg2[%c96, %c0_21] : memref<144x8xbf16, #tpu.memory_space<vmem>>, vector<16x8xbf16>
    %cst_22 = arith.constant dense<0.000000e+00> : vector<512x8xf32>
    %25 = tpu.matmul %23, %24, %cst_22 {dimension_numbers = #tpu.dot_dimension_numbers<[1], [0], [0], [1], [0, 0, 1, 1], [], []>} : vector<512x16xbf16>, vector<16x8xbf16>, vector<512x8xf32> -> vector<512x8xf32>
    %26 = arith.addf %22, %25 : vector<512x8xf32>
    %c33 = arith.constant 33 : index
    %c0_23 = arith.constant 0 : index
    %27 = vector.load %arg1[%c33, %c0_23] : memref<546x16xbf16, #tpu.memory_space<vmem>>, vector<512x16xbf16>
    %c112 = arith.constant 112 : index
    %c0_24 = arith.constant 0 : index
    %28 = vector.load %arg2[%c112, %c0_24] : memref<144x8xbf16, #tpu.memory_space<vmem>>, vector<16x8xbf16>
    %cst_25 = arith.constant dense<0.000000e+00> : vector<512x8xf32>
    %29 = tpu.matmul %27, %28, %cst_25 {dimension_numbers = #tpu.dot_dimension_numbers<[1], [0], [0], [1], [0, 0, 1, 1], [], []>} : vector<512x16xbf16>, vector<16x8xbf16>, vector<512x8xf32> -> vector<512x8xf32>
    %30 = arith.addf %26, %29 : vector<512x8xf32>
    %c34 = arith.constant 34 : index
    %c0_26 = arith.constant 0 : index
    %31 = vector.load %arg1[%c34, %c0_26] : memref<546x16xbf16, #tpu.memory_space<vmem>>, vector<512x16xbf16>
    %c128 = arith.constant 128 : index
    %c0_27 = arith.constant 0 : index
    %32 = vector.load %arg2[%c128, %c0_27] : memref<144x8xbf16, #tpu.memory_space<vmem>>, vector<16x8xbf16>
    %cst_28 = arith.constant dense<0.000000e+00> : vector<512x8xf32>
    %33 = tpu.matmul %31, %32, %cst_28 {dimension_numbers = #tpu.dot_dimension_numbers<[1], [0], [0], [1], [0, 0, 1, 1], [], []>} : vector<512x16xbf16>, vector<16x8xbf16>, vector<512x8xf32> -> vector<512x8xf32>
    %34 = arith.addf %30, %33 : vector<512x8xf32>
    %35 = arith.truncf %34 : vector<512x8xf32> to vector<512x8xbf16>
    %c0_29 = arith.constant 0 : index
    %c0_30 = arith.constant 0 : index
    %36 = vector.load %arg3[%c0_29, %c0_30] : memref<512x8xbf16, #tpu.memory_space<vmem>>, vector<512x8xbf16>
    tpu.vector_store %arg3[%c0_29, %c0_30], %35 {strides = array<i32>} : memref<512x8xbf16, #tpu.memory_space<vmem>>, vector<512x8xbf16>,
    return
  }
  func.func @transform_0(%arg0: i32) -> (i32, i32) {
    %c0_i32 = arith.constant 0 : i32
    %c0_i32_0 = arith.constant 0 : i32
    %c0_i32_1 = arith.constant 0 : i32
    return %c0_i32, %c0_i32_0 : i32, i32
  }
  func.func @transform_1(%arg0: i32) -> (i32, i32) {
    %c0_i32 = arith.constant 0 : i32
    %c0_i32_0 = arith.constant 0 : i32
    %c0_i32_1 = arith.constant 0 : i32
    return %c0_i32, %c0_i32_0 : i32, i32
  }
  func.func @transform_2(%arg0: i32) -> (i32, i32) {
    %c0_i32 = arith.constant 0 : i32
    %c0_i32_0 = arith.constant 0 : i32
    %c0_i32_1 = arith.constant 0 : i32
    return %c0_i32, %c0_i32_0 : i32, i32
  }
}

module attributes {stable_mosaic.version = 11 : i64} {
  func.func @_bn_relu_matmul_kernel(%arg0: i32, %arg1: memref<98x32xbf16, #tpu.memory_space<vmem>>, %arg2: memref<1x32xf32, #tpu.memory_space<vmem>>, %arg3: memref<1x32xf32, #tpu.memory_space<vmem>>, %arg4: memref<32x16xbf16, #tpu.memory_space<vmem>>, %arg5: memref<98x16xbf16, #tpu.memory_space<vmem>>) attributes {dimension_semantics = [#tpu.dimension_semantics<parallel>], iteration_bounds = array<i64: 1>, scalar_prefetch = 0 : i64, scratch_operands = 0 : i64, tpu.core_type = #tpu.core_type<tc>, window_params = [{transform_indices = @transform_0, window_bounds = array<i64: 98, 32>}, {pipeline_mode = #tpu.pipeline_mode<synchronous>, transform_indices = @transform_1, window_bounds = array<i64: 1, 32>}, {pipeline_mode = #tpu.pipeline_mode<synchronous>, transform_indices = @transform_2, window_bounds = array<i64: 1, 32>}, {pipeline_mode = #tpu.pipeline_mode<synchronous>, transform_indices = @transform_3, window_bounds = array<i64: 32, 16>}, {transform_indices = @transform_4, window_bounds = array<i64: 98, 16>}]} {
    %c0 = arith.constant 0 : index
    %c0_0 = arith.constant 0 : index
    %0 = vector.load %arg1[%c0, %c0_0] : memref<98x32xbf16, #tpu.memory_space<vmem>>, vector<98x32xbf16>
    %1 = arith.extf %0 : vector<98x32xbf16> to vector<98x32xf32>
    %c0_1 = arith.constant 0 : index
    %c0_2 = arith.constant 0 : index
    %2 = vector.load %arg2[%c0_1, %c0_2] : memref<1x32xf32, #tpu.memory_space<vmem>>, vector<1x32xf32>
    %3 = vector.broadcast %2 : vector<1x32xf32> to vector<98x32xf32>
    %4 = arith.mulf %1, %3 : vector<98x32xf32>
    %c0_3 = arith.constant 0 : index
    %c0_4 = arith.constant 0 : index
    %5 = vector.load %arg3[%c0_3, %c0_4] : memref<1x32xf32, #tpu.memory_space<vmem>>, vector<1x32xf32>
    %6 = vector.broadcast %5 : vector<1x32xf32> to vector<98x32xf32>
    %7 = arith.addf %4, %6 : vector<98x32xf32>
    %cst = arith.constant 0.000000e+00 : f32
    %8 = vector.broadcast %cst : f32 to vector<98x32xf32>
    %9 = arith.maximumf %7, %8 : vector<98x32xf32>
    %10 = arith.truncf %9 : vector<98x32xf32> to vector<98x32xbf16>
    %c0_5 = arith.constant 0 : index
    %c0_6 = arith.constant 0 : index
    %11 = vector.load %arg4[%c0_5, %c0_6] : memref<32x16xbf16, #tpu.memory_space<vmem>>, vector<32x16xbf16>
    %cst_7 = arith.constant dense<0.000000e+00> : vector<98x16xf32>
    %12 = tpu.matmul %10, %11, %cst_7 {dimension_numbers = #tpu.dot_dimension_numbers<[1], [0], [0], [1], [0, 0, 1, 1], [], []>} : vector<98x32xbf16>, vector<32x16xbf16>, vector<98x16xf32> -> vector<98x16xf32>
    %13 = arith.truncf %12 : vector<98x16xf32> to vector<98x16xbf16>
    %c0_8 = arith.constant 0 : index
    %c0_9 = arith.constant 0 : index
    %14 = vector.load %arg5[%c0_8, %c0_9] : memref<98x16xbf16, #tpu.memory_space<vmem>>, vector<98x16xbf16>
    tpu.vector_store %arg5[%c0_8, %c0_9], %13 {strides = array<i32>} : memref<98x16xbf16, #tpu.memory_space<vmem>>, vector<98x16xbf16>,
    return
  }
  func.func @transform_0(%arg0: i32) -> (i32, i32) {
    %c0_i32 = arith.constant 0 : i32
    %c0_i32_0 = arith.constant 0 : i32
    return %arg0, %c0_i32 : i32, i32
  }
  func.func @transform_1(%arg0: i32) -> (i32, i32) {
    %c0_i32 = arith.constant 0 : i32
    %c0_i32_0 = arith.constant 0 : i32
    %c0_i32_1 = arith.constant 0 : i32
    return %c0_i32, %c0_i32_0 : i32, i32
  }
  func.func @transform_2(%arg0: i32) -> (i32, i32) {
    %c0_i32 = arith.constant 0 : i32
    %c0_i32_0 = arith.constant 0 : i32
    %c0_i32_1 = arith.constant 0 : i32
    return %c0_i32, %c0_i32_0 : i32, i32
  }
  func.func @transform_3(%arg0: i32) -> (i32, i32) {
    %c0_i32 = arith.constant 0 : i32
    %c0_i32_0 = arith.constant 0 : i32
    %c0_i32_1 = arith.constant 0 : i32
    return %c0_i32, %c0_i32_0 : i32, i32
  }
  func.func @transform_4(%arg0: i32) -> (i32, i32) {
    %c0_i32 = arith.constant 0 : i32
    %c0_i32_0 = arith.constant 0 : i32
    return %arg0, %c0_i32 : i32, i32
  }
}

module attributes {stable_mosaic.version = 11 : i64} {
  func.func @_conv3x3_kernel(%arg0: i32, %arg1: memref<182x16xbf16, #tpu.memory_space<vmem>>, %arg2: memref<144x8xbf16, #tpu.memory_space<vmem>>, %arg3: memref<162x8xbf16, #tpu.memory_space<vmem>>) attributes {dimension_semantics = [#tpu.dimension_semantics<arbitrary>], iteration_bounds = array<i64: 1>, scalar_prefetch = 0 : i64, scratch_operands = 0 : i64, tpu.core_type = #tpu.core_type<tc>, window_params = [{pipeline_mode = #tpu.pipeline_mode<synchronous>, transform_indices = @transform_0, window_bounds = array<i64: 182, 16>}, {pipeline_mode = #tpu.pipeline_mode<synchronous>, transform_indices = @transform_1, window_bounds = array<i64: 144, 8>}, {pipeline_mode = #tpu.pipeline_mode<synchronous>, transform_indices = @transform_2, window_bounds = array<i64: 162, 8>}]} {
    %c0 = arith.constant 0 : index
    %c0_0 = arith.constant 0 : index
    %0 = vector.load %arg1[%c0, %c0_0] : memref<182x16xbf16, #tpu.memory_space<vmem>>, vector<162x16xbf16>
    %c0_1 = arith.constant 0 : index
    %c0_2 = arith.constant 0 : index
    %1 = vector.load %arg2[%c0_1, %c0_2] : memref<144x8xbf16, #tpu.memory_space<vmem>>, vector<16x8xbf16>
    %cst = arith.constant dense<0.000000e+00> : vector<162x8xf32>
    %2 = tpu.matmul %0, %1, %cst {dimension_numbers = #tpu.dot_dimension_numbers<[1], [0], [0], [1], [0, 0, 1, 1], [], []>} : vector<162x16xbf16>, vector<16x8xbf16>, vector<162x8xf32> -> vector<162x8xf32>
    %c1 = arith.constant 1 : index
    %c0_3 = arith.constant 0 : index
    %3 = vector.load %arg1[%c1, %c0_3] : memref<182x16xbf16, #tpu.memory_space<vmem>>, vector<162x16xbf16>
    %c16 = arith.constant 16 : index
    %c0_4 = arith.constant 0 : index
    %4 = vector.load %arg2[%c16, %c0_4] : memref<144x8xbf16, #tpu.memory_space<vmem>>, vector<16x8xbf16>
    %cst_5 = arith.constant dense<0.000000e+00> : vector<162x8xf32>
    %5 = tpu.matmul %3, %4, %cst_5 {dimension_numbers = #tpu.dot_dimension_numbers<[1], [0], [0], [1], [0, 0, 1, 1], [], []>} : vector<162x16xbf16>, vector<16x8xbf16>, vector<162x8xf32> -> vector<162x8xf32>
    %6 = arith.addf %2, %5 : vector<162x8xf32>
    %c2 = arith.constant 2 : index
    %c0_6 = arith.constant 0 : index
    %7 = vector.load %arg1[%c2, %c0_6] : memref<182x16xbf16, #tpu.memory_space<vmem>>, vector<162x16xbf16>
    %c32 = arith.constant 32 : index
    %c0_7 = arith.constant 0 : index
    %8 = vector.load %arg2[%c32, %c0_7] : memref<144x8xbf16, #tpu.memory_space<vmem>>, vector<16x8xbf16>
    %cst_8 = arith.constant dense<0.000000e+00> : vector<162x8xf32>
    %9 = tpu.matmul %7, %8, %cst_8 {dimension_numbers = #tpu.dot_dimension_numbers<[1], [0], [0], [1], [0, 0, 1, 1], [], []>} : vector<162x16xbf16>, vector<16x8xbf16>, vector<162x8xf32> -> vector<162x8xf32>
    %10 = arith.addf %6, %9 : vector<162x8xf32>
    %c9 = arith.constant 9 : index
    %c0_9 = arith.constant 0 : index
    %11 = vector.load %arg1[%c9, %c0_9] : memref<182x16xbf16, #tpu.memory_space<vmem>>, vector<162x16xbf16>
    %c48 = arith.constant 48 : index
    %c0_10 = arith.constant 0 : index
    %12 = vector.load %arg2[%c48, %c0_10] : memref<144x8xbf16, #tpu.memory_space<vmem>>, vector<16x8xbf16>
    %cst_11 = arith.constant dense<0.000000e+00> : vector<162x8xf32>
    %13 = tpu.matmul %11, %12, %cst_11 {dimension_numbers = #tpu.dot_dimension_numbers<[1], [0], [0], [1], [0, 0, 1, 1], [], []>} : vector<162x16xbf16>, vector<16x8xbf16>, vector<162x8xf32> -> vector<162x8xf32>
    %14 = arith.addf %10, %13 : vector<162x8xf32>
    %c10 = arith.constant 10 : index
    %c0_12 = arith.constant 0 : index
    %15 = vector.load %arg1[%c10, %c0_12] : memref<182x16xbf16, #tpu.memory_space<vmem>>, vector<162x16xbf16>
    %c64 = arith.constant 64 : index
    %c0_13 = arith.constant 0 : index
    %16 = vector.load %arg2[%c64, %c0_13] : memref<144x8xbf16, #tpu.memory_space<vmem>>, vector<16x8xbf16>
    %cst_14 = arith.constant dense<0.000000e+00> : vector<162x8xf32>
    %17 = tpu.matmul %15, %16, %cst_14 {dimension_numbers = #tpu.dot_dimension_numbers<[1], [0], [0], [1], [0, 0, 1, 1], [], []>} : vector<162x16xbf16>, vector<16x8xbf16>, vector<162x8xf32> -> vector<162x8xf32>
    %18 = arith.addf %14, %17 : vector<162x8xf32>
    %c11 = arith.constant 11 : index
    %c0_15 = arith.constant 0 : index
    %19 = vector.load %arg1[%c11, %c0_15] : memref<182x16xbf16, #tpu.memory_space<vmem>>, vector<162x16xbf16>
    %c80 = arith.constant 80 : index
    %c0_16 = arith.constant 0 : index
    %20 = vector.load %arg2[%c80, %c0_16] : memref<144x8xbf16, #tpu.memory_space<vmem>>, vector<16x8xbf16>
    %cst_17 = arith.constant dense<0.000000e+00> : vector<162x8xf32>
    %21 = tpu.matmul %19, %20, %cst_17 {dimension_numbers = #tpu.dot_dimension_numbers<[1], [0], [0], [1], [0, 0, 1, 1], [], []>} : vector<162x16xbf16>, vector<16x8xbf16>, vector<162x8xf32> -> vector<162x8xf32>
    %22 = arith.addf %18, %21 : vector<162x8xf32>
    %c18 = arith.constant 18 : index
    %c0_18 = arith.constant 0 : index
    %23 = vector.load %arg1[%c18, %c0_18] : memref<182x16xbf16, #tpu.memory_space<vmem>>, vector<162x16xbf16>
    %c96 = arith.constant 96 : index
    %c0_19 = arith.constant 0 : index
    %24 = vector.load %arg2[%c96, %c0_19] : memref<144x8xbf16, #tpu.memory_space<vmem>>, vector<16x8xbf16>
    %cst_20 = arith.constant dense<0.000000e+00> : vector<162x8xf32>
    %25 = tpu.matmul %23, %24, %cst_20 {dimension_numbers = #tpu.dot_dimension_numbers<[1], [0], [0], [1], [0, 0, 1, 1], [], []>} : vector<162x16xbf16>, vector<16x8xbf16>, vector<162x8xf32> -> vector<162x8xf32>
    %26 = arith.addf %22, %25 : vector<162x8xf32>
    %c19 = arith.constant 19 : index
    %c0_21 = arith.constant 0 : index
    %27 = vector.load %arg1[%c19, %c0_21] : memref<182x16xbf16, #tpu.memory_space<vmem>>, vector<162x16xbf16>
    %c112 = arith.constant 112 : index
    %c0_22 = arith.constant 0 : index
    %28 = vector.load %arg2[%c112, %c0_22] : memref<144x8xbf16, #tpu.memory_space<vmem>>, vector<16x8xbf16>
    %cst_23 = arith.constant dense<0.000000e+00> : vector<162x8xf32>
    %29 = tpu.matmul %27, %28, %cst_23 {dimension_numbers = #tpu.dot_dimension_numbers<[1], [0], [0], [1], [0, 0, 1, 1], [], []>} : vector<162x16xbf16>, vector<16x8xbf16>, vector<162x8xf32> -> vector<162x8xf32>
    %30 = arith.addf %26, %29 : vector<162x8xf32>
    %c20 = arith.constant 20 : index
    %c0_24 = arith.constant 0 : index
    %31 = vector.load %arg1[%c20, %c0_24] : memref<182x16xbf16, #tpu.memory_space<vmem>>, vector<162x16xbf16>
    %c128 = arith.constant 128 : index
    %c0_25 = arith.constant 0 : index
    %32 = vector.load %arg2[%c128, %c0_25] : memref<144x8xbf16, #tpu.memory_space<vmem>>, vector<16x8xbf16>
    %cst_26 = arith.constant dense<0.000000e+00> : vector<162x8xf32>
    %33 = tpu.matmul %31, %32, %cst_26 {dimension_numbers = #tpu.dot_dimension_numbers<[1], [0], [0], [1], [0, 0, 1, 1], [], []>} : vector<162x16xbf16>, vector<16x8xbf16>, vector<162x8xf32> -> vector<162x8xf32>
    %34 = arith.addf %30, %33 : vector<162x8xf32>
    %35 = arith.truncf %34 : vector<162x8xf32> to vector<162x8xbf16>
    %c0_27 = arith.constant 0 : index
    %c0_28 = arith.constant 0 : index
    %36 = vector.load %arg3[%c0_27, %c0_28] : memref<162x8xbf16, #tpu.memory_space<vmem>>, vector<162x8xbf16>
    tpu.vector_store %arg3[%c0_27, %c0_28], %35 {strides = array<i32>} : memref<162x8xbf16, #tpu.memory_space<vmem>>, vector<162x8xbf16>,
    return
  }
  func.func @transform_0(%arg0: i32) -> (i32, i32) {
    %c0_i32 = arith.constant 0 : i32
    %c0_i32_0 = arith.constant 0 : i32
    %c0_i32_1 = arith.constant 0 : i32
    return %c0_i32, %c0_i32_0 : i32, i32
  }
  func.func @transform_1(%arg0: i32) -> (i32, i32) {
    %c0_i32 = arith.constant 0 : i32
    %c0_i32_0 = arith.constant 0 : i32
    %c0_i32_1 = arith.constant 0 : i32
    return %c0_i32, %c0_i32_0 : i32, i32
  }
  func.func @transform_2(%arg0: i32) -> (i32, i32) {
    %c0_i32 = arith.constant 0 : i32
    %c0_i32_0 = arith.constant 0 : i32
    %c0_i32_1 = arith.constant 0 : i32
    return %c0_i32, %c0_i32_0 : i32, i32
  }
}

</mosaic_0001>

<bundles_post_ra>
// kernel: densenet_forward.10
= control target key start
LH: loop header
LB: loop body
LE: loop exit
PB: predicated region body
PF: predicated region fallthrough
CT: control target
= control target key end

     0   :  { %s2469_s9 = smov 0   ;;  %s2867_s0 = inlined_call_operand.vmem [shape: bf16[1568,147], index: 0, kind: input, shape index: {}]   ;;  %s2868_s1 = inlined_call_operand.vmem [shape: bf16[147,16], index: 1, kind: input, shape index: {}]   ;;  %s2869_s2 = inlined_call_operand.vmem [shape: bf16[1568,16], index: 2, kind: output, shape index: {}]  }
   0x1 LB: > { %s1893_s10 = sadd.s32 4294967295, %s2450_s9   ;;  %p1897_p0 = scmp.ge.s32.totalorder %s2450_s9, 1  ;;  %s2450_s9 = sphi %s2469_s9, %s12_s9  }
   0x2   : > { %p114_p1 = scmp.lt.s32.totalorder %s2450_s9, 3 }
   0x4   : > { %p115_p2 = pnand %p1897_p0, %p114_p1 }
   0x5   : > { %v2287_v0 = vld [vmem:[%s2868_s1] sm:$0xff] (!%p115_p2)   ;;  %v2452_v1 = vmov (!%p115_p2), 0   ;;  %v2288_v2 = vld [vmem:[%s2868_s1 + $0x8] sm:$0xff] (!%p115_p2)   ;;  %v2289_v3 = vld [vmem:[%s2868_s1 + $0x10] sm:$0xff] (!%p115_p2)   ;;  %s137_s17 = smul.u32 (!%p115_p2), 98, %s1893_s10  ;;  %vm766_vm0 = vcmask (!%p115_p2), 154624  }
   0x6   : > { %118 = sbr.rel (%p115_p2) target bundleno = 455 (0x1c7), region = 28  ;;  %921 = vmatprep.subr.bf16.mxu0 (!%p115_p2), %v2452_v1  ;;  %2257 = vmatprep.subr.bf16.mxu1 (!%p115_p2), %v2452_v1  ;;  %v2290_v4 = vld [vmem:[%s2868_s1 + $0x18] sm:$0xff] (!%p115_p2)   ;;  %v2291_v5 = vld [vmem:[%s2868_s1 + $0x20] sm:$0xff] (!%p115_p2)   ;;  %v2292_v8 = vld [vmem:[%s2868_s1 + $0x28] sm:$0xff] (!%p115_p2)   ;;  %vm914_vm1 = vcmask (!%p115_p2), 1040384   ;;  %vm915_vm2 = vcmask (!%p115_p2), 1041408  }
   0x7   : > { %922 = vmatpush1.bf16.msra.mxu0 (!%p115_p2), %v2287_v0  ;;  %2267 = vmatpush1.bf16.msra.mxu1 (!%p115_p2), %v2287_v0  ;;  %p138_p3 = scmp.lt.s32.totalorder (!%p115_p2), %s137_s17, 195  ;;  %v2293_v9 = vld [vmem:[%s2868_s1 + $0x30] sm:$0xff] (!%p115_p2)   ;;  %v2294_v10 = vld [vmem:[%s2868_s1 + $0x38] sm:$0xff] (!%p115_p2)   ;;  %v2453_v11 = vmov (!%p115_p2), 65535   ;;  %v2295_v13 = vld [vmem:[%s2868_s1 + $0x40] sm:$0xff] (!%p115_p2)   ;;  %vm1738_vm3 = vcmask (!%p115_p2), 125952  }
   0x8   : > { %923 = vmatprep.subr.bf16.mxu0 (!%p115_p2), %v2452_v1  ;;  %2258 = vmatprep.subr.bf16.mxu1 (!%p115_p2), %v2452_v1  ;;  %v916_v12 = vsel (!%p115_p2), %vm914_vm1, 4294967295, %v2453_v11  ;;  %v2296_v14 = vld [vmem:[%s2868_s1 + $0x48] ss:$0 sps:$4 sm:$0x33] (!%p115_p2)  }
   0x9   : > { %v917_v15 = vsel (!%p115_p2), %vm915_vm2, %v916_v12, 0 }
   0xa   : > { %v919_v16 = vand.u32 (!%p115_p2), %v2296_v14, %v917_v15 }
   0xb   : > { %924 = vmatpush1.bf16.msra.mxu0 (!%p115_p2), %v2288_v2  ;;  %2268 = vmatpush1.bf16.msra.mxu1 (!%p115_p2), %v2288_v2 }
   0xc   : > { %925 = vmatprep.subr.bf16.mxu0 (!%p115_p2), %v2452_v1  ;;  %2259 = vmatprep.subr.bf16.mxu1 (!%p115_p2), %v2452_v1 }
   0xd   : > { %s2871_s17 = smov (!%p138_p3, %s137_s17), 195 }
   0xe   : > { %s2158_s20 = sshll.u32 %s2871_s17, 3  ;;  %s1900_s8 = sshll.u32 %s2871_s17, 2 }
   0xf   : > { %926 = vmatpush1.bf16.msra.mxu0 %v2289_v3  ;;  %2269 = vmatpush1.bf16.msra.mxu1 %v2289_v3  ;;  %s2495_s23 = scalar_lea.vmem %s2867_s0, %s2158_s20  ;;  %s2666_s12 = scalar_lea.vmem %s2869_s2, %s1900_s8 }
  0x10   : > { %927 = vmatprep.subr.bf16.mxu0 %v2452_v1  ;;  %2260 = vmatprep.subr.bf16.mxu1 %v2452_v1  ;;  %v2299_v6 = vld [vmem:[%s2495_s23 + $0x4] ss:$8 sps:$4 sm:$0xff]   ;;  %v2302_v7 = vld [vmem:[%s2495_s23 + $0x194] ss:$8 sps:$4 sm:$0xff]   ;;  %v2297_v17 = vld [vmem:[%s2495_s23] ss:$8 sps:$4 sm:$0xff]  }
  0x11   : > { %2009 = vmatprep.mubr.msk.bf16.mxu0 %vm766_vm0, %v2299_v6  ;;  %2034 = vmatprep.mubr.msk.bf16.mxu1 %vm766_vm0, %v2302_v7  ;;  %v2300_v18 = vld [vmem:[%s2495_s23 + $0x190] ss:$8 sps:$4 sm:$0xff]   ;;  %v2303_v19 = vld [vmem:[%s2495_s23 + $0x14] ss:$8 sps:$4 sm:$0xff]   ;;  %v2306_v20 = vld [vmem:[%s2495_s23 + $0x1a4] ss:$8 sps:$4 sm:$0xff]  }
  0x12   : > { %v2305_v21 = vld [vmem:[%s2495_s23 + $0x10] ss:$8 sps:$4 sm:$0xff]   ;;  %v2308_v22 = vld [vmem:[%s2495_s23 + $0x1a0] ss:$8 sps:$4 sm:$0xff]   ;;  %v2309_v23 = vld [vmem:[%s2495_s23 + $0x24] ss:$8 sps:$4 sm:$0xff]  }
  0x13   : > { %928 = vmatpush1.bf16.msra.mxu0 %v2290_v4  ;;  %2270 = vmatpush1.bf16.msra.mxu1 %v2290_v4  ;;  %v2312_v24 = vld [vmem:[%s2495_s23 + $0x1b4] ss:$8 sps:$4 sm:$0xff]   ;;  %v2311_v25 = vld [vmem:[%s2495_s23 + $0x20] ss:$8 sps:$4 sm:$0xff]   ;;  %v2314_v26 = vld [vmem:[%s2495_s23 + $0x1b0] ss:$8 sps:$4 sm:$0xff]  }
  0x14   : > { %929 = vmatprep.subr.bf16.mxu0 %v2452_v1  ;;  %2261 = vmatprep.subr.bf16.mxu1 %v2452_v1  ;;  %v2315_v27 = vld [vmem:[%s2495_s23 + $0x34] ss:$8 sps:$4 sm:$0xff]   ;;  %v2318_v28 = vld [vmem:[%s2495_s23 + $0x1c4] ss:$8 sps:$4 sm:$0xff]   ;;  %v2317_v29 = vld [vmem:[%s2495_s23 + $0x30] ss:$8 sps:$4 sm:$0xff]  }
  0x15   : > { %v2320_v30 = vld [vmem:[%s2495_s23 + $0x1c0] ss:$8 sps:$4 sm:$0xff]   ;;  %v2321_v31 = vld [vmem:[%s2495_s23 + $0x44] ss:$8 sps:$4 sm:$0xff]   ;;  %v2324_v32 = vld [vmem:[%s2495_s23 + $0x1d4] ss:$8 sps:$4 sm:$0xff]  }
  0x16   : > { %v2323_v33 = vld [vmem:[%s2495_s23 + $0x40] ss:$8 sps:$4 sm:$0xff]   ;;  %v2326_v34 = vld [vmem:[%s2495_s23 + $0x1d0] ss:$8 sps:$4 sm:$0xff]   ;;  %v2327_v35 = vld [vmem:[%s2495_s23 + $0x54] ss:$8 sps:$4 sm:$0xff]  }
  0x17   : > { %930 = vmatpush1.bf16.msra.mxu0 %v2291_v5  ;;  %2271 = vmatpush1.bf16.msra.mxu1 %v2291_v5  ;;  %v2330_v36 = vld [vmem:[%s2495_s23 + $0x1e4] ss:$8 sps:$4 sm:$0xff]   ;;  %v2329_v37 = vld [vmem:[%s2495_s23 + $0x50] ss:$8 sps:$4 sm:$0xff]   ;;  %v2332_v38 = vld [vmem:[%s2495_s23 + $0x1e0] ss:$8 sps:$4 sm:$0xff]  }
  0x18   : > { %931 = vmatprep.subr.bf16.mxu0 %v2452_v1  ;;  %2262 = vmatprep.subr.bf16.mxu1 %v2452_v1  ;;  %v2333_v39 = vld [vmem:[%s2495_s23 + $0x64] ss:$8 sps:$4 sm:$0xff]   ;;  %v2336_v40 = vld [vmem:[%s2495_s23 + $0x1f4] ss:$8 sps:$4 sm:$0xff]   ;;  %v2335_v41 = vld [vmem:[%s2495_s23 + $0x60] ss:$8 sps:$4 sm:$0xff]  }
  0x19   : > { %v2338_v42 = vld [vmem:[%s2495_s23 + $0x1f0] ss:$8 sps:$4 sm:$0xff]   ;;  %v2339_v43 = vld [vmem:[%s2495_s23 + $0x74] ss:$8 sps:$4 sm:$0xff]   ;;  %v2342_v44 = vld [vmem:[%s2495_s23 + $0x204] ss:$8 sps:$4 sm:$0xff]  }
  0x1a   : > { %v2341_v45 = vld [vmem:[%s2495_s23 + $0x70] ss:$8 sps:$4 sm:$0xff]   ;;  %v2344_v46 = vld [vmem:[%s2495_s23 + $0x200] ss:$8 sps:$4 sm:$0xff]   ;;  %v2345_v47 = vld [vmem:[%s2495_s23 + $0x84] ss:$8 sps:$4 sm:$0xff]  }
  0x1b   : > { %932 = vmatpush1.bf16.msra.mxu0 %v2292_v8  ;;  %2272 = vmatpush1.bf16.msra.mxu1 %v2292_v8  ;;  %v2348_v48 = vld [vmem:[%s2495_s23 + $0x214] ss:$8 sps:$4 sm:$0xff]   ;;  %v2347_v49 = vld [vmem:[%s2495_s23 + $0x80] ss:$8 sps:$4 sm:$0xff]   ;;  %v2350_v50 = vld [vmem:[%s2495_s23 + $0x210] ss:$8 sps:$4 sm:$0xff]  }
  0x1c   : > { %933 = vmatprep.subr.bf16.mxu0 %v2452_v1  ;;  %2263 = vmatprep.subr.bf16.mxu1 %v2452_v1  ;;  %v2351_v51 = vld [vmem:[%s2495_s23 + $0x94] ss:$8 sps:$4 sm:$0xff]   ;;  %v2354_v52 = vld [vmem:[%s2495_s23 + $0x224] ss:$8 sps:$4 sm:$0xff]   ;;  %v2353_v53 = vld [vmem:[%s2495_s23 + $0x90] ss:$8 sps:$4 sm:$0xff]  }
  0x1d   : > { %v2356_v54 = vld [vmem:[%s2495_s23 + $0x220] ss:$8 sps:$4 sm:$0xff]   ;;  %v2357_v55 = vld [vmem:[%s2495_s23 + $0xa4] ss:$8 sps:$4 sm:$0xff]   ;;  %v2360_v56 = vld [vmem:[%s2495_s23 + $0x234] ss:$8 sps:$4 sm:$0xff]  }
  0x1e   : > { %v2359_v57 = vld [vmem:[%s2495_s23 + $0xa0] ss:$8 sps:$4 sm:$0xff]   ;;  %v2362_v58 = vld [vmem:[%s2495_s23 + $0x230] ss:$8 sps:$4 sm:$0xff]   ;;  %v2363_v59 = vld [vmem:[%s2495_s23 + $0xb4] ss:$8 sps:$4 sm:$0xff]  }
  0x1f   : > { %934 = vmatpush1.bf16.msra.mxu0 %v2293_v9  ;;  %2273 = vmatpush1.bf16.msra.mxu1 %v2293_v9  ;;  %v2366_v60 = vld [vmem:[%s2495_s23 + $0x244] ss:$8 sps:$4 sm:$0xff]   ;;  %v2365_v61 = vld [vmem:[%s2495_s23 + $0xb0] ss:$8 sps:$4 sm:$0xff]   ;;  %v2368_v62 = vld [vmem:[%s2495_s23 + $0x240] ss:$8 sps:$4 sm:$0xff]  }
  0x20   : > { %935 = vmatprep.subr.bf16.mxu0 %v2452_v1  ;;  %2264 = vmatprep.subr.bf16.mxu1 %v2452_v1  ;;  %v2369_v63 = vld [vmem:[%s2495_s23 + $0xc4] ss:$8 sps:$4 sm:$0xff]   ;;  %v2372_v0 = vld [vmem:[%s2495_s23 + $0x254] ss:$8 sps:$4 sm:$0xff]   ;;  %v2374_v2 = vld [vmem:[%s2495_s23 + $0x250] ss:$8 sps:$4 sm:$0xff]  }
  0x21   : > { %v2375_v3 = vld [vmem:[%s2495_s23 + $0xd4] ss:$8 sps:$4 sm:$0xff]   ;;  %v2378_v4 = vld [vmem:[%s2495_s23 + $0x264] ss:$8 sps:$4 sm:$0xff]   ;;  %v2377_v5 = vld [vmem:[%s2495_s23 + $0xd0] ss:$8 sps:$4 sm:$0xff]  }
  0x22   : > { %v2380_v6 = vld [vmem:[%s2495_s23 + $0x260] ss:$8 sps:$4 sm:$0xff]   ;;  %v2381_v7 = vld [vmem:[%s2495_s23 + $0xe4] ss:$8 sps:$4 sm:$0xff]   ;;  %v2384_v8 = vld [vmem:[%s2495_s23 + $0x274] ss:$8 sps:$4 sm:$0xff]  }
  0x23   : > { %936 = vmatpush1.bf16.msra.mxu0 %v2294_v10  ;;  %2274 = vmatpush1.bf16.msra.mxu1 %v2294_v10  ;;  %v2383_v9 = vld [vmem:[%s2495_s23 + $0xe0] ss:$8 sps:$4 sm:$0xff]   ;;  %v2386_v10 = vld [vmem:[%s2495_s23 + $0x270] ss:$8 sps:$4 sm:$0xff]   ;;  %v2387_v11 = vld [vmem:[%s2495_s23 + $0xf4] ss:$8 sps:$4 sm:$0xff]  }
  0x24   : > { %937 = vmatprep.subr.bf16.mxu0 %v2452_v1  ;;  %2265 = vmatprep.subr.bf16.mxu1 %v2452_v1  ;;  %v2390_v12 = vld [vmem:[%s2495_s23 + $0x284] ss:$8 sps:$4 sm:$0xff]   ;;  %v2392_v14 = vld [vmem:[%s2495_s23 + $0x280] ss:$8 sps:$4 sm:$0xff]  }
  0x25   : > { %v2393_v15 = vld [vmem:[%s2495_s23 + $0x104] ss:$8 sps:$4 sm:$0xff]  }
  0x27   : > { %938 = vmatpush1.bf16.msra.mxu0 %v2295_v13  ;;  %2275 = vmatpush1.bf16.msra.mxu1 %v2295_v13  ;;  %v2389_v13 = vld [vmem:[%s2495_s23 + $0xf0] ss:$8 sps:$4 sm:$0xff]  }
  0x28   : > { %939 = vmatprep.subr.bf16.mxu0 %v2452_v1  ;;  %2266 = vmatprep.subr.bf16.mxu1 %v2452_v1  ;;  %v2371_v1 = vld [vmem:[%s2495_s23 + $0xc0] ss:$8 sps:$4 sm:$0xff]  }
  0x2b   : > { %940 = vmatpush1.bf16.msra.mxu0 %v919_v16  ;;  %2276 = vmatpush1.bf16.msra.mxu1 %v919_v16  ;;  %v2396_v16 = vld [vmem:[%s2495_s23 + $0x294] ss:$8 sps:$4 sm:$0xff]  }
  0x2e   : > { %954 = vmatmul.mubr.bf16.vlgmr.msra.gmra.mrb[0].mxu0 %v2297_v17  ;;  %1154 = vmatmul.mubr.bf16.vlgmr.msra.gmra.mrb[0].mxu1 %v2300_v18  ;;  %v2395_v17 = vld [vmem:[%s2495_s23 + $0x100] ss:$8 sps:$4 sm:$0xff]   ;;  %v2398_v18 = vld [vmem:[%s2495_s23 + $0x290] ss:$8 sps:$4 sm:$0xff]  }
  0x2f   : > { %2010 = vmatprep.mubr.msk.bf16.mxu0 %vm766_vm0, %v2303_v19  ;;  %2035 = vmatprep.mubr.msk.bf16.mxu1 %vm766_vm0, %v2306_v20  ;;  %v2399_v19 = vld [vmem:[%s2495_s23 + $0x114] ss:$8 sps:$4 sm:$0xff]   ;;  %v2402_v20 = vld [vmem:[%s2495_s23 + $0x2a4] ss:$8 sps:$4 sm:$0xff]  }
  0x36   : > { %962 = vmatmul.mubr.bf16.gmra.mrb[4].mxu0 %v2305_v21  ;;  %1162 = vmatmul.mubr.bf16.gmra.mrb[4].mxu1 %v2308_v22  ;;  %v2401_v21 = vld [vmem:[%s2495_s23 + $0x110] ss:$8 sps:$4 sm:$0xff]   ;;  %v2404_v22 = vld [vmem:[%s2495_s23 + $0x2a0] ss:$8 sps:$4 sm:$0xff]  }
  0x37   : > { %2011 = vmatprep.mubr.msk.bf16.mxu0 %vm766_vm0, %v2309_v23  ;;  %2036 = vmatprep.mubr.msk.bf16.mxu1 %vm766_vm0, %v2312_v24  ;;  %v2405_v23 = vld [vmem:[%s2495_s23 + $0x124] ss:$8 sps:$4 sm:$0xff]   ;;  %v2408_v24 = vld [vmem:[%s2495_s23 + $0x2b4] ss:$8 sps:$4 sm:$0xff]  }
  0x3e   : > { %970 = vmatmul.mubr.bf16.gmra.mrb[8].mxu0 %v2311_v25  ;;  %1170 = vmatmul.mubr.bf16.gmra.mrb[8].mxu1 %v2314_v26  ;;  %v2407_v25 = vld [vmem:[%s2495_s23 + $0x120] ss:$8 sps:$4 sm:$0xff]   ;;  %v2410_v26 = vld [vmem:[%s2495_s23 + $0x2b0] ss:$8 sps:$4 sm:$0xff]  }
  0x3f   : > { %2012 = vmatprep.mubr.msk.bf16.mxu0 %vm766_vm0, %v2315_v27  ;;  %2037 = vmatprep.mubr.msk.bf16.mxu1 %vm766_vm0, %v2318_v28  ;;  %v2411_v27 = vld [vmem:[%s2495_s23 + $0x134] ss:$8 sps:$4 sm:$0xff]   ;;  %v2414_v28 = vld [vmem:[%s2495_s23 + $0x2c4] ss:$8 sps:$4 sm:$0xff]  }
  0x46   : > { %978 = vmatmul.mubr.bf16.gmra.mrb[12].mxu0 %v2317_v29  ;;  %1178 = vmatmul.mubr.bf16.gmra.mrb[12].mxu1 %v2320_v30  ;;  %v2413_v29 = vld [vmem:[%s2495_s23 + $0x130] ss:$8 sps:$4 sm:$0xff]   ;;  %v2416_v30 = vld [vmem:[%s2495_s23 + $0x2c0] ss:$8 sps:$4 sm:$0xff]  }
  0x47   : > { %2013 = vmatprep.mubr.msk.bf16.mxu0 %vm766_vm0, %v2321_v31  ;;  %2038 = vmatprep.mubr.msk.bf16.mxu1 %vm766_vm0, %v2324_v32  ;;  %v2417_v31 = vld [vmem:[%s2495_s23 + $0x144] ss:$8 sps:$4 sm:$0xff]   ;;  %v2420_v32 = vld [vmem:[%s2495_s23 + $0x2d4] ss:$8 sps:$4 sm:$0xff]  }
  0x4e   : > { %986 = vmatmul.mubr.bf16.gmra.mrb[16].mxu0 %v2323_v33  ;;  %1186 = vmatmul.mubr.bf16.gmra.mrb[16].mxu1 %v2326_v34  ;;  %v2419_v33 = vld [vmem:[%s2495_s23 + $0x140] ss:$8 sps:$4 sm:$0xff]   ;;  %v2422_v34 = vld [vmem:[%s2495_s23 + $0x2d0] ss:$8 sps:$4 sm:$0xff]  }
  0x4f   : > { %2014 = vmatprep.mubr.msk.bf16.mxu0 %vm766_vm0, %v2327_v35  ;;  %2039 = vmatprep.mubr.msk.bf16.mxu1 %vm766_vm0, %v2330_v36  ;;  %v2423_v35 = vld [vmem:[%s2495_s23 + $0x154] ss:$8 sps:$4 sm:$0xff]   ;;  %v2426_v36 = vld [vmem:[%s2495_s23 + $0x2e4] ss:$8 sps:$4 sm:$0xff]  }
  0x56   : > { %994 = vmatmul.mubr.bf16.gmra.mrb[20].mxu0 %v2329_v37  ;;  %1194 = vmatmul.mubr.bf16.gmra.mrb[20].mxu1 %v2332_v38  ;;  %v2425_v37 = vld [vmem:[%s2495_s23 + $0x150] ss:$8 sps:$4 sm:$0xff]   ;;  %v2428_v38 = vld [vmem:[%s2495_s23 + $0x2e0] ss:$8 sps:$4 sm:$0xff]  }
  0x57   : > { %2015 = vmatprep.mubr.msk.bf16.mxu0 %vm766_vm0, %v2333_v39  ;;  %2040 = vmatprep.mubr.msk.bf16.mxu1 %vm766_vm0, %v2336_v40  ;;  %v2429_v39 = vld [vmem:[%s2495_s23 + $0x164] ss:$8 sps:$4 sm:$0xff]   ;;  %v2432_v40 = vld [vmem:[%s2495_s23 + $0x2f4] ss:$8 sps:$4 sm:$0xff]  }
  0x5e   : > { %1002 = vmatmul.mubr.bf16.gmra.mrb[24].mxu0 %v2335_v41  ;;  %1202 = vmatmul.mubr.bf16.gmra.mrb[24].mxu1 %v2338_v42  ;;  %v2431_v41 = vld [vmem:[%s2495_s23 + $0x160] ss:$8 sps:$4 sm:$0xff]   ;;  %v2434_v42 = vld [vmem:[%s2495_s23 + $0x2f0] ss:$8 sps:$4 sm:$0xff]  }
  0x5f   : > { %2016 = vmatprep.mubr.msk.bf16.mxu0 %vm766_vm0, %v2339_v43  ;;  %2041 = vmatprep.mubr.msk.bf16.mxu1 %vm766_vm0, %v2342_v44  ;;  %v2435_v43 = vld [vmem:[%s2495_s23 + $0x174] ss:$8 sps:$4 sm:$0xff]   ;;  %v2438_v44 = vld [vmem:[%s2495_s23 + $0x304] ss:$8 sps:$4 sm:$0xff]  }
  0x66   : > { %1010 = vmatmul.mubr.bf16.gmra.mrb[28].mxu0 %v2341_v45  ;;  %1210 = vmatmul.mubr.bf16.gmra.mrb[28].mxu1 %v2344_v46  ;;  %v2437_v45 = vld [vmem:[%s2495_s23 + $0x170] ss:$8 sps:$4 sm:$0xff]   ;;  %v2440_v46 = vld [vmem:[%s2495_s23 + $0x300] ss:$8 sps:$4 sm:$0xff]  }
  0x67   : > { %2017 = vmatprep.mubr.msk.bf16.mxu0 %vm766_vm0, %v2345_v47  ;;  %2042 = vmatprep.mubr.msk.bf16.mxu1 %vm766_vm0, %v2348_v48  ;;  %v2441_v47 = vld [vmem:[%s2495_s23 + $0x184] ss:$8 sps:$4 sm:$0xff]   ;;  %v2443_v48 = vld [vmem:[%s2495_s23 + $0x180] ss:$8 sps:$4 sm:$0xff]  }
  0x6e   : > { %1018 = vmatmul.mubr.bf16.gmra.mrb[32].mxu0 %v2347_v49  ;;  %1218 = vmatmul.mubr.bf16.gmra.mrb[32].mxu1 %v2350_v50 }
  0x6f   : > { %2018 = vmatprep.mubr.msk.bf16.mxu0 %vm766_vm0, %v2351_v51  ;;  %2043 = vmatprep.mubr.msk.bf16.mxu1 %vm766_vm0, %v2354_v52 }
  0x76   : > { %1026 = vmatmul.mubr.bf16.gmra.mrb[36].mxu0 %v2353_v53  ;;  %1226 = vmatmul.mubr.bf16.gmra.mrb[36].mxu1 %v2356_v54 }
  0x77   : > { %2019 = vmatprep.mubr.msk.bf16.mxu0 %vm766_vm0, %v2357_v55  ;;  %2044 = vmatprep.mubr.msk.bf16.mxu1 %vm766_vm0, %v2360_v56 }
  0x7e   : > { %1034 = vmatmul.mubr.bf16.gmra.mrb[40].mxu0 %v2359_v57  ;;  %1234 = vmatmul.mubr.bf16.gmra.mrb[40].mxu1 %v2362_v58 }
  0x7f   : > { %2020 = vmatprep.mubr.msk.bf16.mxu0 %vm766_vm0, %v2363_v59  ;;  %2045 = vmatprep.mubr.msk.bf16.mxu1 %vm766_vm0, %v2366_v60 }
  0x86   : > { %1042 = vmatmul.mubr.bf16.gmra.mrb[44].mxu0 %v2365_v61  ;;  %1242 = vmatmul.mubr.bf16.gmra.mrb[44].mxu1 %v2368_v62 }
  0x87   : > { %2021 = vmatprep.mubr.msk.bf16.mxu0 %vm766_vm0, %v2369_v63  ;;  %2046 = vmatprep.mubr.msk.bf16.mxu1 %vm766_vm0, %v2372_v0 }
  0x8e   : > { %1050 = vmatmul.mubr.bf16.gmra.mrb[48].mxu0 %v2371_v1  ;;  %1250 = vmatmul.mubr.bf16.gmra.mrb[48].mxu1 %v2374_v2 }
  0x8f   : > { %2022 = vmatprep.mubr.msk.bf16.mxu0 %vm766_vm0, %v2375_v3  ;;  %2047 = vmatprep.mubr.msk.bf16.mxu1 %vm766_vm0, %v2378_v4 }
  0x96   : > { %1058 = vmatmul.mubr.bf16.gmra.mrb[52].mxu0 %v2377_v5  ;;  %1258 = vmatmul.mubr.bf16.gmra.mrb[52].mxu1 %v2380_v6 }
  0x97   : > { %2023 = vmatprep.mubr.msk.bf16.mxu0 %vm766_vm0, %v2381_v7  ;;  %2048 = vmatprep.mubr.msk.bf16.mxu1 %vm766_vm0, %v2384_v8 }
  0x9e   : > { %1066 = vmatmul.mubr.bf16.gmra.mrb[56].mxu0 %v2383_v9  ;;  %1266 = vmatmul.mubr.bf16.gmra.mrb[56].mxu1 %v2386_v10 }
  0x9f   : > { %2024 = vmatprep.mubr.msk.bf16.mxu0 %vm766_vm0, %v2387_v11  ;;  %2049 = vmatprep.mubr.msk.bf16.mxu1 %vm766_vm0, %v2390_v12 }
  0xa6   : > { %1074 = vmatmul.mubr.bf16.gmra.mrb[60].mxu0 %v2389_v13  ;;  %1274 = vmatmul.mubr.bf16.gmra.mrb[60].mxu1 %v2392_v14 }
  0xa7   : > { %2025 = vmatprep.mubr.msk.bf16.mxu0 %vm766_vm0, %v2393_v15  ;;  %2050 = vmatprep.mubr.msk.bf16.mxu1 %vm766_vm0, %v2396_v16 }
  0xae   : > { %1082 = vmatmul.mubr.bf16.gmra.mrb[64].mxu0 %v2395_v17  ;;  %1282 = vmatmul.mubr.bf16.gmra.mrb[64].mxu1 %v2398_v18 }
  0xaf   : > { %2026 = vmatprep.mubr.msk.bf16.mxu0 %vm766_vm0, %v2399_v19  ;;  %2051 = vmatprep.mubr.msk.bf16.mxu1 %vm766_vm0, %v2402_v20 }
  0xb6   : > { %1090 = vmatmul.mubr.bf16.gmra.mrb[68].mxu0 %v2401_v21  ;;  %1290 = vmatmul.mubr.bf16.gmra.mrb[68].mxu1 %v2404_v22 }
  0xb7   : > { %2027 = vmatprep.mubr.msk.bf16.mxu0 %vm766_vm0, %v2405_v23  ;;  %2052 = vmatprep.mubr.msk.bf16.mxu1 %vm766_vm0, %v2408_v24 }
  0xbe   : > { %1098 = vmatmul.mubr.bf16.gmra.mrb[72].mxu0 %v2407_v25  ;;  %1298 = vmatmul.mubr.bf16.gmra.mrb[72].mxu1 %v2410_v26 }
  0xbf   : > { %2028 = vmatprep.mubr.msk.bf16.mxu0 %vm766_vm0, %v2411_v27  ;;  %2053 = vmatprep.mubr.msk.bf16.mxu1 %vm766_vm0, %v2414_v28 }
  0xc6   : > { %1106 = vmatmul.mubr.bf16.gmra.mrb[76].mxu0 %v2413_v29  ;;  %1306 = vmatmul.mubr.bf16.gmra.mrb[76].mxu1 %v2416_v30 }
  0xc7   : > { %2029 = vmatprep.mubr.msk.bf16.mxu0 %vm766_vm0, %v2417_v31  ;;  %2054 = vmatprep.mubr.msk.bf16.mxu1 %vm766_vm0, %v2420_v32 }
  0xce   : > { %1114 = vmatmul.mubr.bf16.gmra.mrb[80].mxu0 %v2419_v33  ;;  %1314 = vmatmul.mubr.bf16.gmra.mrb[80].mxu1 %v2422_v34 }
  0xcf   : > { %2030 = vmatprep.mubr.msk.bf16.mxu0 %vm766_vm0, %v2423_v35  ;;  %2055 = vmatprep.mubr.msk.bf16.mxu1 %vm766_vm0, %v2426_v36 }
  0xd6   : > { %1122 = vmatmul.mubr.bf16.gmra.mrb[84].mxu0 %v2425_v37  ;;  %1322 = vmatmul.mubr.bf16.gmra.mrb[84].mxu1 %v2428_v38 }
  0xd7   : > { %2031 = vmatprep.mubr.msk.bf16.mxu0 %vm766_vm0, %v2429_v39  ;;  %2056 = vmatprep.mubr.msk.bf16.mxu1 %vm766_vm0, %v2432_v40 }
  0xde   : > { %1130 = vmatmul.mubr.bf16.gmra.mrb[88].mxu0 %v2431_v41  ;;  %1330 = vmatmul.mubr.bf16.gmra.mrb[88].mxu1 %v2434_v42 }
  0xdf   : > { %2032 = vmatprep.mubr.msk.bf16.mxu0 %vm766_vm0, %v2435_v43  ;;  %2057 = vmatprep.mubr.msk.bf16.mxu1 %vm766_vm0, %v2438_v44 }
  0xe6   : > { %1138 = vmatmul.mubr.bf16.gmra.mrb[92].mxu0 %v2437_v45  ;;  %1338 = vmatmul.mubr.bf16.gmra.mrb[92].mxu1 %v2440_v46 }
  0xe7   : > { %2033 = vmatprep.mubr.msk.bf16.mxu0 %vm766_vm0, %v2441_v47 }
  0xee   : > { %1146 = vmatmul.mubr.bf16.gmra.mrb[96].mxu0 %v2443_v48 }
 0x101   : > { %v955_v49 = vpop.f32.mrb[0].mxu0  ;;  %v1155_v50 = vpop.f32.mrb[0].mxu1 }
 0x102   : > { %v2159_v51 = vpack.c.bf16 %v955_v49, %v955_v49  ;;  %v957_v52 = vpop.f32.mrb[1].mxu0  ;;  %v2209_v53 = vpack.c.bf16 %v1155_v50, %v1155_v50  ;;  %v1157_v54 = vpop.f32.mrb[1].mxu1 }
 0x103   : > { %v958_v55 = vpop.f32.mrb[2].mxu0  ;;  %v1158_v56 = vpop.f32.mrb[2].mxu1 }
 0x104   : > { %1739 = vst.msk [vmem:[%s2666_s12] sm:$0xf] %vm1738_vm3, %v2159_v51  ;;  %v2160_v57 = vpack.c.bf16 %v958_v55, %v958_v55  ;;  %v960_v58 = vpop.f32.mrb[3].mxu0  ;;  %1789 = vst.msk [vmem:[%s2666_s12 + $0xc8] sm:$0xf] %vm1738_vm3, %v2209_v53  ;;  %v2210_v59 = vpack.c.bf16 %v1158_v56, %v1158_v56  ;;  %v1160_v60 = vpop.f32.mrb[3].mxu1 }
 0x106   : > { %1740 = vst.msk [vmem:[%s2666_s12 + $0x4] sm:$0xf] %vm1738_vm3, %v2160_v57  ;;  %1790 = vst.msk [vmem:[%s2666_s12 + $0xcc] sm:$0xf] %vm1738_vm3, %v2210_v59 }
 0x109   : > { %v963_v61 = vpop.f32.mrb[4].mxu0  ;;  %v1163_v62 = vpop.f32.mrb[4].mxu1 }
 0x10a   : > { %v2161_v63 = vpack.c.bf16 %v963_v61, %v963_v61  ;;  %v965_v0 = vpop.f32.mrb[5].mxu0  ;;  %v2211_v1 = vpack.c.bf16 %v1163_v62, %v1163_v62  ;;  %v1165_v2 = vpop.f32.mrb[5].mxu1 }
 0x10b   : > { %v966_v3 = vpop.f32.mrb[6].mxu0  ;;  %v1166_v4 = vpop.f32.mrb[6].mxu1 }
 0x10c   : > { %1741 = vst.msk [vmem:[%s2666_s12 + $0x8] sm:$0xf] %vm1738_vm3, %v2161_v63  ;;  %v2162_v5 = vpack.c.bf16 %v966_v3, %v966_v3  ;;  %v968_v6 = vpop.f32.mrb[7].mxu0  ;;  %1791 = vst.msk [vmem:[%s2666_s12 + $0xd0] sm:$0xf] %vm1738_vm3, %v2211_v1  ;;  %v2212_v7 = vpack.c.bf16 %v1166_v4, %v1166_v4  ;;  %v1168_v8 = vpop.f32.mrb[7].mxu1 }
 0x10e   : > { %1742 = vst.msk [vmem:[%s2666_s12 + $0xc] sm:$0xf] %vm1738_vm3, %v2162_v5  ;;  %1792 = vst.msk [vmem:[%s2666_s12 + $0xd4] sm:$0xf] %vm1738_vm3, %v2212_v7 }
 0x111   : > { %v971_v9 = vpop.f32.mrb[8].mxu0  ;;  %v1171_v10 = vpop.f32.mrb[8].mxu1 }
 0x112   : > { %v2163_v11 = vpack.c.bf16 %v971_v9, %v971_v9  ;;  %v973_v12 = vpop.f32.mrb[9].mxu0  ;;  %v2213_v13 = vpack.c.bf16 %v1171_v10, %v1171_v10  ;;  %v1173_v14 = vpop.f32.mrb[9].mxu1 }
 0x113   : > { %v974_v15 = vpop.f32.mrb[10].mxu0  ;;  %v1174_v16 = vpop.f32.mrb[10].mxu1 }
 0x114   : > { %1743 = vst.msk [vmem:[%s2666_s12 + $0x10] sm:$0xf] %vm1738_vm3, %v2163_v11  ;;  %v2164_v17 = vpack.c.bf16 %v974_v15, %v974_v15  ;;  %v976_v18 = vpop.f32.mrb[11].mxu0  ;;  %1793 = vst.msk [vmem:[%s2666_s12 + $0xd8] sm:$0xf] %vm1738_vm3, %v2213_v13  ;;  %v2214_v19 = vpack.c.bf16 %v1174_v16, %v1174_v16  ;;  %v1176_v20 = vpop.f32.mrb[11].mxu1 }
 0x116   : > { %1744 = vst.msk [vmem:[%s2666_s12 + $0x14] sm:$0xf] %vm1738_vm3, %v2164_v17  ;;  %1794 = vst.msk [vmem:[%s2666_s12 + $0xdc] sm:$0xf] %vm1738_vm3, %v2214_v19 }
 0x119   : > { %v979_v21 = vpop.f32.mrb[12].mxu0  ;;  %v1179_v22 = vpop.f32.mrb[12].mxu1 }
 0x11a   : > { %v2165_v23 = vpack.c.bf16 %v979_v21, %v979_v21  ;;  %v981_v24 = vpop.f32.mrb[13].mxu0  ;;  %v2215_v25 = vpack.c.bf16 %v1179_v22, %v1179_v22  ;;  %v1181_v26 = vpop.f32.mrb[13].mxu1 }
 0x11b   : > { %v982_v27 = vpop.f32.mrb[14].mxu0  ;;  %v1182_v28 = vpop.f32.mrb[14].mxu1 }
 0x11c   : > { %1745 = vst.msk [vmem:[%s2666_s12 + $0x18] sm:$0xf] %vm1738_vm3, %v2165_v23  ;;  %v2166_v29 = vpack.c.bf16 %v982_v27, %v982_v27  ;;  %v984_v30 = vpop.f32.mrb[15].mxu0  ;;  %1795 = vst.msk [vmem:[%s2666_s12 + $0xe0] sm:$0xf] %vm1738_vm3, %v2215_v25  ;;  %v2216_v31 = vpack.c.bf16 %v1182_v28, %v1182_v28  ;;  %v1184_v32 = vpop.f32.mrb[15].mxu1 }
 0x11e   : > { %1746 = vst.msk [vmem:[%s2666_s12 + $0x1c] sm:$0xf] %vm1738_vm3, %v2166_v29  ;;  %1796 = vst.msk [vmem:[%s2666_s12 + $0xe4] sm:$0xf] %vm1738_vm3, %v2216_v31 }
 0x121   : > { %v987_v33 = vpop.f32.mrb[16].mxu0  ;;  %v1187_v34 = vpop.f32.mrb[16].mxu1 }
 0x122   : > { %v2167_v35 = vpack.c.bf16 %v987_v33, %v987_v33  ;;  %v989_v36 = vpop.f32.mrb[17].mxu0  ;;  %v2217_v37 = vpack.c.bf16 %v1187_v34, %v1187_v34  ;;  %v1189_v38 = vpop.f32.mrb[17].mxu1 }
 0x123   : > { %v990_v39 = vpop.f32.mrb[18].mxu0  ;;  %v1190_v40 = vpop.f32.mrb[18].mxu1 }
 0x124   : > { %1747 = vst.msk [vmem:[%s2666_s12 + $0x20] sm:$0xf] %vm1738_vm3, %v2167_v35  ;;  %v2168_v41 = vpack.c.bf16 %v990_v39, %v990_v39  ;;  %v992_v42 = vpop.f32.mrb[19].mxu0  ;;  %1797 = vst.msk [vmem:[%s2666_s12 + $0xe8] sm:$0xf] %vm1738_vm3, %v2217_v37  ;;  %v2218_v43 = vpack.c.bf16 %v1190_v40, %v1190_v40  ;;  %v1192_v44 = vpop.f32.mrb[19].mxu1 }
 0x126   : > { %1748 = vst.msk [vmem:[%s2666_s12 + $0x24] sm:$0xf] %vm1738_vm3, %v2168_v41  ;;  %1798 = vst.msk [vmem:[%s2666_s12 + $0xec] sm:$0xf] %vm1738_vm3, %v2218_v43 }
 0x129   : > { %v995_v45 = vpop.f32.mrb[20].mxu0  ;;  %v1195_v46 = vpop.f32.mrb[20].mxu1 }
 0x12a   : > { %v2169_v47 = vpack.c.bf16 %v995_v45, %v995_v45  ;;  %v997_v48 = vpop.f32.mrb[21].mxu0  ;;  %v2219_v49 = vpack.c.bf16 %v1195_v46, %v1195_v46  ;;  %v1197_v50 = vpop.f32.mrb[21].mxu1 }
 0x12b   : > { %v998_v51 = vpop.f32.mrb[22].mxu0  ;;  %v1198_v52 = vpop.f32.mrb[22].mxu1 }
 0x12c   : > { %1749 = vst.msk [vmem:[%s2666_s12 + $0x28] sm:$0xf] %vm1738_vm3, %v2169_v47  ;;  %v2170_v53 = vpack.c.bf16 %v998_v51, %v998_v51  ;;  %v1000_v54 = vpop.f32.mrb[23].mxu0  ;;  %1799 = vst.msk [vmem:[%s2666_s12 + $0xf0] sm:$0xf] %vm1738_vm3, %v2219_v49  ;;  %v2220_v55 = vpack.c.bf16 %v1198_v52, %v1198_v52  ;;  %v1200_v56 = vpop.f32.mrb[23].mxu1 }
 0x12e   : > { %1750 = vst.msk [vmem:[%s2666_s12 + $0x2c] sm:$0xf] %vm1738_vm3, %v2170_v53  ;;  %1800 = vst.msk [vmem:[%s2666_s12 + $0xf4] sm:$0xf] %vm1738_vm3, %v2220_v55 }
 0x131   : > { %v1003_v57 = vpop.f32.mrb[24].mxu0  ;;  %v1203_v58 = vpop.f32.mrb[24].mxu1 }
 0x132   : > { %v2171_v59 = vpack.c.bf16 %v1003_v57, %v1003_v57  ;;  %v1005_v60 = vpop.f32.mrb[25].mxu0  ;;  %v2221_v61 = vpack.c.bf16 %v1203_v58, %v1203_v58  ;;  %v1205_v62 = vpop.f32.mrb[25].mxu1 }
 0x133   : > { %v1006_v63 = vpop.f32.mrb[26].mxu0  ;;  %v1206_v0 = vpop.f32.mrb[26].mxu1 }
 0x134   : > { %1751 = vst.msk [vmem:[%s2666_s12 + $0x30] sm:$0xf] %vm1738_vm3, %v2171_v59  ;;  %v2172_v1 = vpack.c.bf16 %v1006_v63, %v1006_v63  ;;  %v1008_v2 = vpop.f32.mrb[27].mxu0  ;;  %1801 = vst.msk [vmem:[%s2666_s12 + $0xf8] sm:$0xf] %vm1738_vm3, %v2221_v61  ;;  %v2222_v3 = vpack.c.bf16 %v1206_v0, %v1206_v0  ;;  %v1208_v4 = vpop.f32.mrb[27].mxu1 }
 0x136   : > { %1752 = vst.msk [vmem:[%s2666_s12 + $0x34] sm:$0xf] %vm1738_vm3, %v2172_v1  ;;  %1802 = vst.msk [vmem:[%s2666_s12 + $0xfc] sm:$0xf] %vm1738_vm3, %v2222_v3 }
 0x139   : > { %v1011_v5 = vpop.f32.mrb[28].mxu0  ;;  %v1211_v6 = vpop.f32.mrb[28].mxu1 }
 0x13a   : > { %v2173_v7 = vpack.c.bf16 %v1011_v5, %v1011_v5  ;;  %v1013_v8 = vpop.f32.mrb[29].mxu0  ;;  %v2223_v9 = vpack.c.bf16 %v1211_v6, %v1211_v6  ;;  %v1213_v10 = vpop.f32.mrb[29].mxu1 }
 0x13b   : > { %v1014_v11 = vpop.f32.mrb[30].mxu0  ;;  %v1214_v12 = vpop.f32.mrb[30].mxu1 }
 0x13c   : > { %1753 = vst.msk [vmem:[%s2666_s12 + $0x38] sm:$0xf] %vm1738_vm3, %v2173_v7  ;;  %v2174_v13 = vpack.c.bf16 %v1014_v11, %v1014_v11  ;;  %v1016_v14 = vpop.f32.mrb[31].mxu0  ;;  %1803 = vst.msk [vmem:[%s2666_s12 + $0x100] sm:$0xf] %vm1738_vm3, %v2223_v9  ;;  %v2224_v15 = vpack.c.bf16 %v1214_v12, %v1214_v12  ;;  %v1216_v16 = vpop.f32.mrb[31].mxu1 }
 0x13e   : > { %1754 = vst.msk [vmem:[%s2666_s12 + $0x3c] sm:$0xf] %vm1738_vm3, %v2174_v13  ;;  %1804 = vst.msk [vmem:[%s2666_s12 + $0x104] sm:$0xf] %vm1738_vm3, %v2224_v15 }
 0x141   : > { %v1019_v17 = vpop.f32.mrb[32].mxu0  ;;  %v1219_v18 = vpop.f32.mrb[32].mxu1 }
 0x142   : > { %v2175_v19 = vpack.c.bf16 %v1019_v17, %v1019_v17  ;;  %v1021_v20 = vpop.f32.mrb[33].mxu0  ;;  %v2225_v21 = vpack.c.bf16 %v1219_v18, %v1219_v18  ;;  %v1221_v22 = vpop.f32.mrb[33].mxu1 }
 0x143   : > { %v1022_v23 = vpop.f32.mrb[34].mxu0  ;;  %v1222_v24 = vpop.f32.mrb[34].mxu1 }
 0x144   : > { %1755 = vst.msk [vmem:[%s2666_s12 + $0x40] sm:$0xf] %vm1738_vm3, %v2175_v19  ;;  %v2176_v25 = vpack.c.bf16 %v1022_v23, %v1022_v23  ;;  %v1024_v26 = vpop.f32.mrb[35].mxu0  ;;  %1805 = vst.msk [vmem:[%s2666_s12 + $0x108] sm:$0xf] %vm1738_vm3, %v2225_v21  ;;  %v2226_v27 = vpack.c.bf16 %v1222_v24, %v1222_v24  ;;  %v1224_v28 = vpop.f32.mrb[35].mxu1 }
 0x146   : > { %1756 = vst.msk [vmem:[%s2666_s12 + $0x44] sm:$0xf] %vm1738_vm3, %v2176_v25  ;;  %1806 = vst.msk [vmem:[%s2666_s12 + $0x10c] sm:$0xf] %vm1738_vm3, %v2226_v27 }
 0x149   : > { %v1027_v29 = vpop.f32.mrb[36].mxu0  ;;  %v1227_v30 = vpop.f32.mrb[36].mxu1 }
 0x14a   : > { %v2177_v31 = vpack.c.bf16 %v1027_v29, %v1027_v29  ;;  %v1029_v32 = vpop.f32.mrb[37].mxu0  ;;  %v2227_v33 = vpack.c.bf16 %v1227_v30, %v1227_v30  ;;  %v1229_v34 = vpop.f32.mrb[37].mxu1 }
 0x14b   : > { %v1030_v35 = vpop.f32.mrb[38].mxu0  ;;  %v1230_v36 = vpop.f32.mrb[38].mxu1 }
 0x14c   : > { %1757 = vst.msk [vmem:[%s2666_s12 + $0x48] sm:$0xf] %vm1738_vm3, %v2177_v31  ;;  %v2178_v37 = vpack.c.bf16 %v1030_v35, %v1030_v35  ;;  %v1032_v38 = vpop.f32.mrb[39].mxu0  ;;  %1807 = vst.msk [vmem:[%s2666_s12 + $0x110] sm:$0xf] %vm1738_vm3, %v2227_v33  ;;  %v2228_v39 = vpack.c.bf16 %v1230_v36, %v1230_v36  ;;  %v1232_v40 = vpop.f32.mrb[39].mxu1 }
 0x14e   : > { %1758 = vst.msk [vmem:[%s2666_s12 + $0x4c] sm:$0xf] %vm1738_vm3, %v2178_v37  ;;  %1808 = vst.msk [vmem:[%s2666_s12 + $0x114] sm:$0xf] %vm1738_vm3, %v2228_v39 }
 0x151   : > { %v1035_v41 = vpop.f32.mrb[40].mxu0  ;;  %v1235_v42 = vpop.f32.mrb[40].mxu1 }
 0x152   : > { %v2179_v43 = vpack.c.bf16 %v1035_v41, %v1035_v41  ;;  %v1037_v44 = vpop.f32.mrb[41].mxu0  ;;  %v2229_v45 = vpack.c.bf16 %v1235_v42, %v1235_v42  ;;  %v1237_v46 = vpop.f32.mrb[41].mxu1 }
 0x153   : > { %v1038_v47 = vpop.f32.mrb[42].mxu0  ;;  %v1238_v48 = vpop.f32.mrb[42].mxu1 }
 0x154   : > { %1759 = vst.msk [vmem:[%s2666_s12 + $0x50] sm:$0xf] %vm1738_vm3, %v2179_v43  ;;  %v2180_v49 = vpack.c.bf16 %v1038_v47, %v1038_v47  ;;  %v1040_v50 = vpop.f32.mrb[43].mxu0  ;;  %1809 = vst.msk [vmem:[%s2666_s12 + $0x118] sm:$0xf] %vm1738_vm3, %v2229_v45  ;;  %v2230_v51 = vpack.c.bf16 %v1238_v48, %v1238_v48  ;;  %v1240_v52 = vpop.f32.mrb[43].mxu1 }
 0x156   : > { %1760 = vst.msk [vmem:[%s2666_s12 + $0x54] sm:$0xf] %vm1738_vm3, %v2180_v49  ;;  %1810 = vst.msk [vmem:[%s2666_s12 + $0x11c] sm:$0xf] %vm1738_vm3, %v2230_v51 }
 0x159   : > { %v1043_v53 = vpop.f32.mrb[44].mxu0  ;;  %v1243_v54 = vpop.f32.mrb[44].mxu1 }
 0x15a   : > { %v2181_v55 = vpack.c.bf16 %v1043_v53, %v1043_v53  ;;  %v1045_v56 = vpop.f32.mrb[45].mxu0  ;;  %v2231_v57 = vpack.c.bf16 %v1243_v54, %v1243_v54  ;;  %v1245_v58 = vpop.f32.mrb[45].mxu1 }
 0x15b   : > { %v1046_v59 = vpop.f32.mrb[46].mxu0  ;;  %v1246_v60 = vpop.f32.mrb[46].mxu1 }
 0x15c   : > { %1761 = vst.msk [vmem:[%s2666_s12 + $0x58] sm:$0xf] %vm1738_vm3, %v2181_v55  ;;  %v2182_v61 = vpack.c.bf16 %v1046_v59, %v1046_v59  ;;  %v1048_v62 = vpop.f32.mrb[47].mxu0  ;;  %1811 = vst.msk [vmem:[%s2666_s12 + $0x120] sm:$0xf] %vm1738_vm3, %v2231_v57  ;;  %v2232_v63 = vpack.c.bf16 %v1246_v60, %v1246_v60  ;;  %v1248_v0 = vpop.f32.mrb[47].mxu1 }
 0x15e   : > { %1762 = vst.msk [vmem:[%s2666_s12 + $0x5c] sm:$0xf] %vm1738_vm3, %v2182_v61  ;;  %1812 = vst.msk [vmem:[%s2666_s12 + $0x124] sm:$0xf] %vm1738_vm3, %v2232_v63 }
 0x161   : > { %v1051_v1 = vpop.f32.mrb[48].mxu0  ;;  %v1251_v2 = vpop.f32.mrb[48].mxu1 }
 0x162   : > { %v2183_v3 = vpack.c.bf16 %v1051_v1, %v1051_v1  ;;  %v1053_v4 = vpop.f32.mrb[49].mxu0  ;;  %v2233_v5 = vpack.c.bf16 %v1251_v2, %v1251_v2  ;;  %v1253_v6 = vpop.f32.mrb[49].mxu1 }
 0x163   : > { %v1054_v7 = vpop.f32.mrb[50].mxu0  ;;  %v1254_v8 = vpop.f32.mrb[50].mxu1 }
 0x164   : > { %1763 = vst.msk [vmem:[%s2666_s12 + $0x60] sm:$0xf] %vm1738_vm3, %v2183_v3  ;;  %v2184_v9 = vpack.c.bf16 %v1054_v7, %v1054_v7  ;;  %v1056_v10 = vpop.f32.mrb[51].mxu0  ;;  %1813 = vst.msk [vmem:[%s2666_s12 + $0x128] sm:$0xf] %vm1738_vm3, %v2233_v5  ;;  %v2234_v11 = vpack.c.bf16 %v1254_v8, %v1254_v8  ;;  %v1256_v12 = vpop.f32.mrb[51].mxu1 }
 0x166   : > { %1764 = vst.msk [vmem:[%s2666_s12 + $0x64] sm:$0xf] %vm1738_vm3, %v2184_v9  ;;  %1814 = vst.msk [vmem:[%s2666_s12 + $0x12c] sm:$0xf] %vm1738_vm3, %v2234_v11 }
 0x169   : > { %v1059_v13 = vpop.f32.mrb[52].mxu0  ;;  %v1259_v14 = vpop.f32.mrb[52].mxu1 }
 0x16a   : > { %v2185_v15 = vpack.c.bf16 %v1059_v13, %v1059_v13  ;;  %v1061_v16 = vpop.f32.mrb[53].mxu0  ;;  %v2235_v17 = vpack.c.bf16 %v1259_v14, %v1259_v14  ;;  %v1261_v18 = vpop.f32.mrb[53].mxu1 }
 0x16b   : > { %v1062_v19 = vpop.f32.mrb[54].mxu0  ;;  %v1262_v20 = vpop.f32.mrb[54].mxu1 }
 0x16c   : > { %1765 = vst.msk [vmem:[%s2666_s12 + $0x68] sm:$0xf] %vm1738_vm3, %v2185_v15  ;;  %v2186_v21 = vpack.c.bf16 %v1062_v19, %v1062_v19  ;;  %v1064_v22 = vpop.f32.mrb[55].mxu0  ;;  %1815 = vst.msk [vmem:[%s2666_s12 + $0x130] sm:$0xf] %vm1738_vm3, %v2235_v17  ;;  %v2236_v23 = vpack.c.bf16 %v1262_v20, %v1262_v20  ;;  %v1264_v24 = vpop.f32.mrb[55].mxu1 }
 0x16e   : > { %1766 = vst.msk [vmem:[%s2666_s12 + $0x6c] sm:$0xf] %vm1738_vm3, %v2186_v21  ;;  %1816 = vst.msk [vmem:[%s2666_s12 + $0x134] sm:$0xf] %vm1738_vm3, %v2236_v23 }
 0x171   : > { %v1067_v25 = vpop.f32.mrb[56].mxu0  ;;  %v1267_v26 = vpop.f32.mrb[56].mxu1 }
 0x172   : > { %v2187_v27 = vpack.c.bf16 %v1067_v25, %v1067_v25  ;;  %v1069_v28 = vpop.f32.mrb[57].mxu0  ;;  %v2237_v29 = vpack.c.bf16 %v1267_v26, %v1267_v26  ;;  %v1269_v30 = vpop.f32.mrb[57].mxu1 }
 0x173   : > { %v1070_v31 = vpop.f32.mrb[58].mxu0  ;;  %v1270_v32 = vpop.f32.mrb[58].mxu1 }
 0x174   : > { %1767 = vst.msk [vmem:[%s2666_s12 + $0x70] sm:$0xf] %vm1738_vm3, %v2187_v27  ;;  %v2188_v33 = vpack.c.bf16 %v1070_v31, %v1070_v31  ;;  %v1072_v34 = vpop.f32.mrb[59].mxu0  ;;  %1817 = vst.msk [vmem:[%s2666_s12 + $0x138] sm:$0xf] %vm1738_vm3, %v2237_v29  ;;  %v2238_v35 = vpack.c.bf16 %v1270_v32, %v1270_v32  ;;  %v1272_v36 = vpop.f32.mrb[59].mxu1 }
 0x176   : > { %1768 = vst.msk [vmem:[%s2666_s12 + $0x74] sm:$0xf] %vm1738_vm3, %v2188_v33  ;;  %1818 = vst.msk [vmem:[%s2666_s12 + $0x13c] sm:$0xf] %vm1738_vm3, %v2238_v35 }
 0x179   : > { %v1075_v37 = vpop.f32.mrb[60].mxu0  ;;  %v1275_v38 = vpop.f32.mrb[60].mxu1 }
 0x17a   : > { %v2189_v39 = vpack.c.bf16 %v1075_v37, %v1075_v37  ;;  %v1077_v40 = vpop.f32.mrb[61].mxu0  ;;  %v2239_v41 = vpack.c.bf16 %v1275_v38, %v1275_v38  ;;  %v1277_v42 = vpop.f32.mrb[61].mxu1 }
 0x17b   : > { %v1078_v43 = vpop.f32.mrb[62].mxu0  ;;  %v1278_v44 = vpop.f32.mrb[62].mxu1 }
 0x17c   : > { %1769 = vst.msk [vmem:[%s2666_s12 + $0x78] sm:$0xf] %vm1738_vm3, %v2189_v39  ;;  %v2190_v45 = vpack.c.bf16 %v1078_v43, %v1078_v43  ;;  %v1080_v46 = vpop.f32.mrb[63].mxu0  ;;  %1819 = vst.msk [vmem:[%s2666_s12 + $0x140] sm:$0xf] %vm1738_vm3, %v2239_v41  ;;  %v2240_v47 = vpack.c.bf16 %v1278_v44, %v1278_v44  ;;  %v1280_v48 = vpop.f32.mrb[63].mxu1 }
 0x17e   : > { %1770 = vst.msk [vmem:[%s2666_s12 + $0x7c] sm:$0xf] %vm1738_vm3, %v2190_v45  ;;  %1820 = vst.msk [vmem:[%s2666_s12 + $0x144] sm:$0xf] %vm1738_vm3, %v2240_v47 }
 0x181   : > { %v1083_v49 = vpop.f32.mrb[64].mxu0  ;;  %v1283_v50 = vpop.f32.mrb[64].mxu1 }
 0x182   : > { %v2191_v51 = vpack.c.bf16 %v1083_v49, %v1083_v49  ;;  %v1085_v52 = vpop.f32.mrb[65].mxu0  ;;  %v2241_v53 = vpack.c.bf16 %v1283_v50, %v1283_v50  ;;  %v1285_v54 = vpop.f32.mrb[65].mxu1 }
 0x183   : > { %v1086_v55 = vpop.f32.mrb[66].mxu0  ;;  %v1286_v56 = vpop.f32.mrb[66].mxu1 }
 0x184   : > { %1771 = vst.msk [vmem:[%s2666_s12 + $0x80] sm:$0xf] %vm1738_vm3, %v2191_v51  ;;  %v2192_v57 = vpack.c.bf16 %v1086_v55, %v1086_v55  ;;  %v1088_v58 = vpop.f32.mrb[67].mxu0  ;;  %1821 = vst.msk [vmem:[%s2666_s12 + $0x148] sm:$0xf] %vm1738_vm3, %v2241_v53  ;;  %v2242_v59 = vpack.c.bf16 %v1286_v56, %v1286_v56  ;;  %v1288_v60 = vpop.f32.mrb[67].mxu1 }
 0x186   : > { %1772 = vst.msk [vmem:[%s2666_s12 + $0x84] sm:$0xf] %vm1738_vm3, %v2192_v57  ;;  %1822 = vst.msk [vmem:[%s2666_s12 + $0x14c] sm:$0xf] %vm1738_vm3, %v2242_v59 }
 0x189   : > { %v1091_v61 = vpop.f32.mrb[68].mxu0  ;;  %v1291_v62 = vpop.f32.mrb[68].mxu1 }
 0x18a   : > { %v2193_v63 = vpack.c.bf16 %v1091_v61, %v1091_v61  ;;  %v1093_v0 = vpop.f32.mrb[69].mxu0  ;;  %v2243_v1 = vpack.c.bf16 %v1291_v62, %v1291_v62  ;;  %v1293_v2 = vpop.f32.mrb[69].mxu1 }
 0x18b   : > { %v1094_v3 = vpop.f32.mrb[70].mxu0  ;;  %v1294_v4 = vpop.f32.mrb[70].mxu1 }
 0x18c   : > { %1773 = vst.msk [vmem:[%s2666_s12 + $0x88] sm:$0xf] %vm1738_vm3, %v2193_v63  ;;  %v2194_v5 = vpack.c.bf16 %v1094_v3, %v1094_v3  ;;  %v1096_v6 = vpop.f32.mrb[71].mxu0  ;;  %1823 = vst.msk [vmem:[%s2666_s12 + $0x150] sm:$0xf] %vm1738_vm3, %v2243_v1  ;;  %v2244_v7 = vpack.c.bf16 %v1294_v4, %v1294_v4  ;;  %v1296_v8 = vpop.f32.mrb[71].mxu1 }
 0x18e   : > { %1774 = vst.msk [vmem:[%s2666_s12 + $0x8c] sm:$0xf] %vm1738_vm3, %v2194_v5  ;;  %1824 = vst.msk [vmem:[%s2666_s12 + $0x154] sm:$0xf] %vm1738_vm3, %v2244_v7 }
 0x191   : > { %v1099_v9 = vpop.f32.mrb[72].mxu0  ;;  %v1299_v10 = vpop.f32.mrb[72].mxu1 }
 0x192   : > { %v2195_v11 = vpack.c.bf16 %v1099_v9, %v1099_v9  ;;  %v1101_v12 = vpop.f32.mrb[73].mxu0  ;;  %v2245_v13 = vpack.c.bf16 %v1299_v10, %v1299_v10  ;;  %v1301_v14 = vpop.f32.mrb[73].mxu1 }
 0x193   : > { %v1102_v15 = vpop.f32.mrb[74].mxu0  ;;  %v1302_v16 = vpop.f32.mrb[74].mxu1 }
 0x194   : > { %1775 = vst.msk [vmem:[%s2666_s12 + $0x90] sm:$0xf] %vm1738_vm3, %v2195_v11  ;;  %v2196_v17 = vpack.c.bf16 %v1102_v15, %v1102_v15  ;;  %v1104_v18 = vpop.f32.mrb[75].mxu0  ;;  %1825 = vst.msk [vmem:[%s2666_s12 + $0x158] sm:$0xf] %vm1738_vm3, %v2245_v13  ;;  %v2246_v19 = vpack.c.bf16 %v1302_v16, %v1302_v16  ;;  %v1304_v20 = vpop.f32.mrb[75].mxu1 }
 0x196   : > { %1776 = vst.msk [vmem:[%s2666_s12 + $0x94] sm:$0xf] %vm1738_vm3, %v2196_v17  ;;  %1826 = vst.msk [vmem:[%s2666_s12 + $0x15c] sm:$0xf] %vm1738_vm3, %v2246_v19 }
 0x199   : > { %v1107_v21 = vpop.f32.mrb[76].mxu0  ;;  %v1307_v22 = vpop.f32.mrb[76].mxu1 }
 0x19a   : > { %v2197_v23 = vpack.c.bf16 %v1107_v21, %v1107_v21  ;;  %v1109_v24 = vpop.f32.mrb[77].mxu0  ;;  %v2247_v25 = vpack.c.bf16 %v1307_v22, %v1307_v22  ;;  %v1309_v26 = vpop.f32.mrb[77].mxu1 }
 0x19b   : > { %v1110_v27 = vpop.f32.mrb[78].mxu0  ;;  %v1310_v28 = vpop.f32.mrb[78].mxu1 }
 0x19c   : > { %1777 = vst.msk [vmem:[%s2666_s12 + $0x98] sm:$0xf] %vm1738_vm3, %v2197_v23  ;;  %v2198_v29 = vpack.c.bf16 %v1110_v27, %v1110_v27  ;;  %v1112_v30 = vpop.f32.mrb[79].mxu0  ;;  %1827 = vst.msk [vmem:[%s2666_s12 + $0x160] sm:$0xf] %vm1738_vm3, %v2247_v25  ;;  %v2248_v31 = vpack.c.bf16 %v1310_v28, %v1310_v28  ;;  %v1312_v32 = vpop.f32.mrb[79].mxu1 }
 0x19e   : > { %1778 = vst.msk [vmem:[%s2666_s12 + $0x9c] sm:$0xf] %vm1738_vm3, %v2198_v29  ;;  %1828 = vst.msk [vmem:[%s2666_s12 + $0x164] sm:$0xf] %vm1738_vm3, %v2248_v31 }
 0x1a1   : > { %v1115_v33 = vpop.f32.mrb[80].mxu0  ;;  %v1315_v34 = vpop.f32.mrb[80].mxu1 }
 0x1a2   : > { %v2199_v35 = vpack.c.bf16 %v1115_v33, %v1115_v33  ;;  %v1117_v36 = vpop.f32.mrb[81].mxu0  ;;  %v2249_v37 = vpack.c.bf16 %v1315_v34, %v1315_v34  ;;  %v1317_v38 = vpop.f32.mrb[81].mxu1 }
 0x1a3   : > { %v1118_v39 = vpop.f32.mrb[82].mxu0  ;;  %v1318_v40 = vpop.f32.mrb[82].mxu1 }
 0x1a4   : > { %1779 = vst.msk [vmem:[%s2666_s12 + $0xa0] sm:$0xf] %vm1738_vm3, %v2199_v35  ;;  %v2200_v41 = vpack.c.bf16 %v1118_v39, %v1118_v39  ;;  %v1120_v42 = vpop.f32.mrb[83].mxu0  ;;  %1829 = vst.msk [vmem:[%s2666_s12 + $0x168] sm:$0xf] %vm1738_vm3, %v2249_v37  ;;  %v2250_v43 = vpack.c.bf16 %v1318_v40, %v1318_v40  ;;  %v1320_v44 = vpop.f32.mrb[83].mxu1 }
 0x1a6   : > { %1780 = vst.msk [vmem:[%s2666_s12 + $0xa4] sm:$0xf] %vm1738_vm3, %v2200_v41  ;;  %1830 = vst.msk [vmem:[%s2666_s12 + $0x16c] sm:$0xf] %vm1738_vm3, %v2250_v43 }
 0x1a9   : > { %v1123_v45 = vpop.f32.mrb[84].mxu0  ;;  %v1323_v46 = vpop.f32.mrb[84].mxu1 }
 0x1aa   : > { %v2201_v47 = vpack.c.bf16 %v1123_v45, %v1123_v45  ;;  %v1125_v48 = vpop.f32.mrb[85].mxu0  ;;  %v2251_v49 = vpack.c.bf16 %v1323_v46, %v1323_v46  ;;  %v1325_v50 = vpop.f32.mrb[85].mxu1 }
 0x1ab   : > { %v1126_v51 = vpop.f32.mrb[86].mxu0  ;;  %v1326_v52 = vpop.f32.mrb[86].mxu1 }
 0x1ac   : > { %1781 = vst.msk [vmem:[%s2666_s12 + $0xa8] sm:$0xf] %vm1738_vm3, %v2201_v47  ;;  %v2202_v53 = vpack.c.bf16 %v1126_v51, %v1126_v51  ;;  %v1128_v54 = vpop.f32.mrb[87].mxu0  ;;  %1831 = vst.msk [vmem:[%s2666_s12 + $0x170] sm:$0xf] %vm1738_vm3, %v2251_v49  ;;  %v2252_v55 = vpack.c.bf16 %v1326_v52, %v1326_v52  ;;  %v1328_v56 = vpop.f32.mrb[87].mxu1 }
 0x1ae   : > { %1782 = vst.msk [vmem:[%s2666_s12 + $0xac] sm:$0xf] %vm1738_vm3, %v2202_v53  ;;  %1832 = vst.msk [vmem:[%s2666_s12 + $0x174] sm:$0xf] %vm1738_vm3, %v2252_v55 }
 0x1b1   : > { %v1131_v57 = vpop.f32.mrb[88].mxu0  ;;  %v1331_v58 = vpop.f32.mrb[88].mxu1 }
 0x1b2   : > { %v2203_v59 = vpack.c.bf16 %v1131_v57, %v1131_v57  ;;  %v1133_v60 = vpop.f32.mrb[89].mxu0  ;;  %v2253_v61 = vpack.c.bf16 %v1331_v58, %v1331_v58  ;;  %v1333_v62 = vpop.f32.mrb[89].mxu1 }
 0x1b3   : > { %v1134_v63 = vpop.f32.mrb[90].mxu0  ;;  %v1334_v0 = vpop.f32.mrb[90].mxu1 }
 0x1b4   : > { %1783 = vst.msk [vmem:[%s2666_s12 + $0xb0] sm:$0xf] %vm1738_vm3, %v2203_v59  ;;  %v2204_v1 = vpack.c.bf16 %v1134_v63, %v1134_v63  ;;  %v1136_v2 = vpop.f32.mrb[91].mxu0  ;;  %1833 = vst.msk [vmem:[%s2666_s12 + $0x178] sm:$0xf] %vm1738_vm3, %v2253_v61  ;;  %v2254_v3 = vpack.c.bf16 %v1334_v0, %v1334_v0  ;;  %v1336_v4 = vpop.f32.mrb[91].mxu1 }
 0x1b6   : > { %1784 = vst.msk [vmem:[%s2666_s12 + $0xb4] sm:$0xf] %vm1738_vm3, %v2204_v1  ;;  %1834 = vst.msk [vmem:[%s2666_s12 + $0x17c] sm:$0xf] %vm1738_vm3, %v2254_v3 }
 0x1b9   : > { %v1139_v5 = vpop.f32.mrb[92].mxu0  ;;  %v1339_v6 = vpop.f32.mrb[92].mxu1 }
 0x1ba   : > { %v2205_v7 = vpack.c.bf16 %v1139_v5, %v1139_v5  ;;  %v1141_v8 = vpop.f32.mrb[93].mxu0  ;;  %v2255_v9 = vpack.c.bf16 %v1339_v6, %v1339_v6  ;;  %v1341_v10 = vpop.f32.mrb[93].mxu1 }
 0x1bb   : > { %v1142_v11 = vpop.f32.mrb[94].mxu0  ;;  %v1342_v12 = vpop.f32.mrb[94].mxu1 }
 0x1bc   : > { %1785 = vst.msk [vmem:[%s2666_s12 + $0xb8] sm:$0xf] %vm1738_vm3, %v2205_v7  ;;  %v2206_v13 = vpack.c.bf16 %v1142_v11, %v1142_v11  ;;  %v1144_v14 = vpop.f32.mrb[95].mxu0  ;;  %1835 = vst.msk [vmem:[%s2666_s12 + $0x180] sm:$0xf] %vm1738_vm3, %v2255_v9  ;;  %v2256_v15 = vpack.c.bf16 %v1342_v12, %v1342_v12  ;;  %v1344_v16 = vpop.f32.mrb[95].mxu1 }
 0x1be   : > { %1786 = vst.msk [vmem:[%s2666_s12 + $0xbc] sm:$0xf] %vm1738_vm3, %v2206_v13  ;;  %1836 = vst.msk [vmem:[%s2666_s12 + $0x184] sm:$0xf] %vm1738_vm3, %v2256_v15 }
 0x1c1   : > { %v1147_v17 = vpop.f32.mrb[96].mxu0 }
 0x1c2   : > { %v2207_v18 = vpack.c.bf16 %v1147_v17, %v1147_v17  ;;  %v1149_v19 = vpop.f32.mrb[97].mxu0 }
 0x1c3   : > { %v1150_v20 = vpop.f32.mrb[98].mxu0 }
 0x1c4   : > { %1787 = vst.msk [vmem:[%s2666_s12 + $0xc0] sm:$0xf] %vm1738_vm3, %v2207_v18  ;;  %v2208_v21 = vpack.c.bf16 %v1150_v20, %v1150_v20  ;;  %v1152_v22 = vpop.f32.mrb[99].mxu0 }
 0x1c6   : > { %1788 = vst.msk [vmem:[%s2666_s12 + $0xc4] sm:$0xf] %vm1738_vm3, %v2208_v21 }
 0x1c7 PF: > { %s12_s9 = sadd.s32 1, %s2450_s9  }
 0x1c8   : > { %p9_p4 = scmp.ge.s32.totalorder %s12_s9, 4  }
 0x1ca   :  { %11 = sbr.rel (!%p9_p4) target bundleno = 1 (0x1), region = 58 }

// kernel: densenet_forward.11
= control target key start
LH: loop header
LB: loop body
LE: loop exit
PB: predicated region body
PF: predicated region fallthrough
CT: control target
= control target key end

     0   :  { %v1262_v0 = vmov 0.0   ;;  %vm1263_vm0 = vmmov 0   ;;  %vm318_vm1 = vcmask 261120   ;;  %vm823_vm2 = vcmask 125952   ;;  %s1800_s3 = inlined_call_operand.vmem [shape: bf16[32,16], index: 3, kind: input, shape index: {}]   ;;  %s1801_s0 = inlined_call_operand.vmem [shape: bf16[392,32], index: 0, kind: input, shape index: {}]   ;;  %s1802_s1 = inlined_call_operand.vmem [shape: f32[1,32], index: 1, kind: input, shape index: {}]   ;;  %s1803_s2 = inlined_call_operand.vmem [shape: f32[1,32], index: 2, kind: input, shape index: {}]   ;;  %s1804_s4 = inlined_call_operand.vmem [shape: bf16[392,16], index: 4, kind: output, shape index: {}]  }
   0x1   :  { %1150 = vmatprep.subr.bf16.mxu0 %v1262_v0  ;;  %v1260_v1 = vld [vmem:[%s1800_s3] sm:$0xff]   ;;  %1254 = vmatprep.subr.bf16.mxu1 %v1262_v0  ;;  %v1261_v2 = vld [vmem:[%s1800_s3 + $0x8] sm:$0xff]   ;;  %v1113_v9 = vld [vmem:[%s1801_s0 + $0x70] sm:$0xff]  }
   0x2   :  { %1154 = vmatprep.mubr.msk.bf16.mxu0 %vm1263_vm0, %v1262_v0  ;;  %1206 = vmatprep.mubr.msk.bf16.mxu1 %vm1263_vm0, %v1262_v0  ;;  %v1005_v3 = vld [vmem:[%s1801_s0] sm:$0xff]   ;;  %v1112_v7 = vld [vmem:[%s1801_s0 + $0x68] sm:$0xff]   ;;  %v1101_v15 = vld [vmem:[%s1801_s0 + $0x10] sm:$0xff]   ;;  %v1062_v18 = vunpack.c.l.bf16 %v1113_v9  ;;  %v1063_v19 = vunpack.c.h.bf16 %v1113_v9 }
   0x3   :  { %1151 = vmatpush3.bf16.msra.mxu0 %v1260_v1  ;;  %1256 = vmatpush3.bf16.msra.mxu1 %v1260_v1  ;;  %v1307_v4 = vld [vmem:[%s1802_s1] ss:$0 sm:$0xff]  ;;  %v1006_v5 = vunpack.c.l.bf16 %v1005_v3  ;;  %v1007_v6 = vunpack.c.h.bf16 %v1005_v3  ;;  %v1100_v8 = vld [vmem:[%s1801_s0 + $0x8] sm:$0xff]   ;;  %v1058_v11 = vunpack.c.l.bf16 %v1112_v7  ;;  %v1059_v12 = vunpack.c.h.bf16 %v1112_v7  ;;  %v1114_v36 = vld [vmem:[%s1801_s0 + $0x78] sm:$0xff]  }
   0x4   :  { %1152 = vmatprep.subr.bf16.mxu0 %v1262_v0  ;;  %1255 = vmatprep.subr.bf16.mxu1 %v1262_v0  ;;  %v1323_v10 = vld [vmem:[%s1803_s2] ss:$0 sm:$0xff]  ;;  %v1010_v13 = vunpack.c.l.bf16 %v1100_v8  ;;  %v1011_v14 = vunpack.c.h.bf16 %v1100_v8  ;;  %v1014_v23 = vunpack.c.l.bf16 %v1101_v15  ;;  %v151_v27 = vmul.f32 %v1062_v18, %v1307_v4  ;;  %v1102_v40 = vld [vmem:[%s1801_s0 + $0x18] sm:$0xff]   ;;  %v1116_v9 = vld [vmem:[%s1801_s0 + $0x88] sm:$0xff]  }
   0x5   :  { %v123_v16 = vmul.f32 %v1006_v5, %v1307_v4  ;;  %v124_v17 = vmul.f32 %v1007_v6, %v1307_v4  ;;  %v149_v20 = vmul.f32 %v1058_v11, %v1307_v4  ;;  %v150_v21 = vmul.f32 %v1059_v12, %v1307_v4  ;;  %v1115_v52 = vld [vmem:[%s1801_s0 + $0x80] sm:$0xff]  }
   0x6   :  { %v125_v22 = vmul.f32 %v1010_v13, %v1307_v4  ;;  %v126_v26 = vmul.f32 %v1011_v14, %v1307_v4  ;;  %v152_v31 = vmul.f32 %v1063_v19, %v1307_v4  ;;  %v207_v35 = vadd.f32 %v1323_v10, %v151_v27  ;;  %v1103_v60 = vld [vmem:[%s1801_s0 + $0x20] sm:$0xff]  }
   0x7   :  { %1153 = vmatpush3.bf16.msra.mxu0 %v1261_v2  ;;  %1257 = vmatpush3.bf16.msra.mxu1 %v1261_v2  ;;  %v179_v24 = vadd.f32 %v1323_v10, %v123_v16  ;;  %v180_v25 = vadd.f32 %v1323_v10, %v124_v17  ;;  %v205_v28 = vadd.f32 %v1323_v10, %v149_v20  ;;  %v1015_v43 = vunpack.c.h.bf16 %v1101_v15  ;;  %v1104_v16 = vld [vmem:[%s1801_s0 + $0x28] sm:$0xff]  }
   0x8   :  { %v206_v29 = vadd.f32 %v1323_v10, %v150_v21  ;;  %v181_v30 = vadd.f32 %v1323_v10, %v125_v22  ;;  %v182_v34 = vadd.f32 %v1323_v10, %v126_v26  ;;  %v208_v39 = vadd.f32 %v1323_v10, %v152_v31  ;;  %v1117_v21 = vld [vmem:[%s1801_s0 + $0x90] sm:$0xff]  }
   0x9   :  { %v228_v32 = vmax.f32 %v179_v24, 0.0  ;;  %v229_v33 = vmax.f32 %v180_v25, 0.0  ;;  %v254_v37 = vmax.f32 %v205_v28, 0.0  ;;  %v127_v46 = vmul.f32 %v1014_v23, %v1307_v4 }
   0xa   :  { %v255_v38 = vmax.f32 %v206_v29, 0.0  ;;  %v230_v42 = vmax.f32 %v181_v30, 0.0  ;;  %v231_v45 = vmax.f32 %v182_v34, 0.0  ;;  %v1066_v47 = vunpack.c.l.bf16 %v1114_v36  ;;  %v1105_v29 = vld [vmem:[%s1801_s0 + $0x30] sm:$0xff]  }
   0xb   :  { %v277_v41 = vpack.c.bf16 %v229_v33, %v228_v32  ;;  %v256_v48 = vmax.f32 %v207_v35, 0.0  ;;  %v128_v49 = vmul.f32 %v1015_v43, %v1307_v4  ;;  %v1067_v50 = vunpack.c.h.bf16 %v1114_v36 }
   0xc   :  { %v290_v44 = vpack.c.bf16 %v255_v38, %v254_v37  ;;  %v1018_v51 = vunpack.c.l.bf16 %v1102_v40  ;;  %v257_v53 = vmax.f32 %v208_v39, 0.0  ;;  %v183_v54 = vadd.f32 %v1323_v10, %v127_v46  ;;  %v1118_v46 = vld [vmem:[%s1801_s0 + $0x98] sm:$0xff]  }
   0xd   :  { %1155 = vmatmul.mubr.msk.bf16.vlgmr.msra.gmra.mrb[0].mxu0 %vm318_vm1, %v277_v41  ;;  %v153_v55 = vmul.f32 %v1066_v47, %v1307_v4  ;;  %v1019_v56 = vunpack.c.h.bf16 %v1102_v40  ;;  %v184_v57 = vadd.f32 %v1323_v10, %v128_v49  ;;  %v154_v58 = vmul.f32 %v1067_v50, %v1307_v4 }
   0xe   :  { %1158 = vmatprep.mubr.msk.bf16.mxu0 %vm1263_vm0, %v1262_v0  ;;  %1207 = vmatmul.mubr.msk.bf16.vlgmr.msra.gmra.mrb[0].mxu1 %vm318_vm1, %v290_v44  ;;  %v129_v59 = vmul.f32 %v1018_v51, %v1307_v4  ;;  %v1070_v63 = vunpack.c.l.bf16 %v1115_v52  ;;  %v278_v1 = vpack.c.bf16 %v231_v45, %v230_v42  ;;  %v1071_v3 = vunpack.c.h.bf16 %v1115_v52 }
   0xf   :  { %1210 = vmatprep.mubr.msk.bf16.mxu1 %vm1263_vm0, %v1262_v0  ;;  %v209_v61 = vadd.f32 %v1323_v10, %v153_v55  ;;  %v130_v62 = vmul.f32 %v1019_v56, %v1307_v4  ;;  %v210_v2 = vadd.f32 %v1323_v10, %v154_v58  ;;  %v291_v5 = vpack.c.bf16 %v257_v53, %v256_v48 }
  0x10   :  { %v232_v6 = vmax.f32 %v183_v54, 0.0  ;;  %v233_v7 = vmax.f32 %v184_v57, 0.0  ;;  %v1022_v8 = vunpack.c.l.bf16 %v1103_v60  ;;  %v185_v11 = vadd.f32 %v1323_v10, %v129_v59  ;;  %v1106_v59 = vld [vmem:[%s1801_s0 + $0x38] sm:$0xff]  }
  0x11   :  { %v258_v12 = vmax.f32 %v209_v61, 0.0  ;;  %v186_v13 = vadd.f32 %v1323_v10, %v130_v62  ;;  %v155_v14 = vmul.f32 %v1070_v63, %v1307_v4  ;;  %v1023_v15 = vunpack.c.h.bf16 %v1103_v60 }
  0x12   :  { %v259_v17 = vmax.f32 %v210_v2, 0.0  ;;  %v156_v18 = vmul.f32 %v1071_v3, %v1307_v4  ;;  %v1074_v19 = vunpack.c.l.bf16 %v1116_v9  ;;  %v1075_v20 = vunpack.c.h.bf16 %v1116_v9 }
  0x13   :  { %v279_v22 = vpack.c.bf16 %v233_v7, %v232_v6  ;;  %v131_v23 = vmul.f32 %v1022_v8, %v1307_v4  ;;  %v132_v24 = vmul.f32 %v1023_v15, %v1307_v4  ;;  %v1026_v27 = vunpack.c.l.bf16 %v1104_v16  ;;  %v1119_v6 = vld [vmem:[%s1801_s0 + $0xa0] sm:$0xff]  }
  0x14   :  { %v157_v25 = vmul.f32 %v1074_v19, %v1307_v4  ;;  %v158_v26 = vmul.f32 %v1075_v20, %v1307_v4  ;;  %v1027_v28 = vunpack.c.h.bf16 %v1104_v16  ;;  %v234_v30 = vmax.f32 %v185_v11, 0.0 }
  0x15   :  { %1159 = vmatmul.mubr.msk.bf16.gmra.mrb[4].mxu0 %vm318_vm1, %v278_v1  ;;  %v235_v31 = vmax.f32 %v186_v13, 0.0  ;;  %v211_v32 = vadd.f32 %v1323_v10, %v155_v14  ;;  %v1078_v33 = vunpack.c.l.bf16 %v1117_v21  ;;  %v292_v34 = vpack.c.bf16 %v259_v17, %v258_v12  ;;  %v1107_v12 = vld [vmem:[%s1801_s0 + $0x40] sm:$0xff]  }
  0x16   :  { %1162 = vmatprep.mubr.msk.bf16.mxu0 %vm1263_vm0, %v1262_v0  ;;  %1211 = vmatmul.mubr.msk.bf16.gmra.mrb[4].mxu1 %vm318_vm1, %v291_v5  ;;  %v212_v35 = vadd.f32 %v1323_v10, %v156_v18  ;;  %v133_v36 = vmul.f32 %v1026_v27, %v1307_v4  ;;  %v134_v37 = vmul.f32 %v1027_v28, %v1307_v4  ;;  %v1079_v39 = vunpack.c.h.bf16 %v1117_v21  ;;  %v1120_v18 = vld [vmem:[%s1801_s0 + $0xa8] sm:$0xff]  }
  0x17   :  { %1214 = vmatprep.mubr.msk.bf16.mxu1 %vm1263_vm0, %v1262_v0  ;;  %v187_v38 = vadd.f32 %v1323_v10, %v131_v23  ;;  %v159_v40 = vmul.f32 %v1078_v33, %v1307_v4  ;;  %v1030_v41 = vunpack.c.l.bf16 %v1105_v29  ;;  %v188_v42 = vadd.f32 %v1323_v10, %v132_v24 }
  0x18   :  { %v213_v43 = vadd.f32 %v1323_v10, %v157_v25  ;;  %v214_v44 = vadd.f32 %v1323_v10, %v158_v26  ;;  %v189_v45 = vadd.f32 %v1323_v10, %v133_v36  ;;  %v190_v47 = vadd.f32 %v1323_v10, %v134_v37  ;;  %v1121_v36 = vld [vmem:[%s1801_s0 + $0xb0] sm:$0xff]  }
  0x19   :  { %v160_v48 = vmul.f32 %v1079_v39, %v1307_v4  ;;  %v215_v49 = vadd.f32 %v1323_v10, %v159_v40  ;;  %v1031_v50 = vunpack.c.h.bf16 %v1105_v29  ;;  %v280_v51 = vpack.c.bf16 %v235_v31, %v234_v30  ;;  %v1108_v31 = vld [vmem:[%s1801_s0 + $0x48] sm:$0xff]  }
  0x1a   :  { %v260_v52 = vmax.f32 %v211_v32, 0.0  ;;  %v261_v53 = vmax.f32 %v212_v35, 0.0  ;;  %v135_v54 = vmul.f32 %v1030_v41, %v1307_v4  ;;  %v236_v55 = vmax.f32 %v187_v38, 0.0 }
  0x1b   :  { %v216_v56 = vadd.f32 %v1323_v10, %v160_v48  ;;  %v136_v57 = vmul.f32 %v1031_v50, %v1307_v4  ;;  %v1082_v58 = vunpack.c.l.bf16 %v1118_v46  ;;  %v237_v60 = vmax.f32 %v188_v42, 0.0 }
  0x1c   :  { %v262_v61 = vmax.f32 %v213_v43, 0.0  ;;  %v263_v62 = vmax.f32 %v214_v44, 0.0  ;;  %v1083_v63 = vunpack.c.h.bf16 %v1118_v46  ;;  %v238_v1 = vmax.f32 %v189_v45, 0.0 }
  0x1d   :  { %1163 = vmatmul.mubr.msk.bf16.gmra.mrb[8].mxu0 %vm318_vm1, %v279_v22  ;;  %v239_v2 = vmax.f32 %v190_v47, 0.0  ;;  %v264_v3 = vmax.f32 %v215_v49, 0.0  ;;  %v161_v5 = vmul.f32 %v1082_v58, %v1307_v4  ;;  %v265_v7 = vmax.f32 %v216_v56, 0.0  ;;  %v1109_v49 = vld [vmem:[%s1801_s0 + $0x50] sm:$0xff]  }
  0x1e   :  { %1166 = vmatprep.mubr.msk.bf16.mxu0 %vm1263_vm0, %v1262_v0  ;;  %1215 = vmatmul.mubr.msk.bf16.gmra.mrb[8].mxu1 %vm318_vm1, %v292_v34  ;;  %v1431_v8 = vadd.f32 %v1323_v10, %v135_v54  ;;  %v162_v9 = vmul.f32 %v1083_v63, %v1307_v4  ;;  %v1034_v11 = vunpack.c.l.bf16 %v1106_v59  ;;  %v293_v13 = vpack.c.bf16 %v261_v53, %v260_v52 }
  0x1f   :  { %1218 = vmatprep.mubr.msk.bf16.mxu1 %vm1263_vm0, %v1262_v0  ;;  %v1438_v14 = vadd.f32 %v1323_v10, %v136_v57  ;;  %v281_v15 = vpack.c.bf16 %v237_v60, %v236_v55  ;;  %v1035_v16 = vunpack.c.h.bf16 %v1106_v59  ;;  %v1086_v17 = vunpack.c.l.bf16 %v1119_v6 }
  0x20   :  { %v294_v19 = vpack.c.bf16 %v263_v62, %v262_v61  ;;  %v1443_v20 = vpack.c.bf16 %v239_v2, %v238_v1  ;;  %v1446_v21 = vadd.f32 %v1323_v10, %v161_v5  ;;  %v1038_v22 = vunpack.c.l.bf16 %v1107_v12  ;;  %v1122_v62 = vld [vmem:[%s1801_s0 + $0xb8] sm:$0xff]  }
  0x21   :  { %v1449_v23 = vpack.c.bf16 %v265_v7, %v264_v3  ;;  %v240_v24 = vmax.f32 %v1431_v8, 0.0  ;;  %v1453_v25 = vadd.f32 %v1323_v10, %v162_v9  ;;  %v1456_v26 = vmul.f32 %v1034_v11, %v1307_v4  ;;  %v1110_v5 = vld [vmem:[%s1801_s0 + $0x58] sm:$0xff]  }
  0x22   :  { %v241_v27 = vmax.f32 %v1438_v14, 0.0  ;;  %v1039_v28 = vunpack.c.h.bf16 %v1107_v12  ;;  %v139_v29 = vmul.f32 %v1038_v22, %v1307_v4  ;;  %v1090_v30 = vunpack.c.l.bf16 %v1120_v18 }
  0x23   :  { %v1469_v32 = vmul.f32 %v1035_v16, %v1307_v4  ;;  %v1087_v33 = vunpack.c.h.bf16 %v1119_v6  ;;  %v1472_v34 = vmul.f32 %v1086_v17, %v1307_v4  ;;  %v1091_v35 = vunpack.c.h.bf16 %v1120_v18  ;;  %v66_v17 = vld [vmem:[%s1801_s0 + $0xc0] sm:$0xf] }
  0x24   :  { %v266_v37 = vmax.f32 %v1446_v21, 0.0  ;;  %v140_v38 = vmul.f32 %v1039_v28, %v1307_v4  ;;  %v195_v39 = vadd.f32 %v1323_v10, %v139_v29  ;;  %v165_v40 = vmul.f32 %v1090_v30, %v1307_v4 }
  0x25   :  { %1167 = vmatmul.mubr.msk.bf16.gmra.mrb[12].mxu0 %vm318_vm1, %v280_v51  ;;  %v267_v41 = vmax.f32 %v1453_v25, 0.0  ;;  %v166_v42 = vmul.f32 %v1091_v35, %v1307_v4  ;;  %v1042_v43 = vunpack.c.l.bf16 %v1108_v31  ;;  %v1043_v44 = vunpack.c.h.bf16 %v1108_v31  ;;  %v1111_v35 = vld [vmem:[%s1801_s0 + $0x60] sm:$0xff]  }
  0x26   :  { %1170 = vmatprep.mubr.msk.bf16.mxu0 %vm1263_vm0, %v1262_v0  ;;  %1219 = vmatmul.mubr.msk.bf16.gmra.mrb[12].mxu1 %vm318_vm1, %v293_v13  ;;  %v196_v45 = vadd.f32 %v1323_v10, %v140_v38  ;;  %v244_v46 = vmax.f32 %v195_v39, 0.0  ;;  %v221_v47 = vadd.f32 %v1323_v10, %v165_v40  ;;  %v1094_v48 = vunpack.c.l.bf16 %v1121_v36 }
  0x27   :  { %1222 = vmatprep.mubr.msk.bf16.mxu1 %vm1263_vm0, %v1262_v0  ;;  %v1489_v50 = vmul.f32 %v1087_v33, %v1307_v4  ;;  %v222_v51 = vadd.f32 %v1323_v10, %v166_v42  ;;  %v141_v52 = vmul.f32 %v1042_v43, %v1307_v4  ;;  %v142_v53 = vmul.f32 %v1043_v44, %v1307_v4 }
  0x28   :  { %v245_v54 = vmax.f32 %v196_v45, 0.0  ;;  %v270_v55 = vmax.f32 %v221_v47, 0.0  ;;  %v1095_v56 = vunpack.c.h.bf16 %v1121_v36  ;;  %v167_v57 = vmul.f32 %v1094_v48, %v1307_v4 }
  0x29   :  { %v271_v58 = vmax.f32 %v222_v51, 0.0  ;;  %v197_v59 = vadd.f32 %v1323_v10, %v141_v52  ;;  %v198_v60 = vadd.f32 %v1323_v10, %v142_v53  ;;  %v1046_v61 = vunpack.c.l.bf16 %v1109_v49 }
  0x2a   :  { %v1504_v63 = vpack.c.bf16 %v245_v54, %v244_v46  ;;  %v168_v1 = vmul.f32 %v1095_v56, %v1307_v4  ;;  %v223_v2 = vadd.f32 %v1323_v10, %v167_v57  ;;  %v1047_v3 = vunpack.c.h.bf16 %v1109_v49 }
  0x2b   :  { %v1513_v6 = vpack.c.bf16 %v271_v58, %v270_v55  ;;  %v246_v7 = vmax.f32 %v197_v59, 0.0  ;;  %v247_v9 = vmax.f32 %v198_v60, 0.0  ;;  %v143_v11 = vmul.f32 %v1046_v61, %v1307_v4 }
  0x2c   :  { %v224_v12 = vadd.f32 %v1323_v10, %v168_v1  ;;  %v272_v13 = vmax.f32 %v223_v2, 0.0  ;;  %v1098_v16 = vunpack.c.l.bf16 %v1122_v62  ;;  %v1099_v22 = vunpack.c.h.bf16 %v1122_v62 }
  0x2d   :  { %1171 = vmatmul.mubr.msk.bf16.gmra.mrb[16].mxu0 %vm318_vm1, %v281_v15  ;;  %v144_v15 = vmul.f32 %v1047_v3, %v1307_v4  ;;  %v1521_v18 = vpack.c.bf16 %v247_v9, %v246_v7  ;;  %v1050_v28 = vunpack.c.l.bf16 %v1110_v5  ;;  %v1051_v33 = vunpack.c.h.bf16 %v1110_v5 }
  0x2e   :  { %1174 = vmatprep.mubr.msk.bf16.mxu0 %vm1263_vm0, %v1262_v0  ;;  %1223 = vmatmul.mubr.msk.bf16.gmra.mrb[16].mxu1 %vm318_vm1, %v294_v19  ;;  %v199_v19 = vadd.f32 %v1323_v10, %v143_v11  ;;  %v273_v29 = vmax.f32 %v224_v12, 0.0  ;;  %v169_v31 = vmul.f32 %v1098_v16, %v1307_v4  ;;  %v170_v38 = vmul.f32 %v1099_v22, %v1307_v4 }
  0x2f   :  { %1226 = vmatprep.mubr.msk.bf16.mxu1 %vm1263_vm0, %v1262_v0  ;;  %v200_v30 = vadd.f32 %v1323_v10, %v144_v15  ;;  %v145_v39 = vmul.f32 %v1050_v28, %v1307_v4  ;;  %v115_v40 = vunpack.c.l.bf16 %v66_v17  ;;  %v146_v45 = vmul.f32 %v1051_v33, %v1307_v4 }
  0x30   :  { %v248_v36 = vmax.f32 %v199_v19, 0.0  ;;  %v299_v42 = vpack.c.bf16 %v273_v29, %v272_v13  ;;  %v225_v44 = vadd.f32 %v1323_v10, %v169_v31  ;;  %v226_v46 = vadd.f32 %v1323_v10, %v170_v38 }
  0x31   :  { %v249_v43 = vmax.f32 %v200_v30, 0.0  ;;  %v201_v47 = vadd.f32 %v1323_v10, %v145_v39  ;;  %v171_v48 = vmul.f32 %v1307_v4, %v115_v40  ;;  %v1054_v49 = vunpack.c.l.bf16 %v1111_v35 }
  0x32   :  { %v274_v52 = vmax.f32 %v225_v44, 0.0  ;;  %v202_v53 = vadd.f32 %v1323_v10, %v146_v45  ;;  %v1055_v54 = vunpack.c.h.bf16 %v1111_v35  ;;  %v283_v58 = vpack.c.bf16 %v241_v27, %v240_v24 }
  0x33   :  { %v287_v51 = vpack.c.bf16 %v249_v43, %v248_v36  ;;  %v250_v55 = vmax.f32 %v201_v47, 0.0  ;;  %v227_v56 = vadd.f32 %v1323_v10, %v171_v48  ;;  %v147_v57 = vmul.f32 %v1054_v49, %v1307_v4 }
  0x34   :  { %v251_v59 = vmax.f32 %v202_v53, 0.0  ;;  %v148_v60 = vmul.f32 %v1055_v54, %v1307_v4  ;;  %v194_v61 = vadd.f32 %v1323_v10, %v1469_v32  ;;  %v219_v62 = vadd.f32 %v1323_v10, %v1472_v34 }
  0x35   :  { %1175 = vmatmul.mubr.msk.bf16.gmra.mrb[20].mxu0 %vm318_vm1, %v1443_v20  ;;  %v275_v20 = vmax.f32 %v226_v46, 0.0  ;;  %v203_v2 = vadd.f32 %v1323_v10, %v147_v57  ;;  %v296_v8 = vpack.c.bf16 %v267_v41, %v266_v37  ;;  %v220_v14 = vadd.f32 %v1323_v10, %v1489_v50 }
  0x36   :  { %1178 = vmatprep.mubr.msk.bf16.mxu0 %vm1263_vm0, %v1262_v0  ;;  %1227 = vmatmul.mubr.msk.bf16.gmra.mrb[20].mxu1 %vm318_vm1, %v1449_v23  ;;  %v193_v23 = vadd.f32 %v1323_v10, %v1456_v26  ;;  %v288_v24 = vpack.c.bf16 %v251_v59, %v250_v55  ;;  %v204_v4 = vadd.f32 %v1323_v10, %v148_v60  ;;  %v243_v34 = vmax.f32 %v194_v61, 0.0 }
  0x37   :  { %1230 = vmatprep.mubr.msk.bf16.mxu1 %vm1263_vm0, %v1262_v0  ;;  %v300_v1 = vpack.c.bf16 %v275_v20, %v274_v52  ;;  %v252_v26 = vmax.f32 %v203_v2, 0.0  ;;  %v268_v21 = vmax.f32 %v219_v62, 0.0  ;;  %v269_v25 = vmax.f32 %v220_v14, 0.0 }
  0x38   :  { %v253_v27 = vmax.f32 %v204_v4, 0.0  ;;  %v242_v32 = vmax.f32 %v193_v23, 0.0  ;;  %v276_v10 = vmax.f32 %v227_v56, 0.0 }
  0x39   :  { %v297_v50 = vpack.c.bf16 %v269_v25, %v268_v21 }
  0x3a   :  { %v289_v37 = vpack.c.bf16 %v253_v27, %v252_v26  ;;  %v284_v41 = vpack.c.bf16 %v243_v34, %v242_v32 }
  0x3d   :  { %1179 = vmatmul.mubr.msk.bf16.gmra.mrb[24].mxu0 %vm318_vm1, %v283_v58 }
  0x3e   :  { %1182 = vmatprep.mubr.msk.bf16.mxu0 %vm1263_vm0, %v1262_v0  ;;  %1231 = vmatmul.mubr.msk.bf16.gmra.mrb[24].mxu1 %vm318_vm1, %v296_v8 }
  0x3f   :  { %1234 = vmatprep.mubr.msk.bf16.mxu1 %vm1263_vm0, %v1262_v0 }
  0x45   :  { %1183 = vmatmul.mubr.msk.bf16.gmra.mrb[28].mxu0 %vm318_vm1, %v284_v41 }
  0x46   :  { %1186 = vmatprep.mubr.msk.bf16.mxu0 %vm1263_vm0, %v1262_v0  ;;  %1235 = vmatmul.mubr.msk.bf16.gmra.mrb[28].mxu1 %vm318_vm1, %v297_v50 }
  0x47   :  { %1238 = vmatprep.mubr.msk.bf16.mxu1 %vm1263_vm0, %v1262_v0 }
  0x4d   :  { %1187 = vmatmul.mubr.msk.bf16.gmra.mrb[32].mxu0 %vm318_vm1, %v1504_v63  ;;  %v301_v63 = vpack.c.bf16 %v276_v10, %v276_v10 }
  0x4e   :  { %1190 = vmatprep.mubr.msk.bf16.mxu0 %vm1263_vm0, %v1262_v0  ;;  %1239 = vmatmul.mubr.msk.bf16.gmra.mrb[32].mxu1 %vm318_vm1, %v1513_v6 }
  0x4f   :  { %1242 = vmatprep.mubr.msk.bf16.mxu1 %vm1263_vm0, %v1262_v0 }
  0x55   :  { %1191 = vmatmul.mubr.msk.bf16.gmra.mrb[36].mxu0 %vm318_vm1, %v1521_v18 }
  0x56   :  { %1194 = vmatprep.mubr.msk.bf16.mxu0 %vm1263_vm0, %v1262_v0  ;;  %1243 = vmatmul.mubr.msk.bf16.gmra.mrb[36].mxu1 %vm318_vm1, %v299_v42 }
  0x57   :  { %1246 = vmatprep.mubr.msk.bf16.mxu1 %vm1263_vm0, %v1262_v0 }
  0x5d   :  { %1195 = vmatmul.mubr.msk.bf16.gmra.mrb[40].mxu0 %vm318_vm1, %v287_v51 }
  0x5e   :  { %1198 = vmatprep.mubr.msk.bf16.mxu0 %vm1263_vm0, %v1262_v0  ;;  %1247 = vmatmul.mubr.msk.bf16.gmra.mrb[40].mxu1 %vm318_vm1, %v300_v1 }
  0x5f   :  { %1250 = vmatprep.mubr.msk.bf16.mxu1 %vm1263_vm0, %v1262_v0 }
  0x65   :  { %1199 = vmatmul.mubr.msk.bf16.gmra.mrb[44].mxu0 %vm318_vm1, %v288_v24 }
  0x66   :  { %1202 = vmatprep.mubr.msk.bf16.mxu0 %vm1263_vm0, %v1262_v0  ;;  %1251 = vmatmul.mubr.msk.bf16.gmra.mrb[44].mxu1 %vm318_vm1, %v301_v63 }
  0x6d   :  { %1203 = vmatmul.mubr.msk.bf16.gmra.mrb[48].mxu0 %vm318_vm1, %v289_v37 }
  0xe0   :  { %v428_v3 = vpop.f32.mrb[0].mxu0 }
  0xe1   :  { %v955_v5 = vpack.c.bf16 %v428_v3, %v428_v3  ;;  %v1156_v6 = vpop.f32.mrb[1].mxu0  ;;  %v532_v7 = vpop.f32.mrb[0].mxu1 }
  0xe2   :  { %v431_v9 = vpop.f32.mrb[2].mxu0  ;;  %v981_v11 = vpack.c.bf16 %v532_v7, %v532_v7  ;;  %v1208_v12 = vpop.f32.mrb[1].mxu1 }
  0xe3   :  { %824 = vst.msk [vmem:[%s1804_s4] sm:$0xf] %vm823_vm2, %v955_v5  ;;  %v956_v13 = vpack.c.bf16 %v431_v9, %v431_v9  ;;  %v1157_v15 = vpop.f32.mrb[3].mxu0  ;;  %v535_v0 = vpop.f32.mrb[2].mxu1 }
  0xe4   :  { %850 = vst.msk [vmem:[%s1804_s4 + $0x68] sm:$0xf] %vm823_vm2, %v981_v11  ;;  %v982_v16 = vpack.c.bf16 %v535_v0, %v535_v0  ;;  %v1209_v17 = vpop.f32.mrb[3].mxu1 }
  0xe5   :  { %825 = vst.msk [vmem:[%s1804_s4 + $0x4] sm:$0xf] %vm823_vm2, %v956_v13 }
  0xe6   :  { %851 = vst.msk [vmem:[%s1804_s4 + $0x6c] sm:$0xf] %vm823_vm2, %v982_v16 }
  0xe8   :  { %v436_v18 = vpop.f32.mrb[4].mxu0 }
  0xe9   :  { %v957_v19 = vpack.c.bf16 %v436_v18, %v436_v18  ;;  %v1160_v22 = vpop.f32.mrb[5].mxu0  ;;  %v540_v28 = vpop.f32.mrb[4].mxu1 }
  0xea   :  { %v439_v29 = vpop.f32.mrb[6].mxu0  ;;  %v983_v30 = vpack.c.bf16 %v540_v28, %v540_v28  ;;  %v1212_v31 = vpop.f32.mrb[5].mxu1 }
  0xeb   :  { %826 = vst.msk [vmem:[%s1804_s4 + $0x8] sm:$0xf] %vm823_vm2, %v957_v19  ;;  %v958_v33 = vpack.c.bf16 %v439_v29, %v439_v29  ;;  %v1161_v35 = vpop.f32.mrb[7].mxu0  ;;  %v543_v36 = vpop.f32.mrb[6].mxu1 }
  0xec   :  { %852 = vst.msk [vmem:[%s1804_s4 + $0x70] sm:$0xf] %vm823_vm2, %v983_v30  ;;  %v984_v38 = vpack.c.bf16 %v543_v36, %v543_v36  ;;  %v1213_v39 = vpop.f32.mrb[7].mxu1 }
  0xed   :  { %827 = vst.msk [vmem:[%s1804_s4 + $0xc] sm:$0xf] %vm823_vm2, %v958_v33 }
  0xee   :  { %853 = vst.msk [vmem:[%s1804_s4 + $0x74] sm:$0xf] %vm823_vm2, %v984_v38 }
  0xf0   :  { %v444_v40 = vpop.f32.mrb[8].mxu0 }
  0xf1   :  { %v959_v42 = vpack.c.bf16 %v444_v40, %v444_v40  ;;  %v1164_v43 = vpop.f32.mrb[9].mxu0  ;;  %v548_v44 = vpop.f32.mrb[8].mxu1 }
  0xf2   :  { %v447_v45 = vpop.f32.mrb[10].mxu0  ;;  %v985_v46 = vpack.c.bf16 %v548_v44, %v548_v44  ;;  %v1216_v47 = vpop.f32.mrb[9].mxu1 }
  0xf3   :  { %828 = vst.msk [vmem:[%s1804_s4 + $0x10] sm:$0xf] %vm823_vm2, %v959_v42  ;;  %v960_v48 = vpack.c.bf16 %v447_v45, %v447_v45  ;;  %v1165_v49 = vpop.f32.mrb[11].mxu0  ;;  %v551_v51 = vpop.f32.mrb[10].mxu1 }
  0xf4   :  { %854 = vst.msk [vmem:[%s1804_s4 + $0x78] sm:$0xf] %vm823_vm2, %v985_v46  ;;  %v986_v52 = vpack.c.bf16 %v551_v51, %v551_v51  ;;  %v1217_v53 = vpop.f32.mrb[11].mxu1 }
  0xf5   :  { %829 = vst.msk [vmem:[%s1804_s4 + $0x14] sm:$0xf] %vm823_vm2, %v960_v48 }
  0xf6   :  { %855 = vst.msk [vmem:[%s1804_s4 + $0x7c] sm:$0xf] %vm823_vm2, %v986_v52 }
  0xf8   :  { %v452_v54 = vpop.f32.mrb[12].mxu0 }
  0xf9   :  { %v961_v20 = vpack.c.bf16 %v452_v54, %v452_v54  ;;  %v1168_v55 = vpop.f32.mrb[13].mxu0  ;;  %v556_v56 = vpop.f32.mrb[12].mxu1 }
  0xfa   :  { %v455_v57 = vpop.f32.mrb[14].mxu0  ;;  %v987_v58 = vpack.c.bf16 %v556_v56, %v556_v56  ;;  %v1220_v23 = vpop.f32.mrb[13].mxu1 }
  0xfb   :  { %830 = vst.msk [vmem:[%s1804_s4 + $0x18] sm:$0xf] %vm823_vm2, %v961_v20  ;;  %v962_v59 = vpack.c.bf16 %v455_v57, %v455_v57  ;;  %v1169_v60 = vpop.f32.mrb[15].mxu0  ;;  %v559_v61 = vpop.f32.mrb[14].mxu1 }
  0xfc   :  { %856 = vst.msk [vmem:[%s1804_s4 + $0x80] sm:$0xf] %vm823_vm2, %v987_v58  ;;  %v988_v62 = vpack.c.bf16 %v559_v61, %v559_v61  ;;  %v1221_v1 = vpop.f32.mrb[15].mxu1 }
  0xfd   :  { %831 = vst.msk [vmem:[%s1804_s4 + $0x1c] sm:$0xf] %vm823_vm2, %v962_v59 }
  0xfe   :  { %857 = vst.msk [vmem:[%s1804_s4 + $0x84] sm:$0xf] %vm823_vm2, %v988_v62 }
 0x100   :  { %v460_v2 = vpop.f32.mrb[16].mxu0 }
 0x101   :  { %v963_v8 = vpack.c.bf16 %v460_v2, %v460_v2  ;;  %v1172_v14 = vpop.f32.mrb[17].mxu0  ;;  %v564_v24 = vpop.f32.mrb[16].mxu1 }
 0x102   :  { %v463_v4 = vpop.f32.mrb[18].mxu0  ;;  %v989_v26 = vpack.c.bf16 %v564_v24, %v564_v24  ;;  %v1224_v27 = vpop.f32.mrb[17].mxu1 }
 0x103   :  { %832 = vst.msk [vmem:[%s1804_s4 + $0x20] sm:$0xf] %vm823_vm2, %v963_v8  ;;  %v964_v32 = vpack.c.bf16 %v463_v4, %v463_v4  ;;  %v1173_v34 = vpop.f32.mrb[19].mxu0  ;;  %v567_v21 = vpop.f32.mrb[18].mxu1 }
 0x104   :  { %858 = vst.msk [vmem:[%s1804_s4 + $0x88] sm:$0xf] %vm823_vm2, %v989_v26  ;;  %v990_v25 = vpack.c.bf16 %v567_v21, %v567_v21  ;;  %v1225_v37 = vpop.f32.mrb[19].mxu1 }
 0x105   :  { %833 = vst.msk [vmem:[%s1804_s4 + $0x24] sm:$0xf] %vm823_vm2, %v964_v32 }
 0x106   :  { %859 = vst.msk [vmem:[%s1804_s4 + $0x8c] sm:$0xf] %vm823_vm2, %v990_v25 }
 0x108   :  { %v468_v41 = vpop.f32.mrb[20].mxu0 }
 0x109   :  { %v965_v50 = vpack.c.bf16 %v468_v41, %v468_v41  ;;  %v1176_v10 = vpop.f32.mrb[21].mxu0  ;;  %v572_v63 = vpop.f32.mrb[20].mxu1 }
 0x10a   :  { %v471_v3 = vpop.f32.mrb[22].mxu0  ;;  %v991_v5 = vpack.c.bf16 %v572_v63, %v572_v63  ;;  %v1228_v6 = vpop.f32.mrb[21].mxu1 }
 0x10b   :  { %834 = vst.msk [vmem:[%s1804_s4 + $0x28] sm:$0xf] %vm823_vm2, %v965_v50  ;;  %v966_v7 = vpack.c.bf16 %v471_v3, %v471_v3  ;;  %v1177_v9 = vpop.f32.mrb[23].mxu0  ;;  %v575_v11 = vpop.f32.mrb[22].mxu1 }
 0x10c   :  { %860 = vst.msk [vmem:[%s1804_s4 + $0x90] sm:$0xf] %vm823_vm2, %v991_v5  ;;  %v992_v12 = vpack.c.bf16 %v575_v11, %v575_v11  ;;  %v1229_v13 = vpop.f32.mrb[23].mxu1 }
 0x10d   :  { %835 = vst.msk [vmem:[%s1804_s4 + $0x2c] sm:$0xf] %vm823_vm2, %v966_v7 }
 0x10e   :  { %861 = vst.msk [vmem:[%s1804_s4 + $0x94] sm:$0xf] %vm823_vm2, %v992_v12 }
 0x110   :  { %v476_v15 = vpop.f32.mrb[24].mxu0 }
 0x111   :  { %v967_v0 = vpack.c.bf16 %v476_v15, %v476_v15  ;;  %v1180_v16 = vpop.f32.mrb[25].mxu0  ;;  %v580_v17 = vpop.f32.mrb[24].mxu1 }
 0x112   :  { %v479_v18 = vpop.f32.mrb[26].mxu0  ;;  %v993_v19 = vpack.c.bf16 %v580_v17, %v580_v17  ;;  %v1232_v22 = vpop.f32.mrb[25].mxu1 }
 0x113   :  { %836 = vst.msk [vmem:[%s1804_s4 + $0x30] sm:$0xf] %vm823_vm2, %v967_v0  ;;  %v968_v28 = vpack.c.bf16 %v479_v18, %v479_v18  ;;  %v1181_v29 = vpop.f32.mrb[27].mxu0  ;;  %v583_v30 = vpop.f32.mrb[26].mxu1 }
 0x114   :  { %862 = vst.msk [vmem:[%s1804_s4 + $0x98] sm:$0xf] %vm823_vm2, %v993_v19  ;;  %v994_v31 = vpack.c.bf16 %v583_v30, %v583_v30  ;;  %v1233_v33 = vpop.f32.mrb[27].mxu1 }
 0x115   :  { %837 = vst.msk [vmem:[%s1804_s4 + $0x34] sm:$0xf] %vm823_vm2, %v968_v28 }
 0x116   :  { %863 = vst.msk [vmem:[%s1804_s4 + $0x9c] sm:$0xf] %vm823_vm2, %v994_v31 }
 0x118   :  { %v484_v35 = vpop.f32.mrb[28].mxu0 }
 0x119   :  { %v969_v36 = vpack.c.bf16 %v484_v35, %v484_v35  ;;  %v1184_v38 = vpop.f32.mrb[29].mxu0  ;;  %v588_v39 = vpop.f32.mrb[28].mxu1 }
 0x11a   :  { %v487_v40 = vpop.f32.mrb[30].mxu0  ;;  %v995_v42 = vpack.c.bf16 %v588_v39, %v588_v39  ;;  %v1236_v43 = vpop.f32.mrb[29].mxu1 }
 0x11b   :  { %838 = vst.msk [vmem:[%s1804_s4 + $0x38] sm:$0xf] %vm823_vm2, %v969_v36  ;;  %v970_v44 = vpack.c.bf16 %v487_v40, %v487_v40  ;;  %v1185_v45 = vpop.f32.mrb[31].mxu0  ;;  %v591_v46 = vpop.f32.mrb[30].mxu1 }
 0x11c   :  { %864 = vst.msk [vmem:[%s1804_s4 + $0xa0] sm:$0xf] %vm823_vm2, %v995_v42  ;;  %v996_v47 = vpack.c.bf16 %v591_v46, %v591_v46  ;;  %v1237_v48 = vpop.f32.mrb[31].mxu1 }
 0x11d   :  { %839 = vst.msk [vmem:[%s1804_s4 + $0x3c] sm:$0xf] %vm823_vm2, %v970_v44 }
 0x11e   :  { %865 = vst.msk [vmem:[%s1804_s4 + $0xa4] sm:$0xf] %vm823_vm2, %v996_v47 }
 0x120   :  { %v492_v49 = vpop.f32.mrb[32].mxu0 }
 0x121   :  { %v971_v51 = vpack.c.bf16 %v492_v49, %v492_v49  ;;  %v1188_v52 = vpop.f32.mrb[33].mxu0  ;;  %v596_v53 = vpop.f32.mrb[32].mxu1 }
 0x122   :  { %v495_v54 = vpop.f32.mrb[34].mxu0  ;;  %v997_v20 = vpack.c.bf16 %v596_v53, %v596_v53  ;;  %v1240_v55 = vpop.f32.mrb[33].mxu1 }
 0x123   :  { %840 = vst.msk [vmem:[%s1804_s4 + $0x40] sm:$0xf] %vm823_vm2, %v971_v51  ;;  %v972_v56 = vpack.c.bf16 %v495_v54, %v495_v54  ;;  %v1189_v57 = vpop.f32.mrb[35].mxu0  ;;  %v599_v58 = vpop.f32.mrb[34].mxu1 }
 0x124   :  { %866 = vst.msk [vmem:[%s1804_s4 + $0xa8] sm:$0xf] %vm823_vm2, %v997_v20  ;;  %v998_v23 = vpack.c.bf16 %v599_v58, %v599_v58  ;;  %v1241_v59 = vpop.f32.mrb[35].mxu1 }
 0x125   :  { %841 = vst.msk [vmem:[%s1804_s4 + $0x44] sm:$0xf] %vm823_vm2, %v972_v56 }
 0x126   :  { %867 = vst.msk [vmem:[%s1804_s4 + $0xac] sm:$0xf] %vm823_vm2, %v998_v23 }
 0x128   :  { %v500_v60 = vpop.f32.mrb[36].mxu0 }
 0x129   :  { %v973_v61 = vpack.c.bf16 %v500_v60, %v500_v60  ;;  %v1192_v62 = vpop.f32.mrb[37].mxu0  ;;  %v604_v1 = vpop.f32.mrb[36].mxu1 }
 0x12a   :  { %v503_v2 = vpop.f32.mrb[38].mxu0  ;;  %v999_v8 = vpack.c.bf16 %v604_v1, %v604_v1  ;;  %v1244_v14 = vpop.f32.mrb[37].mxu1 }
 0x12b   :  { %842 = vst.msk [vmem:[%s1804_s4 + $0x48] sm:$0xf] %vm823_vm2, %v973_v61  ;;  %v974_v24 = vpack.c.bf16 %v503_v2, %v503_v2  ;;  %v1193_v4 = vpop.f32.mrb[39].mxu0  ;;  %v607_v26 = vpop.f32.mrb[38].mxu1 }
 0x12c   :  { %868 = vst.msk [vmem:[%s1804_s4 + $0xb0] sm:$0xf] %vm823_vm2, %v999_v8  ;;  %v1000_v27 = vpack.c.bf16 %v607_v26, %v607_v26  ;;  %v1245_v32 = vpop.f32.mrb[39].mxu1 }
 0x12d   :  { %843 = vst.msk [vmem:[%s1804_s4 + $0x4c] sm:$0xf] %vm823_vm2, %v974_v24 }
 0x12e   :  { %869 = vst.msk [vmem:[%s1804_s4 + $0xb4] sm:$0xf] %vm823_vm2, %v1000_v27 }
 0x130   :  { %v508_v34 = vpop.f32.mrb[40].mxu0 }
 0x131   :  { %v975_v21 = vpack.c.bf16 %v508_v34, %v508_v34  ;;  %v1196_v25 = vpop.f32.mrb[41].mxu0  ;;  %v612_v37 = vpop.f32.mrb[40].mxu1 }
 0x132   :  { %v511_v41 = vpop.f32.mrb[42].mxu0  ;;  %v1001_v50 = vpack.c.bf16 %v612_v37, %v612_v37  ;;  %v1248_v10 = vpop.f32.mrb[41].mxu1 }
 0x133   :  { %844 = vst.msk [vmem:[%s1804_s4 + $0x50] sm:$0xf] %vm823_vm2, %v975_v21  ;;  %v976_v63 = vpack.c.bf16 %v511_v41, %v511_v41  ;;  %v1197_v3 = vpop.f32.mrb[43].mxu0  ;;  %v615_v5 = vpop.f32.mrb[42].mxu1 }
 0x134   :  { %870 = vst.msk [vmem:[%s1804_s4 + $0xb8] sm:$0xf] %vm823_vm2, %v1001_v50  ;;  %v1002_v6 = vpack.c.bf16 %v615_v5, %v615_v5  ;;  %v1249_v7 = vpop.f32.mrb[43].mxu1 }
 0x135   :  { %845 = vst.msk [vmem:[%s1804_s4 + $0x54] sm:$0xf] %vm823_vm2, %v976_v63 }
 0x136   :  { %871 = vst.msk [vmem:[%s1804_s4 + $0xbc] sm:$0xf] %vm823_vm2, %v1002_v6 }
 0x138   :  { %v516_v9 = vpop.f32.mrb[44].mxu0 }
 0x139   :  { %v977_v11 = vpack.c.bf16 %v516_v9, %v516_v9  ;;  %v1200_v12 = vpop.f32.mrb[45].mxu0  ;;  %v620_v13 = vpop.f32.mrb[44].mxu1 }
 0x13a   :  { %v519_v15 = vpop.f32.mrb[46].mxu0  ;;  %v1003_v0 = vpack.c.bf16 %v620_v13, %v620_v13  ;;  %v1252_v16 = vpop.f32.mrb[45].mxu1 }
 0x13b   :  { %846 = vst.msk [vmem:[%s1804_s4 + $0x58] sm:$0xf] %vm823_vm2, %v977_v11  ;;  %v978_v17 = vpack.c.bf16 %v519_v15, %v519_v15  ;;  %v1201_v18 = vpop.f32.mrb[47].mxu0  ;;  %v623_v19 = vpop.f32.mrb[46].mxu1 }
 0x13c   :  { %872 = vst.msk [vmem:[%s1804_s4 + $0xc0] sm:$0xf] %vm823_vm2, %v1003_v0  ;;  %v1253_v22 = vpop.f32.mrb[47].mxu1 }
 0x13d   :  { %847 = vst.msk [vmem:[%s1804_s4 + $0x5c] sm:$0xf] %vm823_vm2, %v978_v17 }
 0x140   :  { %v524_v28 = vpop.f32.mrb[48].mxu0 }
 0x141   :  { %v979_v29 = vpack.c.bf16 %v524_v28, %v524_v28  ;;  %v1204_v30 = vpop.f32.mrb[49].mxu0 }
 0x142   :  { %v527_v31 = vpop.f32.mrb[50].mxu0 }
 0x143   :  { %848 = vst.msk [vmem:[%s1804_s4 + $0x60] sm:$0xf] %vm823_vm2, %v979_v29  ;;  %v980_v33 = vpack.c.bf16 %v527_v31, %v527_v31  ;;  %v1205_v35 = vpop.f32.mrb[51].mxu0 }
 0x145   :  { %849 = vst.msk [vmem:[%s1804_s4 + $0x64] sm:$0xf] %vm823_vm2, %v980_v33 }

// kernel: densenet_forward.12
= control target key start
LH: loop header
LB: loop body
LE: loop exit
PB: predicated region body
PF: predicated region fallthrough
CT: control target
= control target key end

     0   :  { %vm244_vm0 = vsmask.f32 7424  ;;  %vm511_vm1 = vcmask 130048   ;;  %vm1262_vm2 = vcmask 1046528   ;;  %vm6343_vm3 = vcmask 60416   ;;  %s10599_s1 = inlined_call_operand.vmem [shape: bf16[144,8], index: 1, kind: input, shape index: {}]   ;;  %s10600_s0 = inlined_call_operand.vmem [shape: bf16[546,16], index: 0, kind: input, shape index: {}]   ;;  %s10601_s2 = inlined_call_operand.vmem [shape: bf16[512,8], index: 2, kind: output, shape index: {}]  }
   0x1   :  { %v8408_v0 = vld [vmem:[%s10599_s1 + $0x8] sm:$0xff]   ;;  %v8409_v1 = vld [vmem:[%s10599_s1 + $0x20] sm:$0xff]   ;;  %v8683_v14 = vld [vmem:[%s10600_s0 + $0x10] sm:$0xff]  }
   0x2   :  { %7300 = vmatprep.subr.bf16.mxu1 %v8408_v0  ;;  %v12_v2 = vld [vmem:[%s10600_s0] sm:$0xf]  ;;  %v13_v3 = vld [vmem:[%s10600_s0 + $0x4] sm:$0xf]  ;;  %7564 = vmatprep.subr.bf16.mxu0 %v8409_v1  ;;  %v8411_v5 = vld [vmem:[%s10600_s0 + $0x8] sm:$0xff]   ;;  %v2702_v19 = vshll.u32 %v8683_v14, 16 }
   0x3   :  { %7301 = vmatpush3.bf16.msra.mxu1 %v8408_v0  ;;  %v8661_v4 = vcombine.low %v12_v2, %v13_v3  ;;  %7565 = vmatpush3.bf16.msra.mxu0 %v8409_v1  ;;  %v8412_v6 = vld [vmem:[%s10599_s1] sm:$0xff]   ;;  %v2464_v7 = vld [vmem:[%s10600_s0 + $0x8] sm:$0xf]  ;;  %v253_v10 = vshll.u32 %v8411_v5, 16  ;;  %v8677_v11 = vld [vmem:[%s10600_s0 + $0xc] sm:$0xf] }
   0x4   :  { %v257_v12 = vshrl.u32 %v8411_v5, 16  ;;  %7366 = vmatprep.subr.bf16.mxu1 %v8412_v6  ;;  %v6610_v13 = vcombine.low %v2464_v7, %v8677_v11  ;;  %v2706_v20 = vshrl.u32 %v8683_v14, 16  ;;  %v8415_v21 = vld [vmem:[%s10599_s1 + $0x28] sm:$0xff]   ;;  %v8416_v22 = vld [vmem:[%s10600_s0 + $0x10] sm:$0xff]   ;;  %v2704_v26 = vrot.slane %v2702_v19, 1  ;;  %v8696_v28 = vld [vmem:[%s10600_s0 + $0x18] sm:$0xff]  }
   0x5   :  { %v246_v8 = vshrl.u32 %v8661_v4, 16  ;;  %v248_v9 = vshll.u32 %v8661_v4, 16  ;;  %v255_v16 = vrot.slane %v253_v10, 1  ;;  %7630 = vmatprep.subr.bf16.mxu0 %v8415_v21  ;;  %v261_v27 = vshll.u32 %v8416_v22, 16  ;;  %v8418_v30 = vld [vmem:[%s10600_s0 + $0x18] sm:$0xff]   ;;  %v8707_v37 = vld [vmem:[%s10600_s0 + $0x20] sm:$0xff]  }
   0x6   :  { %v2695_v17 = vshrl.u32 %v6610_v13, 16  ;;  %v2697_v18 = vshll.u32 %v6610_v13, 16  ;;  %v265_v31 = vshrl.u32 %v8416_v22, 16  ;;  %v2708_v33 = vor.u32 %v2706_v20, %v2704_v26  ;;  %v8420_v39 = vld [vmem:[%s10600_s0 + $0x20] sm:$0xff]   ;;  %v8718_v44 = vld [vmem:[%s10600_s0 + $0x28] sm:$0xff]   ;;  %v8734_v58 = vld [vmem:[%s10600_s0 + $0x30] sm:$0xff]  }
   0x7   :  { %v250_v15 = vrot.slane %v248_v9, 1  ;;  %v259_v24 = vor.u32 %v257_v12, %v255_v16  ;;  %v263_v34 = vrot.slane %v261_v27, 1  ;;  %v2710_v35 = vshll.u32 %v8696_v28, 16  ;;  %v8422_v57 = vld [vmem:[%s10600_s0 + $0x28] sm:$0xff]   ;;  %v8424_v62 = vld [vmem:[%s10600_s0 + $0x30] sm:$0xff]   ;;  %v8746_v3 = vld [vmem:[%s10600_s0 + $0x38] sm:$0xff]  }
   0x8   :  { %v2699_v25 = vrot.slane %v2697_v18, 1  ;;  %v269_v36 = vshll.u32 %v8418_v30, 16  ;;  %v2714_v38 = vshrl.u32 %v8696_v28, 16  ;;  %v2718_v46 = vshll.u32 %v8707_v37, 16  ;;  %v8426_v13 = vld [vmem:[%s10600_s0 + $0x38] sm:$0xff]   ;;  %v8759_v19 = vld [vmem:[%s10600_s0 + $0x40] sm:$0xff]  }
   0x9   :  { %v251_v23 = vor.u32 %v250_v15, %v246_v8  ;;  %v264_v41 = vsel %vm244_vm0, %v259_v24, %v263_v34  ;;  %v2712_v42 = vrot.slane %v2710_v35, 1  ;;  %v267_v43 = vor.u32 %v265_v31, %v263_v34 }
   0xa   :  { %v2700_v32 = vor.u32 %v2699_v25, %v2695_v17  ;;  %v271_v45 = vrot.slane %v269_v36, 1  ;;  %v273_v47 = vshrl.u32 %v8418_v30, 16  ;;  %v277_v48 = vshll.u32 %v8420_v39, 16 }
   0xb   :  { %v256_v29 = vsel %vm244_vm0, %v251_v23, %v255_v16  ;;  %v2713_v49 = vsel %vm244_vm0, %v2708_v33, %v2712_v42  ;;  %v2716_v50 = vor.u32 %v2714_v38, %v2712_v42  ;;  %v2722_v51 = vshrl.u32 %v8707_v37, 16  ;;  %v8774_v33 = vld [vmem:[%s10600_s0 + $0x48] sm:$0xff]  }
   0xc   :  { %7302 = vmatprep.mubr.msk.bf16.mxu1 %vm511_vm1, %v256_v29  ;;  %v2705_v40 = vsel %vm244_vm0, %v2700_v32, %v2704_v26  ;;  %v2726_v52 = vshll.u32 %v8718_v44, 16  ;;  %v272_v53 = vsel %vm244_vm0, %v267_v43, %v271_v45  ;;  %v2720_v54 = vrot.slane %v2718_v46, 1  ;;  %v8428_v32 = vld [vmem:[%s10600_s0 + $0x40] sm:$0xff]   ;;  %v8430_v38 = vld [vmem:[%s10600_s0 + $0x48] sm:$0xff]  }
   0xd   :  { %7566 = vmatprep.mubr.msk.bf16.mxu0 %vm511_vm1, %v2705_v40  ;;  %7303 = vmatmul.mubr.msk.bf16.vlgmr.msra.gmra.mrb[0].mxu1 %vm511_vm1, %v264_v41  ;;  %v275_v55 = vor.u32 %v273_v47, %v271_v45  ;;  %v279_v56 = vrot.slane %v277_v48, 1  ;;  %v281_v60 = vshrl.u32 %v8420_v39, 16  ;;  %v2730_v61 = vshrl.u32 %v8718_v44, 16  ;;  %v8784_v41 = vld [vmem:[%s10600_s0 + $0x50] sm:$0xff]  }
   0xe   :  { %7367 = vmatpush3.bf16.msra.mxu1 %v8412_v6  ;;  %7567 = vmatmul.mubr.msk.bf16.vlgmr.msra.gmra.mrb[0].mxu0 %vm511_vm1, %v2713_v49  ;;  %v2728_v59 = vrot.slane %v2726_v52, 1  ;;  %v2721_v63 = vsel %vm244_vm0, %v2716_v50, %v2720_v54  ;;  %v2724_v1 = vor.u32 %v2722_v51, %v2720_v54  ;;  %v285_v2 = vshll.u32 %v8422_v57, 16 }
   0xf   :  { %7631 = vmatpush3.bf16.msra.mxu0 %v8415_v21  ;;  %7306 = vmatprep.mubr.msk.bf16.mxu1 %vm511_vm1, %v272_v53  ;;  %v280_v0 = vsel %vm244_vm0, %v275_v55, %v279_v56  ;;  %v283_v5 = vor.u32 %v281_v60, %v279_v56  ;;  %v2734_v7 = vshll.u32 %v8734_v58, 16  ;;  %v289_v8 = vshrl.u32 %v8422_v57, 16  ;;  %v8432_v53 = vld [vmem:[%s10600_s0 + $0x50] sm:$0xff]   ;;  %v8801_v55 = vld [vmem:[%s10600_s0 + $0x58] sm:$0xff]  }
  0x10   :  { %7570 = vmatprep.mubr.msk.bf16.mxu0 %vm511_vm1, %v2721_v63  ;;  %v2732_v6 = vor.u32 %v2730_v61, %v2728_v59  ;;  %v287_v9 = vrot.slane %v285_v2, 1  ;;  %v293_v10 = vshll.u32 %v8424_v62, 16  ;;  %v2738_v12 = vshrl.u32 %v8734_v58, 16  ;;  %v8434_v60 = vld [vmem:[%s10600_s0 + $0x58] sm:$0xff]  }
  0x11   :  { %v2729_v15 = vsel %vm244_vm0, %v2724_v1, %v2728_v59  ;;  %v2736_v16 = vrot.slane %v2734_v7, 1  ;;  %v2742_v17 = vshll.u32 %v8746_v3, 16  ;;  %v297_v18 = vshrl.u32 %v8424_v62, 16  ;;  %v8811_v1 = vld [vmem:[%s10600_s0 + $0x60] sm:$0xff]  }
  0x12   :  { %v288_v20 = vsel %vm244_vm0, %v283_v5, %v287_v9  ;;  %v295_v21 = vrot.slane %v293_v10, 1  ;;  %v301_v22 = vshll.u32 %v8426_v13, 16  ;;  %v291_v24 = vor.u32 %v289_v8, %v287_v9 }
  0x13   :  { %v2737_v23 = vsel %vm244_vm0, %v2732_v6, %v2736_v16  ;;  %v2744_v25 = vrot.slane %v2742_v17, 1  ;;  %v2746_v26 = vshrl.u32 %v8746_v3, 16  ;;  %v2740_v27 = vor.u32 %v2738_v12, %v2736_v16 }
  0x14   :  { %v299_v29 = vor.u32 %v297_v18, %v295_v21  ;;  %v303_v30 = vrot.slane %v301_v22, 1  ;;  %v2750_v31 = vshll.u32 %v8759_v19, 16  ;;  %v309_v36 = vshll.u32 %v8428_v32, 16  ;;  %v8438_v22 = vld [vmem:[%s10600_s0 + $0x68] sm:$0xff]  }
  0x15   :  { %7307 = vmatmul.mubr.msk.bf16.gmra.mrb[4].mxu1 %vm511_vm1, %v280_v0  ;;  %v2748_v34 = vor.u32 %v2746_v26, %v2744_v25  ;;  %v296_v39 = vsel %vm244_vm0, %v291_v24, %v295_v21  ;;  %v305_v40 = vshrl.u32 %v8426_v13, 16  ;;  %v2745_v42 = vsel %vm244_vm0, %v2740_v27, %v2744_v25  ;;  %v8833_v25 = vld [vmem:[%s10600_s0 + $0x68] sm:$0xff]  }
  0x16   :  { %7310 = vmatprep.mubr.msk.bf16.mxu1 %vm511_vm1, %v288_v20  ;;  %7571 = vmatmul.mubr.msk.bf16.gmra.mrb[4].mxu0 %vm511_vm1, %v2729_v15  ;;  %v2752_v35 = vrot.slane %v2750_v31, 1  ;;  %v304_v43 = vsel %vm244_vm0, %v299_v29, %v303_v30  ;;  %v2758_v45 = vshll.u32 %v8774_v33, 16  ;;  %v313_v46 = vshrl.u32 %v8428_v32, 16  ;;  %v8436_v15 = vld [vmem:[%s10600_s0 + $0x60] sm:$0xff]   ;;  %v8839_v32 = vld [vmem:[%s10600_s0 + $0x70] sm:$0xff]  }
  0x17   :  { %7574 = vmatprep.mubr.msk.bf16.mxu0 %vm511_vm1, %v2737_v23  ;;  %v311_v47 = vrot.slane %v309_v36, 1  ;;  %v2754_v48 = vshrl.u32 %v8759_v19, 16  ;;  %v317_v49 = vshll.u32 %v8430_v38, 16  ;;  %v2762_v50 = vshrl.u32 %v8774_v33, 16 }
  0x18   :  { %v2753_v51 = vsel %vm244_vm0, %v2748_v34, %v2752_v35  ;;  %v2766_v52 = vshll.u32 %v8784_v41, 16  ;;  %v307_v54 = vor.u32 %v305_v40, %v303_v30  ;;  %v2760_v56 = vrot.slane %v2758_v45, 1  ;;  %v8440_v45 = vld [vmem:[%s10600_s0 + $0x70] sm:$0xff]  }
  0x19   :  { %v315_v57 = vor.u32 %v313_v46, %v311_v47  ;;  %v319_v59 = vrot.slane %v317_v49, 1  ;;  %v2756_v61 = vor.u32 %v2754_v48, %v2752_v35  ;;  %v325_v0 = vshll.u32 %v8432_v53, 16 }
  0x1a   :  { %v2764_v62 = vor.u32 %v2762_v50, %v2760_v56  ;;  %v2768_v63 = vrot.slane %v2766_v52, 1  ;;  %v312_v2 = vsel %vm244_vm0, %v307_v54, %v311_v47  ;;  %v321_v5 = vshrl.u32 %v8430_v38, 16  ;;  %v8857_v52 = vld [vmem:[%s10600_s0 + $0x78] sm:$0xff]  }
  0x1b   :  { %v2774_v6 = vshll.u32 %v8801_v55, 16  ;;  %v320_v7 = vsel %vm244_vm0, %v315_v57, %v319_v59  ;;  %v329_v8 = vshrl.u32 %v8432_v53, 16  ;;  %v333_v9 = vshll.u32 %v8434_v60, 16  ;;  %v8862_v53 = vld [vmem:[%s10599_s1 + $0x30] sm:$0xff]  }
  0x1c   :  { %v2761_v10 = vsel %vm244_vm0, %v2756_v61, %v2760_v56  ;;  %v2770_v12 = vshrl.u32 %v8784_v41, 16  ;;  %v2778_v13 = vshrl.u32 %v8801_v55, 16  ;;  %v2769_v16 = vsel %vm244_vm0, %v2764_v62, %v2768_v63  ;;  %v8442_v56 = vld [vmem:[%s10600_s0 + $0x78] sm:$0xff]   ;;  %7696 = vmatprep.subr.bf16.mxu0 %v8862_v53 }
  0x1d   :  { %7311 = vmatmul.mubr.msk.bf16.gmra.mrb[8].mxu1 %vm511_vm1, %v296_v39  ;;  %v327_v17 = vrot.slane %v325_v0, 1  ;;  %v2782_v18 = vshll.u32 %v8811_v1, 16  ;;  %v323_v20 = vor.u32 %v321_v5, %v319_v59  ;;  %v2776_v21 = vrot.slane %v2774_v6, 1 }
  0x1e   :  { %7314 = vmatprep.mubr.msk.bf16.mxu1 %vm511_vm1, %v304_v43  ;;  %7575 = vmatmul.mubr.msk.bf16.gmra.mrb[8].mxu0 %vm511_vm1, %v2745_v42  ;;  %v335_v24 = vrot.slane %v333_v9, 1  ;;  %v2772_v26 = vor.u32 %v2770_v12, %v2768_v63  ;;  %v341_v27 = vshll.u32 %v8436_v15, 16  ;;  %v337_v31 = vshrl.u32 %v8434_v60, 16  ;;  %v8874_v63 = vld [vmem:[%s10600_s0 + $0x80] sm:$0xff]  }
  0x1f   :  { %7578 = vmatprep.mubr.msk.bf16.mxu0 %vm511_vm1, %v2753_v51  ;;  %v331_v23 = vor.u32 %v329_v8, %v327_v17  ;;  %v2780_v29 = vor.u32 %v2778_v13, %v2776_v21  ;;  %v2784_v30 = vrot.slane %v2782_v18, 1  ;;  %v328_v34 = vsel %vm244_vm0, %v323_v20, %v327_v17 }
  0x20   :  { %v345_v35 = vshrl.u32 %v8436_v15, 16  ;;  %v349_v36 = vshll.u32 %v8438_v22, 16  ;;  %v2790_v39 = vshll.u32 %v8833_v25, 16  ;;  %v2777_v40 = vsel %vm244_vm0, %v2772_v26, %v2776_v21  ;;  %v8444_v15 = vld [vmem:[%s10600_s0 + $0x80] sm:$0xff]  }
  0x21   :  { %v336_v38 = vsel %vm244_vm0, %v331_v23, %v335_v24  ;;  %v343_v42 = vrot.slane %v341_v27, 1  ;;  %v2786_v43 = vshrl.u32 %v8811_v1, 16  ;;  %v2785_v46 = vsel %vm244_vm0, %v2780_v29, %v2784_v30  ;;  %v8446_v27 = vld [vmem:[%s10600_s0 + $0x88] sm:$0xff]  }
  0x22   :  { %v339_v47 = vor.u32 %v337_v31, %v335_v24  ;;  %v2794_v48 = vshrl.u32 %v8833_v25, 16  ;;  %v2798_v49 = vshll.u32 %v8839_v32, 16  ;;  %v351_v51 = vrot.slane %v349_v36, 1  ;;  %v8905_v31 = vld [vmem:[%s10600_s0 + $0x88] sm:$0xff]  }
  0x23   :  { %v347_v50 = vor.u32 %v345_v35, %v343_v42  ;;  %v2792_v54 = vrot.slane %v2790_v39, 1  ;;  %v2788_v57 = vor.u32 %v2786_v43, %v2784_v30  ;;  %v357_v59 = vshll.u32 %v8440_v45, 16 }
  0x24   :  { %v344_v60 = vsel %vm244_vm0, %v339_v47, %v343_v42  ;;  %v2800_v62 = vrot.slane %v2798_v49, 1  ;;  %v2802_v5 = vshrl.u32 %v8839_v32, 16  ;;  %v2806_v6 = vshll.u32 %v8857_v52, 16 }
  0x25   :  { %7315 = vmatmul.mubr.msk.bf16.gmra.mrb[12].mxu1 %vm511_vm1, %v312_v2  ;;  %v2796_v61 = vor.u32 %v2794_v48, %v2792_v54  ;;  %v352_v0 = vsel %vm244_vm0, %v347_v50, %v351_v51  ;;  %v353_v2 = vshrl.u32 %v8438_v22, 16  ;;  %v365_v8 = vshll.u32 %v8442_v56, 16 }
  0x26   :  { %7318 = vmatprep.mubr.msk.bf16.mxu1 %vm511_vm1, %v320_v7  ;;  %7579 = vmatmul.mubr.msk.bf16.gmra.mrb[12].mxu0 %vm511_vm1, %v2761_v10  ;;  %v361_v7 = vshrl.u32 %v8440_v45, 16  ;;  %v3418_v9 = vrot.slane %v8696_v28, 1  ;;  %v3420_v10 = vrot.slane %v8707_v37, 1  ;;  %v2793_v12 = vsel %vm244_vm0, %v2788_v57, %v2792_v54  ;;  %v8932_v57 = vld [vmem:[%s10600_s0 + $0x90] sm:$0xff]  }
  0x27   :  { %7582 = vmatprep.mubr.msk.bf16.mxu0 %vm511_vm1, %v2769_v16  ;;  %v359_v13 = vrot.slane %v357_v59, 1  ;;  %v2801_v16 = vsel %vm244_vm0, %v2796_v61, %v2800_v62  ;;  %v2810_v17 = vshrl.u32 %v8857_v52, 16  ;;  %v2814_v18 = vshll.u32 %v8874_v63, 16 }
  0x28   :  { %v8892_v20 = vsel %vm1262_vm2, %v3418_v9, %v3420_v10  ;;  %v355_v37 = vor.u32 %v353_v2, %v351_v51  ;;  %v2804_v21 = vor.u32 %v2802_v5, %v2800_v62  ;;  %v2808_v22 = vrot.slane %v2806_v6, 1 }
  0x29   :  { %v3422_v23 = vrot.slane %v8718_v44, 1  ;;  %v363_v24 = vor.u32 %v361_v7, %v359_v13  ;;  %v367_v26 = vrot.slane %v365_v8, 1  ;;  %v3424_v29 = vrot.slane %v8734_v58, 1 }
  0x2a   :  { %v369_v30 = vshrl.u32 %v8442_v56, 16  ;;  %v2816_v35 = vrot.slane %v2814_v18, 1  ;;  %v373_v36 = vshll.u32 %v8444_v15, 16  ;;  %v360_v39 = vsel %vm244_vm0, %v355_v37, %v359_v13  ;;  %v8969_v18 = vld [vmem:[%s10599_s1 + $0x10] sm:$0xff]  }
  0x2b   :  { %v8908_v44 = vsel %vm1262_vm2, %v3420_v10, %v3422_v23  ;;  %v8914_v58 = vsel %vm1262_vm2, %v3422_v23, %v3424_v29  ;;  %v3426_v42 = vrot.slane %v8746_v3, 1  ;;  %v368_v43 = vsel %vm244_vm0, %v363_v24, %v367_v26  ;;  %7432 = vmatprep.subr.bf16.mxu1 %v8969_v18 }
  0x2c   :  { %v2818_v45 = vshrl.u32 %v8874_v63, 16  ;;  %v381_v47 = vshll.u32 %v8446_v27, 16  ;;  %v2822_v48 = vshll.u32 %v8905_v31, 16  ;;  %v3428_v51 = vrot.slane %v8759_v19, 1 }
  0x2d   :  { %7319 = vmatmul.mubr.msk.bf16.gmra.mrb[16].mxu1 %vm511_vm1, %v328_v34  ;;  %v2812_v34 = vor.u32 %v2810_v17, %v2808_v22  ;;  %v8924_v50 = vsel %vm1262_vm2, %v3424_v29, %v3426_v42  ;;  %v371_v3 = vor.u32 %v369_v30, %v367_v26  ;;  %v375_v56 = vrot.slane %v373_v36, 1  ;;  %v8990_v29 = vld [vmem:[%s10600_s0 + $0xa8] sm:$0xff]  }
  0x2e   :  { %7322 = vmatprep.mubr.msk.bf16.mxu1 %vm511_vm1, %v336_v38  ;;  %7583 = vmatmul.mubr.msk.bf16.gmra.mrb[16].mxu0 %vm511_vm1, %v2777_v40  ;;  %v3409_v38 = vld [vmem:[%s10600_s0 + $0x8] sm:$0xe]  ;;  %v2809_v40 = vsel %vm244_vm0, %v2804_v21, %v2808_v22  ;;  %v3430_v59 = vrot.slane %v8774_v33, 1  ;;  %v8942_v19 = vsel %vm1262_vm2, %v3426_v42, %v3428_v51  ;;  %v383_v62 = vrot.slane %v381_v47, 1  ;;  %v8978_v22 = vld [vmem:[%s10600_s0 + $0xa0] sm:$0xff]  }
  0x2f   :  { %7586 = vmatprep.mubr.msk.bf16.mxu0 %vm511_vm1, %v2785_v46  ;;  %v377_v46 = vshrl.u32 %v8444_v15, 16  ;;  %v6676_v49 = vcombine.low %v3409_v38, %v8677_v11  ;;  %v2817_v54 = vsel %vm244_vm0, %v2812_v34, %v2816_v35  ;;  %v8939_v11 = vld [vmem:[%s10600_s0 + $0x98] sm:$0xff]   ;;  %v8949_v33 = vrot.slane %v2822_v48, 1  ;;  %v9023_v48 = vld [vmem:[%s10600_s0 + $0xb0] sm:$0xff]  }
  0x30   :  { %v3416_v5 = vrot.slane %v8683_v14, 1  ;;  %v3432_v6 = vrot.slane %v8784_v41, 1  ;;  %v376_v7 = vsel %vm244_vm0, %v371_v3, %v375_v56  ;;  %v389_v8 = vshll.u32 %v8932_v57, 16 }
  0x31   :  { %v379_v61 = vor.u32 %v377_v46, %v375_v56  ;;  %v3415_v2 = vrot.slane %v6676_v49, 1  ;;  %v3434_v10 = vrot.slane %v8801_v55, 1  ;;  %v393_v13 = vshrl.u32 %v8932_v57, 16 }
  0x32   :  { %v397_v15 = vshll.u32 %v8939_v11, 16  ;;  %v3436_v41 = vrot.slane %v8811_v1, 1  ;;  %v391_v21 = vrot.slane %v389_v8, 1  ;;  %v3438_v23 = vrot.slane %v8833_v25, 1 }
  0x33   :  { %v384_v17 = vsel %vm244_vm0, %v379_v61, %v383_v62  ;;  %v8963_v14 = vsel %vm1262_vm2, %v3432_v6, %v3434_v10  ;;  %v3417_v37 = vsel %vm1262_vm2, %v3415_v2, %v3416_v5  ;;  %v3440_v34 = vrot.slane %v8839_v32, 1  ;;  %v9055_v2 = vld [vmem:[%s10600_s0 + $0xd0] sm:$0xff]  }
  0x34   :  { %v8981_v1 = vsel %vm1262_vm2, %v3434_v10, %v3436_v41  ;;  %v395_v26 = vor.u32 %v393_v13, %v391_v21  ;;  %v8993_v30 = vsel %vm1262_vm2, %v3436_v41, %v3438_v23  ;;  %v3442_v25 = vrot.slane %v8857_v52, 1  ;;  %v9072_v13 = vld [vmem:[%s10599_s1 + $0x38] sm:$0xff]  }
  0x35   :  { %7323 = vmatmul.mubr.msk.bf16.gmra.mrb[20].mxu1 %vm511_vm1, %v344_v60  ;;  %v2820_v60 = vor.u32 %v2818_v45, %v2816_v35  ;;  %v405_v35 = vshll.u32 %v8978_v22, 16  ;;  %v9000_v36 = vsel %vm1262_vm2, %v3438_v23, %v3440_v34  ;;  %v3444_v42 = vrot.slane %v8874_v63, 1  ;;  %v8469_v63 = vld [vmem:[%s10600_s0 + $0xb0] sm:$0xff]  }
  0x36   :  { %7326 = vmatprep.mubr.msk.bf16.mxu1 %vm511_vm1, %v352_v0  ;;  %7587 = vmatmul.mubr.msk.bf16.gmra.mrb[20].mxu0 %vm511_vm1, %v2793_v12  ;;  %v8946_v0 = vsel %vm1262_vm2, %v3428_v51, %v3430_v59  ;;  %v385_v12 = vshrl.u32 %v8446_v27, 16  ;;  %v399_v27 = vrot.slane %v397_v15, 1  ;;  %v413_v52 = vshll.u32 %v8990_v29, 16  ;;  %v9030_v51 = vld [vmem:[%s10600_s0 + $0xb8] sm:$0xff]  }
  0x37   :  { %7590 = vmatprep.mubr.msk.bf16.mxu0 %vm511_vm1, %v2801_v16  ;;  %v8959_v16 = vsel %vm1262_vm2, %v3430_v59, %v3432_v6  ;;  %v2825_v55 = vsel %vm244_vm0, %v2820_v60, %v8949_v33  ;;  %v3419_v45 = vsel %vm1262_vm2, %v3416_v5, %v3418_v9  ;;  %v9017_v46 = vsel %vm1262_vm2, %v3442_v25, %v3444_v42  ;;  %v9060_v5 = vld [vmem:[%s10600_s0 + $0xd8] sm:$0xff]  }
  0x38   :  { %v387_v24 = vor.u32 %v385_v12, %v383_v62  ;;  %v400_v32 = vsel %vm244_vm0, %v395_v26, %v399_v27  ;;  %v407_v47 = vrot.slane %v405_v35, 1  ;;  %v415_v9 = vrot.slane %v413_v52, 1  ;;  %v9044_v62 = vld [vmem:[%s10600_s0 + $0xc0] sm:$0xff]  }
  0x39   :  { %v421_v3 = vshll.u32 %v9023_v48, 16  ;;  %v425_v60 = vshrl.u32 %v9023_v48, 16  ;;  %v429_v61 = vshll.u32 %v9030_v51, 16  ;;  %v433_v10 = vshrl.u32 %v9030_v51, 16 }
  0x3a   :  { %v392_v38 = vsel %vm244_vm0, %v387_v24, %v391_v21  ;;  %v437_v12 = vshll.u32 %v9044_v62, 16  ;;  %v441_v15 = vshrl.u32 %v9044_v62, 16  ;;  %v453_v41 = vshll.u32 %v9055_v2, 16 }
  0x3b   :  { %v431_v8 = vrot.slane %v429_v61, 1 }
  0x3c   :  { %v439_v21 = vrot.slane %v437_v12, 1 }
  0x3d   :  { %7327 = vmatmul.mubr.msk.bf16.gmra.mrb[24].mxu1 %vm511_vm1, %v360_v39  ;;  %v401_v39 = vshrl.u32 %v8939_v11, 16  ;;  %v435_v24 = vor.u32 %v433_v10, %v431_v8 }
  0x3e   :  { %7330 = vmatprep.mubr.msk.bf16.mxu1 %vm511_vm1, %v368_v43  ;;  %7591 = vmatmul.mubr.msk.bf16.gmra.mrb[24].mxu0 %vm511_vm1, %v2809_v40  ;;  %v9005_v40 = vsel %vm1262_vm2, %v3440_v34, %v3442_v25  ;;  %v409_v43 = vshrl.u32 %v8978_v22, 16  ;;  %v443_v34 = vor.u32 %v441_v15, %v439_v21  ;;  %v457_v25 = vshrl.u32 %v9055_v2, 16 }
  0x3f   :  { %7594 = vmatprep.mubr.msk.bf16.mxu0 %vm511_vm1, %v2817_v54  ;;  %v403_v49 = vor.u32 %v401_v39, %v399_v27  ;;  %v417_v54 = vshrl.u32 %v8990_v29, 16  ;;  %v455_v27 = vrot.slane %v453_v41, 1 }
  0x40   :  { %v411_v28 = vor.u32 %v409_v43, %v407_v47  ;;  %v440_v43 = vsel %vm244_vm0, %v435_v24, %v439_v21  ;;  %v3446_v21 = vrot.slane %v8905_v31, 1  ;;  %v8466_v24 = vld [vmem:[%s10600_s0 + $0x98] sm:$0xff]  }
  0x41   :  { %v408_v56 = vsel %vm244_vm0, %v403_v49, %v407_v47  ;;  %v419_v6 = vor.u32 %v417_v54, %v415_v9  ;;  %v459_v47 = vor.u32 %v457_v25, %v455_v27  ;;  %v9120_v54 = vld [vmem:[%s10600_s0 + $0xf8] sm:$0xff]   ;;  %v9188_v25 = vld [vmem:[%s10600_s0 + $0x8] sm:$0xff]  }
  0x42   :  { %v416_v59 = vsel %vm244_vm0, %v411_v28, %v415_v9  ;;  %v9112_v28 = vld [vmem:[%s10600_s0 + $0xf0] sm:$0xff]  }
  0x43   :  { %v489_v61 = vshrl.u32 %v9112_v28, 16 }
  0x45   :  { %7331 = vmatmul.mubr.msk.bf16.gmra.mrb[28].mxu1 %vm511_vm1, %v376_v7 }
  0x46   :  { %7334 = vmatprep.mubr.msk.bf16.mxu1 %vm511_vm1, %v384_v17  ;;  %7595 = vmatmul.mubr.msk.bf16.gmra.mrb[28].mxu0 %vm511_vm1, %v2825_v55  ;;  %v461_v55 = vshll.u32 %v9060_v5, 16 }
  0x47   :  { %7632 = vmatprep.mubr.msk.bf16.mxu0 %vm511_vm1, %v3417_v37 }
  0x48   :  { %v463_v35 = vrot.slane %v461_v55, 1 }
  0x4d   :  { %7335 = vmatmul.mubr.msk.bf16.gmra.mrb[32].mxu1 %vm511_vm1, %v392_v38  ;;  %v465_v38 = vshrl.u32 %v9060_v5, 16 }
  0x4e   :  { %7338 = vmatprep.mubr.msk.bf16.mxu1 %vm511_vm1, %v400_v32  ;;  %7633 = vmatmul.mubr.msk.bf16.vlgmr.msra.gmra.mrb[0].mxu0 %vm511_vm1, %v3419_v45  ;;  %v9099_v32 = vld [vmem:[%s10600_s0 + $0xe8] sm:$0xff]  }
  0x4f   :  { %7697 = vmatpush3.bf16.msra.mxu0 %v8862_v53  ;;  %7636 = vmatprep.mubr.msk.bf16.mxu0 %vm511_vm1, %v8892_v20  ;;  %v9049_v53 = vld [vmem:[%s10600_s0 + $0xc8] sm:$0xff]   ;;  %v423_v20 = vrot.slane %v421_v3, 1  ;;  %v477_v49 = vshll.u32 %v9099_v32, 16  ;;  %v481_v9 = vshrl.u32 %v9099_v32, 16  ;;  %v464_v3 = vsel %vm244_vm0, %v459_v47, %v463_v35  ;;  %v9222_v47 = vld [vmem:[%s10600_s0 + $0x20] sm:$0xff]  }
  0x50   :  { %v445_v17 = vshll.u32 %v9049_v53, 16  ;;  %7762 = vmatprep.subr.bf16.mxu0 %v9072_v13  ;;  %v449_v23 = vshrl.u32 %v9049_v53, 16 }
  0x51   :  { %v427_v7 = vor.u32 %v425_v60, %v423_v20  ;;  %v467_v60 = vor.u32 %v465_v38, %v463_v35  ;;  %v9197_v38 = vld [vmem:[%s10600_s0 + $0x10] sm:$0xff]  }
  0x52   :  { %v447_v26 = vrot.slane %v445_v17, 1 }
  0x53   :  { %v432_v37 = vsel %vm244_vm0, %v427_v7, %v431_v8 }
  0x55   :  { %7339 = vmatmul.mubr.msk.bf16.gmra.mrb[36].mxu1 %vm511_vm1, %v408_v56  ;;  %v479_v56 = vrot.slane %v477_v49, 1 }
  0x56   :  { %7342 = vmatprep.mubr.msk.bf16.mxu1 %vm511_vm1, %v416_v59  ;;  %7637 = vmatmul.mubr.msk.bf16.gmra.mrb[4].mxu0 %vm511_vm1, %v8908_v44  ;;  %v424_v44 = vsel %vm244_vm0, %v419_v6, %v423_v20  ;;  %v485_v59 = vshll.u32 %v9112_v28, 16  ;;  %v493_v20 = vshll.u32 %v9120_v54, 16  ;;  %v8463_v6 = vld [vmem:[%s10600_s0 + $0x100] ss:$0 sps:$4 sm:$0x11]  }
  0x57   :  { %7640 = vmatprep.mubr.msk.bf16.mxu0 %vm511_vm1, %v8914_v58  ;;  %v9082_v58 = vld [vmem:[%s10600_s0 + $0xe0] sm:$0xff]   ;;  %v483_v12 = vor.u32 %v481_v9, %v479_v56  ;;  %v501_v17 = vshll.u32 %v8463_v6, 16 }
  0x58   :  { %v469_v39 = vshll.u32 %v9082_v58, 16  ;;  %v473_v45 = vshrl.u32 %v9082_v58, 16  ;;  %v487_v10 = vrot.slane %v485_v59, 1  ;;  %v9238_v59 = vld [vmem:[%s10600_s0 + $0x28] sm:$0xff]  }
  0x5a   :  { %v471_v52 = vrot.slane %v469_v39, 1  ;;  %v491_v15 = vor.u32 %v489_v61, %v487_v10  ;;  %v488_v41 = vsel %vm244_vm0, %v483_v12, %v487_v10  ;;  %v9270_v12 = vld [vmem:[%s10600_s0 + $0x40] sm:$0xff]  }
  0x5c   :  { %v472_v7 = vsel %vm244_vm0, %v467_v60, %v471_v52 }
  0x5d   :  { %7343 = vmatmul.mubr.msk.bf16.gmra.mrb[40].mxu1 %vm511_vm1, %v424_v44  ;;  %v8465_v44 = vld [vmem:[%s10600_s0 + $0x90] sm:$0xff]  }
  0x5e   :  { %7346 = vmatprep.mubr.msk.bf16.mxu1 %vm511_vm1, %v432_v37  ;;  %7641 = vmatmul.mubr.msk.bf16.gmra.mrb[8].mxu0 %vm511_vm1, %v8924_v50  ;;  %v448_v50 = vsel %vm244_vm0, %v443_v34, %v447_v26  ;;  %v503_v37 = vrot.slane %v501_v17, 1  ;;  %v8468_v34 = vld [vmem:[%s10600_s0 + $0xa8] sm:$0xff]  }
  0x5f   :  { %7644 = vmatprep.mubr.msk.bf16.mxu0 %vm511_vm1, %v8942_v19  ;;  %v451_v19 = vor.u32 %v449_v23, %v447_v26  ;;  %v8467_v26 = vld [vmem:[%s10600_s0 + $0xa0] sm:$0xff]   ;;  %v3454_v39 = vrot.slane %v8468_v34, 1 }
  0x65   :  { %7347 = vmatmul.mubr.msk.bf16.gmra.mrb[44].mxu1 %vm511_vm1, %v440_v43  ;;  %v3456_v43 = vrot.slane %v8469_v63, 1 }
  0x66   :  { %7350 = vmatprep.mubr.msk.bf16.mxu1 %vm511_vm1, %v448_v50  ;;  %7645 = vmatmul.mubr.msk.bf16.gmra.mrb[12].mxu0 %vm511_vm1, %v8946_v0  ;;  %v456_v0 = vsel %vm244_vm0, %v451_v19, %v455_v27  ;;  %v3452_v27 = vrot.slane %v8467_v26, 1  ;;  %v8471_v50 = vld [vmem:[%s10600_s0 + $0xc0] sm:$0xff]   ;;  %v9307_v26 = vld [vmem:[%s10600_s0 + $0x58] sm:$0xff]  }
  0x67   :  { %7648 = vmatprep.mubr.msk.bf16.mxu0 %vm511_vm1, %v8959_v16  ;;  %v475_v16 = vor.u32 %v473_v45, %v471_v52  ;;  %v9214_v45 = vld [vmem:[%s10600_s0 + $0x18] sm:$0xff]   ;;  %v3457_v19 = vsel %vm1262_vm2, %v3454_v39, %v3456_v43  ;;  %v3460_v9 = vrot.slane %v8471_v50, 1 }
  0x68   :  { %v3455_v52 = vsel %vm1262_vm2, %v3452_v27, %v3454_v39 }
  0x69   :  { %v480_v8 = vsel %vm244_vm0, %v475_v16, %v479_v56  ;;  %v9246_v16 = vld [vmem:[%s10600_s0 + $0x30] sm:$0xff]  }
  0x6d   :  { %7351 = vmatmul.mubr.msk.bf16.gmra.mrb[48].mxu1 %vm511_vm1, %v456_v0  ;;  %v8472_v0 = vld [vmem:[%s10600_s0 + $0xc8] sm:$0xff]  }
  0x6e   :  { %7354 = vmatprep.mubr.msk.bf16.mxu1 %vm511_vm1, %v464_v3  ;;  %7649 = vmatmul.mubr.msk.bf16.gmra.mrb[16].mxu0 %vm511_vm1, %v8963_v14  ;;  %v495_v14 = vrot.slane %v493_v20, 1  ;;  %v8473_v3 = vld [vmem:[%s10600_s0 + $0xd0] sm:$0xff]   ;;  %v3462_v61 = vrot.slane %v8472_v0, 1  ;;  %v8484_v0 = vld [vmem:[%s10600_s0 + $0x20] sm:$0xff]  }
  0x6f   :  { %7652 = vmatprep.mubr.msk.bf16.mxu0 %vm511_vm1, %v8981_v1  ;;  %v497_v1 = vshrl.u32 %v9120_v54, 16  ;;  %v3464_v20 = vrot.slane %v8473_v3, 1  ;;  %v9374_v3 = vld [vmem:[%s10600_s0 + $0x88] sm:$0xff]  }
  0x70   :  { %v496_v55 = vsel %vm244_vm0, %v491_v15, %v495_v14  ;;  %v3463_v6 = vsel %vm1262_vm2, %v3460_v9, %v3462_v61 }
  0x71   :  { %v3465_v10 = vsel %vm1262_vm2, %v3462_v61, %v3464_v20  ;;  %v8486_v61 = vld [vmem:[%s10600_s0 + $0x30] sm:$0xff]  }
  0x75   :  { %7355 = vmatmul.mubr.msk.bf16.gmra.mrb[52].mxu1 %vm511_vm1, %v472_v7  ;;  %v8474_v7 = vld [vmem:[%s10600_s0 + $0xd8] sm:$0xff]  }
  0x76   :  { %7358 = vmatprep.mubr.msk.bf16.mxu1 %vm511_vm1, %v480_v8  ;;  %7653 = vmatmul.mubr.msk.bf16.gmra.mrb[20].mxu0 %vm511_vm1, %v8993_v30  ;;  %v499_v30 = vor.u32 %v497_v1, %v495_v14  ;;  %v9259_v8 = vld [vmem:[%s10600_s0 + $0x38] sm:$0xff]   ;;  %v8475_v14 = vld [vmem:[%s10600_s0 + $0xe0] sm:$0xff]   ;;  %v3466_v15 = vrot.slane %v8474_v7, 1  ;;  %v1264_v7 = vrot.slane %v9188_v25, 1 }
  0x77   :  { %7656 = vmatprep.mubr.msk.bf16.mxu0 %vm511_vm1, %v9000_v36  ;;  %v3448_v36 = vrot.slane %v8465_v44, 1  ;;  %v3468_v1 = vrot.slane %v8475_v14, 1  ;;  %v8476_v44 = vld [vmem:[%s10600_s0 + $0xe8] sm:$0xff]  }
  0x78   :  { %v504_v23 = vsel %vm244_vm0, %v499_v30, %v503_v37  ;;  %v3467_v17 = vsel %vm1262_vm2, %v3464_v20, %v3466_v15  ;;  %v8477_v37 = vld [vmem:[%s10600_s0 + $0xf0] sm:$0xff]   ;;  %v8600_v20 = vld [vmem:[%s10600_s0 + $0x4] sm:$0xf] }
  0x79   :  { %v3449_v31 = vsel %vm1262_vm2, %v3446_v21, %v3448_v36  ;;  %v9294_v30 = vld [vmem:[%s10600_s0 + $0x50] sm:$0xff]  }
  0x7d   :  { %7359 = vmatmul.mubr.msk.bf16.gmra.mrb[56].mxu1 %vm511_vm1, %v488_v41  ;;  %v9283_v41 = vld [vmem:[%s10600_s0 + $0x48] sm:$0xff]  }
  0x7e   :  { %7362 = vmatprep.mubr.msk.bf16.mxu1 %vm511_vm1, %v496_v55  ;;  %7657 = vmatmul.mubr.msk.bf16.gmra.mrb[24].mxu0 %vm511_vm1, %v9005_v40  ;;  %v3447_v40 = vsel %vm1262_vm2, %v3444_v42, %v3446_v21  ;;  %v9182_v42 = vld [vmem:[%s10599_s1 + $0x18] sm:$0xff]   ;;  %v3469_v55 = vsel %vm1262_vm2, %v3466_v15, %v3468_v1  ;;  %v3470_v21 = vrot.slane %v8476_v44, 1  ;;  %v9499_v44 = vld [vmem:[%s10599_s1 + $0x20] sm:$0xff]  }
  0x7f   :  { %7660 = vmatprep.mubr.msk.bf16.mxu0 %vm511_vm1, %v9017_v46  ;;  %v3450_v46 = vrot.slane %v8466_v24, 1  ;;  %v8478_v24 = vld [vmem:[%s10600_s0 + $0xf8] sm:$0xff]  }
  0x81   :  { %v3453_v35 = vsel %vm1262_vm2, %v3450_v46, %v3452_v27  ;;  %v3474_v27 = vrot.slane %v8478_v24, 1 }
  0x85   :  { %7363 = vmatmul.mubr.msk.bf16.gmra.mrb[60].mxu1 %vm511_vm1, %v504_v23  ;;  %v3471_v23 = vsel %vm1262_vm2, %v3468_v1, %v3470_v21  ;;  %v8501_v1 = vld [vmem:[%s10600_s0 + $0x98] sm:$0xff]  }
  0x86   :  { %7368 = vmatprep.mubr.msk.bf16.mxu1 %vm511_vm1, %v8661_v4  ;;  %7661 = vmatmul.mubr.msk.bf16.gmra.mrb[28].mxu0 %vm511_vm1, %v3447_v40  ;;  %v3451_v4 = vsel %vm1262_vm2, %v3448_v36, %v3450_v46  ;;  %v3472_v36 = vrot.slane %v8477_v37, 1  ;;  %v9318_v46 = vld [vmem:[%s10600_s0 + $0x60] sm:$0xff]   ;;  %v1274_v37 = vrot.slane %v9246_v16, 1 }
  0x87   :  { %7664 = vmatprep.mubr.msk.bf16.mxu0 %vm511_vm1, %v3449_v31  ;;  %v8479_v31 = vld [vmem:[%s10600_s0 + $0x100] sm:$0xff]  }
  0x88   :  { %v3473_v40 = vsel %vm1262_vm2, %v3470_v21, %v3472_v36  ;;  %v3476_v34 = vrot.slane %v8479_v31, 1  ;;  %v3475_v63 = vsel %vm1262_vm2, %v3472_v36, %v3474_v27  ;;  %v1276_v21 = vrot.slane %v9259_v8, 1 }
  0x8a   :  { %v3477_v39 = vsel %vm1262_vm2, %v3474_v27, %v3476_v34  ;;  %v1277_v24 = vsel %vm1262_vm2, %v1274_v37, %v1276_v21  ;;  %v8507_v27 = vld [vmem:[%s10600_s0 + $0xc8] sm:$0xff]  }
  0x8d   :  { %7369 = vmatmul.mubr.msk.bf16.vlgmr.msra.gmra.mrb[0].mxu1 %vm511_vm1, %v9188_v25  ;;  %v1268_v25 = vrot.slane %v9214_v45, 1 }
  0x8e   :  { %7433 = vmatpush3.bf16.msra.mxu1 %v8969_v18  ;;  %7372 = vmatprep.mubr.msk.bf16.mxu1 %vm511_vm1, %v9197_v38  ;;  %v8470_v18 = vld [vmem:[%s10600_s0 + $0xb8] sm:$0xff]  }
  0x8f   :  { %7665 = vmatmul.mubr.msk.bf16.gmra.mrb[32].mxu0 %vm511_vm1, %v3451_v4  ;;  %7498 = vmatprep.subr.bf16.mxu1 %v9182_v42  ;;  %v3458_v49 = vrot.slane %v8470_v18, 1  ;;  %v8480_v4 = vld [vmem:[%s10600_s0 + $0x108] ss:$0 sps:$4 sm:$0x11]  }
  0x90   :  { %7668 = vmatprep.mubr.msk.bf16.mxu0 %vm511_vm1, %v3453_v35  ;;  %v9331_v35 = vld [vmem:[%s10600_s0 + $0x68] sm:$0xff]   ;;  %v3478_v18 = vrot.slane %v8480_v4, 1 }
  0x91   :  { %v3459_v56 = vsel %vm1262_vm2, %v3456_v43, %v3458_v49  ;;  %v3461_v60 = vsel %vm1262_vm2, %v3458_v49, %v3460_v9  ;;  %v9339_v43 = vld [vmem:[%s10600_s0 + $0x70] sm:$0xff]   ;;  %v9359_v49 = vld [vmem:[%s10600_s0 + $0x80] sm:$0xff]   ;;  %v8483_v9 = vld [vmem:[%s10600_s0 + $0x18] sm:$0xff]  }
  0x92   :  { %v3479_v50 = vsel %vm1262_vm2, %v3476_v34, %v3478_v18 }
  0x95   :  { %7373 = vmatmul.mubr.msk.bf16.gmra.mrb[4].mxu1 %vm511_vm1, %v9214_v45  ;;  %v1272_v45 = vrot.slane %v9238_v59, 1 }
  0x96   :  { %7376 = vmatprep.mubr.msk.bf16.mxu1 %vm511_vm1, %v9222_v47 }
  0x97   :  { %7669 = vmatmul.mubr.msk.bf16.gmra.mrb[36].mxu0 %vm511_vm1, %v3455_v52  ;;  %v8481_v52 = vld [vmem:[%s10600_s0 + $0x10] sm:$0xff]   ;;  %v1275_v36 = vsel %vm1262_vm2, %v1272_v45, %v1274_v37  ;;  %v9640_v37 = vld [vmem:[%s10600_s0 + $0x38] sm:$0xff]  }
  0x98   :  { %7672 = vmatprep.mubr.msk.bf16.mxu0 %vm511_vm1, %v3457_v19  ;;  %v9352_v19 = vld [vmem:[%s10600_s0 + $0x78] sm:$0xff]  }
  0x9d   :  { %7377 = vmatmul.mubr.msk.bf16.gmra.mrb[8].mxu1 %vm511_vm1, %v9238_v59  ;;  %v8504_v59 = vld [vmem:[%s10600_s0 + $0xb0] sm:$0xff]  }
  0x9e   :  { %7380 = vmatprep.mubr.msk.bf16.mxu1 %vm511_vm1, %v9246_v16  ;;  %v1278_v16 = vrot.slane %v9270_v12, 1 }
  0x9f   :  { %7673 = vmatmul.mubr.msk.bf16.gmra.mrb[40].mxu0 %vm511_vm1, %v3459_v56  ;;  %v9381_v56 = vld [vmem:[%s10599_s1 + $0x40] sm:$0xff]  }
  0xa0   :  { %7676 = vmatprep.mubr.msk.bf16.mxu0 %vm511_vm1, %v3461_v60  ;;  %v8485_v60 = vld [vmem:[%s10600_s0 + $0x28] sm:$0xff]   ;;  %v1279_v31 = vsel %vm1262_vm2, %v1276_v21, %v1278_v16 }
  0xa5   :  { %7381 = vmatmul.mubr.msk.bf16.gmra.mrb[12].mxu1 %vm511_vm1, %v9259_v8  ;;  %v1280_v8 = vrot.slane %v9283_v41, 1 }
  0xa6   :  { %7384 = vmatprep.mubr.msk.bf16.mxu1 %vm511_vm1, %v9270_v12  ;;  %v1282_v12 = vrot.slane %v9294_v30, 1 }
  0xa7   :  { %7677 = vmatmul.mubr.msk.bf16.gmra.mrb[44].mxu0 %vm511_vm1, %v3463_v6  ;;  %v1281_v34 = vsel %vm1262_vm2, %v1278_v16, %v1280_v8 }
  0xa8   :  { %7680 = vmatprep.mubr.msk.bf16.mxu0 %vm511_vm1, %v3465_v10  ;;  %v8497_v10 = vld [vmem:[%s10600_s0 + $0x88] sm:$0xff]   ;;  %v1283_v4 = vsel %vm1262_vm2, %v1280_v8, %v1282_v12 }
  0xad   :  { %7385 = vmatmul.mubr.msk.bf16.gmra.mrb[16].mxu1 %vm511_vm1, %v9283_v41  ;;  %v1284_v41 = vrot.slane %v9307_v26, 1 }
  0xae   :  { %7388 = vmatprep.mubr.msk.bf16.mxu1 %vm511_vm1, %v9294_v30  ;;  %v1286_v30 = vrot.slane %v9318_v46, 1 }
  0xaf   :  { %7681 = vmatmul.mubr.msk.bf16.gmra.mrb[48].mxu0 %vm511_vm1, %v3467_v17  ;;  %v1285_v18 = vsel %vm1262_vm2, %v1282_v12, %v1284_v41  ;;  %v8605_v12 = vld [vmem:[%s10600_s0 + $0xa8] sm:$0xff]  }
  0xb0   :  { %7684 = vmatprep.mubr.msk.bf16.mxu0 %vm511_vm1, %v3469_v55 }
  0xb5   :  { %7389 = vmatmul.mubr.msk.bf16.gmra.mrb[20].mxu1 %vm511_vm1, %v9307_v26  ;;  %v1288_v26 = vrot.slane %v9331_v35, 1 }
  0xb6   :  { %7392 = vmatprep.mubr.msk.bf16.mxu1 %vm511_vm1, %v9318_v46  ;;  %v8511_v46 = vld [vmem:[%s10600_s0 + $0xe8] sm:$0xff]  }
  0xb7   :  { %7685 = vmatmul.mubr.msk.bf16.gmra.mrb[52].mxu0 %vm511_vm1, %v3471_v23  ;;  %v8505_v23 = vld [vmem:[%s10600_s0 + $0xb8] sm:$0xff]  }
  0xb8   :  { %7688 = vmatprep.mubr.msk.bf16.mxu0 %vm511_vm1, %v3473_v40  ;;  %v8506_v40 = vld [vmem:[%s10600_s0 + $0xc0] sm:$0xff]  }
  0xbd   :  { %7393 = vmatmul.mubr.msk.bf16.gmra.mrb[24].mxu1 %vm511_vm1, %v9331_v35  ;;  %v8512_v35 = vld [vmem:[%s10600_s0 + $0xf0] sm:$0xff]  }
  0xbe   :  { %7396 = vmatprep.mubr.msk.bf16.mxu1 %vm511_vm1, %v9339_v43 }
  0xbf   :  { %7689 = vmatmul.mubr.msk.bf16.gmra.mrb[56].mxu0 %vm511_vm1, %v3475_v63  ;;  %v8508_v63 = vld [vmem:[%s10600_s0 + $0xd0] sm:$0xff]  }
  0xc0   :  { %7692 = vmatprep.mubr.msk.bf16.mxu0 %vm511_vm1, %v3477_v39  ;;  %v8509_v39 = vld [vmem:[%s10600_s0 + $0xd8] sm:$0xff]  }
  0xc5   :  { %7397 = vmatmul.mubr.msk.bf16.gmra.mrb[28].mxu1 %vm511_vm1, %v9352_v19 }
  0xc6   :  { %7400 = vmatprep.mubr.msk.bf16.mxu1 %vm511_vm1, %v9359_v49 }
  0xc7   :  { %7693 = vmatmul.mubr.msk.bf16.gmra.mrb[60].mxu0 %vm511_vm1, %v3479_v50  ;;  %v8510_v50 = vld [vmem:[%s10600_s0 + $0xe0] sm:$0xff]  }
  0xc8   :  { %7698 = vmatprep.mubr.msk.bf16.mxu0 %vm511_vm1, %v8481_v52  ;;  %v1287_v52 = vsel %vm1262_vm2, %v1284_v41, %v1286_v30  ;;  %v1304_v41 = vrot.slane %v8605_v12, 1  ;;  %v9747_v12 = vld [vmem:[%s10600_s0 + $0x70] sm:$0xff]  }
  0xcd   :  { %7401 = vmatmul.mubr.msk.bf16.gmra.mrb[32].mxu1 %vm511_vm1, %v9374_v3 }
  0xce   :  { %7404 = vmatprep.mubr.msk.bf16.mxu1 %vm511_vm1, %v8932_v57  ;;  %v8487_v57 = vld [vmem:[%s10600_s0 + $0x38] sm:$0xff]  }
  0xcf   :  { %7699 = vmatmul.mubr.msk.bf16.vlgmr.msra.gmra.mrb[0].mxu0 %vm511_vm1, %v8483_v9  ;;  %v4616_v9 = vld [vmem:[%s10600_s0 + $0x10] sm:$0xf] }
  0xd0   :  { %7763 = vmatpush3.bf16.msra.mxu0 %v9072_v13  ;;  %7702 = vmatprep.mubr.msk.bf16.mxu0 %vm511_vm1, %v8484_v0  ;;  %v8488_v13 = vld [vmem:[%s10600_s0 + $0x40] sm:$0xff]   ;;  %v9566_v0 = vld [vmem:[%s10600_s0 + $0x14] sm:$0xf] }
  0xd1   :  { %7828 = vmatprep.subr.bf16.mxu0 %v9381_v56 }
  0xd5   :  { %7405 = vmatmul.mubr.msk.bf16.gmra.mrb[36].mxu1 %vm511_vm1, %v8939_v11  ;;  %v8489_v11 = vld [vmem:[%s10600_s0 + $0x48] sm:$0xff]  }
  0xd6   :  { %7408 = vmatprep.mubr.msk.bf16.mxu1 %vm511_vm1, %v8978_v22  ;;  %v8490_v22 = vld [vmem:[%s10600_s0 + $0x50] sm:$0xff]  }
  0xd7   :  { %7703 = vmatmul.mubr.msk.bf16.gmra.mrb[4].mxu0 %vm511_vm1, %v8485_v60  ;;  %v1289_v60 = vsel %vm1262_vm2, %v1286_v30, %v1288_v26  ;;  %v9669_v30 = vld [vmem:[%s10600_s0 + $0x48] sm:$0xff]  }
  0xd8   :  { %7706 = vmatprep.mubr.msk.bf16.mxu0 %vm511_vm1, %v8486_v61  ;;  %v6775_v61 = vcombine.low %v4616_v9, %v9566_v0 }
  0xdd   :  { %7409 = vmatmul.mubr.msk.bf16.gmra.mrb[40].mxu1 %vm511_vm1, %v8990_v29  ;;  %v8491_v29 = vld [vmem:[%s10600_s0 + $0x58] sm:$0xff]  }
  0xde   :  { %7412 = vmatprep.mubr.msk.bf16.mxu1 %vm511_vm1, %v9023_v48  ;;  %v8492_v48 = vld [vmem:[%s10600_s0 + $0x60] sm:$0xff]  }
  0xdf   :  { %7707 = vmatmul.mubr.msk.bf16.gmra.mrb[8].mxu0 %vm511_vm1, %v8487_v57  ;;  %v1290_v57 = vrot.slane %v9339_v43, 1 }
  0xe0   :  { %7710 = vmatprep.mubr.msk.bf16.mxu0 %vm511_vm1, %v8488_v13  ;;  %v1292_v13 = vrot.slane %v9352_v19, 1  ;;  %v8514_v19 = vld [vmem:[%s10600_s0 + $0x100] sm:$0xff]  }
  0xe2   :  { %v1293_v43 = vsel %vm1262_vm2, %v1290_v57, %v1292_v13 }
  0xe5   :  { %7413 = vmatmul.mubr.msk.bf16.gmra.mrb[44].mxu1 %vm511_vm1, %v9030_v51  ;;  %v8493_v51 = vld [vmem:[%s10600_s0 + $0x68] sm:$0xff]  }
  0xe6   :  { %7416 = vmatprep.mubr.msk.bf16.mxu1 %vm511_vm1, %v9044_v62  ;;  %v8494_v62 = vld [vmem:[%s10600_s0 + $0x70] sm:$0xff]  }
  0xe7   :  { %7711 = vmatmul.mubr.msk.bf16.gmra.mrb[12].mxu0 %vm511_vm1, %v8489_v11  ;;  %v9585_v11 = vld [vmem:[%s10600_s0 + $0x18] sm:$0xff]  }
  0xe8   :  { %7714 = vmatprep.mubr.msk.bf16.mxu0 %vm511_vm1, %v8490_v22  ;;  %v4849_v22 = vshll.u32 %v6775_v61, 16 }
  0xed   :  { %7417 = vmatmul.mubr.msk.bf16.gmra.mrb[48].mxu1 %vm511_vm1, %v9049_v53  ;;  %v1256_v53 = vld [vmem:[%s10600_s0] sm:$0xe] }
  0xee   :  { %7420 = vmatprep.mubr.msk.bf16.mxu1 %vm511_vm1, %v9055_v2  ;;  %v8495_v2 = vld [vmem:[%s10600_s0 + $0x78] sm:$0xff]  }
  0xef   :  { %7715 = vmatmul.mubr.msk.bf16.gmra.mrb[16].mxu0 %vm511_vm1, %v8491_v29  ;;  %v1291_v29 = vsel %vm1262_vm2, %v1288_v26, %v1290_v57  ;;  %v8606_v57 = vld [vmem:[%s10600_s0 + $0xb0] sm:$0xff]  }
  0xf0   :  { %7718 = vmatprep.mubr.msk.bf16.mxu0 %vm511_vm1, %v8492_v48  ;;  %v8513_v48 = vld [vmem:[%s10600_s0 + $0xf8] sm:$0xff]  }
  0xf5   :  { %7421 = vmatmul.mubr.msk.bf16.gmra.mrb[52].mxu1 %vm511_vm1, %v9060_v5  ;;  %v6511_v5 = vcombine.low %v1256_v53, %v8600_v20  ;;  %v4854_v53 = vshll.u32 %v9585_v11, 16  ;;  %v1296_v20 = vrot.slane %v9374_v3, 1  ;;  %v8515_v3 = vld [vmem:[%s10600_s0 + $0x108] sm:$0xff]  }
  0xf6   :  { %7424 = vmatprep.mubr.msk.bf16.mxu1 %vm511_vm1, %v9082_v58  ;;  %v8496_v58 = vld [vmem:[%s10600_s0 + $0x80] sm:$0xff]  }
  0xf7   :  { %7719 = vmatmul.mubr.msk.bf16.gmra.mrb[20].mxu0 %vm511_vm1, %v8493_v51  ;;  %v1263_v6 = vrot.slane %v6511_v5, 1  ;;  %v4847_v51 = vshrl.u32 %v6775_v61, 16  ;;  %v9604_v5 = vld [vmem:[%s10600_s0 + $0x20] sm:$0xff]   ;;  %v4902_v61 = vshll.u32 %v9669_v30, 16 }
  0xf8   :  { %7722 = vmatprep.mubr.msk.bf16.mxu0 %vm511_vm1, %v8494_v62  ;;  %v4851_v62 = vrot.slane %v4849_v22, 1 }
  0xf9   :  { %v1265_v14 = vsel %vm1262_vm2, %v1263_v6, %v1264_v7  ;;  %v4856_v6 = vrot.slane %v4854_v53, 1  ;;  %v9697_v53 = vld [vmem:[%s10600_s0 + $0x58] sm:$0xff]  }
  0xfd   :  { %7425 = vmatmul.mubr.msk.bf16.gmra.mrb[56].mxu1 %vm511_vm1, %v9099_v32  ;;  %v8500_v32 = vld [vmem:[%s10600_s0 + $0x90] sm:$0xff]  }
  0xfe   :  { %7428 = vmatprep.mubr.msk.bf16.mxu1 %vm511_vm1, %v9112_v28  ;;  %v1266_v28 = vrot.slane %v9197_v38, 1  ;;  %v1270_v38 = vrot.slane %v9222_v47, 1 }
  0xff   :  { %7723 = vmatmul.mubr.msk.bf16.gmra.mrb[24].mxu0 %vm511_vm1, %v8495_v2  ;;  %v1294_v2 = vrot.slane %v9359_v49, 1 }
 0x100   :  { %7726 = vmatprep.mubr.msk.bf16.mxu0 %vm511_vm1, %v8496_v58  ;;  %v1267_v15 = vsel %vm1262_vm2, %v1264_v7, %v1266_v28  ;;  %v1269_v17 = vsel %vm1262_vm2, %v1266_v28, %v1268_v25  ;;  %v1271_v55 = vsel %vm1262_vm2, %v1268_v25, %v1270_v38  ;;  %v1273_v47 = vsel %vm1262_vm2, %v1270_v38, %v1272_v45  ;;  %v9610_v7 = vld [vmem:[%s10600_s0 + $0x28] sm:$0xff]   ;;  %v8603_v38 = vld [vmem:[%s10600_s0 + $0x98] sm:$0xff]  }
 0x101   :  { %v4852_v58 = vor.u32 %v4851_v62, %v4847_v51  ;;  %v1295_v49 = vsel %vm1262_vm2, %v1292_v13, %v1294_v2  ;;  %v4866_v25 = vshrl.u32 %v9604_v5, 16  ;;  %v1300_v45 = vrot.slane %v8603_v38, 1 }
 0x102   :  { %v1306_v13 = vrot.slane %v8606_v57, 1  ;;  %v4904_v62 = vrot.slane %v4902_v61, 1  ;;  %v8612_v57 = vld [vmem:[%s10600_s0 + $0xe0] sm:$0xff]  }
 0x103   :  { %v4857_v28 = vsel %vm244_vm0, %v4852_v58, %v4856_v6 }
 0x105   :  { %7429 = vmatmul.mubr.msk.bf16.gmra.mrb[60].mxu1 %vm511_vm1, %v9120_v54  ;;  %v8502_v54 = vld [vmem:[%s10600_s0 + $0xa0] sm:$0xff]  }
 0x106   :  { %7434 = vmatprep.mubr.msk.bf16.mxu1 %vm511_vm1, %v1265_v14  ;;  %v4862_v14 = vshll.u32 %v9604_v5, 16 }
 0x107   :  { %7727 = vmatmul.mubr.msk.bf16.gmra.mrb[28].mxu0 %vm511_vm1, %v8497_v10  ;;  %v1297_v10 = vsel %vm1262_vm2, %v1294_v2, %v1296_v20  ;;  %v1307_v2 = vsel %vm1262_vm2, %v1304_v41, %v1306_v13 }
 0x108   :  { %7730 = vmatprep.mubr.msk.bf16.mxu0 %vm511_vm1, %v8500_v32  ;;  %v4858_v32 = vshrl.u32 %v9585_v11, 16 }
 0x10d   :  { %7435 = vmatmul.mubr.msk.bf16.vlgmr.msra.gmra.mrb[0].mxu1 %vm511_vm1, %v1267_v15  ;;  %v4870_v15 = vshll.u32 %v9610_v7, 16 }
 0x10e   :  { %7499 = vmatpush3.bf16.msra.mxu1 %v9182_v42  ;;  %7438 = vmatprep.mubr.msk.bf16.mxu1 %vm511_vm1, %v1269_v17  ;;  %v8503_v42 = vld [vmem:[%s10600_s0 + $0xa8] sm:$0xff]  }
 0x10f   :  { %7731 = vmatmul.mubr.msk.bf16.gmra.mrb[32].mxu0 %vm511_vm1, %v8501_v1  ;;  %7894 = vmatprep.subr.bf16.mxu1 %v9499_v44  ;;  %v8602_v1 = vld [vmem:[%s10600_s0 + $0x90] sm:$0xff]  }
 0x110   :  { %7734 = vmatprep.mubr.msk.bf16.mxu0 %vm511_vm1, %v8502_v54  ;;  %v1298_v17 = vrot.slane %v8602_v1, 1  ;;  %v4864_v54 = vrot.slane %v4862_v14, 1  ;;  %v4918_v14 = vshll.u32 %v9697_v53, 16 }
 0x112   :  { %v1299_v21 = vsel %vm1262_vm2, %v1296_v20, %v1298_v17 }
 0x115   :  { %7439 = vmatmul.mubr.msk.bf16.gmra.mrb[4].mxu1 %vm511_vm1, %v1271_v55  ;;  %v9634_v55 = vld [vmem:[%s10600_s0 + $0x30] sm:$0xff]  }
 0x116   :  { %7442 = vmatprep.mubr.msk.bf16.mxu1 %vm511_vm1, %v1273_v47  ;;  %v4868_v47 = vor.u32 %v4866_v25, %v4864_v54  ;;  %v4882_v8 = vshrl.u32 %v9634_v55, 16 }
 0x117   :  { %7735 = vmatmul.mubr.msk.bf16.gmra.mrb[36].mxu0 %vm511_vm1, %v8503_v42  ;;  %v4860_v42 = vor.u32 %v4858_v32, %v4856_v6  ;;  %v8608_v32 = vld [vmem:[%s10600_s0 + $0xc0] sm:$0xff]  }
 0x118   :  { %7738 = vmatprep.mubr.msk.bf16.mxu0 %vm511_vm1, %v8504_v59  ;;  %v4872_v59 = vrot.slane %v4870_v15, 1  ;;  %v8609_v15 = vld [vmem:[%s10600_s0 + $0xc8] sm:$0xff]  }
 0x119   :  { %v1312_v1 = vrot.slane %v8609_v15, 1 }
 0x11a   :  { %v4873_v16 = vsel %vm244_vm0, %v4868_v47, %v4872_v59 }
 0x11d   :  { %7443 = vmatmul.mubr.msk.bf16.gmra.mrb[8].mxu1 %vm511_vm1, %v1275_v36  ;;  %v1301_v36 = vsel %vm1262_vm2, %v1298_v17, %v1300_v45  ;;  %v9719_v17 = vld [vmem:[%s10600_s0 + $0x60] sm:$0xff]  }
 0x11e   :  { %7446 = vmatprep.mubr.msk.bf16.mxu1 %vm511_vm1, %v1277_v24  ;;  %v4865_v24 = vsel %vm244_vm0, %v4860_v42, %v4864_v54  ;;  %v9725_v42 = vld [vmem:[%s10600_s0 + $0x68] sm:$0xff]  }
 0x11f   :  { %7739 = vmatmul.mubr.msk.bf16.gmra.mrb[40].mxu0 %vm511_vm1, %v8505_v23  ;;  %v4878_v23 = vshll.u32 %v9634_v55, 16 }
 0x120   :  { %7742 = vmatprep.mubr.msk.bf16.mxu0 %vm511_vm1, %v8506_v40  ;;  %v4874_v40 = vshrl.u32 %v9610_v7, 16 }
 0x125   :  { %7447 = vmatmul.mubr.msk.bf16.gmra.mrb[12].mxu1 %vm511_vm1, %v1279_v31  ;;  %v4886_v31 = vshll.u32 %v9640_v37, 16 }
 0x126   :  { %7450 = vmatprep.mubr.msk.bf16.mxu1 %vm511_vm1, %v1281_v34 }
 0x127   :  { %7743 = vmatmul.mubr.msk.bf16.gmra.mrb[44].mxu0 %vm511_vm1, %v8507_v27  ;;  %v8604_v27 = vld [vmem:[%s10600_s0 + $0xa0] sm:$0xff]  }
 0x128   :  { %7746 = vmatprep.mubr.msk.bf16.mxu0 %vm511_vm1, %v8508_v63  ;;  %v1302_v34 = vrot.slane %v8604_v27, 1  ;;  %v4880_v63 = vrot.slane %v4878_v23, 1  ;;  %v4922_v23 = vshrl.u32 %v9697_v53, 16 }
 0x12a   :  { %v1303_v26 = vsel %vm1262_vm2, %v1300_v45, %v1302_v34  ;;  %v4920_v45 = vrot.slane %v4918_v14, 1 }
 0x12d   :  { %7451 = vmatmul.mubr.msk.bf16.gmra.mrb[16].mxu1 %vm511_vm1, %v1283_v4  ;;  %v9662_v4 = vld [vmem:[%s10600_s0 + $0x40] sm:$0xff]  }
 0x12e   :  { %7454 = vmatprep.mubr.msk.bf16.mxu1 %vm511_vm1, %v1285_v18  ;;  %v4884_v18 = vor.u32 %v4882_v8, %v4880_v63  ;;  %v4894_v9 = vshll.u32 %v9662_v4, 16  ;;  %v8610_v8 = vld [vmem:[%s10600_s0 + $0xd0] sm:$0xff]  }
 0x12f   :  { %7747 = vmatmul.mubr.msk.bf16.gmra.mrb[48].mxu0 %vm511_vm1, %v8509_v39  ;;  %v4876_v39 = vor.u32 %v4874_v40, %v4872_v59  ;;  %v4930_v40 = vshrl.u32 %v9719_v17, 16 }
 0x130   :  { %7750 = vmatprep.mubr.msk.bf16.mxu0 %vm511_vm1, %v8510_v50  ;;  %v4888_v50 = vrot.slane %v4886_v31, 1  ;;  %v4896_v22 = vrot.slane %v4894_v9, 1  ;;  %v1314_v31 = vrot.slane %v8610_v8, 1  ;;  %v4942_v9 = vshll.u32 %v9747_v12, 16 }
 0x135   :  { %7455 = vmatmul.mubr.msk.bf16.gmra.mrb[20].mxu1 %vm511_vm1, %v1287_v52  ;;  %v1305_v52 = vsel %vm1262_vm2, %v1302_v34, %v1304_v41  ;;  %v8611_v34 = vld [vmem:[%s10600_s0 + $0xd8] sm:$0xff]   ;;  %v4924_v41 = vor.u32 %v4922_v23, %v4920_v45 }
 0x136   :  { %7458 = vmatprep.mubr.msk.bf16.mxu1 %vm511_vm1, %v1289_v60  ;;  %v4889_v60 = vsel %vm244_vm0, %v4884_v18, %v4888_v50 }
 0x137   :  { %7751 = vmatmul.mubr.msk.bf16.gmra.mrb[52].mxu0 %vm511_vm1, %v8511_v46  ;;  %v4881_v46 = vsel %vm244_vm0, %v4876_v39, %v4880_v63  ;;  %v1316_v63 = vrot.slane %v8611_v34, 1 }
 0x138   :  { %7754 = vmatprep.mubr.msk.bf16.mxu0 %vm511_vm1, %v8512_v35  ;;  %v4898_v35 = vshrl.u32 %v9662_v4, 16 }
 0x13a   :  { %v4900_v51 = vor.u32 %v4898_v35, %v4896_v22  ;;  %v4946_v35 = vshrl.u32 %v9747_v12, 16 }
 0x13d   :  { %7459 = vmatmul.mubr.msk.bf16.gmra.mrb[24].mxu1 %vm511_vm1, %v1291_v29  ;;  %v8607_v29 = vld [vmem:[%s10600_s0 + $0xb8] sm:$0xff]  }
 0x13e   :  { %7462 = vmatprep.mubr.msk.bf16.mxu1 %vm511_vm1, %v1293_v43  ;;  %v9691_v43 = vld [vmem:[%s10600_s0 + $0x50] sm:$0xff]  }
 0x13f   :  { %7755 = vmatmul.mubr.msk.bf16.gmra.mrb[56].mxu0 %vm511_vm1, %v8513_v48  ;;  %v1308_v48 = vrot.slane %v8607_v29, 1  ;;  %v4910_v58 = vshll.u32 %v9691_v43, 16  ;;  %v8613_v29 = vld [vmem:[%s10600_s0 + $0xe8] sm:$0xff]  }
 0x140   :  { %7758 = vmatprep.mubr.msk.bf16.mxu0 %vm511_vm1, %v8514_v19 }
 0x141   :  { %v1309_v20 = vsel %vm1262_vm2, %v1306_v13, %v1308_v48  ;;  %v4912_v25 = vrot.slane %v4910_v58, 1  ;;  %v1318_v13 = vrot.slane %v8612_v57, 1 }
 0x143   :  { %v1319_v58 = vsel %vm1262_vm2, %v1316_v63, %v1318_v13 }
 0x145   :  { %7463 = vmatmul.mubr.msk.bf16.gmra.mrb[28].mxu1 %vm511_vm1, %v1295_v49  ;;  %v4906_v49 = vshrl.u32 %v9669_v30, 16 }
 0x146   :  { %7466 = vmatprep.mubr.msk.bf16.mxu1 %vm511_vm1, %v1297_v10  ;;  %v4914_v10 = vshrl.u32 %v9691_v43, 16 }
 0x147   :  { %7759 = vmatmul.mubr.msk.bf16.gmra.mrb[60].mxu0 %vm511_vm1, %v8515_v3  ;;  %v4905_v3 = vsel %vm244_vm0, %v4900_v51, %v4904_v62  ;;  %v4908_v54 = vor.u32 %v4906_v49, %v4904_v62 }
 0x148   :  { %7764 = vmatprep.mubr.msk.bf16.mxu0 %vm511_vm1, %v4857_v28  ;;  %v1310_v28 = vrot.slane %v8608_v32, 1  ;;  %v4916_v38 = vor.u32 %v4914_v10, %v4912_v25 }
 0x14a   :  { %v1311_v47 = vsel %vm1262_vm2, %v1308_v48, %v1310_v28  ;;  %v1313_v59 = vsel %vm1262_vm2, %v1310_v28, %v1312_v1  ;;  %v1320_v48 = vrot.slane %v8613_v29, 1 }
 0x14d   :  { %7467 = vmatmul.mubr.msk.bf16.gmra.mrb[32].mxu1 %vm511_vm1, %v1299_v21  ;;  %v4926_v21 = vshll.u32 %v9719_v17, 16 }
 0x14e   :  { %7470 = vmatprep.mubr.msk.bf16.mxu1 %vm511_vm1, %v1301_v36  ;;  %v4913_v36 = vsel %vm244_vm0, %v4908_v54, %v4912_v25  ;;  %v8614_v25 = vld [vmem:[%s10600_s0 + $0xf0] sm:$0xff]   ;;  %v8615_v54 = vld [vmem:[%s10600_s0 + $0xf8] sm:$0xff]  }
 0x14f   :  { %7765 = vmatmul.mubr.msk.bf16.vlgmr.msra.gmra.mrb[0].mxu0 %vm511_vm1, %v4865_v24  ;;  %v4921_v24 = vsel %vm244_vm0, %v4916_v38, %v4920_v45  ;;  %v4928_v27 = vrot.slane %v4926_v21, 1  ;;  %v1322_v15 = vrot.slane %v8614_v25, 1  ;;  %v1324_v38 = vrot.slane %v8615_v54, 1  ;;  %v9803_v45 = vld [vmem:[%s10600_s0 + $0x90] sm:$0xff]   ;;  %v9879_v54 = vld [vmem:[%s10600_s0 + $0xc0] sm:$0xff]  }
 0x150   :  { %7829 = vmatpush3.bf16.msra.mxu0 %v9381_v56  ;;  %7768 = vmatprep.mubr.msk.bf16.mxu0 %vm511_vm1, %v4873_v16  ;;  %v4890_v56 = vshrl.u32 %v9640_v37, 16  ;;  %v4934_v16 = vshll.u32 %v9725_v42, 16 }
 0x151   :  { %v4932_v39 = vor.u32 %v4930_v40, %v4928_v27  ;;  %v1323_v23 = vsel %vm1262_vm2, %v1320_v48, %v1322_v15  ;;  %v4974_v40 = vshll.u32 %v9803_v45, 16 }
 0x152   :  { %v4892_v19 = vor.u32 %v4890_v56, %v4888_v50  ;;  %v4936_v18 = vrot.slane %v4934_v16, 1  ;;  %v9753_v50 = vld [vmem:[%s10600_s0 + $0x78] sm:$0xff]   ;;  %v4938_v56 = vshrl.u32 %v9725_v42, 16 }
 0x153   :  { %v4950_v61 = vshll.u32 %v9753_v50, 16  ;;  %v4954_v10 = vshrl.u32 %v9753_v50, 16 }
 0x154   :  { %v4897_v6 = vsel %vm244_vm0, %v4892_v19, %v4896_v22  ;;  %v4944_v22 = vrot.slane %v4942_v9, 1  ;;  %v9775_v19 = vld [vmem:[%s10600_s0 + $0x80] sm:$0xff]   ;;  %v4940_v51 = vor.u32 %v4938_v56, %v4936_v18 }
 0x155   :  { %7471 = vmatmul.mubr.msk.bf16.gmra.mrb[36].mxu1 %vm511_vm1, %v1303_v26  ;;  %v1315_v26 = vsel %vm1262_vm2, %v1312_v1, %v1314_v31  ;;  %v4958_v49 = vshll.u32 %v9775_v19, 16  ;;  %v4962_v32 = vshrl.u32 %v9775_v19, 16 }
 0x156   :  { %7474 = vmatprep.mubr.msk.bf16.mxu1 %vm511_vm1, %v1305_v52  ;;  %v1317_v52 = vsel %vm1262_vm2, %v1314_v31, %v1316_v63  ;;  %v4948_v62 = vor.u32 %v4946_v35, %v4944_v22  ;;  %v8616_v63 = vld [vmem:[%s10600_s0 + $0x100] ss:$0 sps:$4 sm:$0x11]  }
 0x157   :  { %7769 = vmatmul.mubr.msk.bf16.gmra.mrb[4].mxu0 %vm511_vm1, %v4881_v46  ;;  %v4929_v46 = vsel %vm244_vm0, %v4924_v41, %v4928_v27  ;;  %v4960_v1 = vrot.slane %v4958_v49, 1  ;;  %v4978_v27 = vshrl.u32 %v9803_v45, 16  ;;  %v1326_v41 = vrot.slane %v8616_v63, 1  ;;  %v9861_v49 = vld [vmem:[%s10600_s0 + $0xb8] sm:$0xff]   ;;  %v9905_v63 = vld [vmem:[%s10600_s0 + $0xd0] sm:$0xff]  }
 0x158   :  { %7772 = vmatprep.mubr.msk.bf16.mxu0 %vm511_vm1, %v4889_v60  ;;  %v4937_v60 = vsel %vm244_vm0, %v4932_v39, %v4936_v18  ;;  %v4976_v39 = vrot.slane %v4974_v40, 1  ;;  %v9828_v18 = vld [vmem:[%s10600_s0 + $0xa0] sm:$0xff]  }
 0x159   :  { %v1327_v56 = vsel %vm1262_vm2, %v1324_v38, %v1326_v41  ;;  %v4990_v35 = vshll.u32 %v9828_v18, 16 }
 0x15d   :  { %7475 = vmatmul.mubr.msk.bf16.gmra.mrb[40].mxu1 %vm511_vm1, %v1307_v2  ;;  %v4952_v2 = vrot.slane %v4950_v61, 1 }
 0x15e   :  { %7478 = vmatprep.mubr.msk.bf16.mxu1 %vm511_vm1, %v1309_v20  ;;  %v9781_v20 = vld [vmem:[%s10600_s0 + $0x88] sm:$0xff]  }
 0x15f   :  { %7773 = vmatmul.mubr.msk.bf16.gmra.mrb[8].mxu0 %vm511_vm1, %v4897_v6  ;;  %v1321_v6 = vsel %vm1262_vm2, %v1318_v13, %v1320_v48  ;;  %v4953_v14 = vsel %vm244_vm0, %v4948_v62, %v4952_v2  ;;  %v4966_v28 = vshll.u32 %v9781_v20, 16  ;;  %v4970_v8 = vshrl.u32 %v9781_v20, 16 }
 0x160   :  { %7776 = vmatprep.mubr.msk.bf16.mxu0 %vm511_vm1, %v4905_v3  ;;  %v4945_v3 = vsel %vm244_vm0, %v4940_v51, %v4944_v22  ;;  %v4994_v22 = vshrl.u32 %v9828_v18, 16  ;;  %v4992_v48 = vrot.slane %v4990_v35, 1  ;;  %v9852_v51 = vld [vmem:[%s10600_s0 + $0xb0] sm:$0xff]  }
 0x161   :  { %v4968_v21 = vrot.slane %v4966_v28, 1  ;;  %v5010_v25 = vshrl.u32 %v9852_v51, 16 }
 0x165   :  { %7479 = vmatmul.mubr.msk.bf16.gmra.mrb[44].mxu1 %vm511_vm1, %v1311_v47  ;;  %v4956_v47 = vor.u32 %v4954_v10, %v4952_v2  ;;  %v8536_v2 = vld [vmem:[%s10600_s0 + $0x10] sm:$0xff]   ;;  %v5006_v10 = vshll.u32 %v9852_v51, 16 }
 0x166   :  { %7482 = vmatprep.mubr.msk.bf16.mxu1 %vm511_vm1, %v1313_v59  ;;  %v4964_v59 = vor.u32 %v4962_v32, %v4960_v1 }
 0x167   :  { %7777 = vmatmul.mubr.msk.bf16.gmra.mrb[12].mxu0 %vm511_vm1, %v4913_v36  ;;  %v9809_v36 = vld [vmem:[%s10600_s0 + $0x98] sm:$0xff]   ;;  %v4961_v16 = vsel %vm244_vm0, %v4956_v47, %v4960_v1  ;;  %v5008_v1 = vrot.slane %v5006_v10, 1  ;;  %v8540_v47 = vld [vmem:[%s10600_s0 + $0x20] sm:$0xff]   ;;  %v8550_v10 = vld [vmem:[%s10600_s0 + $0x48] sm:$0xff]  }
 0x168   :  { %7780 = vmatprep.mubr.msk.bf16.mxu0 %vm511_vm1, %v4921_v24  ;;  %v1325_v24 = vsel %vm1262_vm2, %v1322_v15, %v1324_v38  ;;  %v4969_v31 = vsel %vm244_vm0, %v4964_v59, %v4968_v21  ;;  %v4982_v34 = vshll.u32 %v9809_v36, 16  ;;  %v4986_v57 = vshrl.u32 %v9809_v36, 16 }
 0x169   :  { %v5014_v15 = vshll.u32 %v9861_v49, 16  ;;  %v5012_v59 = vor.u32 %v5010_v25, %v5008_v1 }
 0x16a   :  { %v4984_v9 = vrot.slane %v4982_v34, 1 }
 0x16c   :  { %v4988_v62 = vor.u32 %v4986_v57, %v4984_v9 }
 0x16d   :  { %7483 = vmatmul.mubr.msk.bf16.gmra.mrb[48].mxu1 %vm511_vm1, %v1315_v26  ;;  %v4972_v26 = vor.u32 %v4970_v8, %v4968_v21  ;;  %v5016_v21 = vrot.slane %v5014_v15, 1 }
 0x16e   :  { %7486 = vmatprep.mubr.msk.bf16.mxu1 %vm511_vm1, %v1317_v52  ;;  %v4980_v52 = vor.u32 %v4978_v27, %v4976_v39 }
 0x16f   :  { %7781 = vmatmul.mubr.msk.bf16.gmra.mrb[16].mxu0 %vm511_vm1, %v4929_v46  ;;  %v9834_v46 = vld [vmem:[%s10600_s0 + $0xa8] sm:$0xff]   ;;  %v4977_v61 = vsel %vm244_vm0, %v4972_v26, %v4976_v39  ;;  %v5017_v8 = vsel %vm244_vm0, %v5012_v59, %v5016_v21  ;;  %v8544_v39 = vld [vmem:[%s10600_s0 + $0x30] sm:$0xff]  }
 0x170   :  { %7784 = vmatprep.mubr.msk.bf16.mxu0 %vm511_vm1, %v4937_v60  ;;  %v8534_v60 = vld [vmem:[%s10600_s0 + $0x8] sm:$0xff]   ;;  %v4985_v13 = vsel %vm244_vm0, %v4980_v52, %v4984_v9  ;;  %v4998_v29 = vshll.u32 %v9834_v46, 16  ;;  %v5002_v32 = vshrl.u32 %v9834_v46, 16  ;;  %v9914_v9 = vld [vmem:[%s10600_s0 + $0xd8] sm:$0xff]  }
 0x175   :  { %7487 = vmatmul.mubr.msk.bf16.gmra.mrb[52].mxu1 %vm511_vm1, %v1319_v58  ;;  %v4996_v58 = vor.u32 %v4994_v22, %v4992_v48  ;;  %v5046_v22 = vshll.u32 %v9914_v9, 16 }
 0x176   :  { %7490 = vmatprep.mubr.msk.bf16.mxu1 %vm511_vm1, %v1321_v6  ;;  %v5000_v6 = vrot.slane %v4998_v29, 1 }
 0x177   :  { %7785 = vmatmul.mubr.msk.bf16.gmra.mrb[20].mxu0 %vm511_vm1, %v4945_v3  ;;  %v8538_v3 = vld [vmem:[%s10600_s0 + $0x18] sm:$0xff]  }
 0x178   :  { %7788 = vmatprep.mubr.msk.bf16.mxu0 %vm511_vm1, %v4953_v14  ;;  %v4993_v14 = vsel %vm244_vm0, %v4988_v62, %v4992_v48  ;;  %v5001_v28 = vsel %vm244_vm0, %v4996_v58, %v5000_v6  ;;  %v5004_v38 = vor.u32 %v5002_v32, %v5000_v6  ;;  %v9931_v48 = vld [vmem:[%s10600_s0 + $0xe0] sm:$0xff]   ;;  %v5048_v6 = vrot.slane %v5046_v22, 1 }
 0x179   :  { %v5058_v15 = vshrl.u32 %v9931_v48, 16 }
 0x17a   :  { %v5009_v40 = vsel %vm244_vm0, %v5004_v38, %v5008_v1 }
 0x17d   :  { %7491 = vmatmul.mubr.msk.bf16.gmra.mrb[56].mxu1 %vm511_vm1, %v1323_v23  ;;  %v8542_v23 = vld [vmem:[%s10600_s0 + $0x28] sm:$0xff]  }
 0x17e   :  { %7494 = vmatprep.mubr.msk.bf16.mxu1 %vm511_vm1, %v1325_v24  ;;  %v5022_v24 = vshll.u32 %v9879_v54, 16 }
 0x17f   :  { %7789 = vmatmul.mubr.msk.bf16.gmra.mrb[24].mxu0 %vm511_vm1, %v4961_v16  ;;  %v5018_v16 = vshrl.u32 %v9861_v49, 16 }
 0x180   :  { %7792 = vmatprep.mubr.msk.bf16.mxu0 %vm511_vm1, %v4969_v31  ;;  %v5026_v31 = vshrl.u32 %v9879_v54, 16  ;;  %v5024_v34 = vrot.slane %v5022_v24, 1 }
 0x181   :  { %v5020_v41 = vor.u32 %v5018_v16, %v5016_v21  ;;  %v8552_v21 = vld [vmem:[%s10600_s0 + $0x50] sm:$0xff]   ;;  %v8554_v16 = vld [vmem:[%s10600_s0 + $0x58] sm:$0xff]  }
 0x182   :  { %v5028_v26 = vor.u32 %v5026_v31, %v5024_v34 }
 0x183   :  { %v5025_v35 = vsel %vm244_vm0, %v5020_v41, %v5024_v34 }
 0x185   :  { %7495 = vmatmul.mubr.msk.bf16.gmra.mrb[60].mxu1 %vm511_vm1, %v1327_v56  ;;  %v8546_v56 = vld [vmem:[%s10600_s0 + $0x38] sm:$0xff]  }
 0x186   :  { %7500 = vmatprep.mubr.msk.bf16.mxu1 %vm511_vm1, %v8534_v60  ;;  %v5038_v60 = vshll.u32 %v9905_v63, 16 }
 0x187   :  { %7793 = vmatmul.mubr.msk.bf16.gmra.mrb[28].mxu0 %vm511_vm1, %v4977_v61 }
 0x188   :  { %7796 = vmatprep.mubr.msk.bf16.mxu0 %vm511_vm1, %v4985_v13  ;;  %v5042_v13 = vshrl.u32 %v9905_v63, 16  ;;  %v5040_v29 = vrot.slane %v5038_v60, 1  ;;  %v8556_v60 = vld [vmem:[%s10600_s0 + $0x60] sm:$0xff]  }
 0x18a   :  { %v5044_v58 = vor.u32 %v5042_v13, %v5040_v29  ;;  %v8558_v13 = vld [vmem:[%s10600_s0 + $0x68] sm:$0xff]  }
 0x18c   :  { %v5049_v25 = vsel %vm244_vm0, %v5044_v58, %v5048_v6 }
 0x18d   :  { %7501 = vmatmul.mubr.msk.bf16.vlgmr.msra.gmra.mrb[0].mxu1 %vm511_vm1, %v8536_v2  ;;  %v8548_v2 = vld [vmem:[%s10600_s0 + $0x40] sm:$0xff]  }
 0x18e   :  { %7895 = vmatpush3.bf16.msra.mxu1 %v9499_v44  ;;  %7504 = vmatprep.mubr.msk.bf16.mxu1 %vm511_vm1, %v8538_v3  ;;  %v9888_v44 = vld [vmem:[%s10600_s0 + $0xc8] sm:$0xff]  }
 0x18f   :  { %7797 = vmatmul.mubr.msk.bf16.gmra.mrb[32].mxu0 %vm511_vm1, %v4993_v14  ;;  %v5030_v27 = vshll.u32 %v9888_v44, 16  ;;  %v5034_v61 = vshrl.u32 %v9888_v44, 16  ;;  %v9940_v3 = vld [vmem:[%s10600_s0 + $0xe8] sm:$0xff]   ;;  %v5054_v14 = vshll.u32 %v9931_v48, 16 }
 0x190   :  { %7800 = vmatprep.mubr.msk.bf16.mxu0 %vm511_vm1, %v5001_v28  ;;  %v5050_v28 = vshrl.u32 %v9914_v9, 16  ;;  %v5062_v1 = vshll.u32 %v9940_v3, 16 }
 0x191   :  { %v5032_v52 = vrot.slane %v5030_v27, 1  ;;  %v5056_v38 = vrot.slane %v5054_v14, 1  ;;  %v5066_v27 = vshrl.u32 %v9940_v3, 16 }
 0x192   :  { %v5052_v59 = vor.u32 %v5050_v28, %v5048_v6  ;;  %v5064_v24 = vrot.slane %v5062_v1, 1  ;;  %v8560_v28 = vld [vmem:[%s10600_s0 + $0x70] sm:$0xff]   ;;  %v8562_v1 = vld [vmem:[%s10600_s0 + $0x78] sm:$0xff]  }
 0x193   :  { %v5033_v57 = vsel %vm244_vm0, %v5028_v26, %v5032_v52  ;;  %v5036_v62 = vor.u32 %v5034_v61, %v5032_v52  ;;  %v9983_v52 = vld [vmem:[%s10600_s0 + $0x100] sm:$0xff]  }
 0x194   :  { %v5057_v31 = vsel %vm244_vm0, %v5052_v59, %v5056_v38  ;;  %v5086_v22 = vshll.u32 %v9983_v52, 16  ;;  %v5090_v58 = vshrl.u32 %v9983_v52, 16 }
 0x195   :  { %7505 = vmatmul.mubr.msk.bf16.gmra.mrb[4].mxu1 %vm511_vm1, %v8540_v47  ;;  %v5041_v32 = vsel %vm244_vm0, %v5036_v62, %v5040_v29  ;;  %v9957_v47 = vld [vmem:[%s10600_s0 + $0xf0] sm:$0xff]  }
 0x196   :  { %7508 = vmatprep.mubr.msk.bf16.mxu1 %vm511_vm1, %v8542_v23  ;;  %v5060_v23 = vor.u32 %v5058_v15, %v5056_v38  ;;  %v5074_v41 = vshrl.u32 %v9957_v47, 16  ;;  %v5561_v38 = vld [vmem:[%s10600_s0 + $0x10] sm:$0xe] }
 0x197   :  { %7801 = vmatmul.mubr.msk.bf16.gmra.mrb[36].mxu0 %vm511_vm1, %v5009_v40  ;;  %v9966_v40 = vld [vmem:[%s10600_s0 + $0xf8] sm:$0xff]  }
 0x198   :  { %7804 = vmatprep.mubr.msk.bf16.mxu0 %vm511_vm1, %v5017_v8  ;;  %v5070_v8 = vshll.u32 %v9957_v47, 16  ;;  %v5065_v34 = vsel %vm244_vm0, %v5060_v23, %v5064_v24  ;;  %v5082_v62 = vshrl.u32 %v9966_v40, 16 }
 0x19a   :  { %v5072_v26 = vrot.slane %v5070_v8, 1 }
 0x19d   :  { %7509 = vmatmul.mubr.msk.bf16.gmra.mrb[8].mxu1 %vm511_vm1, %v8544_v39  ;;  %v5078_v39 = vshll.u32 %v9966_v40, 16 }
 0x19e   :  { %7512 = vmatprep.mubr.msk.bf16.mxu1 %vm511_vm1, %v8546_v56  ;;  %v5068_v56 = vor.u32 %v5066_v27, %v5064_v24  ;;  %v8564_v27 = vld [vmem:[%s10600_s0 + $0x80] sm:$0xff]  }
 0x19f   :  { %7805 = vmatmul.mubr.msk.bf16.gmra.mrb[40].mxu0 %vm511_vm1, %v5025_v35  ;;  %v5076_v35 = vor.u32 %v5074_v41, %v5072_v26  ;;  %v5080_v61 = vrot.slane %v5078_v39, 1  ;;  %v5568_v41 = vrot.slane %v9585_v11, 1  ;;  %v8566_v39 = vld [vmem:[%s10600_s0 + $0x88] sm:$0xff]   ;;  %v8568_v11 = vld [vmem:[%s10600_s0 + $0x90] sm:$0xff]  }
 0x1a0   :  { %7808 = vmatprep.mubr.msk.bf16.mxu0 %vm511_vm1, %v5033_v57  ;;  %v9992_v57 = vld [vmem:[%s10600_s0 + $0x108] sm:$0xff]   ;;  %v5073_v29 = vsel %vm244_vm0, %v5068_v56, %v5072_v26  ;;  %v5570_v56 = vrot.slane %v9604_v5, 1  ;;  %v5574_v5 = vrot.slane %v9634_v55, 1  ;;  %v5578_v55 = vrot.slane %v9662_v4, 1 }
 0x1a1   :  { %v5094_v6 = vshll.u32 %v9992_v57, 16  ;;  %v5084_v14 = vor.u32 %v5082_v62, %v5080_v61  ;;  %v5582_v4 = vrot.slane %v9691_v43, 1  ;;  %v5586_v43 = vrot.slane %v9719_v17, 1 }
 0x1a2   :  { %v5590_v17 = vrot.slane %v9747_v12, 1  ;;  %v5594_v12 = vrot.slane %v9775_v19, 1 }
 0x1a3   :  { %v5096_v15 = vrot.slane %v5094_v6, 1  ;;  %v8573_v6 = vld [vmem:[%s10600_s0 + $0xb8] sm:$0xff]  }
 0x1a5   :  { %7513 = vmatmul.mubr.msk.bf16.gmra.mrb[12].mxu1 %vm511_vm1, %v8548_v2  ;;  %v5081_v2 = vsel %vm244_vm0, %v5076_v35, %v5080_v61  ;;  %v8569_v35 = vld [vmem:[%s10600_s0 + $0x98] sm:$0xff]   ;;  %v5571_v61 = vsel %vm1262_vm2, %v5568_v41, %v5570_v56 }
 0x1a6   :  { %7516 = vmatprep.mubr.msk.bf16.mxu1 %vm511_vm1, %v8550_v10  ;;  %v5088_v10 = vrot.slane %v5086_v22, 1  ;;  %v5576_v22 = vrot.slane %v9640_v37, 1  ;;  %v8572_v37 = vld [vmem:[%s10600_s0 + $0xb0] sm:$0xff]  }
 0x1a7   :  { %7809 = vmatmul.mubr.msk.bf16.gmra.mrb[44].mxu0 %vm511_vm1, %v5041_v32  ;;  %v10010_v32 = vld [vmem:[%s10600_s0 + $0x110] ss:$0 sps:$4 sm:$0x11]  }
 0x1a8   :  { %7812 = vmatprep.mubr.msk.bf16.mxu0 %vm511_vm1, %v5049_v25  ;;  %v5092_v25 = vor.u32 %v5090_v58, %v5088_v10  ;;  %v5089_v59 = vsel %vm244_vm0, %v5084_v14, %v5088_v10  ;;  %v5102_v23 = vshll.u32 %v10010_v32, 16  ;;  %v5580_v58 = vrot.slane %v9669_v30, 1  ;;  %v8574_v30 = vld [vmem:[%s10600_s0 + $0xc0] sm:$0xff]  }
 0x1a9   :  { %v5579_v10 = vsel %vm1262_vm2, %v5576_v22, %v5578_v55 }
 0x1aa   :  { %v5097_v24 = vsel %vm244_vm0, %v5092_v25, %v5096_v15  ;;  %v5581_v14 = vsel %vm1262_vm2, %v5578_v55, %v5580_v58  ;;  %v8575_v25 = vld [vmem:[%s10600_s0 + $0xc8] sm:$0xff]  }
 0x1ad   :  { %7517 = vmatmul.mubr.msk.bf16.gmra.mrb[16].mxu1 %vm511_vm1, %v8552_v21  ;;  %v5098_v21 = vshrl.u32 %v9992_v57, 16 }
 0x1ae   :  { %7520 = vmatprep.mubr.msk.bf16.mxu1 %vm511_vm1, %v8554_v16  ;;  %v6841_v16 = vcombine.low %v5561_v38, %v9566_v0  ;;  %v5588_v38 = vrot.slane %v9725_v42, 1  ;;  %v8578_v42 = vld [vmem:[%s10600_s0 + $0xe0] sm:$0xff]  }
 0x1af   :  { %7813 = vmatmul.mubr.msk.bf16.gmra.mrb[48].mxu0 %vm511_vm1, %v5057_v31  ;;  %v5100_v8 = vor.u32 %v5098_v21, %v5096_v15  ;;  %v5104_v31 = vrot.slane %v5102_v23, 1  ;;  %v5583_v15 = vsel %vm1262_vm2, %v5580_v58, %v5582_v4 }
 0x1b0   :  { %7816 = vmatprep.mubr.msk.bf16.mxu0 %vm511_vm1, %v5065_v34  ;;  %v5567_v34 = vrot.slane %v6841_v16, 1  ;;  %v5589_v23 = vsel %vm1262_vm2, %v5586_v43, %v5588_v38  ;;  %v8579_v16 = vld [vmem:[%s10600_s0 + $0xe8] sm:$0xff]  }
 0x1b1   :  { %v5105_v0 = vsel %vm244_vm0, %v5100_v8, %v5104_v31  ;;  %v5591_v8 = vsel %vm1262_vm2, %v5588_v38, %v5590_v17 }
 0x1b2   :  { %v5569_v26 = vsel %vm1262_vm2, %v5567_v34, %v5568_v41  ;;  %v8581_v34 = vld [vmem:[%s10600_s0 + $0xf8] sm:$0xff]   ;;  %v8617_v41 = vld [vmem:[%s10600_s0 + $0x88] sm:$0xff]  }
 0x1b5   :  { %7521 = vmatmul.mubr.msk.bf16.gmra.mrb[20].mxu1 %vm511_vm1, %v8556_v60  ;;  %v5572_v60 = vrot.slane %v9610_v7, 1  ;;  %v8570_v7 = vld [vmem:[%s10600_s0 + $0xa0] sm:$0xff]  }
 0x1b6   :  { %7524 = vmatprep.mubr.msk.bf16.mxu1 %vm511_vm1, %v8558_v13 }
 0x1b7   :  { %7817 = vmatmul.mubr.msk.bf16.gmra.mrb[52].mxu0 %vm511_vm1, %v5073_v29  ;;  %v5573_v13 = vsel %vm1262_vm2, %v5570_v56, %v5572_v60  ;;  %v8571_v29 = vld [vmem:[%s10600_s0 + $0xa8] sm:$0xff]   ;;  %v5575_v62 = vsel %vm1262_vm2, %v5572_v60, %v5574_v5  ;;  %v5598_v60 = vrot.slane %v9803_v45, 1 }
 0x1b8   :  { %7820 = vmatprep.mubr.msk.bf16.mxu0 %vm511_vm1, %v5081_v2  ;;  %v5577_v2 = vsel %vm1262_vm2, %v5574_v5, %v5576_v22 }
 0x1bd   :  { %7525 = vmatmul.mubr.msk.bf16.gmra.mrb[24].mxu1 %vm511_vm1, %v8560_v28  ;;  %v5584_v28 = vrot.slane %v9697_v53, 1  ;;  %v8576_v53 = vld [vmem:[%s10600_s0 + $0xd0] sm:$0xff]  }
 0x1be   :  { %7528 = vmatprep.mubr.msk.bf16.mxu1 %vm511_vm1, %v8562_v1 }
 0x1bf   :  { %7821 = vmatmul.mubr.msk.bf16.gmra.mrb[56].mxu0 %vm511_vm1, %v5089_v59  ;;  %v5585_v1 = vsel %vm1262_vm2, %v5582_v4, %v5584_v28  ;;  %v8577_v59 = vld [vmem:[%s10600_s0 + $0xd8] sm:$0xff]   ;;  %v5587_v21 = vsel %vm1262_vm2, %v5584_v28, %v5586_v43 }
 0x1c0   :  { %7824 = vmatprep.mubr.msk.bf16.mxu0 %vm511_vm1, %v5097_v24  ;;  %v5592_v24 = vrot.slane %v9753_v50, 1  ;;  %v8580_v50 = vld [vmem:[%s10600_s0 + $0xf0] sm:$0xff]  }
 0x1c2   :  { %v5593_v31 = vsel %vm1262_vm2, %v5590_v17, %v5592_v24  ;;  %v5608_v17 = vrot.slane %v9861_v49, 1 }
 0x1c5   :  { %7529 = vmatmul.mubr.msk.bf16.gmra.mrb[28].mxu1 %vm511_vm1, %v8564_v27  ;;  %v5596_v27 = vrot.slane %v9781_v20, 1 }
 0x1c6   :  { %7532 = vmatprep.mubr.msk.bf16.mxu1 %vm511_vm1, %v8566_v39  ;;  %v2826_v39 = vshrl.u32 %v8617_v41, 16 }
 0x1c7   :  { %7825 = vmatmul.mubr.msk.bf16.gmra.mrb[60].mxu0 %vm511_vm1, %v5105_v0  ;;  %v8618_v0 = vld [vmem:[%s10600_s0 + $0x90] sm:$0xff]   ;;  %v5597_v20 = vsel %vm1262_vm2, %v5594_v12, %v5596_v27 }
 0x1c8   :  { %7830 = vmatprep.mubr.msk.bf16.mxu0 %vm511_vm1, %v5569_v26  ;;  %v2830_v19 = vshll.u32 %v8618_v0, 16  ;;  %v5595_v26 = vsel %vm1262_vm2, %v5592_v24, %v5594_v12  ;;  %v2828_v56 = vor.u32 %v2826_v39, %v8949_v33 }
 0x1cd   :  { %7533 = vmatmul.mubr.msk.bf16.gmra.mrb[32].mxu1 %vm511_vm1, %v8568_v11  ;;  %v2832_v11 = vrot.slane %v2830_v19, 1  ;;  %v5610_v19 = vrot.slane %v9879_v54, 1 }
 0x1ce   :  { %7536 = vmatprep.mubr.msk.bf16.mxu1 %vm511_vm1, %v8569_v35  ;;  %v8582_v35 = vld [vmem:[%s10600_s0 + $0x100] sm:$0xff]  }
 0x1cf   :  { %7831 = vmatmul.mubr.msk.bf16.vlgmr.msra.gmra.mrb[0].mxu0 %vm511_vm1, %v5571_v61  ;;  %v5600_v61 = vrot.slane %v9809_v36, 1  ;;  %v2833_v22 = vsel %vm244_vm0, %v2828_v56, %v2832_v11  ;;  %v5611_v54 = vsel %vm1262_vm2, %v5608_v17, %v5610_v19 }
 0x1d0   :  { %7834 = vmatprep.mubr.msk.bf16.mxu0 %vm511_vm1, %v5573_v13  ;;  %v8619_v13 = vld [vmem:[%s10600_s0 + $0x98] sm:$0xff]  }
 0x1d1   :  { %v2838_v5 = vshll.u32 %v8619_v13, 16  ;;  %v2842_v33 = vshrl.u32 %v8619_v13, 16  ;;  %v5601_v36 = vsel %vm1262_vm2, %v5598_v60, %v5600_v61  ;;  %v8626_v13 = vld [vmem:[%s10600_s0 + $0xd0] sm:$0xff]  }
 0x1d5   :  { %7537 = vmatmul.mubr.msk.bf16.gmra.mrb[36].mxu1 %vm511_vm1, %v8570_v7  ;;  %v2834_v7 = vshrl.u32 %v8618_v0, 16 }
 0x1d6   :  { %7540 = vmatprep.mubr.msk.bf16.mxu1 %vm511_vm1, %v8571_v29  ;;  %v8620_v29 = vld [vmem:[%s10600_s0 + $0xa0] sm:$0xff]  }
 0x1d7   :  { %7835 = vmatmul.mubr.msk.bf16.gmra.mrb[4].mxu0 %vm511_vm1, %v5575_v62  ;;  %v2846_v45 = vshll.u32 %v8620_v29, 16  ;;  %v5599_v62 = vsel %vm1262_vm2, %v5596_v27, %v5598_v60  ;;  %v2836_v55 = vor.u32 %v2834_v7, %v2832_v11  ;;  %v2850_v28 = vshrl.u32 %v8620_v29, 16 }
 0x1d8   :  { %7838 = vmatprep.mubr.msk.bf16.mxu0 %vm511_vm1, %v5577_v2  ;;  %v2840_v2 = vrot.slane %v2838_v5, 1  ;;  %v2894_v5 = vshll.u32 %v8626_v13, 16 }
 0x1d9   :  { %v2848_v58 = vrot.slane %v2846_v45, 1  ;;  %v5614_v45 = vrot.slane %v9905_v63, 1 }
 0x1da   :  { %v2896_v29 = vrot.slane %v2894_v5, 1 }
 0x1db   :  { %v2852_v38 = vor.u32 %v2850_v28, %v2848_v58 }
 0x1dd   :  { %7541 = vmatmul.mubr.msk.bf16.gmra.mrb[40].mxu1 %vm511_vm1, %v8572_v37  ;;  %v2844_v37 = vor.u32 %v2842_v33, %v2840_v2 }
 0x1de   :  { %7544 = vmatprep.mubr.msk.bf16.mxu1 %vm511_vm1, %v8573_v6  ;;  %v5602_v6 = vrot.slane %v9828_v18, 1 }
 0x1df   :  { %7839 = vmatmul.mubr.msk.bf16.gmra.mrb[8].mxu0 %vm511_vm1, %v5579_v10  ;;  %v5604_v10 = vrot.slane %v9834_v46, 1 }
 0x1e0   :  { %7842 = vmatprep.mubr.msk.bf16.mxu0 %vm511_vm1, %v5581_v14  ;;  %v8621_v14 = vld [vmem:[%s10600_s0 + $0xa8] sm:$0xff]   ;;  %v5603_v18 = vsel %vm1262_vm2, %v5600_v61, %v5602_v6 }
 0x1e1   :  { %v2854_v4 = vshll.u32 %v8621_v14, 16  ;;  %v5605_v46 = vsel %vm1262_vm2, %v5602_v6, %v5604_v10 }
 0x1e5   :  { %7545 = vmatmul.mubr.msk.bf16.gmra.mrb[44].mxu1 %vm511_vm1, %v8574_v30  ;;  %v2841_v30 = vsel %vm244_vm0, %v2836_v55, %v2840_v2 }
 0x1e6   :  { %7548 = vmatprep.mubr.msk.bf16.mxu1 %vm511_vm1, %v8575_v25  ;;  %v2849_v25 = vsel %vm244_vm0, %v2844_v37, %v2848_v58  ;;  %v2898_v37 = vshrl.u32 %v8626_v13, 16 }
 0x1e7   :  { %7843 = vmatmul.mubr.msk.bf16.gmra.mrb[12].mxu0 %vm511_vm1, %v5583_v15  ;;  %v2858_v15 = vshrl.u32 %v8621_v14, 16 }
 0x1e8   :  { %7846 = vmatprep.mubr.msk.bf16.mxu0 %vm511_vm1, %v5585_v1  ;;  %v8622_v1 = vld [vmem:[%s10600_s0 + $0xb0] sm:$0xff]  }
 0x1e9   :  { %v2862_v43 = vshll.u32 %v8622_v1, 16 }
 0x1ed   :  { %7549 = vmatmul.mubr.msk.bf16.gmra.mrb[48].mxu1 %vm511_vm1, %v8576_v53  ;;  %v2856_v53 = vrot.slane %v2854_v4, 1 }
 0x1ee   :  { %7552 = vmatprep.mubr.msk.bf16.mxu1 %vm511_vm1, %v8577_v59 }
 0x1ef   :  { %7847 = vmatmul.mubr.msk.bf16.gmra.mrb[16].mxu0 %vm511_vm1, %v5587_v21  ;;  %v2860_v59 = vor.u32 %v2858_v15, %v2856_v53  ;;  %v2864_v21 = vrot.slane %v2862_v43, 1  ;;  %v5618_v15 = vrot.slane %v9931_v48, 1  ;;  %v8629_v43 = vld [vmem:[%s10600_s0 + $0xe8] sm:$0xff]  }
 0x1f0   :  { %7850 = vmatprep.mubr.msk.bf16.mxu0 %vm511_vm1, %v5589_v23  ;;  %v5606_v23 = vrot.slane %v9852_v51, 1 }
 0x1f2   :  { %v5607_v51 = vsel %vm1262_vm2, %v5604_v10, %v5606_v23  ;;  %v5609_v49 = vsel %vm1262_vm2, %v5606_v23, %v5608_v17  ;;  %v8628_v10 = vld [vmem:[%s10600_s0 + $0xe0] sm:$0xff]  }
 0x1f3   :  { %v2910_v14 = vshll.u32 %v8628_v10, 16 }
 0x1f5   :  { %7553 = vmatmul.mubr.msk.bf16.gmra.mrb[52].mxu1 %vm511_vm1, %v8578_v42  ;;  %v8623_v42 = vld [vmem:[%s10600_s0 + $0xb8] sm:$0xff]  }
 0x1f6   :  { %7556 = vmatprep.mubr.msk.bf16.mxu1 %vm511_vm1, %v8579_v16  ;;  %v2870_v24 = vshll.u32 %v8623_v42, 16  ;;  %v2857_v16 = vsel %vm244_vm0, %v2852_v38, %v2856_v53  ;;  %v2874_v12 = vshrl.u32 %v8623_v42, 16  ;;  %v2914_v53 = vshrl.u32 %v8628_v10, 16 }
 0x1f7   :  { %7851 = vmatmul.mubr.msk.bf16.gmra.mrb[20].mxu0 %vm511_vm1, %v5591_v8  ;;  %v2866_v8 = vshrl.u32 %v8622_v1, 16  ;;  %v5620_v1 = vrot.slane %v9940_v3, 1 }
 0x1f8   :  { %7854 = vmatprep.mubr.msk.bf16.mxu0 %vm511_vm1, %v5593_v31  ;;  %v2865_v31 = vsel %vm244_vm0, %v2860_v59, %v2864_v21  ;;  %v2922_v59 = vshrl.u32 %v8629_v43, 16 }
 0x1f9   :  { %v2868_v41 = vor.u32 %v2866_v8, %v2864_v21  ;;  %v8630_v21 = vld [vmem:[%s10600_s0 + $0xf0] sm:$0xff]   ;;  %v5621_v3 = vsel %vm1262_vm2, %v5618_v15, %v5620_v1  ;;  %v5622_v8 = vrot.slane %v9957_v47, 1 }
 0x1fa   :  { %v2926_v23 = vshll.u32 %v8630_v21, 16 }
 0x1fb   :  { %v5623_v47 = vsel %vm1262_vm2, %v5620_v1, %v5622_v8 }
 0x1fd   :  { %7557 = vmatmul.mubr.msk.bf16.gmra.mrb[56].mxu1 %vm511_vm1, %v8580_v50  ;;  %v8624_v50 = vld [vmem:[%s10600_s0 + $0xc0] sm:$0xff]  }
 0x1fe   :  { %7560 = vmatprep.mubr.msk.bf16.mxu1 %vm511_vm1, %v8581_v34  ;;  %v2878_v27 = vshll.u32 %v8624_v50, 16  ;;  %v2872_v34 = vrot.slane %v2870_v24, 1  ;;  %v2882_v60 = vshrl.u32 %v8624_v50, 16 }
 0x1ff   :  { %7855 = vmatmul.mubr.msk.bf16.gmra.mrb[24].mxu0 %vm511_vm1, %v5595_v26  ;;  %v5612_v26 = vrot.slane %v9888_v44, 1 }
 0x200   :  { %7858 = vmatprep.mubr.msk.bf16.mxu0 %vm511_vm1, %v5597_v20  ;;  %v2876_v39 = vor.u32 %v2874_v12, %v2872_v34  ;;  %v2880_v0 = vrot.slane %v2878_v27, 1  ;;  %v8625_v20 = vld [vmem:[%s10600_s0 + $0xc8] sm:$0xff]   ;;  %v2873_v11 = vsel %vm244_vm0, %v2868_v41, %v2872_v34  ;;  %v8631_v12 = vld [vmem:[%s10600_s0 + $0xf8] sm:$0xff]   ;;  %v8632_v41 = vld [vmem:[%s10600_s0 + $0x100] sm:$0xff]  }
 0x201   :  { %v2886_v56 = vshll.u32 %v8625_v20, 16  ;;  %v2890_v61 = vshrl.u32 %v8625_v20, 16  ;;  %v5613_v44 = vsel %vm1262_vm2, %v5610_v19, %v5612_v26  ;;  %v5615_v63 = vsel %vm1262_vm2, %v5612_v26, %v5614_v45 }
 0x202   :  { %v2934_v50 = vshll.u32 %v8631_v12, 16  ;;  %v2938_v34 = vshrl.u32 %v8631_v12, 16 }
 0x203   :  { %v2888_v7 = vrot.slane %v2886_v56, 1  ;;  %v5626_v56 = vrot.slane %v9983_v52, 1 }
 0x205   :  { %7561 = vmatmul.mubr.msk.bf16.gmra.mrb[60].mxu1 %vm511_vm1, %v8582_v35  ;;  %v2881_v35 = vsel %vm244_vm0, %v2876_v39, %v2880_v0  ;;  %v2892_v33 = vor.u32 %v2890_v61, %v2888_v7  ;;  %v2942_v39 = vshll.u32 %v8632_v41, 16  ;;  %v8633_v61 = vld [vmem:[%s10600_s0 + $0x108] ss:$0 sps:$4 sm:$0x11]  }
 0x206   :  { %7598 = vmatprep.mubr.msk.bf16.mxu1 %vm511_vm1, %v2833_v22  ;;  %v2884_v22 = vor.u32 %v2882_v60, %v2880_v0  ;;  %v2936_v0 = vrot.slane %v2934_v50, 1  ;;  %v2950_v13 = vshll.u32 %v8633_v61, 16 }
 0x207   :  { %7859 = vmatmul.mubr.msk.bf16.gmra.mrb[28].mxu0 %vm511_vm1, %v5599_v62  ;;  %v5616_v62 = vrot.slane %v9914_v9, 1  ;;  %v2897_v58 = vsel %vm244_vm0, %v2892_v33, %v2896_v29  ;;  %v2944_v20 = vrot.slane %v2942_v39, 1 }
 0x208   :  { %7862 = vmatprep.mubr.msk.bf16.mxu0 %vm511_vm1, %v5601_v36  ;;  %v8627_v36 = vld [vmem:[%s10600_s0 + $0xd8] sm:$0xff]   ;;  %v2889_v55 = vsel %vm244_vm0, %v2884_v22, %v2888_v7  ;;  %v2940_v26 = vor.u32 %v2938_v34, %v2936_v0  ;;  %v5630_v7 = vrot.slane %v10010_v32, 1 }
 0x209   :  { %v2902_v2 = vshll.u32 %v8627_v36, 16  ;;  %v2906_v6 = vshrl.u32 %v8627_v36, 16  ;;  %v5617_v9 = vsel %vm1262_vm2, %v5614_v45, %v5616_v62  ;;  %v5619_v48 = vsel %vm1262_vm2, %v5616_v62, %v5618_v15 }
 0x20a   :  { %v2945_v5 = vsel %vm244_vm0, %v2940_v26, %v2944_v20 }
 0x20b   :  { %v2904_v4 = vrot.slane %v2902_v2, 1 }
 0x20d   :  { %7599 = vmatmul.mubr.msk.bf16.vlgmr.msra.gmra.mrb[32].mxu1 %vm511_vm1, %v2841_v30  ;;  %v2900_v30 = vor.u32 %v2898_v37, %v2896_v29  ;;  %v2908_v28 = vor.u32 %v2906_v6, %v2904_v4 }
 0x20e   :  { %7602 = vmatprep.mubr.msk.bf16.mxu1 %vm511_vm1, %v2849_v25  ;;  %v2912_v25 = vrot.slane %v2910_v14, 1 }
 0x20f   :  { %7863 = vmatmul.mubr.msk.bf16.gmra.mrb[32].mxu0 %vm511_vm1, %v5603_v18  ;;  %v2918_v18 = vshll.u32 %v8629_v43, 16 }
 0x210   :  { %7866 = vmatprep.mubr.msk.bf16.mxu0 %vm511_vm1, %v5605_v46  ;;  %v2905_v46 = vsel %vm244_vm0, %v2900_v30, %v2904_v4  ;;  %v2913_v38 = vsel %vm244_vm0, %v2908_v28, %v2912_v25  ;;  %v2916_v42 = vor.u32 %v2914_v53, %v2912_v25 }
 0x211   :  { %v2920_v17 = vrot.slane %v2918_v18, 1 }
 0x213   :  { %v2924_v24 = vor.u32 %v2922_v59, %v2920_v17  ;;  %v2921_v27 = vsel %vm244_vm0, %v2916_v42, %v2920_v17 }
 0x215   :  { %7603 = vmatmul.mubr.msk.bf16.gmra.mrb[36].mxu1 %vm511_vm1, %v2857_v16  ;;  %v2928_v16 = vrot.slane %v2926_v23, 1 }
 0x216   :  { %7606 = vmatprep.mubr.msk.bf16.mxu1 %vm511_vm1, %v2865_v31  ;;  %v5624_v31 = vrot.slane %v9966_v40, 1 }
 0x217   :  { %7867 = vmatmul.mubr.msk.bf16.gmra.mrb[36].mxu0 %vm511_vm1, %v5607_v51  ;;  %v2930_v51 = vshrl.u32 %v8630_v21, 16 }
 0x218   :  { %7870 = vmatprep.mubr.msk.bf16.mxu0 %vm511_vm1, %v5609_v49  ;;  %v2929_v49 = vsel %vm244_vm0, %v2924_v24, %v2928_v16  ;;  %v5625_v40 = vsel %vm1262_vm2, %v5622_v8, %v5624_v31 }
 0x219   :  { %v2932_v19 = vor.u32 %v2930_v51, %v2928_v16 }
 0x21b   :  { %v2937_v60 = vsel %vm244_vm0, %v2932_v19, %v2936_v0 }
 0x21d   :  { %7607 = vmatmul.mubr.msk.bf16.gmra.mrb[40].mxu1 %vm511_vm1, %v2873_v11  ;;  %v5628_v11 = vrot.slane %v9992_v57, 1  ;;  %v2952_v57 = vrot.slane %v2950_v13, 1 }
 0x21e   :  { %7610 = vmatprep.mubr.msk.bf16.mxu1 %vm511_vm1, %v2881_v35  ;;  %v2946_v35 = vshrl.u32 %v8632_v41, 16 }
 0x21f   :  { %7871 = vmatmul.mubr.msk.bf16.gmra.mrb[40].mxu0 %vm511_vm1, %v5611_v54  ;;  %v5627_v54 = vsel %vm1262_vm2, %v5624_v31, %v5626_v56  ;;  %v5631_v33 = vsel %vm1262_vm2, %v5628_v11, %v5630_v7 }
 0x220   :  { %7874 = vmatprep.mubr.msk.bf16.mxu0 %vm511_vm1, %v5613_v44  ;;  %v5629_v44 = vsel %vm1262_vm2, %v5626_v56, %v5628_v11  ;;  %v2948_v52 = vor.u32 %v2946_v35, %v2944_v20 }
 0x222   :  { %v2953_v22 = vsel %vm244_vm0, %v2948_v52, %v2952_v57 }
 0x225   :  { %7611 = vmatmul.mubr.msk.bf16.gmra.mrb[44].mxu1 %vm511_vm1, %v2889_v55 }
 0x226   :  { %7614 = vmatprep.mubr.msk.bf16.mxu1 %vm511_vm1, %v2897_v58 }
 0x227   :  { %7875 = vmatmul.mubr.msk.bf16.gmra.mrb[44].mxu0 %vm511_vm1, %v5615_v63 }
 0x228   :  { %7878 = vmatprep.mubr.msk.bf16.mxu0 %vm511_vm1, %v5617_v9 }
 0x22d   :  { %7615 = vmatmul.mubr.msk.bf16.gmra.mrb[48].mxu1 %vm511_vm1, %v2905_v46 }
 0x22e   :  { %7618 = vmatprep.mubr.msk.bf16.mxu1 %vm511_vm1, %v2913_v38 }
 0x22f   :  { %7879 = vmatmul.mubr.msk.bf16.gmra.mrb[48].mxu0 %vm511_vm1, %v5619_v48 }
 0x230   :  { %7882 = vmatprep.mubr.msk.bf16.mxu0 %vm511_vm1, %v5621_v3 }
 0x235   :  { %7619 = vmatmul.mubr.msk.bf16.gmra.mrb[52].mxu1 %vm511_vm1, %v2921_v27 }
 0x236   :  { %7622 = vmatprep.mubr.msk.bf16.mxu1 %vm511_vm1, %v2929_v49 }
 0x237   :  { %7883 = vmatmul.mubr.msk.bf16.gmra.mrb[52].mxu0 %vm511_vm1, %v5623_v47 }
 0x238   :  { %7886 = vmatprep.mubr.msk.bf16.mxu0 %vm511_vm1, %v5625_v40 }
 0x23d   :  { %7623 = vmatmul.mubr.msk.bf16.gmra.mrb[56].mxu1 %vm511_vm1, %v2937_v60 }
 0x23e   :  { %7626 = vmatprep.mubr.msk.bf16.mxu1 %vm511_vm1, %v2945_v5 }
 0x23f   :  { %7887 = vmatmul.mubr.msk.bf16.gmra.mrb[56].mxu0 %vm511_vm1, %v5627_v54 }
 0x240   :  { %7890 = vmatprep.mubr.msk.bf16.mxu0 %vm511_vm1, %v5629_v44 }
 0x245   :  { %7627 = vmatmul.mubr.msk.bf16.gmra.mrb[60].mxu1 %vm511_vm1, %v2953_v22 }
 0x247   :  { %7891 = vmatmul.mubr.msk.bf16.gmra.mrb[60].mxu0 %vm511_vm1, %v5631_v33 }
 0x260   :  { %v7502_v29 = vpop.f32.mrb[0].mxu1 }
 0x261   :  { %v2145_v45 = vpop.f32.mrb[1].mxu1 }
 0x262   :  { %v7503_v62 = vpop.f32.mrb[2].mxu1 }
 0x263   :  { %v2148_v36 = vpop.f32.mrb[3].mxu1 }
 0x268   :  { %v7506_v2 = vpop.f32.mrb[4].mxu1 }
 0x269   :  { %v2161_v55 = vpop.f32.mrb[5].mxu1 }
 0x26a   :  { %v7507_v37 = vpop.f32.mrb[6].mxu1 }
 0x26b   :  { %v2164_v58 = vpop.f32.mrb[7].mxu1 }
 0x270   :  { %v7510_v6 = vpop.f32.mrb[8].mxu1 }
 0x271   :  { %v2177_v10 = vpop.f32.mrb[9].mxu1 }
 0x272   :  { %v7511_v14 = vpop.f32.mrb[10].mxu1 }
 0x273   :  { %v10280_v32 = vpop.f32.mrb[11].mxu1 }
 0x278   :  { %v10282_v63 = vpop.f32.mrb[12].mxu1 }
 0x279   :  { %v10284_v9 = vpop.f32.mrb[13].mxu1 }
 0x27a   :  { %v10286_v4 = vpop.f32.mrb[14].mxu1 }
 0x27b   :  { %v10288_v30 = vpop.f32.mrb[15].mxu1 }
 0x280   :  { %v10290_v28 = vpop.f32.mrb[16].mxu1 }
 0x281   :  { %v10292_v25 = vpop.f32.mrb[17].mxu1 }
 0x282   :  { %v10294_v15 = vpop.f32.mrb[18].mxu1 }
 0x283   :  { %v10296_v1 = vpop.f32.mrb[19].mxu1 }
 0x288   :  { %v10298_v43 = vpop.f32.mrb[20].mxu1 }
 0x289   :  { %v10300_v18 = vpop.f32.mrb[21].mxu1 }
 0x28a   :  { %v10302_v46 = vpop.f32.mrb[22].mxu1 }
 0x28b   :  { %v10304_v53 = vpop.f32.mrb[23].mxu1 }
 0x290   :  { %v10306_v38 = vpop.f32.mrb[24].mxu1 }
 0x291   :  { %v10308_v59 = vpop.f32.mrb[25].mxu1 }
 0x292   :  { %v10310_v21 = vpop.f32.mrb[26].mxu1 }
 0x293   :  { %v10312_v23 = vpop.f32.mrb[27].mxu1 }
 0x298   :  { %v10314_v48 = vpop.f32.mrb[28].mxu1 }
 0x299   :  { %v10316_v3 = vpop.f32.mrb[29].mxu1 }
 0x29a   :  { %v10318_v17 = vpop.f32.mrb[30].mxu1 }
 0x29b   :  { %v10320_v42 = vpop.f32.mrb[31].mxu1 }
 0x2a2   :  { %v7832_v24 = vpop.f32.mrb[0].mxu0 }
 0x2a3   :  { %v7896_v16 = vadd.f32 %v7832_v24, %v7502_v29  ;;  %v5768_v8 = vpop.f32.mrb[1].mxu0 }
 0x2a4   :  { %v7897_v31 = vadd.f32 %v5768_v8, %v2145_v45  ;;  %v7833_v12 = vpop.f32.mrb[2].mxu0 }
 0x2a5   :  { %v6941_v50 = vpack.c.bf16 %v7896_v16, %v7896_v16  ;;  %v7898_v27 = vadd.f32 %v7833_v12, %v7503_v62  ;;  %v5771_v51 = vpop.f32.mrb[3].mxu0 }
 0x2a6   :  { %v6939_v49 = vpack.c.bf16 %v7897_v31, %v7897_v31  ;;  %v7899_v34 = vadd.f32 %v5771_v51, %v2148_v36 }
 0x2a7   :  { %6346 = vst.msk [vmem:[%s10601_s2 + $0x8] sm:$0xf] %vm6343_vm3, %v6941_v50  ;;  %v6942_v41 = vpack.c.bf16 %v7898_v27, %v7898_v27 }
 0x2a8   :  { %6344 = vst.msk [vmem:[%s10601_s2] sm:$0xf] %vm6343_vm3, %v6939_v49  ;;  %v6940_v39 = vpack.c.bf16 %v7899_v34, %v7899_v34 }
 0x2a9   :  { %6347 = vst.msk [vmem:[%s10601_s2 + $0xc] sm:$0xf] %vm6343_vm3, %v6942_v41 }
 0x2aa   :  { %6345 = vst.msk [vmem:[%s10601_s2 + $0x4] sm:$0xf] %vm6343_vm3, %v6940_v39  ;;  %v7836_v47 = vpop.f32.mrb[4].mxu0 }
 0x2ab   :  { %v7900_v40 = vadd.f32 %v7836_v47, %v7506_v2  ;;  %v5784_v0 = vpop.f32.mrb[5].mxu0 }
 0x2ac   :  { %v7901_v19 = vadd.f32 %v5784_v0, %v2161_v55  ;;  %v7837_v26 = vpop.f32.mrb[6].mxu0 }
 0x2ad   :  { %v6945_v20 = vpack.c.bf16 %v7900_v40, %v7900_v40  ;;  %v7902_v56 = vadd.f32 %v7837_v26, %v7507_v37  ;;  %v5787_v11 = vpop.f32.mrb[7].mxu0 }
 0x2ae   :  { %v6943_v60 = vpack.c.bf16 %v7901_v19, %v7901_v19  ;;  %v7903_v35 = vadd.f32 %v5787_v11, %v2164_v58 }
 0x2af   :  { %6350 = vst.msk [vmem:[%s10601_s2 + $0x18] sm:$0xf] %vm6343_vm3, %v6945_v20  ;;  %v6946_v61 = vpack.c.bf16 %v7902_v56, %v7902_v56 }
 0x2b0   :  { %6348 = vst.msk [vmem:[%s10601_s2 + $0x10] sm:$0xf] %vm6343_vm3, %v6943_v60  ;;  %v6944_v13 = vpack.c.bf16 %v7903_v35, %v7903_v35 }
 0x2b1   :  { %6351 = vst.msk [vmem:[%s10601_s2 + $0x1c] sm:$0xf] %vm6343_vm3, %v6946_v61 }
 0x2b2   :  { %6349 = vst.msk [vmem:[%s10601_s2 + $0x14] sm:$0xf] %vm6343_vm3, %v6944_v13  ;;  %v7840_v5 = vpop.f32.mrb[8].mxu0 }
 0x2b3   :  { %v7904_v54 = vadd.f32 %v7840_v5, %v7510_v6  ;;  %v5800_v44 = vpop.f32.mrb[9].mxu0 }
 0x2b4   :  { %v7905_v52 = vadd.f32 %v5800_v44, %v2177_v10  ;;  %v7841_v57 = vpop.f32.mrb[10].mxu0 }
 0x2b5   :  { %v6949_v7 = vpack.c.bf16 %v7904_v54, %v7904_v54  ;;  %v7906_v22 = vadd.f32 %v7841_v57, %v7511_v14  ;;  %v5803_v33 = vpop.f32.mrb[11].mxu0 }
 0x2b6   :  { %v6947_v29 = vpack.c.bf16 %v7905_v52, %v7905_v52  ;;  %v7907_v45 = vadd.f32 %v5803_v33, %v10280_v32 }
 0x2b7   :  { %6354 = vst.msk [vmem:[%s10601_s2 + $0x28] sm:$0xf] %vm6343_vm3, %v6949_v7  ;;  %v6950_v62 = vpack.c.bf16 %v7906_v22, %v7906_v22 }
 0x2b8   :  { %6352 = vst.msk [vmem:[%s10601_s2 + $0x20] sm:$0xf] %vm6343_vm3, %v6947_v29  ;;  %v6948_v36 = vpack.c.bf16 %v7907_v45, %v7907_v45 }
 0x2b9   :  { %6355 = vst.msk [vmem:[%s10601_s2 + $0x2c] sm:$0xf] %vm6343_vm3, %v6950_v62 }
 0x2ba   :  { %6353 = vst.msk [vmem:[%s10601_s2 + $0x24] sm:$0xf] %vm6343_vm3, %v6948_v36  ;;  %v7844_v2 = vpop.f32.mrb[12].mxu0 }
 0x2bb   :  { %v7908_v55 = vadd.f32 %v7844_v2, %v10282_v63  ;;  %v5816_v37 = vpop.f32.mrb[13].mxu0 }
 0x2bc   :  { %v7909_v58 = vadd.f32 %v5816_v37, %v10284_v9  ;;  %v7845_v6 = vpop.f32.mrb[14].mxu0 }
 0x2bd   :  { %v6953_v10 = vpack.c.bf16 %v7908_v55, %v7908_v55  ;;  %v7910_v14 = vadd.f32 %v7845_v6, %v10286_v4  ;;  %v5819_v32 = vpop.f32.mrb[15].mxu0 }
 0x2be   :  { %v6951_v24 = vpack.c.bf16 %v7909_v58, %v7909_v58  ;;  %v7911_v16 = vadd.f32 %v5819_v32, %v10288_v30 }
 0x2bf   :  { %6358 = vst.msk [vmem:[%s10601_s2 + $0x38] sm:$0xf] %vm6343_vm3, %v6953_v10  ;;  %v6954_v8 = vpack.c.bf16 %v7910_v14, %v7910_v14 }
 0x2c0   :  { %6356 = vst.msk [vmem:[%s10601_s2 + $0x30] sm:$0xf] %vm6343_vm3, %v6951_v24  ;;  %v6952_v63 = vpack.c.bf16 %v7911_v16, %v7911_v16 }
 0x2c1   :  { %6359 = vst.msk [vmem:[%s10601_s2 + $0x3c] sm:$0xf] %vm6343_vm3, %v6954_v8 }
 0x2c2   :  { %6357 = vst.msk [vmem:[%s10601_s2 + $0x34] sm:$0xf] %vm6343_vm3, %v6952_v63  ;;  %v7848_v9 = vpop.f32.mrb[16].mxu0 }
 0x2c3   :  { %v7912_v4 = vadd.f32 %v7848_v9, %v10290_v28  ;;  %v5832_v30 = vpop.f32.mrb[17].mxu0 }
 0x2c4   :  { %v7913_v31 = vadd.f32 %v5832_v30, %v10292_v25  ;;  %v7849_v12 = vpop.f32.mrb[18].mxu0 }
 0x2c5   :  { %v6957_v50 = vpack.c.bf16 %v7912_v4, %v7912_v4  ;;  %v7914_v27 = vadd.f32 %v7849_v12, %v10294_v15  ;;  %v5835_v51 = vpop.f32.mrb[19].mxu0 }
 0x2c6   :  { %v6955_v49 = vpack.c.bf16 %v7913_v31, %v7913_v31  ;;  %v7915_v34 = vadd.f32 %v5835_v51, %v10296_v1 }
 0x2c7   :  { %6362 = vst.msk [vmem:[%s10601_s2 + $0x48] sm:$0xf] %vm6343_vm3, %v6957_v50  ;;  %v6958_v41 = vpack.c.bf16 %v7914_v27, %v7914_v27 }
 0x2c8   :  { %6360 = vst.msk [vmem:[%s10601_s2 + $0x40] sm:$0xf] %vm6343_vm3, %v6955_v49  ;;  %v6956_v28 = vpack.c.bf16 %v7915_v34, %v7915_v34 }
 0x2c9   :  { %6363 = vst.msk [vmem:[%s10601_s2 + $0x4c] sm:$0xf] %vm6343_vm3, %v6958_v41 }
 0x2ca   :  { %6361 = vst.msk [vmem:[%s10601_s2 + $0x44] sm:$0xf] %vm6343_vm3, %v6956_v28  ;;  %v7852_v25 = vpop.f32.mrb[20].mxu0 }
 0x2cb   :  { %v7916_v15 = vadd.f32 %v7852_v25, %v10298_v43  ;;  %v5848_v1 = vpop.f32.mrb[21].mxu0 }
 0x2cc   :  { %v7917_v39 = vadd.f32 %v5848_v1, %v10300_v18  ;;  %v7853_v47 = vpop.f32.mrb[22].mxu0 }
 0x2cd   :  { %v6961_v40 = vpack.c.bf16 %v7916_v15, %v7916_v15  ;;  %v7918_v0 = vadd.f32 %v7853_v47, %v10302_v46  ;;  %v5851_v19 = vpop.f32.mrb[23].mxu0 }
 0x2ce   :  { %v6959_v26 = vpack.c.bf16 %v7917_v39, %v7917_v39  ;;  %v7919_v20 = vadd.f32 %v5851_v19, %v10304_v53 }
 0x2cf   :  { %6366 = vst.msk [vmem:[%s10601_s2 + $0x58] sm:$0xf] %vm6343_vm3, %v6961_v40  ;;  %v6962_v56 = vpack.c.bf16 %v7918_v0, %v7918_v0 }
 0x2d0   :  { %6364 = vst.msk [vmem:[%s10601_s2 + $0x50] sm:$0xf] %vm6343_vm3, %v6959_v26  ;;  %v6960_v43 = vpack.c.bf16 %v7919_v20, %v7919_v20 }
 0x2d1   :  { %6367 = vst.msk [vmem:[%s10601_s2 + $0x5c] sm:$0xf] %vm6343_vm3, %v6962_v56 }
 0x2d2   :  { %6365 = vst.msk [vmem:[%s10601_s2 + $0x54] sm:$0xf] %vm6343_vm3, %v6960_v43  ;;  %v7856_v18 = vpop.f32.mrb[24].mxu0 }
 0x2d3   :  { %v7920_v46 = vadd.f32 %v7856_v18, %v10306_v38  ;;  %v5864_v53 = vpop.f32.mrb[25].mxu0 }
 0x2d4   :  { %v7921_v11 = vadd.f32 %v5864_v53, %v10308_v59  ;;  %v7857_v60 = vpop.f32.mrb[26].mxu0 }
 0x2d5   :  { %v6965_v35 = vpack.c.bf16 %v7920_v46, %v7920_v46  ;;  %v7922_v61 = vadd.f32 %v7857_v60, %v10310_v21  ;;  %v5867_v13 = vpop.f32.mrb[27].mxu0 }
 0x2d6   :  { %v6963_v5 = vpack.c.bf16 %v7921_v11, %v7921_v11  ;;  %v7923_v54 = vadd.f32 %v5867_v13, %v10312_v23 }
 0x2d7   :  { %6370 = vst.msk [vmem:[%s10601_s2 + $0x68] sm:$0xf] %vm6343_vm3, %v6965_v35  ;;  %v6966_v44 = vpack.c.bf16 %v7922_v61, %v7922_v61 }
 0x2d8   :  { %6368 = vst.msk [vmem:[%s10601_s2 + $0x60] sm:$0xf] %vm6343_vm3, %v6963_v5  ;;  %v6964_v38 = vpack.c.bf16 %v7923_v54, %v7923_v54 }
 0x2d9   :  { %6371 = vst.msk [vmem:[%s10601_s2 + $0x6c] sm:$0xf] %vm6343_vm3, %v6966_v44 }
 0x2da   :  { %6369 = vst.msk [vmem:[%s10601_s2 + $0x64] sm:$0xf] %vm6343_vm3, %v6964_v38  ;;  %v7860_v59 = vpop.f32.mrb[28].mxu0 }
 0x2db   :  { %v7924_v21 = vadd.f32 %v7860_v59, %v10314_v48  ;;  %v5880_v23 = vpop.f32.mrb[29].mxu0 }
 0x2dc   :  { %v7925_v52 = vadd.f32 %v5880_v23, %v10316_v3  ;;  %v7861_v57 = vpop.f32.mrb[30].mxu0 }
 0x2dd   :  { %v6969_v7 = vpack.c.bf16 %v7924_v21, %v7924_v21  ;;  %v7926_v22 = vadd.f32 %v7861_v57, %v10318_v17  ;;  %v5883_v33 = vpop.f32.mrb[31].mxu0 }
 0x2de   :  { %v6967_v29 = vpack.c.bf16 %v7925_v52, %v7925_v52  ;;  %v7927_v45 = vadd.f32 %v5883_v33, %v10320_v42 }
 0x2df   :  { %6374 = vst.msk [vmem:[%s10601_s2 + $0x78] sm:$0xf] %vm6343_vm3, %v6969_v7  ;;  %v6970_v62 = vpack.c.bf16 %v7926_v22, %v7926_v22 }
 0x2e0   :  { %6372 = vst.msk [vmem:[%s10601_s2 + $0x70] sm:$0xf] %vm6343_vm3, %v6967_v29  ;;  %v6968_v48 = vpack.c.bf16 %v7927_v45, %v7927_v45  ;;  %v7600_v3 = vpop.f32.mrb[32].mxu1 }
 0x2e1   :  { %6375 = vst.msk [vmem:[%s10601_s2 + $0x7c] sm:$0xf] %vm6343_vm3, %v6970_v62  ;;  %v3218_v17 = vpop.f32.mrb[33].mxu1 }
 0x2e2   :  { %6373 = vst.msk [vmem:[%s10601_s2 + $0x74] sm:$0xf] %vm6343_vm3, %v6968_v48  ;;  %v7864_v42 = vpop.f32.mrb[32].mxu0  ;;  %v7601_v36 = vpop.f32.mrb[34].mxu1 }
 0x2e3   :  { %v7928_v2 = vadd.f32 %v7864_v42, %v7600_v3  ;;  %v5896_v55 = vpop.f32.mrb[33].mxu0  ;;  %v3221_v37 = vpop.f32.mrb[35].mxu1 }
 0x2e4   :  { %v7929_v58 = vadd.f32 %v5896_v55, %v3218_v17  ;;  %v7865_v6 = vpop.f32.mrb[34].mxu0 }
 0x2e5   :  { %v6973_v10 = vpack.c.bf16 %v7928_v2, %v7928_v2  ;;  %v7930_v14 = vadd.f32 %v7865_v6, %v7601_v36  ;;  %v5899_v32 = vpop.f32.mrb[35].mxu0 }
 0x2e6   :  { %v6971_v24 = vpack.c.bf16 %v7929_v58, %v7929_v58  ;;  %v7931_v16 = vadd.f32 %v5899_v32, %v3221_v37 }
 0x2e7   :  { %6378 = vst.msk [vmem:[%s10601_s2 + $0x88] sm:$0xf] %vm6343_vm3, %v6973_v10  ;;  %v6974_v8 = vpack.c.bf16 %v7930_v14, %v7930_v14 }
 0x2e8   :  { %6376 = vst.msk [vmem:[%s10601_s2 + $0x80] sm:$0xf] %vm6343_vm3, %v6971_v24  ;;  %v6972_v63 = vpack.c.bf16 %v7931_v16, %v7931_v16  ;;  %v7604_v9 = vpop.f32.mrb[36].mxu1 }
 0x2e9   :  { %6379 = vst.msk [vmem:[%s10601_s2 + $0x8c] sm:$0xf] %vm6343_vm3, %v6974_v8  ;;  %v3234_v4 = vpop.f32.mrb[37].mxu1 }
 0x2ea   :  { %6377 = vst.msk [vmem:[%s10601_s2 + $0x84] sm:$0xf] %vm6343_vm3, %v6972_v63  ;;  %v7868_v30 = vpop.f32.mrb[36].mxu0  ;;  %v7605_v31 = vpop.f32.mrb[38].mxu1 }
 0x2eb   :  { %v7932_v12 = vadd.f32 %v7868_v30, %v7604_v9  ;;  %v5912_v50 = vpop.f32.mrb[37].mxu0  ;;  %v3237_v27 = vpop.f32.mrb[39].mxu1 }
 0x2ec   :  { %v7933_v51 = vadd.f32 %v5912_v50, %v3234_v4  ;;  %v7869_v49 = vpop.f32.mrb[38].mxu0 }
 0x2ed   :  { %v6977_v34 = vpack.c.bf16 %v7932_v12, %v7932_v12  ;;  %v7934_v41 = vadd.f32 %v7869_v49, %v7605_v31  ;;  %v5915_v28 = vpop.f32.mrb[39].mxu0 }
 0x2ee   :  { %v6975_v25 = vpack.c.bf16 %v7933_v51, %v7933_v51  ;;  %v7935_v15 = vadd.f32 %v5915_v28, %v3237_v27 }
 0x2ef   :  { %6382 = vst.msk [vmem:[%s10601_s2 + $0x98] sm:$0xf] %vm6343_vm3, %v6977_v34  ;;  %v6978_v1 = vpack.c.bf16 %v7934_v41, %v7934_v41 }
 0x2f0   :  { %6380 = vst.msk [vmem:[%s10601_s2 + $0x90] sm:$0xf] %vm6343_vm3, %v6975_v25  ;;  %v6976_v39 = vpack.c.bf16 %v7935_v15, %v7935_v15  ;;  %v7608_v47 = vpop.f32.mrb[40].mxu1 }
 0x2f1   :  { %6383 = vst.msk [vmem:[%s10601_s2 + $0x9c] sm:$0xf] %vm6343_vm3, %v6978_v1  ;;  %v3250_v40 = vpop.f32.mrb[41].mxu1 }
 0x2f2   :  { %6381 = vst.msk [vmem:[%s10601_s2 + $0x94] sm:$0xf] %vm6343_vm3, %v6976_v39  ;;  %v7872_v0 = vpop.f32.mrb[40].mxu0  ;;  %v7609_v19 = vpop.f32.mrb[42].mxu1 }
 0x2f3   :  { %v7936_v26 = vadd.f32 %v7872_v0, %v7608_v47  ;;  %v5928_v20 = vpop.f32.mrb[41].mxu0  ;;  %v3253_v56 = vpop.f32.mrb[43].mxu1 }
 0x2f4   :  { %v7937_v43 = vadd.f32 %v5928_v20, %v3250_v40  ;;  %v7873_v18 = vpop.f32.mrb[42].mxu0 }
 0x2f5   :  { %v6981_v46 = vpack.c.bf16 %v7936_v26, %v7936_v26  ;;  %v7938_v53 = vadd.f32 %v7873_v18, %v7609_v19  ;;  %v5931_v11 = vpop.f32.mrb[43].mxu0 }
 0x2f6   :  { %v6979_v60 = vpack.c.bf16 %v7937_v43, %v7937_v43  ;;  %v7939_v35 = vadd.f32 %v5931_v11, %v3253_v56 }
 0x2f7   :  { %6386 = vst.msk [vmem:[%s10601_s2 + $0xa8] sm:$0xf] %vm6343_vm3, %v6981_v46  ;;  %v6982_v61 = vpack.c.bf16 %v7938_v53, %v7938_v53 }
 0x2f8   :  { %6384 = vst.msk [vmem:[%s10601_s2 + $0xa0] sm:$0xf] %vm6343_vm3, %v6979_v60  ;;  %v6980_v13 = vpack.c.bf16 %v7939_v35, %v7939_v35  ;;  %v7612_v5 = vpop.f32.mrb[44].mxu1 }
 0x2f9   :  { %6387 = vst.msk [vmem:[%s10601_s2 + $0xac] sm:$0xf] %vm6343_vm3, %v6982_v61  ;;  %v3266_v54 = vpop.f32.mrb[45].mxu1 }
 0x2fa   :  { %6385 = vst.msk [vmem:[%s10601_s2 + $0xa4] sm:$0xf] %vm6343_vm3, %v6980_v13  ;;  %v7876_v44 = vpop.f32.mrb[44].mxu0  ;;  %v7613_v38 = vpop.f32.mrb[46].mxu1 }
 0x2fb   :  { %v7940_v59 = vadd.f32 %v7876_v44, %v7612_v5  ;;  %v5944_v21 = vpop.f32.mrb[45].mxu0  ;;  %v3269_v23 = vpop.f32.mrb[47].mxu1 }
 0x2fc   :  { %v7941_v52 = vadd.f32 %v5944_v21, %v3266_v54  ;;  %v7877_v57 = vpop.f32.mrb[46].mxu0 }
 0x2fd   :  { %v6985_v7 = vpack.c.bf16 %v7940_v59, %v7940_v59  ;;  %v7942_v22 = vadd.f32 %v7877_v57, %v7613_v38  ;;  %v5947_v33 = vpop.f32.mrb[47].mxu0 }
 0x2fe   :  { %v6983_v29 = vpack.c.bf16 %v7941_v52, %v7941_v52  ;;  %v7943_v45 = vadd.f32 %v5947_v33, %v3269_v23 }
 0x2ff   :  { %6390 = vst.msk [vmem:[%s10601_s2 + $0xb8] sm:$0xf] %vm6343_vm3, %v6985_v7  ;;  %v6986_v62 = vpack.c.bf16 %v7942_v22, %v7942_v22 }
 0x300   :  { %6388 = vst.msk [vmem:[%s10601_s2 + $0xb0] sm:$0xf] %vm6343_vm3, %v6983_v29  ;;  %v6984_v48 = vpack.c.bf16 %v7943_v45, %v7943_v45  ;;  %v7616_v3 = vpop.f32.mrb[48].mxu1 }
 0x301   :  { %6391 = vst.msk [vmem:[%s10601_s2 + $0xbc] sm:$0xf] %vm6343_vm3, %v6986_v62  ;;  %v3282_v17 = vpop.f32.mrb[49].mxu1 }
 0x302   :  { %6389 = vst.msk [vmem:[%s10601_s2 + $0xb4] sm:$0xf] %vm6343_vm3, %v6984_v48  ;;  %v7880_v42 = vpop.f32.mrb[48].mxu0  ;;  %v7617_v36 = vpop.f32.mrb[50].mxu1 }
 0x303   :  { %v7944_v2 = vadd.f32 %v7880_v42, %v7616_v3  ;;  %v5960_v55 = vpop.f32.mrb[49].mxu0  ;;  %v3285_v37 = vpop.f32.mrb[51].mxu1 }
 0x304   :  { %v7945_v58 = vadd.f32 %v5960_v55, %v3282_v17  ;;  %v7881_v6 = vpop.f32.mrb[50].mxu0 }
 0x305   :  { %v6989_v10 = vpack.c.bf16 %v7944_v2, %v7944_v2  ;;  %v7946_v14 = vadd.f32 %v7881_v6, %v7617_v36  ;;  %v5963_v32 = vpop.f32.mrb[51].mxu0 }
 0x306   :  { %v6987_v24 = vpack.c.bf16 %v7945_v58, %v7945_v58  ;;  %v7947_v16 = vadd.f32 %v5963_v32, %v3285_v37 }
 0x307   :  { %6394 = vst.msk [vmem:[%s10601_s2 + $0xc8] sm:$0xf] %vm6343_vm3, %v6989_v10  ;;  %v6990_v8 = vpack.c.bf16 %v7946_v14, %v7946_v14 }
 0x308   :  { %6392 = vst.msk [vmem:[%s10601_s2 + $0xc0] sm:$0xf] %vm6343_vm3, %v6987_v24  ;;  %v6988_v63 = vpack.c.bf16 %v7947_v16, %v7947_v16  ;;  %v7620_v9 = vpop.f32.mrb[52].mxu1 }
 0x309   :  { %6395 = vst.msk [vmem:[%s10601_s2 + $0xcc] sm:$0xf] %vm6343_vm3, %v6990_v8  ;;  %v3298_v4 = vpop.f32.mrb[53].mxu1 }
 0x30a   :  { %6393 = vst.msk [vmem:[%s10601_s2 + $0xc4] sm:$0xf] %vm6343_vm3, %v6988_v63  ;;  %v7884_v30 = vpop.f32.mrb[52].mxu0  ;;  %v7621_v31 = vpop.f32.mrb[54].mxu1 }
 0x30b   :  { %v7948_v12 = vadd.f32 %v7884_v30, %v7620_v9  ;;  %v5976_v50 = vpop.f32.mrb[53].mxu0  ;;  %v3301_v27 = vpop.f32.mrb[55].mxu1 }
 0x30c   :  { %v7949_v51 = vadd.f32 %v5976_v50, %v3298_v4  ;;  %v7885_v49 = vpop.f32.mrb[54].mxu0 }
 0x30d   :  { %v6993_v34 = vpack.c.bf16 %v7948_v12, %v7948_v12  ;;  %v7950_v41 = vadd.f32 %v7885_v49, %v7621_v31  ;;  %v5979_v28 = vpop.f32.mrb[55].mxu0 }
 0x30e   :  { %v6991_v25 = vpack.c.bf16 %v7949_v51, %v7949_v51  ;;  %v7951_v15 = vadd.f32 %v5979_v28, %v3301_v27 }
 0x30f   :  { %6398 = vst.msk [vmem:[%s10601_s2 + $0xd8] sm:$0xf] %vm6343_vm3, %v6993_v34  ;;  %v6994_v1 = vpack.c.bf16 %v7950_v41, %v7950_v41 }
 0x310   :  { %6396 = vst.msk [vmem:[%s10601_s2 + $0xd0] sm:$0xf] %vm6343_vm3, %v6991_v25  ;;  %v6992_v39 = vpack.c.bf16 %v7951_v15, %v7951_v15  ;;  %v7624_v47 = vpop.f32.mrb[56].mxu1 }
 0x311   :  { %6399 = vst.msk [vmem:[%s10601_s2 + $0xdc] sm:$0xf] %vm6343_vm3, %v6994_v1  ;;  %v3314_v40 = vpop.f32.mrb[57].mxu1 }
 0x312   :  { %6397 = vst.msk [vmem:[%s10601_s2 + $0xd4] sm:$0xf] %vm6343_vm3, %v6992_v39  ;;  %v7888_v0 = vpop.f32.mrb[56].mxu0  ;;  %v7625_v19 = vpop.f32.mrb[58].mxu1 }
 0x313   :  { %v7952_v26 = vadd.f32 %v7888_v0, %v7624_v47  ;;  %v5992_v20 = vpop.f32.mrb[57].mxu0  ;;  %v3317_v56 = vpop.f32.mrb[59].mxu1 }
 0x314   :  { %v7953_v43 = vadd.f32 %v5992_v20, %v3314_v40  ;;  %v7889_v18 = vpop.f32.mrb[58].mxu0 }
 0x315   :  { %v6997_v46 = vpack.c.bf16 %v7952_v26, %v7952_v26  ;;  %v7954_v53 = vadd.f32 %v7889_v18, %v7625_v19  ;;  %v5995_v11 = vpop.f32.mrb[59].mxu0 }
 0x316   :  { %v6995_v60 = vpack.c.bf16 %v7953_v43, %v7953_v43  ;;  %v7955_v35 = vadd.f32 %v5995_v11, %v3317_v56 }
 0x317   :  { %6402 = vst.msk [vmem:[%s10601_s2 + $0xe8] sm:$0xf] %vm6343_vm3, %v6997_v46  ;;  %v6998_v61 = vpack.c.bf16 %v7954_v53, %v7954_v53 }
 0x318   :  { %6400 = vst.msk [vmem:[%s10601_s2 + $0xe0] sm:$0xf] %vm6343_vm3, %v6995_v60  ;;  %v6996_v13 = vpack.c.bf16 %v7955_v35, %v7955_v35  ;;  %v7628_v5 = vpop.f32.mrb[60].mxu1 }
 0x319   :  { %6403 = vst.msk [vmem:[%s10601_s2 + $0xec] sm:$0xf] %vm6343_vm3, %v6998_v61  ;;  %v3330_v54 = vpop.f32.mrb[61].mxu1 }
 0x31a   :  { %6401 = vst.msk [vmem:[%s10601_s2 + $0xe4] sm:$0xf] %vm6343_vm3, %v6996_v13  ;;  %v7892_v44 = vpop.f32.mrb[60].mxu0  ;;  %v7629_v38 = vpop.f32.mrb[62].mxu1 }
 0x31b   :  { %v7956_v59 = vadd.f32 %v7892_v44, %v7628_v5  ;;  %v6008_v21 = vpop.f32.mrb[61].mxu0  ;;  %v3333_v23 = vpop.f32.mrb[63].mxu1 }
 0x31c   :  { %v7957_v52 = vadd.f32 %v6008_v21, %v3330_v54  ;;  %v7893_v57 = vpop.f32.mrb[62].mxu0 }
 0x31d   :  { %v7001_v7 = vpack.c.bf16 %v7956_v59, %v7956_v59  ;;  %v7958_v22 = vadd.f32 %v7893_v57, %v7629_v38  ;;  %v6011_v33 = vpop.f32.mrb[63].mxu0 }
 0x31e   :  { %v6999_v29 = vpack.c.bf16 %v7957_v52, %v7957_v52  ;;  %v7959_v45 = vadd.f32 %v6011_v33, %v3333_v23 }
 0x31f   :  { %6406 = vst.msk [vmem:[%s10601_s2 + $0xf8] sm:$0xf] %vm6343_vm3, %v7001_v7  ;;  %v7002_v62 = vpack.c.bf16 %v7958_v22, %v7958_v22 }
 0x320   :  { %6404 = vst.msk [vmem:[%s10601_s2 + $0xf0] sm:$0xf] %vm6343_vm3, %v6999_v29  ;;  %v7000_v48 = vpack.c.bf16 %v7959_v45, %v7959_v45 }
 0x321   :  { %6407 = vst.msk [vmem:[%s10601_s2 + $0xfc] sm:$0xf] %vm6343_vm3, %v7002_v62 }
 0x322   :  { %6405 = vst.msk [vmem:[%s10601_s2 + $0xf4] sm:$0xf] %vm6343_vm3, %v7000_v48 }

// kernel: densenet_forward.16
= control target key start
LH: loop header
LB: loop body
LE: loop exit
PB: predicated region body
PF: predicated region fallthrough
CT: control target
= control target key end

     0   :  { %v417_v0 = vmov 0.0   ;;  %vm418_vm0 = vmmov 0   ;;  %vm120_vm1 = vcmask 261120   ;;  %vm283_vm2 = vcmask 125952   ;;  %s583_s3 = inlined_call_operand.vmem [shape: bf16[32,16], index: 3, kind: input, shape index: {}]   ;;  %s584_s0 = inlined_call_operand.vmem [shape: bf16[98,32], index: 0, kind: input, shape index: {}]   ;;  %s585_s1 = inlined_call_operand.vmem [shape: f32[1,32], index: 1, kind: input, shape index: {}]   ;;  %s586_s2 = inlined_call_operand.vmem [shape: f32[1,32], index: 2, kind: input, shape index: {}]   ;;  %s587_s4 = inlined_call_operand.vmem [shape: bf16[98,16], index: 4, kind: output, shape index: {}]  }
   0x1   :  { %377 = vmatprep.subr.bf16.mxu0 %v417_v0  ;;  %v415_v1 = vld [vmem:[%s583_s3] sm:$0xff]   ;;  %409 = vmatprep.subr.bf16.mxu1 %v417_v0  ;;  %v416_v2 = vld [vmem:[%s583_s3 + $0x8] sm:$0xff]   ;;  %v364_v22 = vld [vmem:[%s584_s0 + $0x10] sm:$0xff]   ;;  %vm296_vm3 = vcmask 122880  }
   0x2   :  { %381 = vmatprep.mubr.msk.bf16.mxu0 %vm418_vm0, %v417_v0  ;;  %397 = vmatprep.mubr.msk.bf16.mxu1 %vm418_vm0, %v417_v0  ;;  %v340_v3 = vld [vmem:[%s584_s0] sm:$0xff]   ;;  %v363_v8 = vld [vmem:[%s584_s0 + $0x8] sm:$0xff]   ;;  %v349_v34 = vunpack.c.l.bf16 %v364_v22  ;;  %v30_v35 = vld [vmem:[%s584_s0 + $0x30] sm:$0x1]  ;;  %v350_v41 = vunpack.c.h.bf16 %v364_v22 }
   0x3   :  { %378 = vmatpush3.bf16.msra.mxu0 %v415_v1  ;;  %411 = vmatpush3.bf16.msra.mxu1 %v415_v1  ;;  %v462_v4 = vld [vmem:[%s585_s1] ss:$0 sm:$0xff]  ;;  %v341_v5 = vunpack.c.l.bf16 %v340_v3  ;;  %v342_v6 = vunpack.c.h.bf16 %v340_v3  ;;  %v367_v9 = vld [vmem:[%s584_s0 + $0x28] sm:$0xff]   ;;  %v345_v13 = vunpack.c.l.bf16 %v363_v8  ;;  %v346_v14 = vunpack.c.h.bf16 %v363_v8  ;;  %v365_v51 = vld [vmem:[%s584_s0 + $0x18] sm:$0xff]  }
   0x4   :  { %379 = vmatprep.subr.bf16.mxu0 %v417_v0  ;;  %410 = vmatprep.subr.bf16.mxu1 %v417_v0  ;;  %v366_v7 = vld [vmem:[%s584_s0 + $0x20] sm:$0xff]   ;;  %v361_v17 = vunpack.c.l.bf16 %v367_v9  ;;  %v362_v18 = vunpack.c.h.bf16 %v367_v9  ;;  %v43_v45 = vunpack.c.l.bf16 %v30_v35  ;;  %v55_v46 = vmul.f32 %v349_v34, %v462_v4 }
   0x5   :  { %v478_v10 = vld [vmem:[%s586_s2] ss:$0 sm:$0xff]  ;;  %v357_v11 = vunpack.c.l.bf16 %v366_v7  ;;  %v358_v12 = vunpack.c.h.bf16 %v366_v7  ;;  %v51_v15 = vmul.f32 %v341_v5, %v462_v4  ;;  %v52_v16 = vmul.f32 %v342_v6, %v462_v4 }
   0x6   :  { %v53_v21 = vmul.f32 %v345_v13, %v462_v4  ;;  %v54_v25 = vmul.f32 %v346_v14, %v462_v4  ;;  %v61_v26 = vmul.f32 %v361_v17, %v462_v4  ;;  %v62_v30 = vmul.f32 %v362_v18, %v462_v4 }
   0x7   :  { %380 = vmatpush3.bf16.msra.mxu0 %v416_v2  ;;  %412 = vmatpush3.bf16.msra.mxu1 %v416_v2  ;;  %v59_v19 = vmul.f32 %v357_v11, %v462_v4  ;;  %v60_v20 = vmul.f32 %v358_v12, %v462_v4  ;;  %v71_v23 = vadd.f32 %v478_v10, %v51_v15  ;;  %v353_v55 = vunpack.c.l.bf16 %v365_v51 }
   0x8   :  { %v72_v24 = vadd.f32 %v478_v10, %v52_v16  ;;  %v73_v29 = vadd.f32 %v478_v10, %v53_v21  ;;  %v74_v33 = vadd.f32 %v478_v10, %v54_v25  ;;  %v81_v38 = vadd.f32 %v478_v10, %v61_v26 }
   0x9   :  { %v79_v27 = vadd.f32 %v478_v10, %v59_v19  ;;  %v80_v28 = vadd.f32 %v478_v10, %v60_v20  ;;  %v84_v31 = vmax.f32 %v71_v23, 0.0  ;;  %v82_v39 = vadd.f32 %v478_v10, %v62_v30 }
   0xa   :  { %v85_v32 = vmax.f32 %v72_v24, 0.0  ;;  %v86_v43 = vmax.f32 %v73_v29, 0.0  ;;  %v87_v44 = vmax.f32 %v74_v33, 0.0  ;;  %v56_v47 = vmul.f32 %v350_v41, %v462_v4 }
   0xb   :  { %v92_v36 = vmax.f32 %v79_v27, 0.0  ;;  %v93_v37 = vmax.f32 %v80_v28, 0.0  ;;  %v94_v48 = vmax.f32 %v81_v38, 0.0  ;;  %v95_v49 = vmax.f32 %v82_v39, 0.0 }
   0xc   :  { %v97_v40 = vpack.c.bf16 %v85_v32, %v84_v31  ;;  %v63_v50 = vmul.f32 %v462_v4, %v43_v45  ;;  %v98_v52 = vpack.c.bf16 %v87_v44, %v86_v43  ;;  %v75_v53 = vadd.f32 %v478_v10, %v55_v46 }
   0xd   :  { %v101_v42 = vpack.c.bf16 %v93_v37, %v92_v36  ;;  %v76_v54 = vadd.f32 %v478_v10, %v56_v47  ;;  %v354_v56 = vunpack.c.h.bf16 %v365_v51  ;;  %v102_v57 = vpack.c.bf16 %v95_v49, %v94_v48 }
   0xe   :  { %382 = vmatmul.mubr.msk.bf16.vlgmr.msra.gmra.mrb[0].mxu0 %vm120_vm1, %v97_v40  ;;  %v83_v58 = vadd.f32 %v478_v10, %v63_v50  ;;  %v88_v59 = vmax.f32 %v75_v53, 0.0  ;;  %v57_v61 = vmul.f32 %v353_v55, %v462_v4 }
   0xf   :  { %385 = vmatprep.mubr.msk.bf16.mxu0 %vm418_vm0, %v417_v0  ;;  %398 = vmatmul.mubr.msk.bf16.vlgmr.msra.gmra.mrb[0].mxu1 %vm120_vm1, %v101_v42  ;;  %v89_v60 = vmax.f32 %v76_v54, 0.0  ;;  %v58_v62 = vmul.f32 %v354_v56, %v462_v4 }
  0x10   :  { %401 = vmatprep.mubr.msk.bf16.mxu1 %vm418_vm0, %v417_v0  ;;  %v96_v63 = vmax.f32 %v83_v58, 0.0  ;;  %v77_v2 = vadd.f32 %v478_v10, %v57_v61 }
  0x11   :  { %v99_v1 = vpack.c.bf16 %v89_v60, %v88_v59  ;;  %v78_v3 = vadd.f32 %v478_v10, %v58_v62 }
  0x12   :  { %v103_v5 = vpack.c.bf16 %v96_v63, %v96_v63  ;;  %v90_v6 = vmax.f32 %v77_v2, 0.0 }
  0x13   :  { %v91_v7 = vmax.f32 %v78_v3, 0.0 }
  0x15   :  { %v100_v4 = vpack.c.bf16 %v91_v7, %v90_v6 }
  0x16   :  { %386 = vmatmul.mubr.msk.bf16.gmra.mrb[4].mxu0 %vm120_vm1, %v98_v52 }
  0x17   :  { %389 = vmatprep.mubr.msk.bf16.mxu0 %vm418_vm0, %v417_v0  ;;  %402 = vmatmul.mubr.msk.bf16.gmra.mrb[4].mxu1 %vm120_vm1, %v102_v57 }
  0x18   :  { %405 = vmatprep.mubr.msk.bf16.mxu1 %vm418_vm0, %v417_v0 }
  0x1e   :  { %390 = vmatmul.mubr.msk.bf16.gmra.mrb[8].mxu0 %vm120_vm1, %v99_v1 }
  0x1f   :  { %393 = vmatprep.mubr.msk.bf16.mxu0 %vm418_vm0, %v417_v0  ;;  %406 = vmatmul.mubr.msk.bf16.gmra.mrb[8].mxu1 %vm120_vm1, %v103_v5 }
  0x26   :  { %394 = vmatmul.mubr.msk.bf16.gmra.mrb[12].mxu0 %vm120_vm1, %v100_v4 }
  0xe1   :  { %v176_v8 = vpop.f32.mrb[0].mxu0 }
  0xe2   :  { %v326_v9 = vpack.c.bf16 %v176_v8, %v176_v8  ;;  %v383_v11 = vpop.f32.mrb[1].mxu0  ;;  %v208_v12 = vpop.f32.mrb[0].mxu1 }
  0xe3   :  { %v179_v13 = vpop.f32.mrb[2].mxu0  ;;  %v334_v10 = vpack.c.bf16 %v208_v12, %v208_v12  ;;  %v399_v14 = vpop.f32.mrb[1].mxu1 }
  0xe4   :  { %284 = vst.msk [vmem:[%s587_s4] sm:$0xf] %vm283_vm2, %v326_v9  ;;  %v327_v15 = vpack.c.bf16 %v179_v13, %v179_v13  ;;  %v384_v0 = vpop.f32.mrb[3].mxu0  ;;  %v211_v16 = vpop.f32.mrb[2].mxu1 }
  0xe5   :  { %292 = vst.msk [vmem:[%s587_s4 + $0x20] sm:$0xf] %vm283_vm2, %v334_v10  ;;  %v335_v17 = vpack.c.bf16 %v211_v16, %v211_v16  ;;  %v400_v18 = vpop.f32.mrb[3].mxu1 }
  0xe6   :  { %285 = vst.msk [vmem:[%s587_s4 + $0x4] sm:$0xf] %vm283_vm2, %v327_v15 }
  0xe7   :  { %293 = vst.msk [vmem:[%s587_s4 + $0x24] sm:$0xf] %vm283_vm2, %v335_v17 }
  0xe9   :  { %v184_v19 = vpop.f32.mrb[4].mxu0 }
  0xea   :  { %v328_v20 = vpack.c.bf16 %v184_v19, %v184_v19  ;;  %v387_v21 = vpop.f32.mrb[5].mxu0  ;;  %v216_v22 = vpop.f32.mrb[4].mxu1 }
  0xeb   :  { %v187_v23 = vpop.f32.mrb[6].mxu0  ;;  %v336_v24 = vpack.c.bf16 %v216_v22, %v216_v22  ;;  %v403_v25 = vpop.f32.mrb[5].mxu1 }
  0xec   :  { %286 = vst.msk [vmem:[%s587_s4 + $0x8] sm:$0xf] %vm283_vm2, %v328_v20  ;;  %v329_v26 = vpack.c.bf16 %v187_v23, %v187_v23  ;;  %v388_v27 = vpop.f32.mrb[7].mxu0  ;;  %v219_v28 = vpop.f32.mrb[6].mxu1 }
  0xed   :  { %294 = vst.msk [vmem:[%s587_s4 + $0x28] sm:$0xf] %vm283_vm2, %v336_v24  ;;  %v337_v29 = vpack.c.bf16 %v219_v28, %v219_v28  ;;  %v404_v30 = vpop.f32.mrb[7].mxu1 }
  0xee   :  { %287 = vst.msk [vmem:[%s587_s4 + $0xc] sm:$0xf] %vm283_vm2, %v329_v26 }
  0xef   :  { %295 = vst.msk [vmem:[%s587_s4 + $0x2c] sm:$0xf] %vm283_vm2, %v337_v29 }
  0xf1   :  { %v192_v31 = vpop.f32.mrb[8].mxu0 }
  0xf2   :  { %v330_v32 = vpack.c.bf16 %v192_v31, %v192_v31  ;;  %v391_v33 = vpop.f32.mrb[9].mxu0  ;;  %v224_v34 = vpop.f32.mrb[8].mxu1 }
  0xf3   :  { %v195_v35 = vpop.f32.mrb[10].mxu0  ;;  %v338_v36 = vpack.c.bf16 %v224_v34, %v224_v34  ;;  %v407_v37 = vpop.f32.mrb[9].mxu1 }
  0xf4   :  { %288 = vst.msk [vmem:[%s587_s4 + $0x10] sm:$0xf] %vm283_vm2, %v330_v32  ;;  %v331_v38 = vpack.c.bf16 %v195_v35, %v195_v35  ;;  %v392_v39 = vpop.f32.mrb[11].mxu0  ;;  %v227_v40 = vpop.f32.mrb[10].mxu1 }
  0xf5   :  { %297 = vst.msk [vmem:[%s587_s4 + $0x30] sm:$0x1] %vm296_vm3, %v338_v36  ;;  %v408_v41 = vpop.f32.mrb[11].mxu1 }
  0xf6   :  { %289 = vst.msk [vmem:[%s587_s4 + $0x14] sm:$0xf] %vm283_vm2, %v331_v38 }
  0xf9   :  { %v200_v42 = vpop.f32.mrb[12].mxu0 }
  0xfa   :  { %v332_v43 = vpack.c.bf16 %v200_v42, %v200_v42  ;;  %v395_v44 = vpop.f32.mrb[13].mxu0 }
  0xfb   :  { %v203_v45 = vpop.f32.mrb[14].mxu0 }
  0xfc   :  { %290 = vst.msk [vmem:[%s587_s4 + $0x18] sm:$0xf] %vm283_vm2, %v332_v43  ;;  %v333_v46 = vpack.c.bf16 %v203_v45, %v203_v45  ;;  %v396_v47 = vpop.f32.mrb[15].mxu0 }
  0xfe   :  { %291 = vst.msk [vmem:[%s587_s4 + $0x1c] sm:$0xf] %vm283_vm2, %v333_v46 }

// kernel: densenet_forward.17
= control target key start
LH: loop header
LB: loop body
LE: loop exit
PB: predicated region body
PF: predicated region fallthrough
CT: control target
= control target key end

     0   :  { %v3463_v0 = vmov 0.0   ;;  %vm3464_vm0 = vmmov 0   ;;  %vm185_vm1 = vcmask 130048   ;;  %vm497_vm2 = vcmask 1046528   ;;  %s4372_s1 = inlined_call_operand.vmem [shape: bf16[144,8], index: 1, kind: input, shape index: {}]   ;;  %s4373_s0 = inlined_call_operand.vmem [shape: bf16[182,16], index: 0, kind: input, shape index: {}]   ;;  %s4374_s2 = inlined_call_operand.vmem [shape: bf16[162,8], index: 2, kind: output, shape index: {}]  }
   0x1   :  { %2851 = vmatprep.subr.bf16.mxu0 %v3463_v0  ;;  %v3414_v1 = vld [vmem:[%s4372_s1 + $0x20] sm:$0xff]   ;;  %2853 = vmatprep.mubr.msk.bf16.mxu0 %vm3464_vm0, %v3463_v0  ;;  %v3490_v2 = vld [vmem:[%s4373_s0 + $0x8] sm:$0xf]  ;;  %v3497_v3 = vld [vmem:[%s4373_s0 + $0xc] sm:$0xff]   ;;  %vm91_vm3 = vsmask.f32 7424 }
   0x2   :  { %2667 = vmatprep.subr.bf16.mxu1 %v3463_v0  ;;  %2669 = vmatprep.mubr.msk.bf16.mxu1 %vm3464_vm0, %v3463_v0  ;;  %v1042_v4 = vld [vmem:[%s4373_s0 + $0x4] sm:$0xe]  ;;  %v3418_v6 = vld [vmem:[%s4372_s1 + $0x8] sm:$0xff]   ;;  %v1049_v7 = vrot.slane %v3497_v3, 1  ;;  %v12_v10 = vld [vmem:[%s4373_s0] sm:$0xf] }
   0x3   :  { %2852 = vmatpush3.bf16.msra.mxu0 %v3414_v1  ;;  %v3503_v5 = vcombine.low %v1042_v4, %v3490_v2  ;;  %v3419_v8 = vld [vmem:[%s4372_s1 + $0x28] sm:$0xff]   ;;  %2668 = vmatpush3.bf16.msra.mxu1 %v3418_v6  ;;  %v3520_v11 = vld [vmem:[%s4373_s0 + $0x4] sm:$0xf]  ;;  %v3536_v16 = vld [vmem:[%s4373_s0 + $0x14] sm:$0xff]   ;;  %v783_v59 = vshll.u32 %v3497_v3, 16  ;;  %v787_v61 = vshrl.u32 %v3497_v3, 16 }
   0x4   :  { %2897 = vmatprep.subr.bf16.mxu0 %v3463_v0  ;;  %v3525_v12 = vld [vmem:[%s4373_s0 + $0x8] sm:$0xff]   ;;  %v3528_v13 = vcombine.low %v12_v10, %v3520_v11  ;;  %2713 = vmatprep.subr.bf16.mxu1 %v3463_v0  ;;  %v1051_v19 = vrot.slane %v3536_v16, 1  ;;  %v3547_v20 = vld [vmem:[%s4373_s0 + $0x10] sm:$0xff]   ;;  %v3423_v23 = vld [vmem:[%s4372_s1] sm:$0xff]   ;;  %vm1255_vm4 = vsmask.f32 6400 }
   0x5   :  { %v1048_v9 = vrot.slane %v3503_v5, 1  ;;  %v100_v15 = vshll.u32 %v3525_v12, 16  ;;  %v104_v25 = vshrl.u32 %v3525_v12, 16  ;;  %v108_v26 = vshll.u32 %v3547_v20, 16  ;;  %v3559_v28 = vld [vmem:[%s4373_s0 + $0x1c] sm:$0xff]   ;;  %v3582_v38 = vld [vmem:[%s4373_s0 + $0x24] sm:$0xff]  }
   0x6   :  { %v93_v17 = vshrl.u32 %v3528_v13, 16  ;;  %v95_v18 = vshll.u32 %v3528_v13, 16  ;;  %v1052_v27 = vsel %vm497_vm2, %v1049_v7, %v1051_v19  ;;  %v3567_v32 = vld [vmem:[%s4373_s0 + $0x18] sm:$0xff]   ;;  %v1053_v33 = vrot.slane %v3559_v28, 1  ;;  %v3591_v41 = vld [vmem:[%s4373_s0 + $0x20] sm:$0xff]   ;;  %v3603_v47 = vld [vmem:[%s4373_s0 + $0x2c] sm:$0xff]  }
   0x7   :  { %v1050_v14 = vsel %vm497_vm2, %v1048_v9, %v1049_v7  ;;  %v102_v22 = vrot.slane %v100_v15, 1  ;;  %v110_v31 = vrot.slane %v108_v26, 1  ;;  %v112_v35 = vshrl.u32 %v3547_v20, 16  ;;  %v3612_v50 = vld [vmem:[%s4373_s0 + $0x28] sm:$0xff]   ;;  %v3624_v56 = vld [vmem:[%s4373_s0 + $0x34] sm:$0xff]  }
   0x8   :  { %2854 = vmatmul.mubr.msk.bf16.vlgmr.msra.gmra.mrb[0].mxu0 %vm185_vm1, %v1050_v14  ;;  %v97_v21 = vrot.slane %v95_v18, 1  ;;  %v116_v36 = vshll.u32 %v3567_v32, 16  ;;  %v1054_v37 = vsel %vm497_vm2, %v1051_v19, %v1053_v33  ;;  %v1055_v42 = vrot.slane %v3582_v38, 1  ;;  %v3630_v58 = vld [vmem:[%s4373_s0 + $0x30] sm:$0xff]   ;;  %v3659_v18 = vld [vmem:[%s4373_s0 + $0x38] sm:$0xff]  }
   0x9   :  { %2898 = vmatpush3.bf16.msra.mxu0 %v3419_v8  ;;  %2857 = vmatprep.mubr.msk.bf16.mxu0 %vm3464_vm0, %v3463_v0  ;;  %v106_v30 = vor.u32 %v104_v25, %v102_v22  ;;  %v114_v39 = vor.u32 %v112_v35, %v110_v31  ;;  %v120_v44 = vshrl.u32 %v3567_v32, 16  ;;  %v124_v45 = vshll.u32 %v3591_v41, 16  ;;  %v3683_v35 = vld [vmem:[%s4373_s0 + $0x40] sm:$0xff]  }
   0xa   :  { %2943 = vmatprep.subr.bf16.mxu0 %v3463_v0  ;;  %v98_v24 = vor.u32 %v97_v21, %v93_v17  ;;  %v118_v40 = vrot.slane %v116_v36, 1  ;;  %v1056_v46 = vsel %vm497_vm2, %v1053_v33, %v1055_v42  ;;  %v1057_v51 = vrot.slane %v3603_v47, 1 }
   0xb   :  { %v111_v34 = vsel %vm91_vm3, %v106_v30, %v110_v31  ;;  %v126_v49 = vrot.slane %v124_v45, 1  ;;  %v128_v52 = vshrl.u32 %v3591_v41, 16  ;;  %v132_v54 = vshll.u32 %v3612_v50, 16 }
   0xc   :  { %v103_v29 = vsel %vm91_vm3, %v98_v24, %v102_v22  ;;  %v119_v43 = vsel %vm91_vm3, %v114_v39, %v118_v40  ;;  %v122_v48 = vor.u32 %v120_v44, %v118_v40  ;;  %v1058_v55 = vsel %vm497_vm2, %v1055_v42, %v1057_v51 }
   0xd   :  { %2670 = vmatmul.mubr.msk.bf16.vlgmr.msra.gmra.mrb[0].mxu1 %vm185_vm1, %v103_v29  ;;  %v130_v57 = vor.u32 %v128_v52, %v126_v49  ;;  %v134_v60 = vrot.slane %v132_v54, 1  ;;  %v1257_v62 = vshrl.u32 %v3503_v5, 16  ;;  %v1260_v63 = vshll.u32 %v3503_v5, 16  ;;  %v3433_v29 = vld [vmem:[%s4372_s1 + $0x30] sm:$0xff]  }
   0xe   :  { %2714 = vmatpush3.bf16.msra.mxu1 %v3423_v23  ;;  %2673 = vmatprep.mubr.msk.bf16.mxu1 %vm3464_vm0, %v3463_v0  ;;  %v127_v53 = vsel %vm91_vm3, %v122_v48, %v126_v49  ;;  %v1059_v1 = vrot.slane %v3624_v56, 1  ;;  %v136_v4 = vshrl.u32 %v3612_v50, 16  ;;  %v140_v6 = vshll.u32 %v3630_v58, 16 }
   0xf   :  { %2759 = vmatprep.subr.bf16.mxu1 %v3463_v0  ;;  %v1265_v7 = vrot.slane %v783_v59, 2  ;;  %v135_v8 = vsel %vm91_vm3, %v130_v57, %v134_v60  ;;  %v1259_v9 = vrot.slane %v1257_v62, 1  ;;  %v1262_v10 = vrot.slane %v1260_v63, 2 }
  0x10   :  { %2858 = vmatmul.mubr.msk.bf16.gmra.mrb[4].mxu0 %vm185_vm1, %v1052_v27  ;;  %v1264_v14 = vrot.slane %v787_v61, 1  ;;  %v1060_v5 = vsel %vm497_vm2, %v1057_v51, %v1059_v1  ;;  %v138_v15 = vor.u32 %v136_v4, %v134_v60  ;;  %v142_v17 = vrot.slane %v140_v6, 1  ;;  %v3705_v51 = vld [vmem:[%s4373_s0 + $0x48] sm:$0xff]  }
  0x11   :  { %2861 = vmatprep.mubr.msk.bf16.mxu0 %vm3464_vm0, %v3463_v0  ;;  %v791_v19 = vshll.u32 %v3536_v16, 16  ;;  %v795_v21 = vshrl.u32 %v3536_v16, 16  ;;  %v1263_v22 = vor.u32 %v1262_v10, %v1259_v9  ;;  %v144_v25 = vshrl.u32 %v3630_v58, 16 }
  0x12   :  { %v1266_v23 = vor.u32 %v1265_v7, %v1264_v14  ;;  %v143_v24 = vsel %vm91_vm3, %v138_v15, %v142_v17  ;;  %v148_v26 = vshll.u32 %v3659_v18, 16  ;;  %v803_v39 = vshrl.u32 %v3559_v28, 16 }
  0x13   :  { %v1268_v30 = vrot.slane %v795_v21, 1  ;;  %v1269_v31 = vrot.slane %v791_v19, 2  ;;  %v146_v33 = vor.u32 %v144_v25, %v142_v17  ;;  %v152_v42 = vshrl.u32 %v3659_v18, 16 }
  0x14   :  { %v1267_v27 = vsel %vm1255_vm4, %v1263_v22, %v1266_v23  ;;  %v1272_v45 = vrot.slane %v803_v39, 1  ;;  %v811_v54 = vshrl.u32 %v3582_v38, 16  ;;  %v160_v57 = vshrl.u32 %v3683_v35, 16 }
  0x15   :  { %2674 = vmatmul.mubr.msk.bf16.gmra.mrb[4].mxu1 %vm185_vm1, %v111_v34  ;;  %v150_v34 = vrot.slane %v148_v26, 1  ;;  %v1270_v36 = vor.u32 %v1269_v31, %v1268_v30  ;;  %v164_v60 = vshll.u32 %v3705_v51, 16  ;;  %v815_v10 = vshll.u32 %v3603_v47, 16 }
  0x16   :  { %2677 = vmatprep.mubr.msk.bf16.mxu1 %vm3464_vm0, %v3463_v0  ;;  %v1276_v63 = vrot.slane %v811_v54, 1  ;;  %v819_v14 = vshrl.u32 %v3603_v47, 16  ;;  %v168_v15 = vshrl.u32 %v3705_v51, 16  ;;  %v827_v30 = vshrl.u32 %v3624_v56, 16 }
  0x17   :  { %v151_v40 = vsel %vm91_vm3, %v146_v33, %v150_v34  ;;  %v1271_v44 = vsel %vm1255_vm4, %v1266_v23, %v1270_v36  ;;  %v154_v48 = vor.u32 %v152_v42, %v150_v34  ;;  %v166_v7 = vrot.slane %v164_v60, 1 }
  0x18   :  { %2862 = vmatmul.mubr.msk.bf16.gmra.mrb[8].mxu0 %vm185_vm1, %v1054_v37  ;;  %v799_v37 = vshll.u32 %v3559_v28, 16  ;;  %v1280_v23 = vrot.slane %v819_v14, 1  ;;  %v1284_v34 = vrot.slane %v827_v30, 1  ;;  %vm2056_vm5 = vcmask 1045504  }
  0x19   :  { %2865 = vmatprep.mubr.msk.bf16.mxu0 %vm3464_vm0, %v3463_v0  ;;  %v170_v25 = vor.u32 %v168_v15, %v166_v7  ;;  %vm2343_vm6 = vcmask 60416   ;;  %vm2364_vm7 = vcmask 57344  }
  0x1d   :  { %2678 = vmatmul.mubr.msk.bf16.gmra.mrb[8].mxu1 %vm185_vm1, %v119_v43  ;;  %v156_v43 = vshll.u32 %v3683_v35, 16 }
  0x1e   :  { %2681 = vmatprep.mubr.msk.bf16.mxu1 %vm3464_vm0, %v3463_v0 }
  0x1f   :  { %v158_v49 = vrot.slane %v156_v43, 1 }
  0x20   :  { %2866 = vmatmul.mubr.msk.bf16.gmra.mrb[12].mxu0 %vm185_vm1, %v1056_v46  ;;  %v1273_v46 = vrot.slane %v799_v37, 2 }
  0x21   :  { %2869 = vmatprep.mubr.msk.bf16.mxu0 %vm3464_vm0, %v3463_v0  ;;  %v162_v6 = vor.u32 %v160_v57, %v158_v49 }
  0x22   :  { %v1274_v52 = vor.u32 %v1273_v46, %v1272_v45 }
  0x24   :  { %v1275_v62 = vsel %vm1255_vm4, %v1270_v36, %v1274_v52 }
  0x25   :  { %2682 = vmatmul.mubr.msk.bf16.gmra.mrb[12].mxu1 %vm185_vm1, %v127_v53  ;;  %v807_v53 = vshll.u32 %v3582_v38, 16 }
  0x26   :  { %2685 = vmatprep.mubr.msk.bf16.mxu1 %vm3464_vm0, %v3463_v0 }
  0x27   :  { %v1277_v4 = vrot.slane %v807_v53, 2 }
  0x28   :  { %2870 = vmatmul.mubr.msk.bf16.gmra.mrb[16].mxu0 %vm185_vm1, %v1058_v55  ;;  %v159_v55 = vsel %vm91_vm3, %v154_v48, %v158_v49 }
  0x29   :  { %2873 = vmatprep.mubr.msk.bf16.mxu0 %vm3464_vm0, %v3463_v0  ;;  %v1278_v9 = vor.u32 %v1277_v4, %v1276_v63  ;;  %v3439_v63 = vld [vmem:[%s4372_s1 + $0x10] sm:$0xff]  }
  0x2b   :  { %v1279_v22 = vsel %vm1255_vm4, %v1274_v52, %v1278_v9 }
  0x2d   :  { %2686 = vmatmul.mubr.msk.bf16.gmra.mrb[16].mxu1 %vm185_vm1, %v135_v8  ;;  %v3726_v8 = vld [vmem:[%s4373_s0 + $0x50] ss:$0 sps:$4 sm:$0x33]  }
  0x2e   :  { %2689 = vmatprep.mubr.msk.bf16.mxu1 %vm3464_vm0, %v3463_v0  ;;  %v172_v17 = vshll.u32 %v3726_v8, 16  ;;  %v176_v42 = vshrl.u32 %v3726_v8, 16 }
  0x30   :  { %2874 = vmatmul.mubr.msk.bf16.gmra.mrb[20].mxu0 %vm185_vm1, %v1060_v5  ;;  %v167_v5 = vsel %vm91_vm3, %v162_v6, %v166_v7  ;;  %v174_v26 = vrot.slane %v172_v17, 1 }
  0x31   :  { %2899 = vmatprep.mubr.msk.bf16.mxu0 %vm3464_vm0, %v3463_v0 }
  0x32   :  { %v175_v31 = vsel %vm91_vm3, %v170_v25, %v174_v26  ;;  %v178_v46 = vor.u32 %v176_v42, %v174_v26 }
  0x35   :  { %2690 = vmatmul.mubr.msk.bf16.gmra.mrb[20].mxu1 %vm185_vm1, %v143_v24  ;;  %v1281_v24 = vrot.slane %v815_v10, 2 }
  0x36   :  { %2693 = vmatprep.mubr.msk.bf16.mxu1 %vm3464_vm0, %v3463_v0 }
  0x38   :  { %2900 = vmatmul.mubr.msk.bf16.vlgmr.msra.gmra.mrb[0].mxu0 %vm185_vm1, %v1267_v27  ;;  %v1282_v27 = vor.u32 %v1281_v24, %v1280_v23  ;;  %v3442_v24 = vld [vmem:[%s4373_s0 + $0x54] ss:$0 sps:$4 sm:$0x77]  }
  0x39   :  { %2944 = vmatpush3.bf16.msra.mxu0 %v3433_v29  ;;  %2903 = vmatprep.mubr.msk.bf16.mxu0 %vm3464_vm0, %v3463_v0  ;;  %v823_v29 = vshll.u32 %v3624_v56, 16  ;;  %v1301_v26 = vshrl.u32 %v3442_v24, 16 }
  0x3a   :  { %2989 = vmatprep.subr.bf16.mxu0 %v3463_v0  ;;  %v1283_v33 = vsel %vm1255_vm4, %v1278_v9, %v1282_v27  ;;  %v3797_v9 = vld [vmem:[%s4373_s0 + $0x4c] sm:$0xff]  }
  0x3b   :  { %v1285_v36 = vrot.slane %v823_v29, 2  ;;  %v847_v15 = vshll.u32 %v3797_v9, 16  ;;  %v851_v17 = vshrl.u32 %v3797_v9, 16 }
  0x3d   :  { %2694 = vmatmul.mubr.msk.bf16.gmra.mrb[24].mxu1 %vm185_vm1, %v151_v40  ;;  %v3757_v40 = vld [vmem:[%s4373_s0 + $0x3c] sm:$0xff]   ;;  %v1286_v43 = vor.u32 %v1285_v36, %v1284_v34  ;;  %v1297_v23 = vrot.slane %v847_v15, 2 }
  0x3e   :  { %2697 = vmatprep.mubr.msk.bf16.mxu1 %vm3464_vm0, %v3463_v0  ;;  %v835_v45 = vshrl.u32 %v3757_v40, 16 }
  0x3f   :  { %v1287_v48 = vsel %vm1255_vm4, %v1282_v27, %v1286_v43  ;;  %v1304_v27 = vshll.u32 %v3442_v24, 16  ;;  %v3901_v24 = vld [vmem:[%s4373_s0 + $0x28] sm:$0xff]  }
  0x40   :  { %2904 = vmatmul.mubr.msk.bf16.gmra.mrb[4].mxu0 %vm185_vm1, %v1271_v44  ;;  %v831_v44 = vshll.u32 %v3757_v40, 16  ;;  %v1288_v49 = vrot.slane %v835_v45, 1 }
  0x41   :  { %2907 = vmatprep.mubr.msk.bf16.mxu0 %vm3464_vm0, %v3463_v0  ;;  %v1306_v34 = vrot.slane %v1304_v27, 2  ;;  %v3915_v27 = vld [vmem:[%s4373_s0 + $0x30] sm:$0xff]  }
  0x42   :  { %v1289_v52 = vrot.slane %v831_v44, 2 }
  0x44   :  { %v1290_v57 = vor.u32 %v1289_v52, %v1288_v49  ;;  %v3854_v49 = vld [vmem:[%s4373_s0 + $0x10] sm:$0xff]  }
  0x45   :  { %2698 = vmatmul.mubr.msk.bf16.gmra.mrb[28].mxu1 %vm185_vm1, %v159_v55  ;;  %v3776_v55 = vld [vmem:[%s4373_s0 + $0x44] sm:$0xff]  }
  0x46   :  { %2701 = vmatprep.mubr.msk.bf16.mxu1 %vm3464_vm0, %v3463_v0  ;;  %v839_v60 = vshll.u32 %v3776_v55, 16  ;;  %v1291_v4 = vsel %vm1255_vm4, %v1286_v43, %v1290_v57  ;;  %v1489_v43 = vld [vmem:[%s4373_s0 + $0x8] sm:$0xe] }
  0x48   :  { %2908 = vmatmul.mubr.msk.bf16.gmra.mrb[8].mxu0 %vm185_vm1, %v1275_v62  ;;  %v843_v62 = vshrl.u32 %v3776_v55, 16  ;;  %v1293_v7 = vrot.slane %v839_v60, 2 }
  0x49   :  { %2911 = vmatprep.mubr.msk.bf16.mxu0 %vm3464_vm0, %v3463_v0 }
  0x4a   :  { %v1292_v6 = vrot.slane %v843_v62, 1 }
  0x4d   :  { %2702 = vmatmul.mubr.msk.bf16.gmra.mrb[32].mxu1 %vm185_vm1, %v167_v5  ;;  %v1294_v5 = vor.u32 %v1293_v7, %v1292_v6  ;;  %v3872_v6 = vld [vmem:[%s4373_s0 + $0x18] sm:$0xff]  }
  0x4e   :  { %2705 = vmatprep.mubr.msk.bf16.mxu1 %vm3464_vm0, %v3463_v0  ;;  %v1568_v7 = vrot.slane %v3872_v6, 1 }
  0x50   :  { %2912 = vmatmul.mubr.msk.bf16.gmra.mrb[12].mxu0 %vm185_vm1, %v1279_v22  ;;  %v1295_v22 = vsel %vm1255_vm4, %v1290_v57, %v1294_v5  ;;  %v1566_v57 = vrot.slane %v3854_v49, 1 }
  0x51   :  { %2915 = vmatprep.mubr.msk.bf16.mxu0 %vm3464_vm0, %v3463_v0 }
  0x55   :  { %2706 = vmatmul.mubr.msk.bf16.gmra.mrb[36].mxu1 %vm185_vm1, %v175_v31 }
  0x56   :  { %2709 = vmatprep.mubr.msk.bf16.mxu1 %vm3464_vm0, %v3463_v0 }
  0x58   :  { %2916 = vmatmul.mubr.msk.bf16.gmra.mrb[16].mxu0 %vm185_vm1, %v1283_v33  ;;  %v1303_v33 = vrot.slane %v1301_v26, 1 }
  0x59   :  { %2919 = vmatprep.mubr.msk.bf16.mxu0 %vm3464_vm0, %v3463_v0 }
  0x5a   :  { %v1307_v36 = vor.u32 %v1306_v34, %v1303_v33  ;;  %v3929_v34 = vld [vmem:[%s4373_s0 + $0x38] sm:$0xff]  }
  0x5d   :  { %2710 = vmatmul.mubr.msk.bf16.gmra.mrb[40].mxu1 %vm185_vm1, %v178_v46  ;;  %v3846_v46 = vld [vmem:[%s4373_s0 + $0xc] sm:$0xf] }
  0x5e   :  { %2715 = vmatprep.mubr.msk.bf16.mxu1 %vm3464_vm0, %v3463_v0 }
  0x60   :  { %2920 = vmatmul.mubr.msk.bf16.gmra.mrb[20].mxu0 %vm185_vm1, %v1287_v48  ;;  %v3849_v48 = vcombine.low %v1489_v43, %v3846_v46  ;;  %v3450_v43 = vld [vmem:[%s4373_s0 + $0x50] ss:$0 sps:$4 sm:$0x11]  }
  0x61   :  { %2923 = vmatprep.mubr.msk.bf16.mxu0 %vm3464_vm0, %v3463_v0 }
  0x62   :  { %v1565_v52 = vrot.slane %v3849_v48, 1 }
  0x65   :  { %2716 = vmatmul.mubr.msk.bf16.vlgmr.msra.gmra.mrb[0].mxu1 %vm185_vm1, %v3528_v13  ;;  %v1296_v13 = vrot.slane %v851_v17, 1 }
  0x66   :  { %2760 = vmatpush3.bf16.msra.mxu1 %v3439_v63  ;;  %2719 = vmatprep.mubr.msk.bf16.mxu1 %vm3464_vm0, %v3463_v0  ;;  %v1567_v63 = vsel %vm497_vm2, %v1565_v52, %v1566_v57 }
  0x67   :  { %2805 = vmatprep.subr.bf16.mxu1 %v3463_v0  ;;  %v1298_v25 = vor.u32 %v1297_v23, %v1296_v13 }
  0x68   :  { %2924 = vmatmul.mubr.msk.bf16.gmra.mrb[24].mxu0 %vm185_vm1, %v1291_v4  ;;  %v3445_v4 = vld [vmem:[%s4372_s1 + $0x38] sm:$0xff]  }
  0x69   :  { %2927 = vmatprep.mubr.msk.bf16.mxu0 %vm3464_vm0, %v3463_v0  ;;  %v1299_v31 = vsel %vm1255_vm4, %v1294_v5, %v1298_v25  ;;  %v1308_v42 = vsel %vm1255_vm4, %v1298_v25, %v1307_v36  ;;  %v1569_v5 = vsel %vm497_vm2, %v1566_v57, %v1568_v7  ;;  %v1572_v25 = vrot.slane %v3901_v24, 1 }
  0x6d   :  { %2720 = vmatmul.mubr.msk.bf16.gmra.mrb[4].mxu1 %vm185_vm1, %v3525_v12 }
  0x6e   :  { %2723 = vmatprep.mubr.msk.bf16.mxu1 %vm3464_vm0, %v3463_v0 }
  0x70   :  { %2928 = vmatmul.mubr.msk.bf16.gmra.mrb[28].mxu0 %vm185_vm1, %v1295_v22  ;;  %v3887_v22 = vld [vmem:[%s4373_s0 + $0x20] sm:$0xff]  }
  0x71   :  { %2931 = vmatprep.mubr.msk.bf16.mxu0 %vm3464_vm0, %v3463_v0  ;;  %v1570_v13 = vrot.slane %v3887_v22, 1 }
  0x73   :  { %v1571_v23 = vsel %vm497_vm2, %v1568_v7, %v1570_v13  ;;  %v1573_v26 = vsel %vm497_vm2, %v1570_v13, %v1572_v25  ;;  %v499_v7 = vrot.slane %v3525_v12, 1  ;;  %v3454_v13 = vld [vmem:[%s4372_s1 + $0x18] sm:$0xff]   ;;  %v501_v12 = vrot.slane %v3547_v20, 1 }
  0x75   :  { %2724 = vmatmul.mubr.msk.bf16.gmra.mrb[8].mxu1 %vm185_vm1, %v3547_v20  ;;  %v503_v20 = vrot.slane %v3567_v32, 1 }
  0x76   :  { %2727 = vmatprep.mubr.msk.bf16.mxu1 %vm3464_vm0, %v3463_v0 }
  0x78   :  { %2932 = vmatmul.mubr.msk.bf16.gmra.mrb[32].mxu0 %vm185_vm1, %v1299_v31  ;;  %v1574_v31 = vrot.slane %v3915_v27, 1 }
  0x79   :  { %2935 = vmatprep.mubr.msk.bf16.mxu0 %vm3464_vm0, %v3463_v0 }
  0x7a   :  { %v1575_v33 = vsel %vm497_vm2, %v1572_v25, %v1574_v31  ;;  %v3968_v25 = vld [vmem:[%s4373_s0 + $0x48] sm:$0xff]  }
  0x7d   :  { %2728 = vmatmul.mubr.msk.bf16.gmra.mrb[12].mxu1 %vm185_vm1, %v3567_v32  ;;  %v505_v32 = vrot.slane %v3591_v41, 1 }
  0x7e   :  { %2731 = vmatprep.mubr.msk.bf16.mxu1 %vm3464_vm0, %v3463_v0 }
  0x80   :  { %2936 = vmatmul.mubr.msk.bf16.gmra.mrb[36].mxu0 %vm185_vm1, %v1308_v42  ;;  %v491_v42 = vld [vmem:[%s4373_s0] sm:$0xe] }
  0x81   :  { %2939 = vmatprep.mubr.msk.bf16.mxu0 %vm3464_vm0, %v3463_v0  ;;  %v2406_v52 = vcombine.low %v491_v42, %v3520_v11 }
  0x85   :  { %2732 = vmatmul.mubr.msk.bf16.gmra.mrb[16].mxu1 %vm185_vm1, %v3591_v41  ;;  %v1773_v41 = vshrl.u32 %v3849_v48, 16 }
  0x86   :  { %2735 = vmatprep.mubr.msk.bf16.mxu1 %vm3464_vm0, %v3463_v0 }
  0x88   :  { %2940 = vmatmul.mubr.msk.bf16.gmra.mrb[40].mxu0 %vm185_vm1, %v1307_v36  ;;  %v1576_v36 = vrot.slane %v3929_v34, 1 }
  0x89   :  { %2945 = vmatprep.mubr.msk.bf16.mxu0 %vm3464_vm0, %v3463_v0 }
  0x8a   :  { %v1577_v57 = vsel %vm497_vm2, %v1574_v31, %v1576_v36  ;;  %v502_v31 = vsel %vm497_vm2, %v499_v7, %v501_v12 }
  0x8d   :  { %2736 = vmatmul.mubr.msk.bf16.gmra.mrb[20].mxu1 %vm185_vm1, %v3612_v50 }
  0x8e   :  { %2739 = vmatprep.mubr.msk.bf16.mxu1 %vm3464_vm0, %v3463_v0 }
  0x90   :  { %2946 = vmatmul.mubr.msk.bf16.vlgmr.msra.gmra.mrb[0].mxu0 %vm185_vm1, %v1567_v63  ;;  %v3950_v63 = vld [vmem:[%s4373_s0 + $0x40] sm:$0xff]  }
  0x91   :  { %2990 = vmatpush3.bf16.msra.mxu0 %v3445_v4  ;;  %2949 = vmatprep.mubr.msk.bf16.mxu0 %vm3464_vm0, %v3463_v0  ;;  %v498_v4 = vrot.slane %v2406_v52, 1  ;;  %v1578_v11 = vrot.slane %v3950_v63, 1 }
  0x92   :  { %3035 = vmatprep.subr.bf16.mxu0 %v3463_v0 }
  0x95   :  { %2740 = vmatmul.mubr.msk.bf16.gmra.mrb[24].mxu1 %vm185_vm1, %v3630_v58 }
  0x96   :  { %2743 = vmatprep.mubr.msk.bf16.mxu1 %vm3464_vm0, %v3463_v0 }
  0x98   :  { %2950 = vmatmul.mubr.msk.bf16.gmra.mrb[4].mxu0 %vm185_vm1, %v1569_v5  ;;  %v500_v5 = vsel %vm497_vm2, %v498_v4, %v499_v7  ;;  %v506_v7 = vsel %vm497_vm2, %v503_v20, %v505_v32 }
  0x99   :  { %2953 = vmatprep.mubr.msk.bf16.mxu0 %vm3464_vm0, %v3463_v0 }
  0x9d   :  { %2744 = vmatmul.mubr.msk.bf16.gmra.mrb[28].mxu1 %vm185_vm1, %v3659_v18 }
  0x9e   :  { %2747 = vmatprep.mubr.msk.bf16.mxu1 %vm3464_vm0, %v3463_v0 }
  0xa0   :  { %2954 = vmatmul.mubr.msk.bf16.gmra.mrb[8].mxu0 %vm185_vm1, %v1571_v23  ;;  %v1579_v23 = vsel %vm497_vm2, %v1576_v36, %v1578_v11  ;;  %v3984_v36 = vld [vmem:[%s4373_s0 + $0x50] sm:$0xff]  }
  0xa1   :  { %2957 = vmatprep.mubr.msk.bf16.mxu0 %vm3464_vm0, %v3463_v0  ;;  %v1582_v42 = vrot.slane %v3984_v36, 1 }
  0xa5   :  { %2748 = vmatmul.mubr.msk.bf16.gmra.mrb[32].mxu1 %vm185_vm1, %v3683_v35 }
  0xa6   :  { %2751 = vmatprep.mubr.msk.bf16.mxu1 %vm3464_vm0, %v3463_v0 }
  0xa8   :  { %2958 = vmatmul.mubr.msk.bf16.gmra.mrb[12].mxu0 %vm185_vm1, %v1573_v26  ;;  %v1580_v26 = vrot.slane %v3968_v25, 1 }
  0xa9   :  { %2961 = vmatprep.mubr.msk.bf16.mxu0 %vm3464_vm0, %v3463_v0 }
  0xaa   :  { %v1583_v52 = vsel %vm497_vm2, %v1580_v26, %v1582_v42 }
  0xad   :  { %2752 = vmatmul.mubr.msk.bf16.gmra.mrb[36].mxu1 %vm185_vm1, %v3705_v51 }
  0xae   :  { %2755 = vmatprep.mubr.msk.bf16.mxu1 %vm3464_vm0, %v3463_v0 }
  0xb0   :  { %2962 = vmatmul.mubr.msk.bf16.gmra.mrb[16].mxu0 %vm185_vm1, %v1575_v33  ;;  %v1581_v33 = vsel %vm497_vm2, %v1578_v11, %v1580_v26 }
  0xb1   :  { %2965 = vmatprep.mubr.msk.bf16.mxu0 %vm3464_vm0, %v3463_v0 }
  0xb5   :  { %2756 = vmatmul.mubr.msk.bf16.gmra.mrb[40].mxu1 %vm185_vm1, %v3450_v43  ;;  %v504_v43 = vsel %vm497_vm2, %v501_v12, %v503_v20  ;;  %v1784_v12 = vshll.u32 %v3854_v49, 16 }
  0xb6   :  { %2761 = vmatprep.mubr.msk.bf16.mxu1 %vm3464_vm0, %v3463_v0 }
  0xb8   :  { %2966 = vmatmul.mubr.msk.bf16.gmra.mrb[20].mxu0 %vm185_vm1, %v1577_v57  ;;  %v3457_v57 = vld [vmem:[%s4373_s0 + $0x58] ss:$0 sps:$4 sm:$0x33]  }
  0xb9   :  { %2969 = vmatprep.mubr.msk.bf16.mxu0 %vm3464_vm0, %v3463_v0  ;;  %v1584_v4 = vrot.slane %v3457_v57, 1  ;;  %v1793_v57 = vshll.u32 %v3872_v6, 16 }
  0xbb   :  { %v1585_v11 = vsel %vm497_vm2, %v1582_v42, %v1584_v4  ;;  %v1786_v42 = vrot.slane %v1784_v12, 2 }
  0xbd   :  { %2762 = vmatmul.mubr.msk.bf16.vlgmr.msra.gmra.mrb[0].mxu1 %vm185_vm1, %v500_v5  ;;  %v507_v5 = vrot.slane %v3612_v50, 1  ;;  %v509_v50 = vrot.slane %v3630_v58, 1  ;;  %v511_v58 = vrot.slane %v3659_v18, 1  ;;  %v513_v18 = vrot.slane %v3683_v35, 1 }
  0xbe   :  { %2806 = vmatpush3.bf16.msra.mxu1 %v3454_v13  ;;  %2765 = vmatprep.mubr.msk.bf16.mxu1 %vm3464_vm0, %v3463_v0  ;;  %v1776_v13 = vshll.u32 %v3849_v48, 16  ;;  %v515_v35 = vrot.slane %v3705_v51, 1  ;;  %v517_v51 = vrot.slane %v3726_v8, 1 }
  0xbf   :  { %3081 = vmatprep.subr.bf16.mxu1 %v3463_v0  ;;  %v508_v26 = vsel %vm497_vm2, %v505_v32, %v507_v5  ;;  %v510_v32 = vsel %vm497_vm2, %v507_v5, %v509_v50  ;;  %v512_v12 = vsel %vm497_vm2, %v509_v50, %v511_v58  ;;  %v1811_v50 = vshll.u32 %v3901_v24, 16 }
  0xc0   :  { %2970 = vmatmul.mubr.msk.bf16.gmra.mrb[24].mxu0 %vm185_vm1, %v1579_v23  ;;  %v1781_v23 = vshrl.u32 %v3854_v49, 16 }
  0xc1   :  { %2973 = vmatprep.mubr.msk.bf16.mxu0 %vm3464_vm0, %v3463_v0 }
  0xc2   :  { %v1783_v20 = vrot.slane %v1781_v23, 1  ;;  %v1802_v23 = vshll.u32 %v3887_v22, 16 }
  0xc5   :  { %2766 = vmatmul.mubr.msk.bf16.gmra.mrb[4].mxu1 %vm185_vm1, %v502_v31  ;;  %v1775_v31 = vrot.slane %v1773_v41, 1  ;;  %v1795_v41 = vrot.slane %v1793_v57, 2  ;;  %v1813_v57 = vrot.slane %v1811_v50, 2 }
  0xc6   :  { %2769 = vmatprep.mubr.msk.bf16.mxu1 %vm3464_vm0, %v3463_v0 }
  0xc8   :  { %2974 = vmatmul.mubr.msk.bf16.gmra.mrb[28].mxu0 %vm185_vm1, %v1581_v33  ;;  %v1778_v33 = vrot.slane %v1776_v13, 2  ;;  %v1799_v13 = vshrl.u32 %v3887_v22, 16 }
  0xc9   :  { %2977 = vmatprep.mubr.msk.bf16.mxu0 %vm3464_vm0, %v3463_v0 }
  0xca   :  { %v1779_v48 = vor.u32 %v1778_v33, %v1775_v31  ;;  %v1801_v31 = vrot.slane %v1799_v13, 1  ;;  %v1804_v33 = vrot.slane %v1802_v23, 2  ;;  %v699_v13 = vld [vmem:[%s4373_s0 + $0x4] sm:$0xf] }
  0xcd   :  { %2770 = vmatmul.mubr.msk.bf16.gmra.mrb[8].mxu1 %vm185_vm1, %v504_v43  ;;  %v1787_v43 = vor.u32 %v1786_v42, %v1783_v20  ;;  %v1805_v20 = vor.u32 %v1804_v33, %v1801_v31  ;;  %v1808_v42 = vshrl.u32 %v3901_v24, 16  ;;  %v2419_v31 = vcombine.low %v699_v13, %v3490_v2 }
  0xce   :  { %2773 = vmatprep.mubr.msk.bf16.mxu1 %vm3464_vm0, %v3463_v0  ;;  %v518_v33 = vsel %vm497_vm2, %v515_v35, %v517_v51  ;;  %v1835_v2 = vshrl.u32 %v3950_v63, 16 }
  0xd0   :  { %2978 = vmatmul.mubr.msk.bf16.gmra.mrb[32].mxu0 %vm185_vm1, %v1583_v52  ;;  %v1790_v52 = vshrl.u32 %v3872_v6, 16 }
  0xd1   :  { %2981 = vmatprep.mubr.msk.bf16.mxu0 %vm3464_vm0, %v3463_v0 }
  0xd5   :  { %2774 = vmatmul.mubr.msk.bf16.gmra.mrb[12].mxu1 %vm185_vm1, %v506_v7  ;;  %v1788_v7 = vsel %vm1255_vm4, %v1779_v48, %v1787_v43  ;;  %v514_v48 = vsel %vm497_vm2, %v511_v58, %v513_v18 }
  0xd6   :  { %2777 = vmatprep.mubr.msk.bf16.mxu1 %vm3464_vm0, %v3463_v0 }
  0xd8   :  { %2982 = vmatmul.mubr.msk.bf16.gmra.mrb[36].mxu0 %vm185_vm1, %v1585_v11  ;;  %v1792_v11 = vrot.slane %v1790_v52, 1  ;;  %v1810_v52 = vrot.slane %v1808_v42, 1  ;;  %v778_v42 = vshll.u32 %v2419_v31, 16 }
  0xd9   :  { %2985 = vmatprep.mubr.msk.bf16.mxu0 %vm3464_vm0, %v3463_v0 }
  0xda   :  { %v1796_v5 = vor.u32 %v1795_v41, %v1792_v11  ;;  %v516_v11 = vsel %vm497_vm2, %v513_v18, %v515_v35  ;;  %v1837_v35 = vrot.slane %v1835_v2, 1 }
  0xdd   :  { %2778 = vmatmul.mubr.msk.bf16.gmra.mrb[16].mxu1 %vm185_vm1, %v508_v26  ;;  %v1797_v26 = vsel %vm1255_vm4, %v1787_v43, %v1796_v5  ;;  %v1806_v43 = vsel %vm1255_vm4, %v1796_v5, %v1805_v20 }
  0xde   :  { %2781 = vmatprep.mubr.msk.bf16.mxu1 %vm3464_vm0, %v3463_v0 }
  0xe0   :  { %2986 = vmatmul.mubr.msk.bf16.gmra.mrb[40].mxu0 %vm185_vm1, %v1584_v4  ;;  %v3458_v4 = vld [vmem:[%s4372_s1 + $0x40] sm:$0xff]  }
  0xe1   :  { %2991 = vmatprep.mubr.msk.bf16.mxu0 %vm3464_vm0, %v3463_v0 }
  0xe5   :  { %2782 = vmatmul.mubr.msk.bf16.gmra.mrb[20].mxu1 %vm185_vm1, %v510_v32  ;;  %v1814_v32 = vor.u32 %v1813_v57, %v1810_v52  ;;  %v780_v52 = vrot.slane %v778_v42, 1 }
  0xe6   :  { %2785 = vmatprep.mubr.msk.bf16.mxu1 %vm3464_vm0, %v3463_v0 }
  0xe7   :  { %v1815_v41 = vsel %vm1255_vm4, %v1805_v20, %v1814_v32 }
  0xe8   :  { %2992 = vmatmul.mubr.msk.bf16.vlgmr.msra.gmra.mrb[0].mxu0 %vm185_vm1, %v1788_v7  ;;  %v1817_v7 = vshrl.u32 %v3915_v27, 16 }
  0xe9   :  { %3036 = vmatpush3.bf16.msra.mxu0 %v3458_v4  ;;  %2995 = vmatprep.mubr.msk.bf16.mxu0 %vm3464_vm0, %v3463_v0  ;;  %v1820_v4 = vshll.u32 %v3915_v27, 16 }
  0xea   :  { %v1819_v58 = vrot.slane %v1817_v7, 1 }
  0xeb   :  { %v1822_v5 = vrot.slane %v1820_v4, 2  ;;  %v785_v4 = vrot.slane %v783_v59, 1  ;;  %v3462_v59 = vld [vmem:[%s4372_s1 + $0x20] sm:$0xff]  }
  0xed   :  { %2786 = vmatmul.mubr.msk.bf16.gmra.mrb[24].mxu1 %vm185_vm1, %v512_v12  ;;  %v1823_v23 = vor.u32 %v1822_v5, %v1819_v58  ;;  %v1826_v12 = vshrl.u32 %v3929_v34, 16  ;;  %v1847_v58 = vshll.u32 %v3968_v25, 16 }
  0xee   :  { %2789 = vmatprep.mubr.msk.bf16.mxu1 %vm3464_vm0, %v3463_v0 }
  0xef   :  { %v1824_v18 = vsel %vm1255_vm4, %v1814_v32, %v1823_v23  ;;  %v1828_v20 = vrot.slane %v1826_v12, 1  ;;  %v789_v12 = vor.u32 %v787_v61, %v785_v4 }
  0xf0   :  { %2996 = vmatmul.mubr.msk.bf16.gmra.mrb[4].mxu0 %vm185_vm1, %v1797_v26  ;;  %v1829_v26 = vshll.u32 %v3929_v34, 16 }
  0xf1   :  { %2999 = vmatprep.mubr.msk.bf16.mxu0 %vm3464_vm0, %v3463_v0 }
  0xf2   :  { %v1831_v8 = vrot.slane %v1829_v26, 2  ;;  %v793_v26 = vrot.slane %v791_v19, 1  ;;  %v4123_v19 = vld [vmem:[%s4373_s0 + $0x58] ss:$0 sps:$4 sm:$0x77]  }
  0xf4   :  { %v1832_v50 = vor.u32 %v1831_v8, %v1828_v20  ;;  %v794_v20 = vsel %vm91_vm3, %v789_v12, %v793_v26  ;;  %v797_v42 = vor.u32 %v795_v21, %v793_v26  ;;  %v809_v21 = vrot.slane %v807_v53, 1  ;;  %v2050_v53 = vld [vmem:[%s4373_s0 + $0x8] sm:$0xc] }
  0xf5   :  { %2790 = vmatmul.mubr.msk.bf16.gmra.mrb[28].mxu1 %vm185_vm1, %v514_v48  ;;  %v1838_v48 = vshll.u32 %v3950_v63, 16 }
  0xf6   :  { %2793 = vmatprep.mubr.msk.bf16.mxu1 %vm3464_vm0, %v3463_v0  ;;  %v1833_v57 = vsel %vm1255_vm4, %v1823_v23, %v1832_v50  ;;  %v1849_v23 = vrot.slane %v1847_v58, 2  ;;  %v813_v28 = vor.u32 %v811_v54, %v809_v21  ;;  %v825_v54 = vrot.slane %v823_v29, 1 }
  0xf7   :  { %v1840_v32 = vrot.slane %v1838_v48, 2  ;;  %v1862_v48 = vshrl.u32 %v4123_v19, 16  ;;  %v2058_v58 = vrot.slane %v3854_v49, 2  ;;  %v2060_v29 = vrot.slane %v3872_v6, 2 }
  0xf8   :  { %3000 = vmatmul.mubr.msk.bf16.gmra.mrb[8].mxu0 %vm185_vm1, %v1806_v43  ;;  %v776_v43 = vshrl.u32 %v2419_v31, 16  ;;  %v829_v47 = vor.u32 %v827_v30, %v825_v54  ;;  %v2062_v6 = vrot.slane %v3887_v22, 2  ;;  %v3461_v22 = vld [vmem:[%s4373_s0 + $0x54] ss:$0 sps:$4 sm:$0x33]  }
  0xf9   :  { %3003 = vmatprep.mubr.msk.bf16.mxu0 %vm3464_vm0, %v3463_v0  ;;  %v855_v26 = vshll.u32 %v3461_v22, 16 }
  0xfa   :  { %v781_v7 = vor.u32 %v780_v52, %v776_v43  ;;  %v1865_v43 = vshll.u32 %v4123_v19, 16 }
  0xfc   :  { %v786_v5 = vsel %vm91_vm3, %v781_v7, %v785_v4 }
  0xfd   :  { %2794 = vmatmul.mubr.msk.bf16.gmra.mrb[32].mxu1 %vm185_vm1, %v516_v11  ;;  %v1841_v11 = vor.u32 %v1840_v32, %v1837_v35  ;;  %v1864_v35 = vrot.slane %v1862_v48, 1  ;;  %v1867_v32 = vrot.slane %v1865_v43, 2  ;;  %v1067_v48 = vrot.slane %v3461_v22, 1 }
  0xfe   :  { %2797 = vmatprep.mubr.msk.bf16.mxu1 %vm3464_vm0, %v3463_v0 }
 0x100   :  { %3004 = vmatmul.mubr.msk.bf16.gmra.mrb[12].mxu0 %vm185_vm1, %v1815_v41  ;;  %v1844_v41 = vshrl.u32 %v3968_v25, 16 }
 0x101   :  { %3007 = vmatprep.mubr.msk.bf16.mxu0 %vm3464_vm0, %v3463_v0 }
 0x102   :  { %v1846_v13 = vrot.slane %v1844_v41, 1  ;;  %v2504_v41 = vcombine.low %v2050_v53, %v3846_v46 }
 0x104   :  { %v1850_v31 = vor.u32 %v1849_v23, %v1846_v13  ;;  %v2063_v23 = vsel %vm2056_vm5, %v2060_v29, %v2062_v6 }
 0x105   :  { %2798 = vmatmul.mubr.msk.bf16.gmra.mrb[36].mxu1 %vm185_vm1, %v518_v33  ;;  %v1853_v33 = vshrl.u32 %v3984_v36, 16 }
 0x106   :  { %2801 = vmatprep.mubr.msk.bf16.mxu1 %vm3464_vm0, %v3463_v0  ;;  %v1851_v8 = vsel %vm1255_vm4, %v1841_v11, %v1850_v31 }
 0x107   :  { %v1855_v3 = vrot.slane %v1853_v33, 1 }
 0x108   :  { %3008 = vmatmul.mubr.msk.bf16.gmra.mrb[16].mxu0 %vm185_vm1, %v1824_v18  ;;  %v1856_v18 = vshll.u32 %v3984_v36, 16 }
 0x109   :  { %3011 = vmatprep.mubr.msk.bf16.mxu0 %vm3464_vm0, %v3463_v0 }
 0x10a   :  { %v1858_v61 = vrot.slane %v1856_v18, 2 }
 0x10c   :  { %v1859_v2 = vor.u32 %v1858_v61, %v1855_v3  ;;  %v1061_v3 = vrot.slane %v3757_v40, 1  ;;  %v2070_v61 = vrot.slane %v3950_v63, 2  ;;  %v1063_v40 = vrot.slane %v3776_v55, 1 }
 0x10d   :  { %2802 = vmatmul.mubr.msk.bf16.gmra.mrb[40].mxu1 %vm185_vm1, %v517_v51  ;;  %v1842_v51 = vsel %vm1255_vm4, %v1832_v50, %v1841_v11  ;;  %v801_v50 = vrot.slane %v799_v37, 1  ;;  %v1868_v37 = vor.u32 %v1867_v32, %v1864_v35  ;;  %v2072_v63 = vrot.slane %v3968_v25, 2 }
 0x10e   :  { %2807 = vmatprep.mubr.msk.bf16.mxu1 %vm3464_vm0, %v3463_v0  ;;  %v1064_v56 = vsel %vm497_vm2, %v1061_v3, %v1063_v40  ;;  %v2074_v55 = vrot.slane %v3984_v36, 2 }
 0x10f   :  { %v802_v52 = vsel %vm91_vm3, %v797_v42, %v801_v50  ;;  %v805_v16 = vor.u32 %v803_v39, %v801_v50  ;;  %v1869_v4 = vsel %vm1255_vm4, %v1859_v2, %v1868_v37  ;;  %v817_v39 = vrot.slane %v815_v10, 1 }
 0x110   :  { %3012 = vmatmul.mubr.msk.bf16.gmra.mrb[20].mxu0 %vm185_vm1, %v1833_v57  ;;  %v1860_v57 = vsel %vm1255_vm4, %v1850_v31, %v1859_v2  ;;  %v2057_v10 = vrot.slane %v2504_v41, 2  ;;  %v1065_v50 = vrot.slane %v3797_v9, 1  ;;  %v2075_v2 = vsel %vm2056_vm5, %v2072_v63, %v2074_v55 }
 0x111   :  { %3015 = vmatprep.mubr.msk.bf16.mxu0 %vm3464_vm0, %v3463_v0  ;;  %v810_v7 = vsel %vm91_vm3, %v805_v16, %v809_v21  ;;  %v818_v11 = vsel %vm91_vm3, %v813_v28, %v817_v39  ;;  %v821_v38 = vor.u32 %v819_v14, %v817_v39  ;;  %v833_v14 = vrot.slane %v831_v44, 1 }
 0x112   :  { %v841_v44 = vrot.slane %v839_v60, 1  ;;  %v849_v60 = vrot.slane %v847_v15, 1  ;;  %v857_v15 = vrot.slane %v855_v26, 1  ;;  %v1066_v25 = vsel %vm497_vm2, %v1063_v40, %v1065_v50 }
 0x113   :  { %v826_v46 = vsel %vm91_vm3, %v821_v38, %v825_v54  ;;  %v834_v49 = vsel %vm91_vm3, %v829_v47, %v833_v14  ;;  %v837_v30 = vor.u32 %v835_v45, %v833_v14  ;;  %v2076_v9 = vrot.slane %v4123_v19, 2 }
 0x114   :  { %v845_v45 = vor.u32 %v843_v62, %v841_v44  ;;  %v853_v62 = vor.u32 %v851_v17, %v849_v60  ;;  %v2068_v17 = vrot.slane %v3929_v34, 2  ;;  %v1062_v34 = vsel %vm497_vm2, %v1059_v1, %v1061_v3 }
 0x115   :  { %2808 = vmatmul.mubr.msk.bf16.vlgmr.msra.gmra.mrb[0].mxu1 %vm185_vm1, %v786_v5  ;;  %v2059_v5 = vsel %vm2056_vm5, %v2057_v10, %v2058_v58  ;;  %v842_v13 = vsel %vm91_vm3, %v837_v30, %v841_v44  ;;  %v2073_v1 = vsel %vm2056_vm5, %v2070_v61, %v2072_v63  ;;  %v1068_v43 = vsel %vm497_vm2, %v1065_v50, %v1067_v48 }
 0x116   :  { %3082 = vmatpush3.bf16.msra.mxu1 %v3462_v59  ;;  %2811 = vmatprep.mubr.msk.bf16.mxu1 %vm3464_vm0, %v3463_v0  ;;  %v2064_v59 = vrot.slane %v3901_v24, 2  ;;  %v850_v12 = vsel %vm91_vm3, %v845_v45, %v849_v60  ;;  %v2066_v24 = vrot.slane %v3915_v27, 2  ;;  %v858_v33 = vsel %vm91_vm3, %v853_v62, %v857_v15 }
 0x117   :  { %v2071_v42 = vsel %vm2056_vm5, %v2068_v17, %v2070_v61  ;;  %v2077_v36 = vsel %vm2056_vm5, %v2074_v55, %v2076_v9 }
 0x118   :  { %3016 = vmatmul.mubr.msk.bf16.gmra.mrb[24].mxu0 %vm185_vm1, %v1842_v51  ;;  %v2061_v51 = vsel %vm2056_vm5, %v2058_v58, %v2060_v29  ;;  %v2065_v31 = vsel %vm2056_vm5, %v2062_v6, %v2064_v59  ;;  %v2067_v18 = vsel %vm2056_vm5, %v2064_v59, %v2066_v24  ;;  %v2069_v27 = vsel %vm2056_vm5, %v2066_v24, %v2068_v17 }
 0x119   :  { %3019 = vmatprep.mubr.msk.bf16.mxu0 %vm3464_vm0, %v3463_v0 }
 0x11d   :  { %2812 = vmatmul.mubr.msk.bf16.gmra.mrb[4].mxu1 %vm185_vm1, %v794_v20  ;;  %v859_v20 = vshrl.u32 %v3461_v22, 16 }
 0x11e   :  { %2815 = vmatprep.mubr.msk.bf16.mxu1 %vm3464_vm0, %v3463_v0 }
 0x120   :  { %3020 = vmatmul.mubr.msk.bf16.gmra.mrb[28].mxu0 %vm185_vm1, %v1851_v8  ;;  %v861_v8 = vor.u32 %v859_v20, %v857_v15 }
 0x121   :  { %3023 = vmatprep.mubr.msk.bf16.mxu0 %vm3464_vm0, %v3463_v0 }
 0x125   :  { %2816 = vmatmul.mubr.msk.bf16.gmra.mrb[8].mxu1 %vm185_vm1, %v802_v52 }
 0x126   :  { %2819 = vmatprep.mubr.msk.bf16.mxu1 %vm3464_vm0, %v3463_v0 }
 0x128   :  { %3024 = vmatmul.mubr.msk.bf16.gmra.mrb[32].mxu0 %vm185_vm1, %v1860_v57 }
 0x129   :  { %3027 = vmatprep.mubr.msk.bf16.mxu0 %vm3464_vm0, %v3463_v0 }
 0x12d   :  { %2820 = vmatmul.mubr.msk.bf16.gmra.mrb[12].mxu1 %vm185_vm1, %v810_v7 }
 0x12e   :  { %2823 = vmatprep.mubr.msk.bf16.mxu1 %vm3464_vm0, %v3463_v0 }
 0x130   :  { %3028 = vmatmul.mubr.msk.bf16.gmra.mrb[36].mxu0 %vm185_vm1, %v1869_v4 }
 0x131   :  { %3031 = vmatprep.mubr.msk.bf16.mxu0 %vm3464_vm0, %v3463_v0 }
 0x135   :  { %2824 = vmatmul.mubr.msk.bf16.gmra.mrb[16].mxu1 %vm185_vm1, %v818_v11 }
 0x136   :  { %2827 = vmatprep.mubr.msk.bf16.mxu1 %vm3464_vm0, %v3463_v0 }
 0x138   :  { %3032 = vmatmul.mubr.msk.bf16.gmra.mrb[40].mxu0 %vm185_vm1, %v1868_v37 }
 0x139   :  { %3037 = vmatprep.mubr.msk.bf16.mxu0 %vm3464_vm0, %v3463_v0 }
 0x13d   :  { %2828 = vmatmul.mubr.msk.bf16.gmra.mrb[20].mxu1 %vm185_vm1, %v826_v46 }
 0x13e   :  { %2831 = vmatprep.mubr.msk.bf16.mxu1 %vm3464_vm0, %v3463_v0 }
 0x140   :  { %3038 = vmatmul.mubr.msk.bf16.vlgmr.msra.gmra.mrb[0].mxu0 %vm185_vm1, %v2059_v5 }
 0x141   :  { %3041 = vmatprep.mubr.msk.bf16.mxu0 %vm3464_vm0, %v3463_v0 }
 0x145   :  { %2832 = vmatmul.mubr.msk.bf16.gmra.mrb[24].mxu1 %vm185_vm1, %v834_v49 }
 0x146   :  { %2835 = vmatprep.mubr.msk.bf16.mxu1 %vm3464_vm0, %v3463_v0 }
 0x148   :  { %3042 = vmatmul.mubr.msk.bf16.gmra.mrb[4].mxu0 %vm185_vm1, %v2061_v51 }
 0x149   :  { %3045 = vmatprep.mubr.msk.bf16.mxu0 %vm3464_vm0, %v3463_v0 }
 0x14d   :  { %2836 = vmatmul.mubr.msk.bf16.gmra.mrb[28].mxu1 %vm185_vm1, %v842_v13 }
 0x14e   :  { %2839 = vmatprep.mubr.msk.bf16.mxu1 %vm3464_vm0, %v3463_v0 }
 0x150   :  { %3046 = vmatmul.mubr.msk.bf16.gmra.mrb[8].mxu0 %vm185_vm1, %v2063_v23 }
 0x151   :  { %3049 = vmatprep.mubr.msk.bf16.mxu0 %vm3464_vm0, %v3463_v0 }
 0x155   :  { %2840 = vmatmul.mubr.msk.bf16.gmra.mrb[32].mxu1 %vm185_vm1, %v850_v12 }
 0x156   :  { %2843 = vmatprep.mubr.msk.bf16.mxu1 %vm3464_vm0, %v3463_v0 }
 0x158   :  { %3050 = vmatmul.mubr.msk.bf16.gmra.mrb[12].mxu0 %vm185_vm1, %v2065_v31 }
 0x159   :  { %3053 = vmatprep.mubr.msk.bf16.mxu0 %vm3464_vm0, %v3463_v0 }
 0x15d   :  { %2844 = vmatmul.mubr.msk.bf16.gmra.mrb[36].mxu1 %vm185_vm1, %v858_v33 }
 0x15e   :  { %2847 = vmatprep.mubr.msk.bf16.mxu1 %vm3464_vm0, %v3463_v0 }
 0x160   :  { %3054 = vmatmul.mubr.msk.bf16.gmra.mrb[16].mxu0 %vm185_vm1, %v2067_v18 }
 0x161   :  { %3057 = vmatprep.mubr.msk.bf16.mxu0 %vm3464_vm0, %v3463_v0 }
 0x165   :  { %2848 = vmatmul.mubr.msk.bf16.gmra.mrb[40].mxu1 %vm185_vm1, %v861_v8 }
 0x166   :  { %2877 = vmatprep.mubr.msk.bf16.mxu1 %vm3464_vm0, %v3463_v0 }
 0x168   :  { %3058 = vmatmul.mubr.msk.bf16.gmra.mrb[20].mxu0 %vm185_vm1, %v2069_v27 }
 0x169   :  { %3061 = vmatprep.mubr.msk.bf16.mxu0 %vm3464_vm0, %v3463_v0 }
 0x16d   :  { %2878 = vmatmul.mubr.msk.bf16.vlgmr.msra.gmra.mrb[24].mxu1 %vm185_vm1, %v1062_v34 }
 0x16e   :  { %2881 = vmatprep.mubr.msk.bf16.mxu1 %vm3464_vm0, %v3463_v0 }
 0x170   :  { %3062 = vmatmul.mubr.msk.bf16.gmra.mrb[24].mxu0 %vm185_vm1, %v2071_v42 }
 0x171   :  { %3065 = vmatprep.mubr.msk.bf16.mxu0 %vm3464_vm0, %v3463_v0 }
 0x175   :  { %2882 = vmatmul.mubr.msk.bf16.gmra.mrb[28].mxu1 %vm185_vm1, %v1064_v56 }
 0x176   :  { %2885 = vmatprep.mubr.msk.bf16.mxu1 %vm3464_vm0, %v3463_v0 }
 0x178   :  { %3066 = vmatmul.mubr.msk.bf16.gmra.mrb[28].mxu0 %vm185_vm1, %v2073_v1 }
 0x179   :  { %3069 = vmatprep.mubr.msk.bf16.mxu0 %vm3464_vm0, %v3463_v0 }
 0x17d   :  { %2886 = vmatmul.mubr.msk.bf16.gmra.mrb[32].mxu1 %vm185_vm1, %v1066_v25 }
 0x17e   :  { %2889 = vmatprep.mubr.msk.bf16.mxu1 %vm3464_vm0, %v3463_v0 }
 0x180   :  { %3070 = vmatmul.mubr.msk.bf16.gmra.mrb[32].mxu0 %vm185_vm1, %v2075_v2 }
 0x181   :  { %3073 = vmatprep.mubr.msk.bf16.mxu0 %vm3464_vm0, %v3463_v0 }
 0x185   :  { %2890 = vmatmul.mubr.msk.bf16.gmra.mrb[36].mxu1 %vm185_vm1, %v1068_v43 }
 0x186   :  { %2893 = vmatprep.mubr.msk.bf16.mxu1 %vm3464_vm0, %v3463_v0 }
 0x188   :  { %3074 = vmatmul.mubr.msk.bf16.gmra.mrb[36].mxu0 %vm185_vm1, %v2077_v36 }
 0x189   :  { %3077 = vmatprep.mubr.msk.bf16.mxu0 %vm3464_vm0, %v3463_v0 }
 0x18d   :  { %2894 = vmatmul.mubr.msk.bf16.gmra.mrb[40].mxu1 %vm185_vm1, %v1067_v48 }
 0x190   :  { %3078 = vmatmul.mubr.msk.bf16.gmra.mrb[40].mxu0 %vm185_vm1, %v2076_v9 }
 0x1e8   :  { %v935_v52 = vpop.f32.mrb[0].mxu1 }
 0x1e9   :  { %v2809_v19 = vpop.f32.mrb[1].mxu1 }
 0x1ea   :  { %v938_v57 = vpop.f32.mrb[2].mxu1 }
 0x1eb   :  { %v2810_v35 = vpop.f32.mrb[3].mxu1 }
 0x1f0   :  { %v943_v32 = vpop.f32.mrb[4].mxu1 }
 0x1f1   :  { %v2813_v16 = vpop.f32.mrb[5].mxu1 }
 0x1f2   :  { %v946_v21 = vpop.f32.mrb[6].mxu1 }
 0x1f3   :  { %v2814_v37 = vpop.f32.mrb[7].mxu1 }
 0x1f8   :  { %v951_v7 = vpop.f32.mrb[8].mxu1 }
 0x1f9   :  { %v2817_v4 = vpop.f32.mrb[9].mxu1 }
 0x1fa   :  { %v954_v28 = vpop.f32.mrb[10].mxu1 }
 0x1fb   :  { %v2818_v39 = vpop.f32.mrb[11].mxu1 }
 0x200   :  { %v959_v53 = vpop.f32.mrb[12].mxu1 }
 0x201   :  { %v2821_v11 = vpop.f32.mrb[13].mxu1 }
 0x202   :  { %v962_v41 = vpop.f32.mrb[14].mxu1 }
 0x203   :  { %v2822_v0 = vpop.f32.mrb[15].mxu1 }
 0x208   :  { %v967_v38 = vpop.f32.mrb[16].mxu1 }
 0x209   :  { %v2825_v54 = vpop.f32.mrb[17].mxu1 }
 0x20a   :  { %v970_v10 = vpop.f32.mrb[18].mxu1 }
 0x20b   :  { %v2826_v58 = vpop.f32.mrb[19].mxu1 }
 0x210   :  { %v975_v46 = vpop.f32.mrb[20].mxu1 }
 0x211   :  { %v2829_v5 = vpop.f32.mrb[21].mxu1 }
 0x212   :  { %v978_v14 = vpop.f32.mrb[22].mxu1 }
 0x213   :  { %v2151_v47 = vpop.f32.mrb[0].mxu0  ;;  %v2830_v51 = vpop.f32.mrb[23].mxu1 }
 0x214   :  { %v3083_v29 = vadd.f32 %v2151_v47, %v935_v52  ;;  %v3039_v49 = vpop.f32.mrb[1].mxu0 }
 0x215   :  { %v2154_v30 = vpop.f32.mrb[2].mxu0 }
 0x216   :  { %v2538_v44 = vpack.c.bf16 %v3083_v29, %v3083_v29  ;;  %v3084_v6 = vadd.f32 %v2154_v30, %v938_v57  ;;  %v3040_v13 = vpop.f32.mrb[3].mxu0 }
 0x218   :  { %2344 = vst.msk [vmem:[%s4374_s2] sm:$0xf] %vm2343_vm6, %v2538_v44  ;;  %v2539_v23 = vpack.c.bf16 %v3084_v6, %v3084_v6 }
 0x21a   :  { %2345 = vst.msk [vmem:[%s4374_s2 + $0x4] sm:$0xf] %vm2343_vm6, %v2539_v23 }
 0x21b   :  { %v2159_v45 = vpop.f32.mrb[4].mxu0 }
 0x21c   :  { %v3085_v60 = vadd.f32 %v2159_v45, %v943_v32  ;;  %v3043_v22 = vpop.f32.mrb[5].mxu0 }
 0x21d   :  { %v2162_v59 = vpop.f32.mrb[6].mxu0 }
 0x21e   :  { %v2540_v12 = vpack.c.bf16 %v3085_v60, %v3085_v60  ;;  %v3086_v26 = vadd.f32 %v2162_v59, %v946_v21  ;;  %v3044_v31 = vpop.f32.mrb[7].mxu0 }
 0x220   :  { %2346 = vst.msk [vmem:[%s4374_s2 + $0x8] sm:$0xf] %vm2343_vm6, %v2540_v12  ;;  %v2541_v62 = vpack.c.bf16 %v3086_v26, %v3086_v26 }
 0x222   :  { %2347 = vst.msk [vmem:[%s4374_s2 + $0xc] sm:$0xf] %vm2343_vm6, %v2541_v62 }
 0x223   :  { %v2167_v15 = vpop.f32.mrb[8].mxu0 }
 0x224   :  { %v3087_v24 = vadd.f32 %v2167_v15, %v951_v7  ;;  %v3047_v33 = vpop.f32.mrb[9].mxu0 }
 0x225   :  { %v2170_v18 = vpop.f32.mrb[10].mxu0 }
 0x226   :  { %v2542_v20 = vpack.c.bf16 %v3087_v24, %v3087_v24  ;;  %v3088_v17 = vadd.f32 %v2170_v18, %v954_v28  ;;  %v3048_v8 = vpop.f32.mrb[11].mxu0 }
 0x228   :  { %2348 = vst.msk [vmem:[%s4374_s2 + $0x10] sm:$0xf] %vm2343_vm6, %v2542_v20  ;;  %v2543_v27 = vpack.c.bf16 %v3088_v17, %v3088_v17 }
 0x22a   :  { %2349 = vst.msk [vmem:[%s4374_s2 + $0x14] sm:$0xf] %vm2343_vm6, %v2543_v27 }
 0x22b   :  { %v2175_v3 = vpop.f32.mrb[12].mxu0 }
 0x22c   :  { %v3089_v61 = vadd.f32 %v2175_v3, %v959_v53  ;;  %v3051_v34 = vpop.f32.mrb[13].mxu0 }
 0x22d   :  { %v2178_v42 = vpop.f32.mrb[14].mxu0 }
 0x22e   :  { %v2544_v40 = vpack.c.bf16 %v3089_v61, %v3089_v61  ;;  %v3090_v63 = vadd.f32 %v2178_v42, %v962_v41  ;;  %v3052_v56 = vpop.f32.mrb[15].mxu0 }
 0x230   :  { %2350 = vst.msk [vmem:[%s4374_s2 + $0x18] sm:$0xf] %vm2343_vm6, %v2544_v40  ;;  %v2545_v1 = vpack.c.bf16 %v3090_v63, %v3090_v63 }
 0x232   :  { %2351 = vst.msk [vmem:[%s4374_s2 + $0x1c] sm:$0xf] %vm2343_vm6, %v2545_v1 }
 0x233   :  { %v2183_v50 = vpop.f32.mrb[16].mxu0 }
 0x234   :  { %v3091_v55 = vadd.f32 %v2183_v50, %v967_v38  ;;  %v3055_v25 = vpop.f32.mrb[17].mxu0 }
 0x235   :  { %v2186_v2 = vpop.f32.mrb[18].mxu0 }
 0x236   :  { %v2546_v48 = vpack.c.bf16 %v3091_v55, %v3091_v55  ;;  %v3092_v9 = vadd.f32 %v2186_v2, %v970_v10  ;;  %v3056_v43 = vpop.f32.mrb[19].mxu0 }
 0x238   :  { %2352 = vst.msk [vmem:[%s4374_s2 + $0x20] sm:$0xf] %vm2343_vm6, %v2546_v48  ;;  %v2547_v36 = vpack.c.bf16 %v3092_v9, %v3092_v9 }
 0x23a   :  { %2353 = vst.msk [vmem:[%s4374_s2 + $0x24] sm:$0xf] %vm2343_vm6, %v2547_v36 }
 0x23b   :  { %v2191_v52 = vpop.f32.mrb[20].mxu0 }
 0x23c   :  { %v3093_v19 = vadd.f32 %v2191_v52, %v975_v46  ;;  %v3059_v57 = vpop.f32.mrb[21].mxu0 }
 0x23d   :  { %v2194_v35 = vpop.f32.mrb[22].mxu0 }
 0x23e   :  { %v2548_v32 = vpack.c.bf16 %v3093_v19, %v3093_v19  ;;  %v3094_v16 = vadd.f32 %v2194_v35, %v978_v14  ;;  %v3060_v21 = vpop.f32.mrb[23].mxu0 }
 0x240   :  { %2354 = vst.msk [vmem:[%s4374_s2 + $0x28] sm:$0xf] %vm2343_vm6, %v2548_v32  ;;  %v2549_v37 = vpack.c.bf16 %v3094_v16, %v3094_v16  ;;  %v1190_v7 = vpop.f32.mrb[24].mxu1 }
 0x241   :  { %v2879_v4 = vpop.f32.mrb[25].mxu1 }
 0x242   :  { %2355 = vst.msk [vmem:[%s4374_s2 + $0x2c] sm:$0xf] %vm2343_vm6, %v2549_v37  ;;  %v1193_v39 = vpop.f32.mrb[26].mxu1 }
 0x243   :  { %v2199_v28 = vpop.f32.mrb[24].mxu0  ;;  %v2880_v41 = vpop.f32.mrb[27].mxu1 }
 0x244   :  { %v3095_v53 = vadd.f32 %v2199_v28, %v1190_v7  ;;  %v3063_v11 = vpop.f32.mrb[25].mxu0 }
 0x245   :  { %v2202_v0 = vpop.f32.mrb[26].mxu0 }
 0x246   :  { %v2550_v38 = vpack.c.bf16 %v3095_v53, %v3095_v53  ;;  %v3096_v54 = vadd.f32 %v2202_v0, %v1193_v39  ;;  %v3064_v10 = vpop.f32.mrb[27].mxu0 }
 0x248   :  { %2356 = vst.msk [vmem:[%s4374_s2 + $0x30] sm:$0xf] %vm2343_vm6, %v2550_v38  ;;  %v2551_v58 = vpack.c.bf16 %v3096_v54, %v3096_v54  ;;  %v1198_v46 = vpop.f32.mrb[28].mxu1 }
 0x249   :  { %v2883_v5 = vpop.f32.mrb[29].mxu1 }
 0x24a   :  { %2357 = vst.msk [vmem:[%s4374_s2 + $0x34] sm:$0xf] %vm2343_vm6, %v2551_v58  ;;  %v1201_v14 = vpop.f32.mrb[30].mxu1 }
 0x24b   :  { %v2207_v47 = vpop.f32.mrb[28].mxu0  ;;  %v2884_v51 = vpop.f32.mrb[31].mxu1 }
 0x24c   :  { %v3097_v29 = vadd.f32 %v2207_v47, %v1198_v46  ;;  %v3067_v49 = vpop.f32.mrb[29].mxu0 }
 0x24d   :  { %v2210_v30 = vpop.f32.mrb[30].mxu0 }
 0x24e   :  { %v2552_v44 = vpack.c.bf16 %v3097_v29, %v3097_v29  ;;  %v3098_v6 = vadd.f32 %v2210_v30, %v1201_v14  ;;  %v3068_v13 = vpop.f32.mrb[31].mxu0 }
 0x250   :  { %2358 = vst.msk [vmem:[%s4374_s2 + $0x38] sm:$0xf] %vm2343_vm6, %v2552_v44  ;;  %v2553_v23 = vpack.c.bf16 %v3098_v6, %v3098_v6  ;;  %v1206_v45 = vpop.f32.mrb[32].mxu1 }
 0x251   :  { %v2887_v60 = vpop.f32.mrb[33].mxu1 }
 0x252   :  { %2359 = vst.msk [vmem:[%s4374_s2 + $0x3c] sm:$0xf] %vm2343_vm6, %v2553_v23  ;;  %v1209_v59 = vpop.f32.mrb[34].mxu1 }
 0x253   :  { %v2215_v22 = vpop.f32.mrb[32].mxu0  ;;  %v2888_v31 = vpop.f32.mrb[35].mxu1 }
 0x254   :  { %v3099_v12 = vadd.f32 %v2215_v22, %v1206_v45  ;;  %v3071_v26 = vpop.f32.mrb[33].mxu0 }
 0x255   :  { %v2218_v62 = vpop.f32.mrb[34].mxu0 }
 0x256   :  { %v2554_v15 = vpack.c.bf16 %v3099_v12, %v3099_v12  ;;  %v3100_v24 = vadd.f32 %v2218_v62, %v1209_v59  ;;  %v3072_v33 = vpop.f32.mrb[35].mxu0 }
 0x258   :  { %2360 = vst.msk [vmem:[%s4374_s2 + $0x40] sm:$0xf] %vm2343_vm6, %v2554_v15  ;;  %v2555_v18 = vpack.c.bf16 %v3100_v24, %v3100_v24  ;;  %v1214_v20 = vpop.f32.mrb[36].mxu1 }
 0x259   :  { %v2891_v17 = vpop.f32.mrb[37].mxu1 }
 0x25a   :  { %2361 = vst.msk [vmem:[%s4374_s2 + $0x44] sm:$0xf] %vm2343_vm6, %v2555_v18  ;;  %v1217_v27 = vpop.f32.mrb[38].mxu1 }
 0x25b   :  { %v2223_v8 = vpop.f32.mrb[36].mxu0  ;;  %v2892_v34 = vpop.f32.mrb[39].mxu1 }
 0x25c   :  { %v3101_v3 = vadd.f32 %v2223_v8, %v1214_v20  ;;  %v3075_v61 = vpop.f32.mrb[37].mxu0 }
 0x25d   :  { %v2226_v42 = vpop.f32.mrb[38].mxu0 }
 0x25e   :  { %v2556_v40 = vpack.c.bf16 %v3101_v3, %v3101_v3  ;;  %v3102_v63 = vadd.f32 %v2226_v42, %v1217_v27  ;;  %v3076_v56 = vpop.f32.mrb[39].mxu0 }
 0x260   :  { %2362 = vst.msk [vmem:[%s4374_s2 + $0x48] sm:$0xf] %vm2343_vm6, %v2556_v40  ;;  %v2557_v1 = vpack.c.bf16 %v3102_v63, %v3102_v63  ;;  %v1222_v50 = vpop.f32.mrb[40].mxu1 }
 0x261   :  { %v2895_v55 = vpop.f32.mrb[41].mxu1 }
 0x262   :  { %2363 = vst.msk [vmem:[%s4374_s2 + $0x4c] sm:$0xf] %vm2343_vm6, %v2557_v1  ;;  %v1225_v2 = vpop.f32.mrb[42].mxu1 }
 0x263   :  { %v2231_v25 = vpop.f32.mrb[40].mxu0  ;;  %v2896_v43 = vpop.f32.mrb[43].mxu1 }
 0x264   :  { %v3103_v48 = vadd.f32 %v2231_v25, %v1222_v50  ;;  %v3079_v9 = vpop.f32.mrb[41].mxu0 }
 0x265   :  { %v2234_v36 = vpop.f32.mrb[42].mxu0 }
 0x266   :  { %v2558_v52 = vpack.c.bf16 %v3103_v48, %v3103_v48  ;;  %v3080_v19 = vpop.f32.mrb[43].mxu0 }
 0x268   :  { %2365 = vst.msk [vmem:[%s4374_s2 + $0x50] sm:$0x1] %vm2364_vm7, %v2558_v52 }

</bundles_post_ra>
